<compile_context>
chip_gen: v7x
topology: tpu7x:2x2x1
jax: 0.10.0
libtpu: 0.0.40
codegen_flags: <defaults>
</compile_context>

<pallas_src>
import functools
from math import pi

import jax
import jax.numpy as jnp
from jax.experimental import pallas as pl
from jax.experimental.pallas import tpu as pltpu


# ----------------------------------------------------------------------------
# Shared math
# ----------------------------------------------------------------------------
def _gelu(x):
    # exact erf-based GELU (torch.nn.GELU default)
    return 0.5 * x * (1.0 + jax.lax.erf(x * 0.7071067811865476))


def _layer_norm(x, eps=1e-5):
    # sum / sum-of-squares form: the two lane reductions can issue back-to-back
    n = x.shape[-1]
    s = jnp.sum(x, axis=-1, keepdims=True)
    ss = jnp.sum(x * x, axis=-1, keepdims=True)
    mu = s * (1.0 / n)
    var = ss * (1.0 / n) - mu * mu
    return (x - mu) * jax.lax.rsqrt(var + eps)


# ----------------------------------------------------------------------------
# Fused Pallas kernel: grid = (T_tiles, num_layers)
# ----------------------------------------------------------------------------
def fused_style_transformer_kernel(
        x_ref, temb_ref, emb_ref, gb_ref, hm_ref, hmt_ref,
        inproj_w_ref, inproj_b_ref, outproj_w_ref, outproj_b_ref,
        ln2_w_ref, ln2_b_ref, ff_w1_ref, ff_b1_ref, ff_w2_ref, ff_b2_ref,
        conv_w_ref, conv_b_ref,
        o_ref, xres_ref, *, resident):
    li = pl.program_id(1)
    num_layers = pl.num_programs(1)

    B, Tt, C = xres_ref.shape
    bf16 = jnp.bfloat16
    f32 = jnp.float32

    def lp(ref):
        # per-layer parameter access: VMEM-resident stacked (L, ...) block indexed by
        # the layer program id, or a per-layer streamed block.
        return ref[li] if resident else ref[...]

    # Load the activation tile into the VMEM-resident buffer once per T-tile.
    @pl.when(li == 0)
    def _init():
        xres_ref[...] = x_ref[...]

    x = xres_ref[...]                                        # (B, Tt, C) f32 residual

    # x + mapping (embedding.expand) + time embedding (Fourier+Linear+GELU hoisted).
    x = x + emb_ref[...] + temb_ref[...].astype(f32)

    # --- AdaLayerNorm (style FC hoisted -> gamma/beta stream) -----------------------
    gb = lp(gb_ref)                                          # (B, 2C)
    gamma = gb[:, None, :C]                                  # (B, 1, C)
    beta = gb[:, None, C:]                                   # (B, 1, C)
    x = (1.0 + gamma) * _layer_norm(x) + beta

    # --- MultiheadAttention over the batch axis (torch batch_first=False) ------------
    # 1/sqrt(d) is folded into the in_proj q columns (wrapper, trace time).
    qkv = jnp.einsum('btc,cf->btf', x.astype(bf16), lp(inproj_w_ref),
                     preferred_element_type=f32) + lp(inproj_b_ref)   # (B, Tt, 3C)
    q = qkv[..., :C]
    k = qkv[..., C:2 * C]
    v = qkv[..., 2 * C:]

    hm = hm_ref[...]         # (C, H) 0/1 head-segment indicator (per-head d-sum)
    hmt = hmt_ref[...]       # (H, C) 0/1 (per-head lane broadcast)

    # Per-query-row attention: scores live as (Tt, H) planes (Tt on lanes), softmax over
    # the B_k axis is an elementwise combine of B planes (pure VPU, no XLU reduction).
    ctx_rows = []
    for i in range(B):
        qi = q[i]                                                    # (Tt, C)
        s_list = [jnp.dot(qi * k[j], hm, preferred_element_type=f32)  # (Tt, H)
                  for j in range(B)]
        m = s_list[0]
        for s in s_list[1:]:
            m = jnp.maximum(m, s)
        e_list = [jnp.exp(s - m) for s in s_list]
        denom = e_list[0]
        for e in e_list[1:]:
            denom = denom + e
        inv = pl.reciprocal(denom, approx=True)                      # EUP
        acc = None
        for j in range(B):
            bc = jnp.dot(e_list[j] * inv, hmt,
                         preferred_element_type=f32)                 # (Tt, C)
            term = bc * v[j]
            acc = term if acc is None else acc + term
        ctx_rows.append(acc)
    ctx = jnp.stack(ctx_rows, axis=0)                                # (B, Tt, C)

    attn = jnp.einsum('btc,cf->btf', ctx.astype(bf16), lp(outproj_w_ref),
                      preferred_element_type=f32) + lp(outproj_b_ref)
    x = x + attn

    # --- LayerNorm (affine) -----------------------------------------------------------
    x = _layer_norm(x) * lp(ln2_w_ref) + lp(ln2_b_ref)

    # --- Feed forward -------------------------------------------------------------------
    hdn = _gelu(jnp.einsum('btc,cf->btf', x.astype(bf16), lp(ff_w1_ref),
                           preferred_element_type=f32) + lp(ff_b1_ref))
    x = x + (jnp.einsum('btf,fc->btc', hdn.astype(bf16), lp(ff_w2_ref),
                        preferred_element_type=f32) + lp(ff_b2_ref))

    xres_ref[...] = x

    # --- Fused 1x1 Conv1d epilogue on the last layer (output block index constant over
    #     the 'arbitrary' layer axis -> flushed once per T-tile) ------------------------
    @pl.when(li == num_layers - 1)
    def _epilogue():
        o_ref[...] = jnp.einsum('btc,co->bto', x.astype(bf16), conv_w_ref[...],
                                preferred_element_type=f32) + conv_b_ref[...]


# ----------------------------------------------------------------------------
# Wrapper
# ----------------------------------------------------------------------------
def _pick_t_tile(T, B, target_m=256, cap_m=1024):
    """Largest-needed t_tile (multiple of 8 dividing T) s.t. B*t_tile reaches ~MXU M."""
    best = None
    for t in range(8, T + 1, 8):
        if T % t:
            continue
        if best is None or B * t <= cap_m:
            best = t
        if B * t >= target_m:
            break
    return best if best is not None else T


def style_transformer1d_forward(x, time, embedding, features, params, num_heads,
                                t_tile=None):
    """Whole StyleTransformer1d (all blocks + final 1x1 conv) in ONE pallas_call."""
    B, T, C = x.shape
    L = params['inproj_w'].shape[0]
    MC = params['ff_w1'].shape[-1]
    H = num_heads
    assert C % H == 0
    d = C // H

    if t_tile is None:
        t_tile = _pick_t_tile(T, B)
    assert T % t_tile == 0 and (t_tile % 8 == 0 or t_tile == T)
    n_t = T // t_tile

    f32, bf16 = jnp.float32, jnp.bfloat16

    # --- hoisted, T-tile-independent / lane-misaligned precomputation (trace time) ----
    # Per-layer time embedding: Fourier feats (F = time_dim+1, lane-misaligned) +
    # Linear + GELU, streamed to the kernel as a lane-dense (L, B, T, C) bf16 slab.
    t3 = time.astype(f32)[:, :, None]                                     # (B, T, 1)
    freqs = t3[None] * params['pos_w'][:, None, None, :] * (2.0 * pi)     # (L,B,T,half)
    four = jnp.concatenate(
        [jnp.broadcast_to(t3[None], (L, B, T, 1)), jnp.sin(freqs), jnp.cos(freqs)],
        axis=-1)                                                          # (L, B, T, F)
    temb = _gelu(jnp.einsum('lbtf,lfc->lbtc', four, params['tlin_w'])
                 + params['tlin_b'][:, None]).astype(bf16)                # (L, B, T, C)

    # AdaLayerNorm style FC hoisted (independent of the T-tile).
    gb = (jnp.einsum('bs,lsc->lbc', features.astype(f32), params['ada_w'])
          + params['ada_b']).astype(f32)                                  # (L, B, 2C)

    # Fold the 1/sqrt(d) query scale into the in_proj q columns.
    colscale = jnp.concatenate([jnp.full((C,), 1.0 / (d ** 0.5), f32),
                                jnp.ones((2 * C,), f32)])
    inproj_w = (params['inproj_w'] * colscale).astype(bf16)
    inproj_b = (params['inproj_b'] * colscale).astype(f32)

    # Head-segment indicator matrices (per-head d-reduction / lane broadcast).
    hm = (jnp.arange(C)[:, None] // d == jnp.arange(H)[None, :]).astype(f32)  # (C, H)
    hmt = hm.T                                                                # (H, C)

    # Keep all per-layer weights VMEM-resident across T-tiles when they fit.
    per_layer_bytes = 2 * (C * 3 * C + C * C + C * MC + MC * C) \
        + 4 * (3 * C + 2 * C + 2 * C + MC + C + B * 2 * C)
    resident = L * per_layer_bytes <= 8 * 1024 * 1024

    args = (
        x.astype(f32), temb, embedding.astype(f32), gb, hm, hmt,
        inproj_w, inproj_b,
        params['outproj_w'].astype(bf16), params['outproj_b'].astype(f32),
        params['ln2_w'].astype(f32), params['ln2_b'].astype(f32),
        params['ff_w1'].astype(bf16), params['ff_b1'].astype(f32),
        params['ff_w2'].astype(bf16), params['ff_b2'].astype(f32),
        params['conv_w'].astype(bf16), params['conv_b'].astype(f32),
    )

    def act_spec():
        return pl.BlockSpec((B, t_tile, C), lambda ti, li: (0, ti, 0))

    def const_spec(shape):
        nd = len(shape)
        return pl.BlockSpec(tuple(shape), lambda ti, li: (0,) * nd)

    def layer_spec(arr):
        if resident:
            return const_spec(arr.shape)        # fetched once, indexed by li in-kernel
        s = arr.shape
        return pl.BlockSpec((None,) + tuple(s[1:]),
                            lambda ti, li: (li,) + (0,) * (len(s) - 1))

    in_specs = [
        act_spec(),                                                          # x
        pl.BlockSpec((None, B, t_tile, C), lambda ti, li: (li, 0, ti, 0)),   # time emb
        const_spec(embedding.shape),                                         # mapping
        layer_spec(gb),                                                      # gamma/beta
        const_spec(hm.shape), const_spec(hmt.shape),                         # head masks
        layer_spec(inproj_w), layer_spec(inproj_b),                          # MHA in_proj
        layer_spec(params['outproj_w']), layer_spec(params['outproj_b']),    # MHA out_proj
        layer_spec(params['ln2_w']), layer_spec(params['ln2_b']),            # LayerNorm2
        layer_spec(params['ff_w1']), layer_spec(params['ff_b1']),            # FF linear 1
        layer_spec(params['ff_w2']), layer_spec(params['ff_b2']),            # FF linear 2
        const_spec(params['conv_w'].shape), const_spec(params['conv_b'].shape),
    ]

    return pl.pallas_call(
        functools.partial(fused_style_transformer_kernel, resident=resident),
        out_shape=jax.ShapeDtypeStruct((B, T, C), f32),
        grid=(n_t, L),
        in_specs=in_specs,
        out_specs=act_spec(),
        scratch_shapes=[pltpu.VMEM((B, t_tile, C), f32)],
        compiler_params=pltpu.CompilerParams(
            dimension_semantics=("parallel", "arbitrary")),
    )(*args)


# ----------------------------------------------------------------------------
# Pure-JAX f32 reference (same semantics, no Pallas) for a numerical check
# ----------------------------------------------------------------------------
def style_transformer1d_ref(x, time, embedding, features, params, num_heads):
    B, T, C = x.shape
    H = num_heads
    d = C // H
    L = params['tlin_w'].shape[0]
    t3 = time[:, :, None]
    for l in range(L):
        x = x + embedding                                                  # + mapping
        freqs = t3 * params['pos_w'][l] * (2.0 * pi)
        four = jnp.concatenate([t3, jnp.sin(freqs), jnp.cos(freqs)], axis=-1)
        x = x + _gelu(four @ params['tlin_w'][l] + params['tlin_b'][l])
        h = features @ params['ada_w'][l] + params['ada_b'][l]
        gamma, beta = h[:, :C][:, None, :], h[:, C:][:, None, :]
        x = (1.0 + gamma) * _layer_norm(x) + beta
        qkv = x @ params['inproj_w'][l] + params['inproj_b'][l]
        q, k, v = qkv[..., :C], qkv[..., C:2 * C], qkv[..., 2 * C:]
        q4 = q.reshape(B, T, H, d)
        k4 = k.reshape(B, T, H, d)
        v4 = v.reshape(B, T, H, d)
        scores = jnp.einsum('ithd,jthd->thij', q4, k4) / (d ** 0.5)
        p = jax.nn.softmax(scores, axis=-1)
        ctx = jnp.einsum('thij,jthd->ithd', p, v4).reshape(B, T, C)
        x = x + (ctx @ params['outproj_w'][l] + params['outproj_b'][l])
        x = _layer_norm(x) * params['ln2_w'][l] + params['ln2_b'][l]
        hdn = _gelu(x @ params['ff_w1'][l] + params['ff_b1'][l])
        x = x + (hdn @ params['ff_w2'][l] + params['ff_b2'][l])
    return x @ params['conv_w'] + params['conv_b']


# ----------------------------------------------------------------------------
# Deterministic parameter init (stacked along a leading layer axis; weights stored
# pre-transposed to (in, out); biases as (1, N))
# ----------------------------------------------------------------------------
def init_params(key, num_layers, channels, multiplier, context_features, time_dim):
    C = channels
    half = time_dim // 2
    F = time_dim + 1
    S = context_features
    MC = C * multiplier
    L = num_layers

    def nrm(k, shape, scale=0.05):
        return (scale * jax.random.normal(k, shape)).astype(jnp.float32)

    ks = jax.random.split(key, 14)
    return dict(
        pos_w=nrm(ks[0], (L, half), 1.0),
        tlin_w=nrm(ks[1], (L, F, C)), tlin_b=nrm(ks[2], (L, 1, C), 0.02),
        ada_w=nrm(ks[3], (L, S, 2 * C)), ada_b=nrm(ks[4], (L, 1, 2 * C), 0.02),
        inproj_w=nrm(ks[5], (L, C, 3 * C)), inproj_b=nrm(ks[6], (L, 1, 3 * C), 0.02),
        outproj_w=nrm(ks[7], (L, C, C)), outproj_b=nrm(ks[8], (L, 1, C), 0.02),
        ln2_w=jnp.ones((L, 1, C), jnp.float32), ln2_b=jnp.zeros((L, 1, C), jnp.float32),
        ff_w1=nrm(ks[9], (L, C, MC)), ff_b1=nrm(ks[10], (L, 1, MC), 0.02),
        ff_w2=nrm(ks[11], (L, MC, C)), ff_b2=jnp.zeros((L, 1, C), jnp.float32),
        conv_w=nrm(ks[12], (C, C)), conv_b=nrm(ks[13], (1, C), 0.02),
    )


# ----------------------------------------------------------------------------
if __name__ == "__main__":
    key = jax.random.PRNGKey(0)
    # hidden_dim=128 (lane-aligned, 4 heads x 32), matches IntensityExtractor's
    # style_transformer config; T chosen so the T-tile axis is even (2 tiles of 128
    # -> B*t_tile = 256 MXU rows and both v7x TensorCores get work).
    B, T = 2, 256
    num_layers, channels, num_heads = 3, 128, 4
    multiplier, context_features, time_dim = 2, 128, 32

    k1, k2, k3, k4 = jax.random.split(key, 4)
    x = jax.random.normal(k1, (B, T, channels), jnp.float32)
    time = jnp.broadcast_to(jnp.linspace(0.0, 1.0, T, dtype=jnp.float32)[None, :], (B, T))
    embedding = jax.random.normal(k2, (B, 1, channels), jnp.float32)
    features = jax.random.normal(k3, (B, context_features), jnp.float32)
    params = init_params(k4, num_layers, channels, multiplier, context_features, time_dim)

    out = style_transformer1d_forward(x, time, embedding, features, params, num_heads)
    out = jax.block_until_ready(out)

    with jax.default_matmul_precision("highest"):
        ref = style_transformer1d_ref(x, time, embedding, features, params, num_heads)
    max_err = float(jnp.max(jnp.abs(out - ref)))
    # bf16 MXU inputs (f32 accumulation) + approx softmax reciprocal vs f32 reference
    assert max_err < 1e-1, f"Pallas vs f32 reference mismatch: max abs err {max_err}"

    print("KERNEL_OK")
</pallas_src>

<mosaic_0001>
module attributes {stable_mosaic.version = 11 : i64} {
  func.func @fused_style_transformer_kernel(%arg0: i32, %arg1: i32, %arg2: memref<2x128x128xf32, #tpu.memory_space<vmem>>, %arg3: memref<1x2x128x128xbf16, #tpu.memory_space<vmem>>, %arg4: memref<2x1x128xf32, #tpu.memory_space<vmem>>, %arg5: memref<3x2x256xf32, #tpu.memory_space<vmem>>, %arg6: memref<128x4xf32, #tpu.memory_space<vmem>>, %arg7: memref<4x128xf32, #tpu.memory_space<vmem>>, %arg8: memref<3x128x384xbf16, #tpu.memory_space<vmem>>, %arg9: memref<3x1x384xf32, #tpu.memory_space<vmem>>, %arg10: memref<3x128x128xbf16, #tpu.memory_space<vmem>>, %arg11: memref<3x1x128xf32, #tpu.memory_space<vmem>>, %arg12: memref<3x1x128xf32, #tpu.memory_space<vmem>>, %arg13: memref<3x1x128xf32, #tpu.memory_space<vmem>>, %arg14: memref<3x128x256xbf16, #tpu.memory_space<vmem>>, %arg15: memref<3x1x256xf32, #tpu.memory_space<vmem>>, %arg16: memref<3x256x128xbf16, #tpu.memory_space<vmem>>, %arg17: memref<3x1x128xf32, #tpu.memory_space<vmem>>, %arg18: memref<128x128xbf16, #tpu.memory_space<vmem>>, %arg19: memref<1x128xf32, #tpu.memory_space<vmem>>, %arg20: memref<2x128x128xf32, #tpu.memory_space<vmem>>, %arg21: memref<2x128x128xf32, #tpu.memory_space<vmem>>) attributes {dimension_semantics = [#tpu.dimension_semantics<parallel>, #tpu.dimension_semantics<arbitrary>], iteration_bounds = array<i64: 2, 3>, scalar_prefetch = 0 : i64, scratch_operands = 1 : i64, tpu.core_type = #tpu.core_type<tc>, window_params = [{transform_indices = @transform_0, window_bounds = array<i64: 2, 128, 128>}, {transform_indices = @transform_1, window_bounds = array<i64: 1, 2, 128, 128>}, {pipeline_mode = #tpu.pipeline_mode<synchronous>, transform_indices = @transform_2, window_bounds = array<i64: 2, 1, 128>}, {pipeline_mode = #tpu.pipeline_mode<synchronous>, transform_indices = @transform_3, window_bounds = array<i64: 3, 2, 256>}, {pipeline_mode = #tpu.pipeline_mode<synchronous>, transform_indices = @transform_4, window_bounds = array<i64: 128, 4>}, {pipeline_mode = #tpu.pipeline_mode<synchronous>, transform_indices = @transform_5, window_bounds = array<i64: 4, 128>}, {pipeline_mode = #tpu.pipeline_mode<synchronous>, transform_indices = @transform_6, window_bounds = array<i64: 3, 128, 384>}, {pipeline_mode = #tpu.pipeline_mode<synchronous>, transform_indices = @transform_7, window_bounds = array<i64: 3, 1, 384>}, {pipeline_mode = #tpu.pipeline_mode<synchronous>, transform_indices = @transform_8, window_bounds = array<i64: 3, 128, 128>}, {pipeline_mode = #tpu.pipeline_mode<synchronous>, transform_indices = @transform_9, window_bounds = array<i64: 3, 1, 128>}, {pipeline_mode = #tpu.pipeline_mode<synchronous>, transform_indices = @transform_10, window_bounds = array<i64: 3, 1, 128>}, {pipeline_mode = #tpu.pipeline_mode<synchronous>, transform_indices = @transform_11, window_bounds = array<i64: 3, 1, 128>}, {pipeline_mode = #tpu.pipeline_mode<synchronous>, transform_indices = @transform_12, window_bounds = array<i64: 3, 128, 256>}, {pipeline_mode = #tpu.pipeline_mode<synchronous>, transform_indices = @transform_13, window_bounds = array<i64: 3, 1, 256>}, {pipeline_mode = #tpu.pipeline_mode<synchronous>, transform_indices = @transform_14, window_bounds = array<i64: 3, 256, 128>}, {pipeline_mode = #tpu.pipeline_mode<synchronous>, transform_indices = @transform_15, window_bounds = array<i64: 3, 1, 128>}, {pipeline_mode = #tpu.pipeline_mode<synchronous>, transform_indices = @transform_16, window_bounds = array<i64: 128, 128>}, {pipeline_mode = #tpu.pipeline_mode<synchronous>, transform_indices = @transform_17, window_bounds = array<i64: 1, 128>}, {transform_indices = @transform_18, window_bounds = array<i64: 2, 128, 128>}]} {
    %c0_i32 = arith.constant 0 : i32
    %0 = arith.cmpi eq, %arg1, %c0_i32 : i32
    %1 = arith.extui %0 : i1 to i32
    %c0_i32_0 = arith.constant 0 : i32
    %2 = arith.cmpi ne, %1, %c0_i32_0 : i32
    scf.if %2 {
      %c0_65 = arith.constant 0 : index
      %c0_66 = arith.constant 0 : index
      %c0_67 = arith.constant 0 : index
      %194 = vector.load %arg2[%c0_65, %c0_66, %c0_67] : memref<2x128x128xf32, #tpu.memory_space<vmem>>, vector<2x128x128xf32>
      %c0_68 = arith.constant 0 : index
      %c0_69 = arith.constant 0 : index
      %c0_70 = arith.constant 0 : index
      %195 = vector.load %arg21[%c0_68, %c0_69, %c0_70] : memref<2x128x128xf32, #tpu.memory_space<vmem>>, vector<2x128x128xf32>
      tpu.vector_store %arg21[%c0_68, %c0_69, %c0_70], %194 {strides = array<i32>} : memref<2x128x128xf32, #tpu.memory_space<vmem>>, vector<2x128x128xf32>,
    } else {
    }
    %c0 = arith.constant 0 : index
    %c0_1 = arith.constant 0 : index
    %c0_2 = arith.constant 0 : index
    %3 = vector.load %arg21[%c0, %c0_1, %c0_2] : memref<2x128x128xf32, #tpu.memory_space<vmem>>, vector<2x128x128xf32>
    %c0_3 = arith.constant 0 : index
    %c0_4 = arith.constant 0 : index
    %c0_5 = arith.constant 0 : index
    %4 = vector.load %arg4[%c0_3, %c0_4, %c0_5] : memref<2x1x128xf32, #tpu.memory_space<vmem>>, vector<2x1x128xf32>
    %5 = vector.broadcast %4 : vector<2x1x128xf32> to vector<2x128x128xf32>
    %6 = arith.addf %3, %5 : vector<2x128x128xf32>
    %c0_6 = arith.constant 0 : index
    %c0_7 = arith.constant 0 : index
    %c0_8 = arith.constant 0 : index
    %c0_9 = arith.constant 0 : index
    %7 = vector.load %arg3[%c0_6, %c0_7, %c0_8, %c0_9] : memref<1x2x128x128xbf16, #tpu.memory_space<vmem>>, vector<1x2x128x128xbf16>
    %8 = vector.shape_cast %7 : vector<1x2x128x128xbf16> to vector<2x128x128xbf16>
    %9 = arith.extf %8 : vector<2x128x128xbf16> to vector<2x128x128xf32>
    %10 = arith.addf %6, %9 : vector<2x128x128xf32>
    %11 = arith.index_cast %arg1 : i32 to index
    %c0_10 = arith.constant 0 : index
    %c0_11 = arith.constant 0 : index
    %12 = vector.load %arg5[%11, %c0_10, %c0_11] : memref<3x2x256xf32, #tpu.memory_space<vmem>>, vector<1x2x256xf32>
    %13 = vector.shape_cast %12 : vector<1x2x256xf32> to vector<2x256xf32>
    %14 = vector.extract_strided_slice %13 {offsets = [0, 0], sizes = [2, 128], strides = [1, 1]} : vector<2x256xf32> to vector<2x128xf32>
    %15 = vector.shape_cast %14 : vector<2x128xf32> to vector<2x1x128xf32>
    %16 = vector.extract_strided_slice %13 {offsets = [0, 128], sizes = [2, 128], strides = [1, 1]} : vector<2x256xf32> to vector<2x128xf32>
    %17 = vector.shape_cast %16 : vector<2x128xf32> to vector<2x1x128xf32>
    %cst = arith.constant 1.000000e+00 : f32
    %18 = vector.broadcast %cst : f32 to vector<2x1x128xf32>
    %19 = arith.addf %18, %15 : vector<2x1x128xf32>
    %cst_12 = arith.constant dense<0.000000e+00> : vector<2x128xf32>
    %20 = vector.multi_reduction <add>, %10, %cst_12 [2] : vector<2x128x128xf32> to vector<2x128xf32>
    %21 = vector.shape_cast %20 : vector<2x128xf32> to vector<2x128x1xf32>
    %22 = arith.mulf %10, %10 : vector<2x128x128xf32>
    %cst_13 = arith.constant dense<0.000000e+00> : vector<2x128xf32>
    %23 = vector.multi_reduction <add>, %22, %cst_13 [2] : vector<2x128x128xf32> to vector<2x128xf32>
    %24 = vector.shape_cast %23 : vector<2x128xf32> to vector<2x128x1xf32>
    %cst_14 = arith.constant 7.812500e-03 : f32
    %25 = vector.broadcast %cst_14 : f32 to vector<2x128x1xf32>
    %26 = arith.mulf %21, %25 : vector<2x128x1xf32>
    %cst_15 = arith.constant 7.812500e-03 : f32
    %27 = vector.broadcast %cst_15 : f32 to vector<2x128x1xf32>
    %28 = arith.mulf %24, %27 : vector<2x128x1xf32>
    %29 = arith.mulf %26, %26 : vector<2x128x1xf32>
    %30 = arith.subf %28, %29 : vector<2x128x1xf32>
    %31 = vector.broadcast %26 : vector<2x128x1xf32> to vector<2x128x128xf32>
    %32 = arith.subf %10, %31 : vector<2x128x128xf32>
    %cst_16 = arith.constant 9.99999974E-6 : f32
    %33 = vector.broadcast %cst_16 : f32 to vector<2x128x1xf32>
    %34 = arith.addf %30, %33 : vector<2x128x1xf32>
    %35 = math.rsqrt %34 : vector<2x128x1xf32>
    %36 = vector.broadcast %35 : vector<2x128x1xf32> to vector<2x128x128xf32>
    %37 = arith.mulf %32, %36 : vector<2x128x128xf32>
    %38 = vector.broadcast %19 : vector<2x1x128xf32> to vector<2x128x128xf32>
    %39 = arith.mulf %38, %37 : vector<2x128x128xf32>
    %40 = vector.broadcast %17 : vector<2x1x128xf32> to vector<2x128x128xf32>
    %41 = arith.addf %39, %40 : vector<2x128x128xf32>
    %42 = arith.truncf %41 : vector<2x128x128xf32> to vector<2x128x128xbf16>
    %43 = arith.index_cast %arg1 : i32 to index
    %c0_17 = arith.constant 0 : index
    %c0_18 = arith.constant 0 : index
    %44 = vector.load %arg8[%43, %c0_17, %c0_18] : memref<3x128x384xbf16, #tpu.memory_space<vmem>>, vector<1x128x384xbf16>
    %45 = vector.shape_cast %44 : vector<1x128x384xbf16> to vector<128x384xbf16>
    "tpu.trace_start"() <{level = 10 : i32, message = "btc,cf->btf"}> : () -> ()
    %cst_19 = arith.constant dense<0.000000e+00> : vector<2x128x384xf32>
    %46 = tpu.matmul %42, %45, %cst_19 {dimension_numbers = #tpu.dot_dimension_numbers<[2], [0], [0, 1], [1], [0, 0, 0, 1, 1, 1], [], []>} : vector<2x128x128xbf16>, vector<128x384xbf16>, vector<2x128x384xf32> -> vector<2x128x384xf32>
    "tpu.trace_stop"() : () -> ()
    %47 = arith.index_cast %arg1 : i32 to index
    %c0_20 = arith.constant 0 : index
    %c0_21 = arith.constant 0 : index
    %48 = vector.load %arg9[%47, %c0_20, %c0_21] : memref<3x1x384xf32, #tpu.memory_space<vmem>>, vector<1x1x384xf32>
    %49 = vector.shape_cast %48 : vector<1x1x384xf32> to vector<1x384xf32>
    %50 = vector.shape_cast %49 : vector<1x384xf32> to vector<1x1x384xf32>
    %51 = vector.broadcast %50 : vector<1x1x384xf32> to vector<2x128x384xf32>
    %52 = arith.addf %46, %51 : vector<2x128x384xf32>
    %53 = vector.extract_strided_slice %52 {offsets = [0, 0, 0], sizes = [2, 128, 128], strides = [1, 1, 1]} : vector<2x128x384xf32> to vector<2x128x128xf32>
    %54 = vector.extract_strided_slice %52 {offsets = [0, 0, 128], sizes = [2, 128, 128], strides = [1, 1, 1]} : vector<2x128x384xf32> to vector<2x128x128xf32>
    %55 = vector.extract_strided_slice %52 {offsets = [0, 0, 256], sizes = [2, 128, 128], strides = [1, 1, 1]} : vector<2x128x384xf32> to vector<2x128x128xf32>
    %c0_22 = arith.constant 0 : index
    %c0_23 = arith.constant 0 : index
    %56 = vector.load %arg6[%c0_22, %c0_23] : memref<128x4xf32, #tpu.memory_space<vmem>>, vector<128x4xf32>
    %c0_24 = arith.constant 0 : index
    %c0_25 = arith.constant 0 : index
    %57 = vector.load %arg7[%c0_24, %c0_25] : memref<4x128xf32, #tpu.memory_space<vmem>>, vector<4x128xf32>
    %58 = vector.extract_strided_slice %53 {offsets = [0, 0, 0], sizes = [1, 128, 128], strides = [1, 1, 1]} : vector<2x128x128xf32> to vector<1x128x128xf32>
    %59 = vector.shape_cast %58 : vector<1x128x128xf32> to vector<128x128xf32>
    %60 = vector.extract_strided_slice %54 {offsets = [0, 0, 0], sizes = [1, 128, 128], strides = [1, 1, 1]} : vector<2x128x128xf32> to vector<1x128x128xf32>
    %61 = vector.shape_cast %60 : vector<1x128x128xf32> to vector<128x128xf32>
    %62 = arith.mulf %59, %61 : vector<128x128xf32>
    %cst_26 = arith.constant dense<0.000000e+00> : vector<128x4xf32>
    %63 = tpu.matmul %62, %56, %cst_26 {dimension_numbers = #tpu.dot_dimension_numbers<[1], [0], [0], [1], [0, 0, 1, 1], [], []>} : vector<128x128xf32>, vector<128x4xf32>, vector<128x4xf32> -> vector<128x4xf32>
    %64 = vector.extract_strided_slice %54 {offsets = [1, 0, 0], sizes = [1, 128, 128], strides = [1, 1, 1]} : vector<2x128x128xf32> to vector<1x128x128xf32>
    %65 = vector.shape_cast %64 : vector<1x128x128xf32> to vector<128x128xf32>
    %66 = arith.mulf %59, %65 : vector<128x128xf32>
    %cst_27 = arith.constant dense<0.000000e+00> : vector<128x4xf32>
    %67 = tpu.matmul %66, %56, %cst_27 {dimension_numbers = #tpu.dot_dimension_numbers<[1], [0], [0], [1], [0, 0, 1, 1], [], []>} : vector<128x128xf32>, vector<128x4xf32>, vector<128x4xf32> -> vector<128x4xf32>
    %68 = arith.maximumf %63, %67 : vector<128x4xf32>
    %69 = arith.subf %63, %68 : vector<128x4xf32>
    %70 = math.exp %69 : vector<128x4xf32>
    %71 = arith.subf %67, %68 : vector<128x4xf32>
    %72 = math.exp %71 : vector<128x4xf32>
    %73 = arith.addf %70, %72 : vector<128x4xf32>
    %74 = tpu.reciprocal %73 {approx = true} : vector<128x4xf32> -> vector<128x4xf32>
    %75 = arith.mulf %70, %74 : vector<128x4xf32>
    %cst_28 = arith.constant dense<0.000000e+00> : vector<128x128xf32>
    %76 = tpu.matmul %75, %57, %cst_28 {dimension_numbers = #tpu.dot_dimension_numbers<[1], [0], [0], [1], [0, 0, 1, 1], [], []>} : vector<128x4xf32>, vector<4x128xf32>, vector<128x128xf32> -> vector<128x128xf32>
    %77 = vector.extract_strided_slice %55 {offsets = [0, 0, 0], sizes = [1, 128, 128], strides = [1, 1, 1]} : vector<2x128x128xf32> to vector<1x128x128xf32>
    %78 = vector.shape_cast %77 : vector<1x128x128xf32> to vector<128x128xf32>
    %79 = arith.mulf %76, %78 : vector<128x128xf32>
    %80 = arith.mulf %72, %74 : vector<128x4xf32>
    %cst_29 = arith.constant dense<0.000000e+00> : vector<128x128xf32>
    %81 = tpu.matmul %80, %57, %cst_29 {dimension_numbers = #tpu.dot_dimension_numbers<[1], [0], [0], [1], [0, 0, 1, 1], [], []>} : vector<128x4xf32>, vector<4x128xf32>, vector<128x128xf32> -> vector<128x128xf32>
    %82 = vector.extract_strided_slice %55 {offsets = [1, 0, 0], sizes = [1, 128, 128], strides = [1, 1, 1]} : vector<2x128x128xf32> to vector<1x128x128xf32>
    %83 = vector.shape_cast %82 : vector<1x128x128xf32> to vector<128x128xf32>
    %84 = arith.mulf %81, %83 : vector<128x128xf32>
    %85 = arith.addf %79, %84 : vector<128x128xf32>
    %86 = vector.extract_strided_slice %53 {offsets = [1, 0, 0], sizes = [1, 128, 128], strides = [1, 1, 1]} : vector<2x128x128xf32> to vector<1x128x128xf32>
    %87 = vector.shape_cast %86 : vector<1x128x128xf32> to vector<128x128xf32>
    %88 = vector.extract_strided_slice %54 {offsets = [0, 0, 0], sizes = [1, 128, 128], strides = [1, 1, 1]} : vector<2x128x128xf32> to vector<1x128x128xf32>
    %89 = vector.shape_cast %88 : vector<1x128x128xf32> to vector<128x128xf32>
    %90 = arith.mulf %87, %89 : vector<128x128xf32>
    %cst_30 = arith.constant dense<0.000000e+00> : vector<128x4xf32>
    %91 = tpu.matmul %90, %56, %cst_30 {dimension_numbers = #tpu.dot_dimension_numbers<[1], [0], [0], [1], [0, 0, 1, 1], [], []>} : vector<128x128xf32>, vector<128x4xf32>, vector<128x4xf32> -> vector<128x4xf32>
    %92 = vector.extract_strided_slice %54 {offsets = [1, 0, 0], sizes = [1, 128, 128], strides = [1, 1, 1]} : vector<2x128x128xf32> to vector<1x128x128xf32>
    %93 = vector.shape_cast %92 : vector<1x128x128xf32> to vector<128x128xf32>
    %94 = arith.mulf %87, %93 : vector<128x128xf32>
    %cst_31 = arith.constant dense<0.000000e+00> : vector<128x4xf32>
    %95 = tpu.matmul %94, %56, %cst_31 {dimension_numbers = #tpu.dot_dimension_numbers<[1], [0], [0], [1], [0, 0, 1, 1], [], []>} : vector<128x128xf32>, vector<128x4xf32>, vector<128x4xf32> -> vector<128x4xf32>
    %96 = arith.maximumf %91, %95 : vector<128x4xf32>
    %97 = arith.subf %91, %96 : vector<128x4xf32>
    %98 = math.exp %97 : vector<128x4xf32>
    %99 = arith.subf %95, %96 : vector<128x4xf32>
    %100 = math.exp %99 : vector<128x4xf32>
    %101 = arith.addf %98, %100 : vector<128x4xf32>
    %102 = tpu.reciprocal %101 {approx = true} : vector<128x4xf32> -> vector<128x4xf32>
    %103 = arith.mulf %98, %102 : vector<128x4xf32>
    %cst_32 = arith.constant dense<0.000000e+00> : vector<128x128xf32>
    %104 = tpu.matmul %103, %57, %cst_32 {dimension_numbers = #tpu.dot_dimension_numbers<[1], [0], [0], [1], [0, 0, 1, 1], [], []>} : vector<128x4xf32>, vector<4x128xf32>, vector<128x128xf32> -> vector<128x128xf32>
    %105 = vector.extract_strided_slice %55 {offsets = [0, 0, 0], sizes = [1, 128, 128], strides = [1, 1, 1]} : vector<2x128x128xf32> to vector<1x128x128xf32>
    %106 = vector.shape_cast %105 : vector<1x128x128xf32> to vector<128x128xf32>
    %107 = arith.mulf %104, %106 : vector<128x128xf32>
    %108 = arith.mulf %100, %102 : vector<128x4xf32>
    %cst_33 = arith.constant dense<0.000000e+00> : vector<128x128xf32>
    %109 = tpu.matmul %108, %57, %cst_33 {dimension_numbers = #tpu.dot_dimension_numbers<[1], [0], [0], [1], [0, 0, 1, 1], [], []>} : vector<128x4xf32>, vector<4x128xf32>, vector<128x128xf32> -> vector<128x128xf32>
    %110 = vector.extract_strided_slice %55 {offsets = [1, 0, 0], sizes = [1, 128, 128], strides = [1, 1, 1]} : vector<2x128x128xf32> to vector<1x128x128xf32>
    %111 = vector.shape_cast %110 : vector<1x128x128xf32> to vector<128x128xf32>
    %112 = arith.mulf %109, %111 : vector<128x128xf32>
    %113 = arith.addf %107, %112 : vector<128x128xf32>
    %114 = vector.shape_cast %85 : vector<128x128xf32> to vector<1x128x128xf32>
    %115 = vector.shape_cast %113 : vector<128x128xf32> to vector<1x128x128xf32>
    %116 = tpu.concatenate %114, %115 in 0 : vector<1x128x128xf32>, vector<1x128x128xf32> -> vector<2x128x128xf32>
    %117 = arith.truncf %116 : vector<2x128x128xf32> to vector<2x128x128xbf16>
    %118 = arith.index_cast %arg1 : i32 to index
    %c0_34 = arith.constant 0 : index
    %c0_35 = arith.constant 0 : index
    %119 = vector.load %arg10[%118, %c0_34, %c0_35] : memref<3x128x128xbf16, #tpu.memory_space<vmem>>, vector<1x128x128xbf16>
    %120 = vector.shape_cast %119 : vector<1x128x128xbf16> to vector<128x128xbf16>
    "tpu.trace_start"() <{level = 10 : i32, message = "btc,cf->btf"}> : () -> ()
    %cst_36 = arith.constant dense<0.000000e+00> : vector<2x128x128xf32>
    %121 = tpu.matmul %117, %120, %cst_36 {dimension_numbers = #tpu.dot_dimension_numbers<[2], [0], [0, 1], [1], [0, 0, 0, 1, 1, 1], [], []>} : vector<2x128x128xbf16>, vector<128x128xbf16>, vector<2x128x128xf32> -> vector<2x128x128xf32>
    "tpu.trace_stop"() : () -> ()
    %122 = arith.index_cast %arg1 : i32 to index
    %c0_37 = arith.constant 0 : index
    %c0_38 = arith.constant 0 : index
    %123 = vector.load %arg11[%122, %c0_37, %c0_38] : memref<3x1x128xf32, #tpu.memory_space<vmem>>, vector<1x1x128xf32>
    %124 = vector.shape_cast %123 : vector<1x1x128xf32> to vector<1x128xf32>
    %125 = vector.shape_cast %124 : vector<1x128xf32> to vector<1x1x128xf32>
    %126 = vector.broadcast %125 : vector<1x1x128xf32> to vector<2x128x128xf32>
    %127 = arith.addf %121, %126 : vector<2x128x128xf32>
    %128 = arith.addf %41, %127 : vector<2x128x128xf32>
    %cst_39 = arith.constant dense<0.000000e+00> : vector<2x128xf32>
    %129 = vector.multi_reduction <add>, %128, %cst_39 [2] : vector<2x128x128xf32> to vector<2x128xf32>
    %130 = vector.shape_cast %129 : vector<2x128xf32> to vector<2x128x1xf32>
    %131 = arith.mulf %128, %128 : vector<2x128x128xf32>
    %cst_40 = arith.constant dense<0.000000e+00> : vector<2x128xf32>
    %132 = vector.multi_reduction <add>, %131, %cst_40 [2] : vector<2x128x128xf32> to vector<2x128xf32>
    %133 = vector.shape_cast %132 : vector<2x128xf32> to vector<2x128x1xf32>
    %cst_41 = arith.constant 7.812500e-03 : f32
    %134 = vector.broadcast %cst_41 : f32 to vector<2x128x1xf32>
    %135 = arith.mulf %130, %134 : vector<2x128x1xf32>
    %cst_42 = arith.constant 7.812500e-03 : f32
    %136 = vector.broadcast %cst_42 : f32 to vector<2x128x1xf32>
    %137 = arith.mulf %133, %136 : vector<2x128x1xf32>
    %138 = arith.mulf %135, %135 : vector<2x128x1xf32>
    %139 = arith.subf %137, %138 : vector<2x128x1xf32>
    %140 = vector.broadcast %135 : vector<2x128x1xf32> to vector<2x128x128xf32>
    %141 = arith.subf %128, %140 : vector<2x128x128xf32>
    %cst_43 = arith.constant 9.99999974E-6 : f32
    %142 = vector.broadcast %cst_43 : f32 to vector<2x128x1xf32>
    %143 = arith.addf %139, %142 : vector<2x128x1xf32>
    %144 = math.rsqrt %143 : vector<2x128x1xf32>
    %145 = vector.broadcast %144 : vector<2x128x1xf32> to vector<2x128x128xf32>
    %146 = arith.mulf %141, %145 : vector<2x128x128xf32>
    %147 = arith.index_cast %arg1 : i32 to index
    %c0_44 = arith.constant 0 : index
    %c0_45 = arith.constant 0 : index
    %148 = vector.load %arg12[%147, %c0_44, %c0_45] : memref<3x1x128xf32, #tpu.memory_space<vmem>>, vector<1x1x128xf32>
    %149 = vector.shape_cast %148 : vector<1x1x128xf32> to vector<1x128xf32>
    %150 = vector.shape_cast %149 : vector<1x128xf32> to vector<1x1x128xf32>
    %151 = vector.broadcast %150 : vector<1x1x128xf32> to vector<2x128x128xf32>
    %152 = arith.mulf %146, %151 : vector<2x128x128xf32>
    %153 = arith.index_cast %arg1 : i32 to index
    %c0_46 = arith.constant 0 : index
    %c0_47 = arith.constant 0 : index
    %154 = vector.load %arg13[%153, %c0_46, %c0_47] : memref<3x1x128xf32, #tpu.memory_space<vmem>>, vector<1x1x128xf32>
    %155 = vector.shape_cast %154 : vector<1x1x128xf32> to vector<1x128xf32>
    %156 = vector.shape_cast %155 : vector<1x128xf32> to vector<1x1x128xf32>
    %157 = vector.broadcast %156 : vector<1x1x128xf32> to vector<2x128x128xf32>
    %158 = arith.addf %152, %157 : vector<2x128x128xf32>
    %159 = arith.truncf %158 : vector<2x128x128xf32> to vector<2x128x128xbf16>
    %160 = arith.index_cast %arg1 : i32 to index
    %c0_48 = arith.constant 0 : index
    %c0_49 = arith.constant 0 : index
    %161 = vector.load %arg14[%160, %c0_48, %c0_49] : memref<3x128x256xbf16, #tpu.memory_space<vmem>>, vector<1x128x256xbf16>
    %162 = vector.shape_cast %161 : vector<1x128x256xbf16> to vector<128x256xbf16>
    "tpu.trace_start"() <{level = 10 : i32, message = "btc,cf->btf"}> : () -> ()
    %cst_50 = arith.constant dense<0.000000e+00> : vector<2x128x256xf32>
    %163 = tpu.matmul %159, %162, %cst_50 {dimension_numbers = #tpu.dot_dimension_numbers<[2], [0], [0, 1], [1], [0, 0, 0, 1, 1, 1], [], []>} : vector<2x128x128xbf16>, vector<128x256xbf16>, vector<2x128x256xf32> -> vector<2x128x256xf32>
    "tpu.trace_stop"() : () -> ()
    %164 = arith.index_cast %arg1 : i32 to index
    %c0_51 = arith.constant 0 : index
    %c0_52 = arith.constant 0 : index
    %165 = vector.load %arg15[%164, %c0_51, %c0_52] : memref<3x1x256xf32, #tpu.memory_space<vmem>>, vector<1x1x256xf32>
    %166 = vector.shape_cast %165 : vector<1x1x256xf32> to vector<1x256xf32>
    %167 = vector.shape_cast %166 : vector<1x256xf32> to vector<1x1x256xf32>
    %168 = vector.broadcast %167 : vector<1x1x256xf32> to vector<2x128x256xf32>
    %169 = arith.addf %163, %168 : vector<2x128x256xf32>
    %cst_53 = arith.constant 5.000000e-01 : f32
    %170 = vector.broadcast %cst_53 : f32 to vector<2x128x256xf32>
    %171 = arith.mulf %170, %169 : vector<2x128x256xf32>
    %cst_54 = arith.constant 0.707106769 : f32
    %172 = vector.broadcast %cst_54 : f32 to vector<2x128x256xf32>
    %173 = arith.mulf %169, %172 : vector<2x128x256xf32>
    %174 = math.erf %173 : vector<2x128x256xf32>
    %cst_55 = arith.constant 1.000000e+00 : f32
    %175 = vector.broadcast %cst_55 : f32 to vector<2x128x256xf32>
    %176 = arith.addf %175, %174 : vector<2x128x256xf32>
    %177 = arith.mulf %171, %176 : vector<2x128x256xf32>
    %178 = arith.truncf %177 : vector<2x128x256xf32> to vector<2x128x256xbf16>
    %179 = arith.index_cast %arg1 : i32 to index
    %c0_56 = arith.constant 0 : index
    %c0_57 = arith.constant 0 : index
    %180 = vector.load %arg16[%179, %c0_56, %c0_57] : memref<3x256x128xbf16, #tpu.memory_space<vmem>>, vector<1x256x128xbf16>
    %181 = vector.shape_cast %180 : vector<1x256x128xbf16> to vector<256x128xbf16>
    "tpu.trace_start"() <{level = 10 : i32, message = "btf,fc->btc"}> : () -> ()
    %cst_58 = arith.constant dense<0.000000e+00> : vector<2x128x128xf32>
    %182 = tpu.matmul %178, %181, %cst_58 {dimension_numbers = #tpu.dot_dimension_numbers<[2], [0], [0, 1], [1], [0, 0, 0, 1, 1, 1], [], []>} : vector<2x128x256xbf16>, vector<256x128xbf16>, vector<2x128x128xf32> -> vector<2x128x128xf32>
    "tpu.trace_stop"() : () -> ()
    %183 = arith.index_cast %arg1 : i32 to index
    %c0_59 = arith.constant 0 : index
    %c0_60 = arith.constant 0 : index
    %184 = vector.load %arg17[%183, %c0_59, %c0_60] : memref<3x1x128xf32, #tpu.memory_space<vmem>>, vector<1x1x128xf32>
    %185 = vector.shape_cast %184 : vector<1x1x128xf32> to vector<1x128xf32>
    %186 = vector.shape_cast %185 : vector<1x128xf32> to vector<1x1x128xf32>
    %187 = vector.broadcast %186 : vector<1x1x128xf32> to vector<2x128x128xf32>
    %188 = arith.addf %182, %187 : vector<2x128x128xf32>
    %189 = arith.addf %158, %188 : vector<2x128x128xf32>
    %c0_61 = arith.constant 0 : index
    %c0_62 = arith.constant 0 : index
    %c0_63 = arith.constant 0 : index
    %190 = vector.load %arg21[%c0_61, %c0_62, %c0_63] : memref<2x128x128xf32, #tpu.memory_space<vmem>>, vector<2x128x128xf32>
    tpu.vector_store %arg21[%c0_61, %c0_62, %c0_63], %189 {strides = array<i32>} : memref<2x128x128xf32, #tpu.memory_space<vmem>>, vector<2x128x128xf32>,
    %c2_i32 = arith.constant 2 : i32
    %191 = arith.cmpi eq, %arg1, %c2_i32 : i32
    %192 = arith.extui %191 : i1 to i32
    %c0_i32_64 = arith.constant 0 : i32
    %193 = arith.cmpi ne, %192, %c0_i32_64 : i32
    scf.if %193 {
      %194 = arith.truncf %189 : vector<2x128x128xf32> to vector<2x128x128xbf16>
      %c0_65 = arith.constant 0 : index
      %c0_66 = arith.constant 0 : index
      %195 = vector.load %arg18[%c0_65, %c0_66] : memref<128x128xbf16, #tpu.memory_space<vmem>>, vector<128x128xbf16>
      "tpu.trace_start"() <{level = 10 : i32, message = "btc,co->bto"}> : () -> ()
      %cst_67 = arith.constant dense<0.000000e+00> : vector<2x128x128xf32>
      %196 = tpu.matmul %194, %195, %cst_67 {dimension_numbers = #tpu.dot_dimension_numbers<[2], [0], [0, 1], [1], [0, 0, 0, 1, 1, 1], [], []>} : vector<2x128x128xbf16>, vector<128x128xbf16>, vector<2x128x128xf32> -> vector<2x128x128xf32>
      "tpu.trace_stop"() : () -> ()
      %c0_68 = arith.constant 0 : index
      %c0_69 = arith.constant 0 : index
      %197 = vector.load %arg19[%c0_68, %c0_69] : memref<1x128xf32, #tpu.memory_space<vmem>>, vector<1x128xf32>
      %198 = vector.shape_cast %197 : vector<1x128xf32> to vector<1x1x128xf32>
      %199 = vector.broadcast %198 : vector<1x1x128xf32> to vector<2x128x128xf32>
      %200 = arith.addf %196, %199 : vector<2x128x128xf32>
      %c0_70 = arith.constant 0 : index
      %c0_71 = arith.constant 0 : index
      %c0_72 = arith.constant 0 : index
      %201 = vector.load %arg20[%c0_70, %c0_71, %c0_72] : memref<2x128x128xf32, #tpu.memory_space<vmem>>, vector<2x128x128xf32>
      tpu.vector_store %arg20[%c0_70, %c0_71, %c0_72], %200 {strides = array<i32>} : memref<2x128x128xf32, #tpu.memory_space<vmem>>, vector<2x128x128xf32>,
    } else {
    }
    return
  }
  func.func @transform_0(%arg0: i32, %arg1: i32) -> (i32, i32, i32) {
    %c0_i32 = arith.constant 0 : i32
    %c0_i32_0 = arith.constant 0 : i32
    %c0_i32_1 = arith.constant 0 : i32
    return %c0_i32, %arg0, %c0_i32_0 : i32, i32, i32
  }
  func.func @transform_1(%arg0: i32, %arg1: i32) -> (i32, i32, i32, i32) {
    %c0_i32 = arith.constant 0 : i32
    %c0_i32_0 = arith.constant 0 : i32
    %c0_i32_1 = arith.constant 0 : i32
    return %arg1, %c0_i32, %arg0, %c0_i32_0 : i32, i32, i32, i32
  }
  func.func @transform_2(%arg0: i32, %arg1: i32) -> (i32, i32, i32) {
    %c0_i32 = arith.constant 0 : i32
    %c0_i32_0 = arith.constant 0 : i32
    %c0_i32_1 = arith.constant 0 : i32
    %c0_i32_2 = arith.constant 0 : i32
    return %c0_i32, %c0_i32_0, %c0_i32_1 : i32, i32, i32
  }
  func.func @transform_3(%arg0: i32, %arg1: i32) -> (i32, i32, i32) {
    %c0_i32 = arith.constant 0 : i32
    %c0_i32_0 = arith.constant 0 : i32
    %c0_i32_1 = arith.constant 0 : i32
    %c0_i32_2 = arith.constant 0 : i32
    return %c0_i32, %c0_i32_0, %c0_i32_1 : i32, i32, i32
  }
  func.func @transform_4(%arg0: i32, %arg1: i32) -> (i32, i32) {
    %c0_i32 = arith.constant 0 : i32
    %c0_i32_0 = arith.constant 0 : i32
    %c0_i32_1 = arith.constant 0 : i32
    return %c0_i32, %c0_i32_0 : i32, i32
  }
  func.func @transform_5(%arg0: i32, %arg1: i32) -> (i32, i32) {
    %c0_i32 = arith.constant 0 : i32
    %c0_i32_0 = arith.constant 0 : i32
    %c0_i32_1 = arith.constant 0 : i32
    return %c0_i32, %c0_i32_0 : i32, i32
  }
  func.func @transform_6(%arg0: i32, %arg1: i32) -> (i32, i32, i32) {
    %c0_i32 = arith.constant 0 : i32
    %c0_i32_0 = arith.constant 0 : i32
    %c0_i32_1 = arith.constant 0 : i32
    %c0_i32_2 = arith.constant 0 : i32
    return %c0_i32, %c0_i32_0, %c0_i32_1 : i32, i32, i32
  }
  func.func @transform_7(%arg0: i32, %arg1: i32) -> (i32, i32, i32) {
    %c0_i32 = arith.constant 0 : i32
    %c0_i32_0 = arith.constant 0 : i32
    %c0_i32_1 = arith.constant 0 : i32
    %c0_i32_2 = arith.constant 0 : i32
    return %c0_i32, %c0_i32_0, %c0_i32_1 : i32, i32, i32
  }
  func.func @transform_8(%arg0: i32, %arg1: i32) -> (i32, i32, i32) {
    %c0_i32 = arith.constant 0 : i32
    %c0_i32_0 = arith.constant 0 : i32
    %c0_i32_1 = arith.constant 0 : i32
    %c0_i32_2 = arith.constant 0 : i32
    return %c0_i32, %c0_i32_0, %c0_i32_1 : i32, i32, i32
  }
  func.func @transform_9(%arg0: i32, %arg1: i32) -> (i32, i32, i32) {
    %c0_i32 = arith.constant 0 : i32
    %c0_i32_0 = arith.constant 0 : i32
    %c0_i32_1 = arith.constant 0 : i32
    %c0_i32_2 = arith.constant 0 : i32
    return %c0_i32, %c0_i32_0, %c0_i32_1 : i32, i32, i32
  }
  func.func @transform_10(%arg0: i32, %arg1: i32) -> (i32, i32, i32) {
    %c0_i32 = arith.constant 0 : i32
    %c0_i32_0 = arith.constant 0 : i32
    %c0_i32_1 = arith.constant 0 : i32
    %c0_i32_2 = arith.constant 0 : i32
    return %c0_i32, %c0_i32_0, %c0_i32_1 : i32, i32, i32
  }
  func.func @transform_11(%arg0: i32, %arg1: i32) -> (i32, i32, i32) {
    %c0_i32 = arith.constant 0 : i32
    %c0_i32_0 = arith.constant 0 : i32
    %c0_i32_1 = arith.constant 0 : i32
    %c0_i32_2 = arith.constant 0 : i32
    return %c0_i32, %c0_i32_0, %c0_i32_1 : i32, i32, i32
  }
  func.func @transform_12(%arg0: i32, %arg1: i32) -> (i32, i32, i32) {
    %c0_i32 = arith.constant 0 : i32
    %c0_i32_0 = arith.constant 0 : i32
    %c0_i32_1 = arith.constant 0 : i32
    %c0_i32_2 = arith.constant 0 : i32
    return %c0_i32, %c0_i32_0, %c0_i32_1 : i32, i32, i32
  }
  func.func @transform_13(%arg0: i32, %arg1: i32) -> (i32, i32, i32) {
    %c0_i32 = arith.constant 0 : i32
    %c0_i32_0 = arith.constant 0 : i32
    %c0_i32_1 = arith.constant 0 : i32
    %c0_i32_2 = arith.constant 0 : i32
    return %c0_i32, %c0_i32_0, %c0_i32_1 : i32, i32, i32
  }
  func.func @transform_14(%arg0: i32, %arg1: i32) -> (i32, i32, i32) {
    %c0_i32 = arith.constant 0 : i32
    %c0_i32_0 = arith.constant 0 : i32
    %c0_i32_1 = arith.constant 0 : i32
    %c0_i32_2 = arith.constant 0 : i32
    return %c0_i32, %c0_i32_0, %c0_i32_1 : i32, i32, i32
  }
  func.func @transform_15(%arg0: i32, %arg1: i32) -> (i32, i32, i32) {
    %c0_i32 = arith.constant 0 : i32
    %c0_i32_0 = arith.constant 0 : i32
    %c0_i32_1 = arith.constant 0 : i32
    %c0_i32_2 = arith.constant 0 : i32
    return %c0_i32, %c0_i32_0, %c0_i32_1 : i32, i32, i32
  }
  func.func @transform_16(%arg0: i32, %arg1: i32) -> (i32, i32) {
    %c0_i32 = arith.constant 0 : i32
    %c0_i32_0 = arith.constant 0 : i32
    %c0_i32_1 = arith.constant 0 : i32
    return %c0_i32, %c0_i32_0 : i32, i32
  }
  func.func @transform_17(%arg0: i32, %arg1: i32) -> (i32, i32) {
    %c0_i32 = arith.constant 0 : i32
    %c0_i32_0 = arith.constant 0 : i32
    %c0_i32_1 = arith.constant 0 : i32
    return %c0_i32, %c0_i32_0 : i32, i32
  }
  func.func @transform_18(%arg0: i32, %arg1: i32) -> (i32, i32, i32) {
    %c0_i32 = arith.constant 0 : i32
    %c0_i32_0 = arith.constant 0 : i32
    %c0_i32_1 = arith.constant 0 : i32
    return %c0_i32, %arg0, %c0_i32_0 : i32, i32, i32
  }
}

</mosaic_0001>

<bundles_post_ra>
// kernel: tpu_custom_call.1
= control target key start
LH: loop header
LB: loop body
LE: loop exit
PB: predicated region body
PF: predicated region fallthrough
CT: control target
= control target key end

     0   :  { %s11856_s0 = inlined_call_operand.hbm [shape: f32[2,256,128], index: 0, kind: input, shape index: {}]   ;;  %s11857_s1 = inlined_call_operand.hbm [shape: bf16[3,2,256,128], index: 1, kind: input, shape index: {}]   ;;  %s11858_s2 = inlined_call_operand.vmem [shape: f32[2,1,128], index: 2, kind: input, shape index: {}]   ;;  %s11859_s3 = inlined_call_operand.vmem [shape: f32[3,2,256], index: 3, kind: input, shape index: {}]   ;;  %s11860_s4 = inlined_call_operand.vmem [shape: f32[128,4], index: 4, kind: input, shape index: {}]   ;;  %s11861_s5 = inlined_call_operand.vmem [shape: f32[4,128], index: 5, kind: input, shape index: {}]   ;;  %s11862_s6 = inlined_call_operand.hbm [shape: bf16[3,128,384], index: 6, kind: input, shape index: {}]   ;;  %s11863_s7 = inlined_call_operand.vmem [shape: f32[3,1,384], index: 7, kind: input, shape index: {}]   ;;  %s11864_s8 = inlined_call_operand.hbm [shape: bf16[3,128,128], index: 8, kind: input, shape index: {}]   ;;  %s11865_s9 = inlined_call_operand.vmem [shape: f32[3,1,128], index: 9, kind: input, shape index: {}]   ;;  %s11866_s10 = inlined_call_operand.vmem [shape: f32[3,1,128], index: 10, kind: input, shape index: {}]   ;;  %s11867_s11 = inlined_call_operand.vmem [shape: f32[3,1,128], index: 11, kind: input, shape index: {}]   ;;  %s11868_s12 = inlined_call_operand.hbm [shape: bf16[3,128,256], index: 12, kind: input, shape index: {}]   ;;  %s11869_s13 = inlined_call_operand.vmem [shape: f32[3,1,256], index: 13, kind: input, shape index: {}]   ;;  %s11870_s14 = inlined_call_operand.hbm [shape: bf16[3,256,128], index: 14, kind: input, shape index: {}]   ;;  %s11871_s15 = inlined_call_operand.vmem [shape: f32[3,1,128], index: 15, kind: input, shape index: {}]   ;;  %s11872_s16 = inlined_call_operand.vmem [shape: bf16[128,128], index: 16, kind: input, shape index: {}]   ;;  %s11873_s17 = inlined_call_operand.vmem [shape: f32[1,128], index: 17, kind: input, shape index: {}]   ;;  %s11874_s18 = inlined_call_operand.hbm [shape: f32[2,256,128], index: 18, kind: output, shape index: {}]  }
   0x1   :  { %11970 = sst [smem:[#allocation123_spill]] %s11856_s0 }
   0x2   :  { %11971 = sst [smem:[#allocation124_spill]] %s11857_s1 }
   0x3   :  { %11972 = sst [smem:[#allocation125_spill]] %s11858_s2 }
   0x4   :  { %11973 = sst [smem:[#allocation126_spill]] %s11859_s3 }
   0x5   :  { %11974 = sst [smem:[#allocation127_spill]] %s11860_s4 }
   0x6   :  { %11975 = sst [smem:[#allocation128_spill]] %s11861_s5 }
   0x7   :  { %11976 = sst [smem:[#allocation129_spill]] %s11863_s7 }
   0x8   :  { %11977 = sst [smem:[#allocation130_spill]] %s11865_s9 }
   0x9   :  { %11978 = sst [smem:[#allocation131_spill]] %s11866_s10 }
   0xa   :  { %11979 = sst [smem:[#allocation132_spill]] %s11867_s11 }
   0xb   :  { %11980 = sst [smem:[#allocation133_spill]] %s11869_s13 }
   0xc   :  { %11981 = sst [smem:[#allocation134_spill]] %s11871_s15 }
   0xd   :  { %11982 = sst [smem:[#allocation135_spill]] %s11872_s16 }
   0xe   :  { %11983 = sst [smem:[#allocation136_spill]] %s11873_s17 }
   0xf   :  { %11984 = sst [smem:[#allocation137_spill]] %s11874_s18 }
  0x10   :  { %23 = vsyncpa [#allocation4], 0 }
  0x11   :  { %25 = vsyncpa [#allocation4 + $0x1], 0 }
  0x12   :  { %26 = vsyncpa [#allocation7], 0 }
  0x13   :  { %28 = vsyncpa [#allocation7 + $0x1], 0 }
  0x14   :  { %29 = vsyncpa [#allocation10], 0 }
  0x15   :  { %30 = vsyncpa [#allocation13], 0 }
  0x16   :  { %31 = vsyncpa [#allocation5], 0 }
  0x17   :  { %33 = vsyncpa [#allocation5 + $0x1], 0  ;;  %s8634_s27 = smov 0   ;;  %s8636_s28 = smov 0  }
  0x18   :  { %s8638_s29 = smov 0   ;;  %s8640_s30 = smov 0  }
  0x19   :  { %s8642_s0 = smov 0   ;;  %s8644_s19 = smov 0  }
  0x1a   :  { %s8646_s1 = smov 0   ;;  %s8648_s20 = smov 0  }
  0x1b   :  { %s8650_s21 = smov 0   ;;  %s8652_s22 = smov 0  }
  0x1c   :  { %s8654_s2 = smov 0  }
  0x1d LB: > { %11985 = sst [smem:[#allocation29_spill]] %s8471_s28  ;;  %s8690_s23 = sadd.s32 4294967295, %s8507_s2   ;;  %s8507_s2 = sphi %s8654_s2, %s39_s2   ;;  %s8503_s22 = sphi %s8652_s22, %s12266_s22   ;;  %s8499_s21 = sphi %s8650_s21, %s12265_s21   ;;  %s8495_s20 = sphi %s8648_s20, %s12264_s20   ;;  %s8491_s1 = sphi %s8646_s1, %s12263_s1   ;;  %s8487_s19 = sphi %s8644_s19, %s12262_s19   ;;  %s8483_s0 = sphi %s8642_s0, %s12261_s0   ;;  %s8479_s30 = sphi %s8640_s30, %s12260_s30   ;;  %s8475_s29 = sphi %s8638_s29, %s12259_s29   ;;  %s8471_s28 = sphi %s8636_s28, %s12258_s28   ;;  %s8467_s27 = sphi %s8634_s27, %s12253_s27  }
  0x1e   : > { %11986 = sst [smem:[#allocation30_spill]] %s8479_s30  ;;  %s6273_s24 = sadd.s32 4294967294, %s8507_s2  }
  0x1f   : > { %11987 = sst [smem:[#allocation31_spill]] %s8491_s1  ;;  %s48_s25 = sadd.s32 1, %s8499_s21 }
  0x20   : > { %11988 = sst [smem:[#allocation32_spill]] %s8495_s20  ;;  %s51_s26 = sadd.s32 1, %s8503_s22 }
  0x21   : > { %p49_p0 = scmp.ge.s32.totalorder %s48_s25, 3  ;;  %s58_s18 = sadd.s32 1, %s8487_s19 }
  0x22   : > { %p65_p1 = scmp.ne.s32.totalorder %s8487_s19, %s8483_s0  ;;  %p66_p2 = scmp.eq.s32.totalorder %s8507_s2, 0 }
  0x23   : > { %s12268_s25 = smov (%p49_p0, %s48_s25), 0  ;;  %s12270_s26 = smov (!%p49_p0, %s51_s26), %s8503_s22 }
  0x24   : > { %11989 = sst [smem:[#allocation33_spill]] %s12268_s25  ;;  %p8707_p3 = por %p66_p2, %p65_p1 }
  0x25   : > { %p11878_p4 = scmp.ne.s32.totalorder %s8483_s0, %s8479_s30  ;;  %p53_p5 = scmp.ge.s32.totalorder %s12270_s26, 2 }
  0x26   : > { %s11990_s20 = scalar_select %p8707_p3, 1, 0 }
  0x27   : > { %p11886_p6 = scmp.eq.s32.totalorder %s8690_s23, 0  ;;  %s81_s17 = ssub.s32 %s8499_s21, %s12268_s25 }
  0x28   : > { %s86_s16 = sadd.s32 1, %s8475_s29  ;;  %s12272_s26 = smov (%p53_p5, %s12270_s26), 0 }
  0x29   : > { %11991 = sst [smem:[#allocation34_spill]] %s12272_s26  ;;  %p8724_p7 = por %p11886_p6, %p11878_p4 }
  0x2a   : > { %p93_p8 = scmp.ne.s32.totalorder %s8475_s29, %s8471_s28  ;;  %s55_s13 = ssub.s32 %s8503_s22, %s12272_s26 }
  0x2b   : > { %s11992_s15 = scalar_select %p8724_p7, 1, 0 }
  0x2c   : > { %p99_p9 = scmp.ne.s32.totalorder %s8471_s28, %s8467_s27  ;;  %p56_p10 = scmp.eq.s32.totalorder %s55_s13, 0 }
  0x2d   : > { %s83_s25 = sor.u32 %s81_s17, %s55_s13  ;;  %p8736_p12 = por %p93_p8, %p66_p2 }
  0x2e   : > { %p84_p11 = scmp.eq.s32.totalorder %s83_s25, 0  ;;  %p8748_p13 = por %p99_p9, %p11886_p6 }
  0x2f   : > { %s11993_s11 = scalar_select %p8736_p12, 1, 0 }
  0x30   : > { %s8741_s10 = scalar_select %p56_p10, %s8487_s19, %s58_s18  }
  0x31   : > { %s8744_s9 = scalar_select %p84_p11, %s8475_s29, %s86_s16  }
  0x32   : > { %11994 = sst [smem:[#allocation35_spill]] %s8741_s10  ;;  %p459_p0 = scmp.eq.s32.totalorder %s8690_s23, 5 }
  0x33   : > { %11995 = sst [smem:[#allocation36_spill]] %s8744_s9  ;;  %p465_p5 = scmp.eq.s32.totalorder %s6273_s24, 5 }
  0x34   : > { %s11996_s5 = scalar_select %p8748_p13, 1, 0 }
  0x35   : > { %p6274_p4 = scmp.ge.s32.totalorder %s8507_s2, 1  ;;  %p8757_p7 = por %p459_p0, %p65_p1 }
  0x36   : > { %11997 = sst [smem:[#allocation37_spill]] %s11996_s5  ;;  %p472_p2 = scmp.lt.s32.totalorder %s8507_s2, 7 }
  0x37   : > { %s11998_s13 = scalar_select %p8757_p7, 1, 0 }
  0x38   : > { %p12000_p8 = scmp.ne.s32.totalorder %s8483_s0, %s8479_s30  ;;  %p8769_p10 = pnand %p6274_p4, %p472_p2 }
  0x39   : > { %11999 = sst [smem:[#allocation38_spill]] %s11998_s13  ;;  %s8509_s18 = smov [#allocation9]  }
  0x3a   : > { %p8765_p12 = por %p465_p5, %p12000_p8  ;;  %s512_s27 = sshll.u32 %s8509_s18, 4  ;;  %s513_s27 = int_to_ptr.vmem [resolvable:$true] %s512_s27 }
  0x3b   : > { %s12003_s16 = scalar_select %p8769_p10, 1, 0 }
  0x3c   : > { %s12001_s17 = scalar_select %p8765_p12, 1, 0 }
  0x3d   : > { %p7602_p9 = pneg %p8769_p10  ;;  %s8285_s10 = scalar_lea.hbm %s11864_s8, 3072 }
  0x3e   : > { %12002 = sst [smem:[#allocation39_spill]] %s12001_s17  ;;  %p8286_p4 = scmp.ne.s32.totalorder %s11864_s8, %s8285_s10 }
  0x3f   : > { %p8777_p1 = pnand %p7602_p9, %p11886_p6  ;;  %p8292_p2 = scmp.lt.u32.totalorder %s8285_s10, %s11864_s8 }
  0x41   : > { %p8789_p11 = pneg %p8777_p1 }
  0x43   : > { %p8288_p0 = pnand %p8789_p11, %p8286_p4 }
  0x45   : > { %p8289_p5 = pneg %p8288_p0 }
  0x47   : > { %p8294_p8 = pnand %p8292_p2, %p8289_p5 }
  0x49   : > { %8297 = shalt.err (!%p8294_p8)
}
  0x4a   : > { %s8298_s26 = scalar_lea.vmem %s513_s27, 3072  ;;  %p8306_p7 = scmp.lt.s32.totalorder %s513_s27, %s513_s27 }
  0x4b   : > { %p8299_p9 = scmp.ne.s32.totalorder %s513_s27, %s8298_s26  ;;  %p8307_p13 = scmp.lt.s32.totalorder %s8298_s26, %s8298_s26 }
  0x4d   : > { %p8301_p6 = pnand %p8299_p9, %p8789_p11  ;;  %p8308_p10 = por %p8307_p13, %p8306_p7 }
  0x4f   : > { %p8302_p12 = pneg %p8301_p6 }
  0x51   : > { %p8309_p3 = pnand %p8308_p10, %p8302_p12 }
  0x53   : > { %8312 = shalt.err (!%p8309_p3)
}
  0x54   : > { %s11896_s9 = smov 64   ;;  %s11897_s17 = smov 4  }
  0x55   : > { %7608 = dma.hbm_to_vmem [thread:$0]  (!%p8777_p1), %s11864_s8, 3072, %s513_s27, [#allocation10], %s11896_s9, %s11896_s9, %s11897_s17  }
  0x56   : > { %s8512_s13 = smov [#allocation8]   ;;  %s8313_s3 = scalar_lea.hbm %s11862_s6, 9216 }
  0x57   : > { %s496_s25 = sshll.u32 %s8512_s13, 4  ;;  %p8314_p3 = scmp.ne.s32.totalorder %s11862_s6, %s8313_s3  ;;  %s497_s25 = int_to_ptr.vmem [resolvable:$true] %s496_s25 }
  0x58   : > { %p8320_p12 = scmp.lt.u32.totalorder %s8313_s3, %s11862_s6 }
  0x59   : > { %p8316_p6 = pnand %p8314_p3, %p8789_p11 }
  0x5b   : > { %p8317_p7 = pneg %p8316_p6 }
  0x5d   : > { %p8322_p13 = pnand %p8320_p12, %p8317_p7 }
  0x5f   : > { %8325 = shalt.err (!%p8322_p13)
}
  0x60   : > { %s8326_s27 = scalar_lea.vmem %s497_s25, 9216  ;;  %p8334_p5 = scmp.lt.s32.totalorder %s497_s25, %s497_s25 }
  0x61   : > { %p8327_p10 = scmp.ne.s32.totalorder %s497_s25, %s8326_s27  ;;  %p8335_p2 = scmp.lt.s32.totalorder %s8326_s27, %s8326_s27 }
  0x63   : > { %p8329_p4 = pnand %p8327_p10, %p8789_p11  ;;  %p8336_p8 = por %p8335_p2, %p8334_p5 }
  0x65   : > { %p8330_p0 = pneg %p8329_p4 }
  0x67   : > { %p8337_p9 = pnand %p8336_p8, %p8330_p0 }
  0x69   : > { %8340 = shalt.err (!%p8337_p9)
}
  0x6a   : > { %s8513_s4 = smov 192   ;;  %s8514_s7 = smov 12  }
  0x6b   : > { %7605 = dma.hbm_to_vmem [thread:$0]  (!%p8777_p1), %s11862_s6, 9216, %s497_s25, [#allocation7], %s8513_s4, %s8513_s4, %s8514_s7  }
  0x6c   : > { %s8515_s28 = smov [#allocation11]   ;;  %s8341_s13 = scalar_lea.hbm %s11868_s12, 6144 }
  0x6d   : > { %s534_s1 = sshll.u32 %s8515_s28, 4  ;;  %p8342_p3 = scmp.ne.s32.totalorder %s11868_s12, %s8341_s13  ;;  %s535_s1 = int_to_ptr.vmem [resolvable:$true] %s534_s1 }
  0x6e   : > { %p8348_p12 = scmp.lt.u32.totalorder %s8341_s13, %s11868_s12 }
  0x6f   : > { %p8344_p6 = pnand %p8342_p3, %p8789_p11 }
  0x71   : > { %p8345_p7 = pneg %p8344_p6 }
  0x73   : > { %p8350_p13 = pnand %p8348_p12, %p8345_p7 }
  0x75   : > { %8353 = shalt.err (!%p8350_p13)
}
  0x76   : > { %s8354_s25 = scalar_lea.vmem %s535_s1, 6144  ;;  %p8362_p5 = scmp.lt.s32.totalorder %s535_s1, %s535_s1 }
  0x77   : > { %p8355_p10 = scmp.ne.s32.totalorder %s535_s1, %s8354_s25  ;;  %p8363_p2 = scmp.lt.s32.totalorder %s8354_s25, %s8354_s25 }
  0x79   : > { %p8357_p4 = pnand %p8355_p10, %p8789_p11  ;;  %p8364_p8 = por %p8363_p2, %p8362_p5 }
  0x7b   : > { %p8358_p0 = pneg %p8357_p4 }
  0x7d   : > { %p8365_p9 = pnand %p8364_p8, %p8358_p0 }
  0x7f   : > { %8368 = shalt.err (!%p8365_p9)
}
  0x80   : > { %s8516_s4 = smov 128   ;;  %s8517_s7 = smov 8  }
  0x81   : > { %7611 = dma.hbm_to_vmem [thread:$0]  (!%p8777_p1), %s11868_s12, 6144, %s535_s1, [#allocation10], %s8516_s4, %s8516_s4, %s8517_s7  }
  0x82   : > { %s8518_s5 = smov [#allocation12]   ;;  %s8369_s30 = scalar_lea.hbm %s11870_s14, 6144 }
  0x83   : > { %s550_s3 = sshll.u32 %s8518_s5, 4  ;;  %p8370_p3 = scmp.ne.s32.totalorder %s11870_s14, %s8369_s30  ;;  %s551_s3 = int_to_ptr.vmem [resolvable:$true] %s550_s3 }
  0x84   : > { %p8376_p12 = scmp.lt.u32.totalorder %s8369_s30, %s11870_s14 }
  0x85   : > { %p8372_p6 = pnand %p8370_p3, %p8789_p11 }
  0x87   : > { %p8373_p7 = pneg %p8372_p6 }
  0x89   : > { %p8378_p13 = pnand %p8376_p12, %p8373_p7 }
  0x8b   : > { %8381 = shalt.err (!%p8378_p13)
}
  0x8c   : > { %s8382_s1 = scalar_lea.vmem %s551_s3, 6144  ;;  %p8390_p5 = scmp.lt.s32.totalorder %s551_s3, %s551_s3 }
  0x8d   : > { %p8383_p10 = scmp.ne.s32.totalorder %s551_s3, %s8382_s1  ;;  %p8391_p2 = scmp.lt.s32.totalorder %s8382_s1, %s8382_s1 }
  0x8f   : > { %p8385_p4 = pnand %p8383_p10, %p8789_p11  ;;  %p8392_p8 = por %p8391_p2, %p8390_p5 }
  0x91   : > { %p8386_p0 = pneg %p8385_p4 }
  0x93   : > { %p8393_p9 = pnand %p8392_p8, %p8386_p0 }
  0x95   : > { %8396 = shalt.err (!%p8393_p9)
}
  0x96   : > { %s12006_s4 = smov 4   ;;  %s12007_s7 = smov 64  }
  0x97   : > { %7614 = dma.hbm_to_vmem [thread:$0]  (!%p8777_p1), %s11870_s14, 6144, %s551_s3, [#allocation13], %s12007_s7, %s12007_s7, %s12006_s4  }
  0x98   : > { %p6279_p3 = scmp.ge.s32.totalorder %s8507_s2, 6 }
  0x9a   : > { %569 = sbr.rel (%p6279_p3) target bundleno = 195 (0xc3), region = 80 }
  0xa1   : > { %s573_s18 = sand.u32 1, %s8487_s19   ;;  %s6462_s5 = sshll.u32 %s8503_s22, 11 }
  0xa2   : > { %s6280_s24 = sshll.u32 %s573_s18, 8  ;;  %s12008_s30 = sld [smem:[#allocation123_spill]] }
  0xa3   : > { %p12009_p11 = scmp.ne.s32.totalorder %s11990_s20, 0  ;;  %s577_s26 = scalar_lea.vmem [#allocation3], %s6280_s24 }
  0xa4   : > { %s596_s27 = sshll.u32 %s577_s26, 4  ;;  %s8519_s1 = smov 4096   ;;  %s597_s27 = int_to_ptr.vmem [resolvable:$true] %s596_s27 }
  0xa5   : > { %s7568_s3 = scalar_select %p12009_p11, [#allocation0], [#allocation21] }
  0xa6   : > { %7569 = sst [smem:[#allocation16]] (%p12009_p11), %s8519_s1  ;;  %s8520_s4 = smov 2048  }
  0xa7   : > { %s588_s25 = sld [smem:[%s7568_s3]]   ;;  %s8521_s7 = smov 16  }
  0xa8   : > { %s583_s13 = scalar_lea.hbm %s12008_s30, %s6462_s5  ;;  %7570 = sst [smem:[#allocation16 + $0x1]] (%p12009_p11), %s8520_s4 }
  0xa9   : > { %7571 = sst [smem:[#allocation16 + $0x2]] (%p12009_p11), %s8521_s7  ;;  %s8522_s9 = smov 128  }
  0xaa   : > { %7572 = sst [smem:[#allocation16 + $0x3]] (%p12009_p11), %s8522_s9  ;;  %s8523_s5 = smov 8  }
  0xab   : > { %7573 = sst [smem:[#allocation16 + $0x4]] (%p12009_p11), %s8522_s9  ;;  %s574_s28 = scalar_lea.sflag [#allocation4], %s573_s18 }
  0xac   : > { %7574 = sst [smem:[#allocation16 + $0x5]] (%p12009_p11), %s8523_s5  ;;  %s8524_s10 = smov [#allocation15]  }
  0xad   : > { %s6283_s17 = sshll.u32 %s588_s25, 26 }
  0xae   : > { %s6284_s24 = sadd.s32 134217728, %s6283_s17 }
  0xaf   : > { %7575 = dma.general (%p12009_p11), %s583_s13, 4096, %s597_s27, %s574_s28, %s8524_s10, [#allocation16], %s6284_s24, 0  }
  0xb0   : > { %s621_s30 = sand.u32 1, %s8475_s29   ;;  %s6286_s26 = sshll.u32 %s8503_s22, 4 }
  0xb1   : > { %s6285_s3 = sshll.u32 %s621_s30, 7  ;;  %s6287_s25 = sshll.u32 %s8499_s21, 6 }
  0xb2   : > { %s619_s1 = sand.u32 1, %s8507_s2   ;;  %s629_s4 = sadd.s32 %s6287_s25, %s6286_s26 }
  0xb3   : > { %s623_s18 = scalar_lea.vmem [#allocation6], %s6285_s3  ;;  %s6288_s13 = sshll.u32 %s629_s4, 6 }
  0xb4   : > { %s644_s20 = sshll.u32 %s623_s18, 4  ;;  %s8525_s27 = smov 2048   ;;  %s645_s20 = int_to_ptr.vmem [resolvable:$true] %s644_s20 }
  0xb5   : > { %p12010_p1 = scmp.ne.s32.totalorder %s11993_s11, 0  ;;  %s8526_s17 = smov 1024  }
  0xb6   : > { %s8527_s5 = smov 16   ;;  %s8528_s24 = smov 64  }
  0xb7   : > { %7577 = sst [smem:[#allocation18]] (%p12010_p1), %s8525_s27  ;;  %s8529_s28 = smov 4  }
  0xb8   : > { %s7576_s7 = scalar_select %p12010_p1, [#allocation0], [#allocation22] }
  0xb9   : > { %7578 = sst [smem:[#allocation18 + $0x1]] (%p12010_p1), %s8526_s17  ;;  %s620_s18 = scalar_lea.sflag [#allocation7], %s619_s1 }
  0xba   : > { %s636_s9 = sld [smem:[%s7576_s7]]   ;;  %s8530_s27 = smov [#allocation17]  }
  0xbb   : > { %7579 = sst [smem:[#allocation18 + $0x2]] (%p12010_p1), %s8527_s5  ;;  %s12011_s3 = sld [smem:[#allocation124_spill]] }
  0xbc   : > { %7580 = sst [smem:[#allocation18 + $0x3]] (%p12010_p1), %s8528_s24 }
  0xbd   : > { %7581 = sst [smem:[#allocation18 + $0x4]] (%p12010_p1), %s8528_s24 }
  0xbe   : > { %7582 = sst [smem:[#allocation18 + $0x5]] (%p12010_p1), %s8529_s28 }
  0xc0   : > { %s6289_s25 = sshll.u32 %s636_s9, 26 }
  0xc1   : > { %s631_s26 = scalar_lea.hbm %s12011_s3, %s6288_s13  ;;  %s6290_s4 = sadd.s32 134217728, %s6289_s25 }
  0xc2   : > { %7583 = dma.general (%p12010_p1), %s631_s26, 2048, %s645_s20, %s620_s18, %s8530_s27, [#allocation18], %s6290_s4, 0  }
  0xc3 PF: > { %p12012_p6 = scmp.ne.s32.totalorder %s12003_s16, 0 }
  0xc5   : > { %669 = sbr.rel (%p12012_p6) target bundleno = 2700 (0xa8c), region = 92 }
  0xcc   : > { %s8913_s7 = sand.u32 1, %s8483_s0   ;;  %p12013_p7 = scmp.ne.s32.totalorder %s11992_s15, 0 }
  0xcd   : > { %s6292_s17 = sshll.u32 %s8913_s7, 8  ;;  %s672_s5 = scalar_lea.sflag [#allocation4], %s8913_s7 }
  0xce   : > { %s8917_s24 = scalar_lea.vmem [#allocation3], %s6292_s17 }
  0xcf   : > { %8442 = dma.done.wait (%p12013_p7), %s672_s5, 4096  }
  0xd0   : > { %8444 = vsyncadd (%p12013_p7), %s672_s5, 4294963200  ;;  %s12014_s11 = sld [smem:[#allocation29_spill]]  ;;  %s680_s16 = sand.u32 1, %s8690_s23  }
  0xd1   : > { %s12015_s1 = sld [smem:[#allocation37_spill]]  ;;  %s681_s9 = scalar_lea.sflag [#allocation7], %s680_s16 }
  0xd6   : > { %s682_s20 = sand.u32 1, %s12014_s11  }
  0xd7   : > { %s6293_s13 = sshll.u32 %s682_s20, 7  ;;  %p12016_p12 = scmp.ne.s32.totalorder %s12015_s1, 0 }
  0xd8   : > { %s8925_s28 = scalar_lea.vmem [#allocation6], %s6293_s13 }
  0xd9   : > { %8446 = dma.done.wait (%p12016_p12), %s681_s9, 2048  }
  0xda   : > { %8448 = vsyncadd (%p12016_p12), %s681_s9, 4294965248  ;;  %p12017_p13 = scmp.eq.s32.totalorder %s8690_s23, 0 }
  0xdc   : > { %8450 = dma.done.wait (%p12017_p13), [#allocation7], 9216   ;;  %p12018_p10 = pmov %p12017_p13 }
  0xde   : > { %8452 = vsyncadd (%p12018_p10), [#allocation7], 4294958080  ;;  %p12019_p4 = pmov %p12018_p10 }
  0xe0   : > { %8454 = dma.done.wait (%p12019_p4), [#allocation10], 9216   ;;  %p12020_p0 = pmov %p12019_p4 }
  0xe2   : > { %8456 = vsyncadd (%p12020_p0), [#allocation10], 4294958080  ;;  %p12021_p5 = pmov %p12020_p0 }
  0xe3   : > { %p12022_p2 = pmov %p12020_p0 }
  0xe4   : > { %8458 = dma.done.wait (%p12021_p5), [#allocation13], 6144  }
  0xe5   : > { %8460 = vsyncadd (%p12022_p2), [#allocation13], 4294961152  ;;  %s8943_s15 = scalar_lea.vmem [#allocation14], %s6292_s17  ;;  %s12023_s10 = sld [smem:[#allocation31_spill]] }
  0xeb   : > { %p6299_p8 = scmp.ne.s32.totalorder %s12023_s10, 0 }
  0xec   : > { %v766_v0 = vld [vmem:[%s8917_s24] sm:$0xff] (!%p6299_p8)  ;;  %v767_v1 = vld [vmem:[%s8917_s24 + $0x8] sm:$0xff] (!%p6299_p8)  ;;  %v768_v2 = vld [vmem:[%s8917_s24 + $0x10] sm:$0xff] (!%p6299_p8) }
  0xed   : > { %765 = sbr.rel (%p6299_p8) target bundleno = 253 (0xfd), region = 120  ;;  %798 = vst [vmem:[#allocation2] sm:$0xff] (!%p6299_p8), %v766_v0  ;;  %799 = vst [vmem:[#allocation2 + $0x8] sm:$0xff] (!%p6299_p8), %v767_v1  ;;  %v769_v3 = vld [vmem:[%s8917_s24 + $0x18] sm:$0xff] (!%p6299_p8)  ;;  %v770_v4 = vld [vmem:[%s8917_s24 + $0x20] sm:$0xff] (!%p6299_p8) }
  0xee   : > { %800 = vst [vmem:[#allocation2 + $0x10] sm:$0xff] (!%p6299_p8), %v768_v2  ;;  %v771_v5 = vld [vmem:[%s8917_s24 + $0x28] sm:$0xff] (!%p6299_p8)  ;;  %801 = vst [vmem:[#allocation2 + $0x18] sm:$0xff] (!%p6299_p8), %v769_v3  ;;  %v772_v6 = vld [vmem:[%s8917_s24 + $0x30] sm:$0xff] (!%p6299_p8) }
  0xef   : > { %802 = vst [vmem:[#allocation2 + $0x20] sm:$0xff] (!%p6299_p8), %v770_v4  ;;  %803 = vst [vmem:[#allocation2 + $0x28] sm:$0xff] (!%p6299_p8), %v771_v5  ;;  %v773_v7 = vld [vmem:[%s8917_s24 + $0x38] sm:$0xff] (!%p6299_p8)  ;;  %v774_v8 = vld [vmem:[%s8917_s24 + $0x40] sm:$0xff] (!%p6299_p8) }
  0xf0   : > { %804 = vst [vmem:[#allocation2 + $0x30] sm:$0xff] (!%p6299_p8), %v772_v6  ;;  %805 = vst [vmem:[#allocation2 + $0x38] sm:$0xff] (!%p6299_p8), %v773_v7  ;;  %v775_v9 = vld [vmem:[%s8917_s24 + $0x48] sm:$0xff] (!%p6299_p8)  ;;  %v776_v10 = vld [vmem:[%s8917_s24 + $0x50] sm:$0xff] (!%p6299_p8) }
  0xf1   : > { %806 = vst [vmem:[#allocation2 + $0x40] sm:$0xff] (!%p6299_p8), %v774_v8  ;;  %v777_v11 = vld [vmem:[%s8917_s24 + $0x58] sm:$0xff] (!%p6299_p8)  ;;  %807 = vst [vmem:[#allocation2 + $0x48] sm:$0xff] (!%p6299_p8), %v775_v9  ;;  %v778_v12 = vld [vmem:[%s8917_s24 + $0x60] sm:$0xff] (!%p6299_p8) }
  0xf2   : > { %808 = vst [vmem:[#allocation2 + $0x50] sm:$0xff] (!%p6299_p8), %v776_v10  ;;  %809 = vst [vmem:[#allocation2 + $0x58] sm:$0xff] (!%p6299_p8), %v777_v11  ;;  %v779_v13 = vld [vmem:[%s8917_s24 + $0x68] sm:$0xff] (!%p6299_p8)  ;;  %v780_v14 = vld [vmem:[%s8917_s24 + $0x70] sm:$0xff] (!%p6299_p8) }
  0xf3   : > { %810 = vst [vmem:[#allocation2 + $0x60] sm:$0xff] (!%p6299_p8), %v778_v12  ;;  %811 = vst [vmem:[#allocation2 + $0x68] sm:$0xff] (!%p6299_p8), %v779_v13  ;;  %v781_v15 = vld [vmem:[%s8917_s24 + $0x78] sm:$0xff] (!%p6299_p8)  ;;  %v782_v16 = vld [vmem:[%s8917_s24 + $0x80] sm:$0xff] (!%p6299_p8) }
  0xf4   : > { %812 = vst [vmem:[#allocation2 + $0x70] sm:$0xff] %v780_v14  ;;  %v783_v17 = vld [vmem:[%s8917_s24 + $0x88] sm:$0xff]  ;;  %813 = vst [vmem:[#allocation2 + $0x78] sm:$0xff] %v781_v15  ;;  %v784_v18 = vld [vmem:[%s8917_s24 + $0x90] sm:$0xff] }
  0xf5   : > { %814 = vst [vmem:[#allocation2 + $0x80] sm:$0xff] %v782_v16  ;;  %815 = vst [vmem:[#allocation2 + $0x88] sm:$0xff] %v783_v17  ;;  %v785_v19 = vld [vmem:[%s8917_s24 + $0x98] sm:$0xff]  ;;  %v786_v20 = vld [vmem:[%s8917_s24 + $0xa0] sm:$0xff] }
  0xf6   : > { %816 = vst [vmem:[#allocation2 + $0x90] sm:$0xff] %v784_v18  ;;  %817 = vst [vmem:[#allocation2 + $0x98] sm:$0xff] %v785_v19  ;;  %v787_v21 = vld [vmem:[%s8917_s24 + $0xa8] sm:$0xff]  ;;  %v788_v22 = vld [vmem:[%s8917_s24 + $0xb0] sm:$0xff] }
  0xf7   : > { %818 = vst [vmem:[#allocation2 + $0xa0] sm:$0xff] %v786_v20  ;;  %v789_v23 = vld [vmem:[%s8917_s24 + $0xb8] sm:$0xff]  ;;  %819 = vst [vmem:[#allocation2 + $0xa8] sm:$0xff] %v787_v21  ;;  %v790_v24 = vld [vmem:[%s8917_s24 + $0xc0] sm:$0xff] }
  0xf8   : > { %820 = vst [vmem:[#allocation2 + $0xb0] sm:$0xff] %v788_v22  ;;  %821 = vst [vmem:[#allocation2 + $0xb8] sm:$0xff] %v789_v23  ;;  %v791_v25 = vld [vmem:[%s8917_s24 + $0xc8] sm:$0xff]  ;;  %v792_v26 = vld [vmem:[%s8917_s24 + $0xd0] sm:$0xff] }
  0xf9   : > { %822 = vst [vmem:[#allocation2 + $0xc0] sm:$0xff] %v790_v24  ;;  %823 = vst [vmem:[#allocation2 + $0xc8] sm:$0xff] %v791_v25  ;;  %v793_v27 = vld [vmem:[%s8917_s24 + $0xd8] sm:$0xff]  ;;  %v794_v28 = vld [vmem:[%s8917_s24 + $0xe0] sm:$0xff] }
  0xfa   : > { %824 = vst [vmem:[#allocation2 + $0xd0] sm:$0xff] %v792_v26  ;;  %v795_v29 = vld [vmem:[%s8917_s24 + $0xe8] sm:$0xff]  ;;  %825 = vst [vmem:[#allocation2 + $0xd8] sm:$0xff] %v793_v27  ;;  %v796_v30 = vld [vmem:[%s8917_s24 + $0xf0] sm:$0xff] }
  0xfb   : > { %826 = vst [vmem:[#allocation2 + $0xe0] sm:$0xff] %v794_v28  ;;  %827 = vst [vmem:[#allocation2 + $0xe8] sm:$0xff] %v795_v29  ;;  %v797_v31 = vld [vmem:[%s8917_s24 + $0xf8] sm:$0xff] }
  0xfc   : > { %828 = vst [vmem:[#allocation2 + $0xf0] sm:$0xff] %v796_v30  ;;  %829 = vst [vmem:[#allocation2 + $0xf8] sm:$0xff] %v797_v31 }
  0xfd PF: > { %v830_v32 = vld [vmem:[#allocation2] sm:$0xff]  ;;  %s12024_s3 = sld [smem:[#allocation125_spill]]  ;;  %v831_v37 = vld [vmem:[#allocation2 + $0x8] sm:$0xff]  ;;  %s12025_s26 = sld [smem:[#allocation31_spill]]  ;;  %v6534_v53 = vld [vmem:[%s8925_s28 + $0x10] sm:$0xff]   ;;  %vm2625_vm0 = vcmask 1043456  }
  0xfe   : > { %v6470_v34 = vld [vmem:[%s8925_s28] sm:$0xff]   ;;  %v832_v40 = vld [vmem:[#allocation2 + $0x10] sm:$0xff]  ;;  %v6533_v41 = vld [vmem:[%s8925_s28 + $0x8] sm:$0xff]   ;;  %v6479_v58 = vunpack.c.l.bf16 %v6534_v53  ;;  %v6480_v61 = vunpack.c.h.bf16 %v6534_v53  ;;  %s12027_s5 = sld [smem:[#allocation129_spill]]  ;;  %s12028_s9 = sld [smem:[#allocation126_spill]]  ;;  %vm2576_vm1 = vcmask 31744  }
  0xff   : > { %v6471_v36 = vunpack.c.l.bf16 %v6470_v34  ;;  %v6472_v38 = vunpack.c.h.bf16 %v6470_v34  ;;  %v833_v44 = vld [vmem:[#allocation2 + $0x18] sm:$0xff]  ;;  %v6475_v47 = vunpack.c.l.bf16 %v6533_v41  ;;  %v6476_v50 = vunpack.c.h.bf16 %v6533_v41  ;;  %v834_v52 = vld [vmem:[#allocation2 + $0x20] sm:$0xff]  ;;  %v835_v55 = vld [vmem:[#allocation2 + $0x28] sm:$0xff]  ;;  %s12061_s30 = sld [smem:[#allocation127_spill]]  ;;  %s12076_s27 = sld [smem:[#allocation128_spill]] }
 0x100   : > { %v836_v62 = vld [vmem:[#allocation2 + $0x30] sm:$0xff]  ;;  %v6535_v63 = vld [vmem:[%s8925_s28 + $0x18] sm:$0xff]   ;;  %v6536_v14 = vld [vmem:[%s8925_s28 + $0x20] sm:$0xff]   ;;  %s12195_s13 = sld [smem:[#allocation130_spill]]  ;;  %s12216_s23 = sld [smem:[#allocation131_spill]] }
 0x101   : > { %v837_v3 = vld [vmem:[#allocation2 + $0x38] sm:$0xff]  ;;  %v6483_v8 = vunpack.c.l.bf16 %v6535_v63  ;;  %v6484_v12 = vunpack.c.h.bf16 %v6535_v63  ;;  %v838_v13 = vld [vmem:[#allocation2 + $0x40] sm:$0xff]  ;;  %v839_v18 = vld [vmem:[#allocation2 + $0x48] sm:$0xff]  ;;  %v6487_v23 = vunpack.c.l.bf16 %v6536_v14  ;;  %v6488_v27 = vunpack.c.h.bf16 %v6536_v14 }
 0x102   : > { %v840_v31 = vld [vmem:[#allocation2 + $0x50] sm:$0xff] }
 0x103   : > { %v8981_v33 = vld [vmem:[%s12024_s3] ss:$0 sm:$0xff]  ;;  %s6464_s25 = smul.u32 192, %s12025_s26  ;;  %v843_v53 = vld [vmem:[#allocation2 + $0x68] sm:$0xff]  ;;  %s6463_s16 = sshll.u32 %s12025_s26, 2 }
 0x104   : > { %v876_v35 = vadd.f32 %v8981_v33, %v830_v32  ;;  %v877_v39 = vadd.f32 %v8981_v33, %v831_v37  ;;  %v878_v46 = vadd.f32 %v8981_v33, %v832_v40  ;;  %v879_v49 = vadd.f32 %v8981_v33, %v833_v44  ;;  %v6537_v32 = vld [vmem:[%s8925_s28 + $0x28] sm:$0xff]   ;;  %s1576_s18 = smul.u32 3, %s12025_s26  ;;  %p6447_p9 = scmp.ne.s32.totalorder %s12025_s26, 2 }
 0x105   : > { %v880_v57 = vadd.f32 %v8981_v33, %v834_v52  ;;  %v881_v60 = vadd.f32 %v8981_v33, %v835_v55  ;;  %s9014_s4 = scalar_lea.vmem [#allocation8], %s6464_s25  ;;  %v882_v7 = vadd.f32 %v8981_v33, %v836_v62  ;;  %v883_v11 = vadd.f32 %v8981_v33, %v837_v3  ;;  %v6539_v3 = vld [vmem:[%s8925_s28 + $0x38] sm:$0xff]   ;;  %s12062_s25 = smov %s12061_s30 }
 0x106   : > { %v8987_v42 = vadd.f32 %v6471_v36, %v876_v35  ;;  %v8989_v43 = vadd.f32 %v6472_v38, %v877_v39  ;;  %v8999_v51 = vadd.f32 %v6475_v47, %v878_v46  ;;  %v9003_v54 = vadd.f32 %v6476_v50, %v879_v49  ;;  %v7746_v1 = vld [vmem:[%s9014_s4 + $0x4] ss:$12 sps:$4 sm:$0xff]   ;;  %v7748_v2 = vld [vmem:[%s9014_s4] ss:$12 sps:$4 sm:$0xff]   ;;  %v7749_v5 = vld [vmem:[%s9014_s4 + $0x1c] ss:$12 sps:$4 sm:$0xff]   ;;  %s9107_s24 = scalar_lea.vmem %s12027_s5, %s1576_s18 }
 0x107   : > { %v9016_v0 = vadd.f32 %v6479_v58, %v880_v57  ;;  %v9020_v4 = vadd.f32 %v6480_v61, %v881_v60  ;;  %1723 = vmatprep.subr.bf16.mxu0 %v7746_v1  ;;  %7528 = vmatprep.subr.bf16.mxu1 %v7746_v1  ;;  %v7751_v9 = vld [vmem:[%s9014_s4 + $0x18] ss:$12 sps:$4 sm:$0xff]   ;;  %v7752_v15 = vld [vmem:[%s9014_s4 + $0x34] ss:$12 sps:$4 sm:$0xff]   ;;  %v9034_v16 = vadd.f32 %v6483_v8, %v882_v7  ;;  %v7754_v17 = vld [vmem:[%s9014_s4 + $0x30] ss:$12 sps:$4 sm:$0xff]   ;;  %v6491_v38 = vunpack.c.l.bf16 %v6537_v32 }
 0x108   : > { %1023 = vadd.xlane.f32.xlu0 %v8987_v42  ;;  %v1087_v45 = vmul.f32 %v8987_v42, %v8987_v42  ;;  %v1088_v48 = vmul.f32 %v8989_v43, %v8989_v43  ;;  %v1089_v56 = vmul.f32 %v8999_v51, %v8999_v51  ;;  %v1090_v59 = vmul.f32 %v9003_v54, %v9003_v54  ;;  %v7755_v20 = vld [vmem:[%s9014_s4 + $0x4c] ss:$12 sps:$4 sm:$0xff]   ;;  %v7757_v24 = vld [vmem:[%s9014_s4 + $0x48] ss:$12 sps:$4 sm:$0xff]   ;;  %v7758_v28 = vld [vmem:[%s9014_s4 + $0x64] ss:$12 sps:$4 sm:$0xff]  }
 0x109   : > { %1724 = vmatpush1.bf16.msra.mxu0 %v7748_v2  ;;  %v1091_v6 = vmul.f32 %v9016_v0, %v9016_v0  ;;  %7536 = vmatpush1.bf16.msra.mxu1 %v7748_v2  ;;  %v1092_v10 = vmul.f32 %v9020_v4, %v9020_v4  ;;  %v9037_v19 = vadd.f32 %v6484_v12, %v883_v11  ;;  %v7760_v30 = vld [vmem:[%s9014_s4 + $0x60] ss:$12 sps:$4 sm:$0xff]   ;;  %v841_v35 = vld [vmem:[#allocation2 + $0x58] sm:$0xff]  ;;  %v6538_v49 = vld [vmem:[%s8925_s28 + $0x30] sm:$0xff]   ;;  %v1441_v1 = vlaneseq  ;;  %s6466_s5 = sshll.u32 %s12025_s26, 7  ;;  %s12245_s18 = sld [smem:[#allocation136_spill]] (!%p6447_p9) }
 0x10a   : > { %1119 = vadd.xlane.f32.xlu1 %v1087_v45  ;;  %1725 = vmatprep.subr.bf16.mxu0 %v7749_v5  ;;  %v1093_v21 = vmul.f32 %v9034_v16, %v9034_v16  ;;  %v884_v22 = vadd.f32 %v8981_v33, %v838_v13  ;;  %v885_v26 = vadd.f32 %v8981_v33, %v839_v18  ;;  %v7761_v39 = vld [vmem:[%s9014_s4 + $0x7c] ss:$12 sps:$4 sm:$0xff]   ;;  %v7763_v40 = vld [vmem:[%s9014_s4 + $0x78] ss:$12 sps:$4 sm:$0xff]   ;;  %v6492_v45 = vunpack.c.h.bf16 %v6537_v32  ;;  %v7764_v47 = vld [vmem:[%s9014_s4 + $0x94] ss:$12 sps:$4 sm:$0xff]  }
 0x10b   : > { %7529 = vmatprep.subr.bf16.mxu1 %v7749_v5  ;;  %v1094_v25 = vmul.f32 %v9037_v19, %v9037_v19  ;;  %v886_v37 = vadd.f32 %v8981_v33, %v840_v31  ;;  %v887_v44 = vadd.f32 %v8981_v33, %v841_v35  ;;  %v7766_v50 = vld [vmem:[%s9014_s4 + $0x90] ss:$12 sps:$4 sm:$0xff]   ;;  %v6495_v57 = vunpack.c.l.bf16 %v6538_v49  ;;  %v7767_v58 = vld [vmem:[%s9014_s4 + $0xac] ss:$12 sps:$4 sm:$0xff]   ;;  %v846_v18 = vld [vmem:[#allocation2 + $0x80] sm:$0xff]  ;;  %s10601_s11 = scalar_lea.vmem [#allocation11], %s6466_s5 }
 0x10c   : > { %1025 = vadd.xlane.f32.xlu0 %v8989_v43  ;;  %v9050_v29 = vadd.f32 %v6487_v23, %v884_v22  ;;  %v9054_v34 = vadd.f32 %v6488_v27, %v885_v26  ;;  %v889_v61 = vadd.f32 %v8981_v33, %v843_v53  ;;  %v6496_v62 = vunpack.c.h.bf16 %v6538_v49  ;;  %v844_v2 = vld [vmem:[#allocation2 + $0x70] sm:$0xff]  ;;  %v845_v7 = vld [vmem:[#allocation2 + $0x78] sm:$0xff]  ;;  %v850_v49 = vld [vmem:[#allocation2 + $0xa0] sm:$0xff]  ;;  %s10605_s1 = scalar_lea.vmem [#allocation12], %s6466_s5 }
 0x10d   : > { %1726 = vmatpush1.bf16.msra.mxu0 %v7751_v9  ;;  %7537 = vmatpush1.bf16.msra.mxu1 %v7751_v9  ;;  %v9066_v46 = vadd.f32 %v6491_v38, %v886_v37  ;;  %v9071_v52 = vadd.f32 %v6492_v45, %v887_v44  ;;  %v11902_v5 = vmov 0   ;;  %v890_v9 = vadd.f32 %v8981_v33, %v844_v2  ;;  %v848_v35 = vld [vmem:[#allocation2 + $0x90] sm:$0xff]  ;;  %v849_v38 = vld [vmem:[#allocation2 + $0x98] sm:$0xff]  ;;  %v855_v2 = vld [vmem:[#allocation2 + $0xc8] sm:$0xff] }
 0x10e   : > { %1121 = vadd.xlane.f32.xlu1 %v1088_v48  ;;  %1727 = vmatprep.subr.bf16.mxu0 %v7752_v15  ;;  %v1095_v36 = vmul.f32 %v9050_v29, %v9050_v29  ;;  %v1096_v41 = vmul.f32 %v9054_v34, %v9054_v34  ;;  %v842_v48 = vld [vmem:[#allocation2 + $0x60] sm:$0xff]  ;;  %v9094_v11 = vshrl.u32 %v1441_v1, 7  ;;  %v891_v13 = vadd.f32 %v8981_v33, %v845_v7 }
 0x10f   : > { %7530 = vmatprep.subr.bf16.mxu1 %v7752_v15  ;;  %v1097_v55 = vmul.f32 %v9066_v46, %v9066_v46  ;;  %v1098_v60 = vmul.f32 %v9071_v52, %v9071_v52  ;;  %1755 = vmatprep.mubr.bf16.mxu0 %v11902_v5  ;;  %v6500_v14 = vunpack.c.h.bf16 %v6539_v3 }
 0x110   : > { %1027 = vadd.xlane.f32.xlu0 %v8999_v51  ;;  %1875 = vmatprep.mubr.bf16.mxu1 %v11902_v5  ;;  %12026 = vst [vmem:[#allocation40_spill] sm:$0xff] %v9094_v11  ;;  %v1590_v15 = vsub.s32 2, %v9094_v11 }
 0x111   : > { %1728 = vmatpush1.bf16.msra.mxu0 %v7754_v17  ;;  %7538 = vmatpush1.bf16.msra.mxu1 %v7754_v17  ;;  %v9116_v22 = vadd.f32 %v6500_v14, %v891_v13 }
 0x112   : > { %1029 = vadd.xlane.f32.xlu1 %v9003_v54  ;;  %1729 = vmatprep.subr.bf16.mxu0 %v7755_v20 }
 0x113   : > { %7531 = vmatprep.subr.bf16.mxu1 %v7755_v20  ;;  %v9112_v20 = vld [vmem:[%s12024_s3 + $0x1] ss:$0 sm:$0xff] }
 0x114   : > { %1123 = vadd.xlane.f32.xlu0 %v1089_v56  ;;  %v888_v56 = vadd.f32 %v8981_v33, %v842_v48  ;;  %v6540_v33 = vld [vmem:[%s8925_s28 + $0x40] sm:$0xff]   ;;  %v892_v26 = vadd.f32 %v9112_v20, %v846_v18  ;;  %v895_v45 = vadd.f32 %v9112_v20, %v849_v38  ;;  %v852_v18 = vld [vmem:[#allocation2 + $0xb0] sm:$0xff]  ;;  %v857_v38 = vld [vmem:[#allocation2 + $0xd8] sm:$0xff] }
 0x115   : > { %1730 = vmatpush1.bf16.msra.mxu0 %v7757_v24  ;;  %7539 = vmatpush1.bf16.msra.mxu1 %v7757_v24  ;;  %v847_v24 = vld [vmem:[#allocation2 + $0x88] sm:$0xff]  ;;  %v6503_v27 = vunpack.c.l.bf16 %v6540_v33  ;;  %v6504_v31 = vunpack.c.h.bf16 %v6540_v33  ;;  %v6543_v33 = vld [vmem:[%s8925_s28 + $0x58] sm:$0xff]  }
 0x116   : > { %1125 = vadd.xlane.f32.xlu1 %v1090_v59  ;;  %1731 = vmatprep.subr.bf16.mxu0 %v7758_v28  ;;  %v7769_v59 = vld [vmem:[%s9014_s4 + $0xa8] ss:$12 sps:$4 sm:$0xff]   ;;  %v9083_v63 = vadd.f32 %v6495_v57, %v888_v56  ;;  %v896_v57 = vadd.f32 %v9112_v20, %v850_v49 }
 0x117   : > { %7532 = vmatprep.subr.bf16.mxu1 %v7758_v28  ;;  %v1102_v28 = vmul.f32 %v9116_v22, %v9116_v22  ;;  %v9128_v32 = vadd.f32 %v6503_v27, %v892_v26  ;;  %v898_v26 = vadd.f32 %v9112_v20, %v852_v18  ;;  %v6515_v27 = vunpack.c.l.bf16 %v6543_v33  ;;  %v861_v18 = vld [vmem:[#allocation2 + $0xf8] sm:$0xff] }
 0x118   : > { %1031 = vadd.xlane.f32.xlu0 %v9016_v0  ;;  %v1099_v8 = vmul.f32 %v9083_v63, %v9083_v63 }
 0x119   : > { %1732 = vmatpush1.bf16.msra.mxu0 %v7760_v30  ;;  %7540 = vmatpush1.bf16.msra.mxu1 %v7760_v30  ;;  %v893_v30 = vadd.f32 %v9112_v20, %v847_v24  ;;  %v853_v24 = vld [vmem:[#allocation2 + $0xb8] sm:$0xff] }
 0x11a   : > { %1033 = vadd.xlane.f32.xlu1 %v9020_v4  ;;  %1733 = vmatprep.subr.bf16.mxu0 %v7761_v39 }
 0x11b   : > { %7533 = vmatprep.subr.bf16.mxu1 %v7761_v39  ;;  %v9131_v37 = vadd.f32 %v6504_v31, %v893_v30  ;;  %v1103_v39 = vmul.f32 %v9128_v32, %v9128_v32  ;;  %v6545_v30 = vld [vmem:[%s8925_s28 + $0x68] sm:$0xff]  }
 0x11c   : > { %1127 = vadd.xlane.f32.xlu0 %v1091_v6  ;;  %v9088_v6 = vadd.f32 %v6496_v62, %v889_v61 }
 0x11d   : > { %1734 = vmatpush1.bf16.msra.mxu0 %v7763_v40  ;;  %7541 = vmatpush1.bf16.msra.mxu1 %v7763_v40  ;;  %v894_v40 = vadd.f32 %v9112_v20, %v848_v35  ;;  %v1104_v44 = vmul.f32 %v9131_v37, %v9131_v37  ;;  %v899_v35 = vadd.f32 %v9112_v20, %v853_v24 }
 0x11e   : > { %1129 = vadd.xlane.f32.xlu1 %v1092_v10  ;;  %1735 = vmatprep.subr.bf16.mxu0 %v7764_v47  ;;  %v6499_v10 = vunpack.c.l.bf16 %v6539_v3  ;;  %v1100_v12 = vmul.f32 %v9088_v6, %v9088_v6 }
 0x11f   : > { %7534 = vmatprep.subr.bf16.mxu1 %v7764_v47 }
 0x120   : > { %1035 = vadd.xlane.f32.xlu0 %v9034_v16  ;;  %v9102_v17 = vadd.f32 %v6499_v10, %v890_v9  ;;  %v901_v10 = vadd.f32 %v9112_v20, %v855_v2 }
 0x121   : > { %1736 = vmatpush1.bf16.msra.mxu0 %v7766_v50  ;;  %7542 = vmatpush1.bf16.msra.mxu1 %v7766_v50  ;;  %v6542_v50 = vld [vmem:[%s8925_s28 + $0x50] sm:$0xff]  }
 0x122   : > { %1037 = vadd.xlane.f32.xlu1 %v9037_v19  ;;  %1737 = vmatprep.subr.bf16.mxu0 %v7767_v58  ;;  %v6512_v1 = vunpack.c.h.bf16 %v6542_v50 }
 0x123   : > { %7535 = vmatprep.subr.bf16.mxu1 %v7767_v58  ;;  %v6511_v58 = vunpack.c.l.bf16 %v6542_v50 }
 0x124   : > { %1131 = vadd.xlane.f32.xlu0 %v1093_v21  ;;  %v1578_v21 = vld [vmem:[%s9107_s24] sm:$0x7] }
 0x125   : > { %1738 = vmatpush1.bf16.msra.mxu0 %v7769_v59  ;;  %7543 = vmatpush1.bf16.msra.mxu1 %v7769_v59  ;;  %v9118_v23 = vrot.slane %v1578_v21, %v1590_v15  ;;  %v854_v59 = vld [vmem:[#allocation2 + $0xc0] sm:$0xff]  ;;  %v9155_v3 = vadd.f32 %v6511_v58, %v896_v57  ;;  %v6546_v57 = vld [vmem:[%s8925_s28 + $0x70] sm:$0xff]  }
 0x126   : > { %1133 = vadd.xlane.f32.xlu1 %v1094_v25  ;;  %v1101_v25 = vmul.f32 %v9102_v17, %v9102_v17  ;;  %v900_v7 = vadd.f32 %v9112_v20, %v854_v59  ;;  %v859_v59 = vld [vmem:[#allocation2 + $0xe8] sm:$0xff] }
 0x127   : > { %v1107_v15 = vmul.f32 %v9155_v3, %v9155_v3  ;;  %v905_v2 = vadd.f32 %v9112_v20, %v859_v59 }
 0x128   : > { %1039 = vadd.xlane.f32.xlu0 %v9050_v29 }
 0x12a   : > { %1041 = vadd.xlane.f32.xlu1 %v9054_v34 }
 0x12c   : > { %1135 = vadd.xlane.f32.xlu0 %v1095_v36  ;;  %v6541_v36 = vld [vmem:[%s8925_s28 + $0x48] sm:$0xff]  }
 0x12d   : > { %v6508_v47 = vunpack.c.h.bf16 %v6541_v36 }
 0x12e   : > { %1137 = vadd.xlane.f32.xlu1 %v1096_v41  ;;  %v6507_v41 = vunpack.c.l.bf16 %v6541_v36  ;;  %v6516_v36 = vunpack.c.h.bf16 %v6543_v33 }
 0x12f   : > { %v9144_v53 = vadd.f32 %v6508_v47, %v895_v45  ;;  %v903_v45 = vadd.f32 %v9112_v20, %v857_v38  ;;  %v6524_v47 = vunpack.c.h.bf16 %v6545_v30 }
 0x130   : > { %1043 = vadd.xlane.f32.xlu0 %v9066_v46  ;;  %v9141_v48 = vadd.f32 %v6507_v41, %v894_v40  ;;  %v6523_v41 = vunpack.c.l.bf16 %v6545_v30 }
 0x131   : > { %v1106_v61 = vmul.f32 %v9144_v53, %v9144_v53  ;;  %v9191_v50 = vadd.f32 %v6524_v47, %v903_v45 }
 0x132   : > { %1045 = vadd.xlane.f32.xlu1 %v9071_v52  ;;  %v1105_v56 = vmul.f32 %v9141_v48, %v9141_v48 }
 0x134   : > { %1139 = vadd.xlane.f32.xlu0 %v1097_v55  ;;  %v851_v55 = vld [vmem:[#allocation2 + $0xa8] sm:$0xff] }
 0x135   : > { %v897_v62 = vadd.f32 %v9112_v20, %v851_v55 }
 0x136   : > { %1141 = vadd.xlane.f32.xlu1 %v1098_v60  ;;  %v6544_v60 = vld [vmem:[%s8925_s28 + $0x60] sm:$0xff]  }
 0x137   : > { %v9158_v9 = vadd.f32 %v6512_v1, %v897_v62  ;;  %v6527_v62 = vunpack.c.l.bf16 %v6546_v57  ;;  %v1114_v1 = vmul.f32 %v9191_v50, %v9191_v50 }
 0x138   : > { %1047 = vadd.xlane.f32.xlu0 %v9083_v63 }
 0x139   : > { %v1108_v21 = vmul.f32 %v9158_v9, %v9158_v9 }
 0x13a   : > { %1049 = vadd.xlane.f32.xlu1 %v9088_v6 }
 0x13c   : > { %1143 = vadd.xlane.f32.xlu0 %v1099_v8  ;;  %v6519_v8 = vunpack.c.l.bf16 %v6544_v60 }
 0x13e   : > { %1145 = vadd.xlane.f32.xlu1 %v1100_v12  ;;  %v6520_v12 = vunpack.c.h.bf16 %v6544_v60  ;;  %v9162_v13 = vadd.f32 %v6519_v8, %v900_v7  ;;  %v6528_v7 = vunpack.c.h.bf16 %v6546_v57 }
 0x140   : > { %1051 = vadd.xlane.f32.xlu0 %v9102_v17  ;;  %v9165_v14 = vadd.f32 %v6520_v12, %v901_v10  ;;  %v860_v10 = vld [vmem:[#allocation2 + $0xf0] sm:$0xff]  ;;  %v6547_v12 = vld [vmem:[%s8925_s28 + $0x78] sm:$0xff]   ;;  %s1006_s28 = scalar_lea.vmem %s12028_s9, %s6463_s16  ;;  %s3998_s9 = scalar_lea.vmem %s12195_s13, %s12025_s26 }
 0x141   : > { %v6531_v24 = vunpack.c.l.bf16 %v6547_v12 }
 0x142   : > { %1053 = vadd.xlane.f32.xlu1 %v9116_v22  ;;  %v1112_v31 = vmul.f32 %v9165_v14, %v9165_v14 }
 0x144   : > { %1147 = vadd.xlane.f32.xlu0 %v1101_v25  ;;  %v1111_v25 = vmul.f32 %v9162_v13, %v9162_v13 }
 0x146   : > { %1149 = vadd.xlane.f32.xlu1 %v1102_v28  ;;  %v856_v28 = vld [vmem:[#allocation2 + $0xd0] sm:$0xff] }
 0x147   : > { %v902_v40 = vadd.f32 %v9112_v20, %v856_v28 }
 0x148   : > { %1055 = vadd.xlane.f32.xlu0 %v9128_v32 }
 0x149   : > { %v9188_v49 = vadd.f32 %v6523_v41, %v902_v40 }
 0x14a   : > { %1057 = vadd.xlane.f32.xlu1 %v9131_v37 }
 0x14b   : > { %v1113_v60 = vmul.f32 %v9188_v49, %v9188_v49 }
 0x14c   : > { %1151 = vadd.xlane.f32.xlu0 %v1103_v39  ;;  %v9181_v39 = vadd.f32 %v6515_v27, %v898_v26  ;;  %v907_v26 = vadd.f32 %v9112_v20, %v861_v18  ;;  %v6532_v27 = vunpack.c.h.bf16 %v6547_v12 }
 0x14e   : > { %1153 = vadd.xlane.f32.xlu1 %v1104_v44  ;;  %v9184_v44 = vadd.f32 %v6516_v36, %v899_v35  ;;  %v1109_v55 = vmul.f32 %v9181_v39, %v9181_v39  ;;  %v9221_v30 = vadd.f32 %v6532_v27, %v907_v26 }
 0x150   : > { %1059 = vadd.xlane.f32.xlu0 %v9141_v48  ;;  %v1110_v58 = vmul.f32 %v9184_v44, %v9184_v44  ;;  %v1118_v35 = vmul.f32 %v9221_v30, %v9221_v30 }
 0x152   : > { %1061 = vadd.xlane.f32.xlu1 %v9144_v53 }
 0x154   : > { %1155 = vadd.xlane.f32.xlu0 %v1105_v56  ;;  %v858_v56 = vld [vmem:[#allocation2 + $0xe0] sm:$0xff] }
 0x156   : > { %1157 = vadd.xlane.f32.xlu1 %v1106_v61  ;;  %v904_v61 = vadd.f32 %v9112_v20, %v858_v56 }
 0x158   : > { %1063 = vadd.xlane.f32.xlu0 %v9155_v3  ;;  %v9206_v8 = vadd.f32 %v6527_v62, %v904_v61 }
 0x15a   : > { %1065 = vadd.xlane.f32.xlu1 %v9158_v9  ;;  %v1115_v33 = vmul.f32 %v9206_v8, %v9206_v8 }
 0x15c   : > { %1071 = vadd.xlane.f32.xlu0 %v9162_v13 }
 0x15e   : > { %1073 = vadd.xlane.f32.xlu1 %v9165_v14 }
 0x160   : > { %1159 = vadd.xlane.f32.xlu0 %v1107_v15  ;;  %v9209_v15 = vadd.f32 %v6528_v7, %v905_v2 }
 0x162   : > { %1161 = vadd.xlane.f32.xlu1 %v1108_v21  ;;  %v906_v21 = vadd.f32 %v9112_v20, %v860_v10  ;;  %v9230_v20 = vld [vmem:[%s9014_s4 + $0x8] ss:$12 sps:$4 sm:$0xff]  }
 0x163   : > { %6928 = vmatprep.subr.bf16.mxu1 %v9230_v20 }
 0x164   : > { %1167 = vadd.xlane.f32.xlu0 %v1111_v25  ;;  %v1116_v25 = vmul.f32 %v9209_v15, %v9209_v15  ;;  %v9219_v28 = vadd.f32 %v6531_v24, %v906_v21  ;;  %v9243_v21 = vld.sshfl [vmem:[%s1006_s28] sm:$0x33 pattern:$0x75316420] }
 0x166   : > { %1169 = vadd.xlane.f32.xlu1 %v1112_v31  ;;  %v1117_v31 = vmul.f32 %v9219_v28, %v9219_v28 }
 0x168   : > { %1067 = vadd.xlane.f32.xlu0 %v9181_v39 }
 0x16a   : > { %1069 = vadd.xlane.f32.xlu1 %v9184_v44 }
 0x16c   : > { %1075 = vadd.xlane.f32.xlu0 %v9188_v49 }
 0x16e   : > { %1077 = vadd.xlane.f32.xlu1 %v9191_v50 }
 0x170   : > { %1163 = vadd.xlane.f32.xlu0 %v1109_v55 }
 0x172   : > { %1165 = vadd.xlane.f32.xlu1 %v1110_v58 }
 0x174   : > { %1171 = vadd.xlane.f32.xlu0 %v1113_v60 }
 0x176   : > { %1173 = vadd.xlane.f32.xlu1 %v1114_v1 }
 0x178   : > { %1079 = vadd.xlane.f32.xlu0 %v9206_v8 }
 0x17a   : > { %1081 = vadd.xlane.f32.xlu1 %v9209_v15 }
 0x17c   : > { %1175 = vadd.xlane.f32.xlu0 %v1115_v33 }
 0x17e   : > { %1177 = vadd.xlane.f32.xlu1 %v1116_v25 }
 0x180   : > { %1083 = vadd.xlane.f32.xlu0 %v9219_v28 }
 0x182   : > { %1085 = vadd.xlane.f32.xlu1 %v9221_v30 }
 0x184   : > { %1179 = vadd.xlane.f32.xlu0 %v1117_v31 }
 0x186   : > { %1181 = vadd.xlane.f32.xlu1 %v1118_v35  ;;  %v1021_v35 = vadd.f32 1.0, %v9243_v21 }
 0x195   : > { %v1024_v36 = vpop.xlane.xlu0 %1023 }
 0x196   : > { %v1183_v38 = vmul.f32 0.0078125, %v1024_v36  ;;  %v9249_v36 = vsub.s32 0, %v9094_v11 }
 0x197   : > { %v1120_v40 = vpop.xlane.xlu1 %1119 }
 0x198   : > { %v1247_v41 = vmul.f32 %v1183_v38, %v1183_v38  ;;  %v1215_v45 = vmul.f32 0.0078125, %v1120_v40  ;;  %12029 = vst [vmem:[#allocation41_spill] sm:$0xff] %v9249_v36 }
 0x199   : > { %v1026_v47 = vpop.xlane.xlu0 %1025 }
 0x19a   : > { %v1279_v55 = vsub.f32 %v1215_v45, %v1247_v41  ;;  %v1184_v56 = vmul.f32 0.0078125, %v1026_v47  ;;  %v1311_v47 = vsub.f32 %v8987_v42, %v1183_v38 }
 0x19b   : > { %v1122_v57 = vpop.xlane.xlu1 %1121 }
 0x19c   : > { %v1343_v58 = vadd.f32 1e-05, %v1279_v55  ;;  %v1248_v59 = vmul.f32 %v1184_v56, %v1184_v56  ;;  %v1216_v60 = vmul.f32 0.0078125, %v1122_v57  ;;  %v1312_v42 = vsub.f32 %v8989_v43, %v1184_v56 }
 0x19d   : > { %v1028_v61 = vpop.xlane.xlu0 %1027 }
 0x19e   : > { %7826 = vrsqrt.f32 %v1343_v58  ;;  %v1280_v62 = vsub.f32 %v1216_v60, %v1248_v59  ;;  %v9234_v1 = vmul.f32 0.0078125, %v1028_v61 }
 0x19f   : > { %v1030_v2 = vpop.xlane.xlu1 %1029 }
 0x1a0   : > { %v1344_v7 = vadd.f32 1e-05, %v1280_v62  ;;  %v1249_v10 = vmul.f32 %v9234_v1, %v9234_v1  ;;  %v9241_v12 = vmul.f32 0.0078125, %v1030_v2  ;;  %v1019_v62 = vrot.slane %v9243_v21, 1 }
 0x1a1   : > { %v1124_v18 = vpop.xlane.xlu0 %1123 }
 0x1a2   : > { %7828 = vrsqrt.f32 %v1344_v7  ;;  %v1217_v33 = vmul.f32 0.0078125, %v1124_v18  ;;  %v1250_v25 = vmul.f32 %v9241_v12, %v9241_v12  ;;  %v9260_v7 = vrot.slane %v1021_v35, %v9249_v36 }
 0x1a3   : > { %v1126_v24 = vpop.xlane.xlu1 %1125 }
 0x1a4   : > { %v1281_v26 = vsub.f32 %v1217_v33, %v1249_v10  ;;  %v1218_v27 = vmul.f32 0.0078125, %v1126_v24 }
 0x1a5   : > { %v1032_v31 = vpop.xlane.xlu0 %1031 }
 0x1a6   : > { %v1345_v40 = vadd.f32 1e-05, %v1281_v26  ;;  %v1282_v41 = vsub.f32 %v1218_v27, %v1250_v25  ;;  %v9251_v45 = vmul.f32 0.0078125, %v1032_v31 }
 0x1a7   : > { %v1034_v55 = vpop.xlane.xlu1 %1033 }
 0x1a8   : > { %v7827_v57 = vpop.eup %7826  ;;  %7830 = vrsqrt.f32 %v1345_v40  ;;  %v1346_v58 = vadd.f32 1e-05, %v1282_v41  ;;  %v1251_v59 = vmul.f32 %v9251_v45, %v9251_v45  ;;  %v9256_v60 = vmul.f32 0.0078125, %v1034_v55 }
 0x1a9   : > { %v1128_v61 = vpop.xlane.xlu0 %1127  ;;  %v1407_v2 = vmul.f32 %v7827_v57, %v1311_v47  ;;  %v9267_v40 = vrot.slane %v1019_v62, %v9249_v36 }
 0x1aa   : > { %7832 = vrsqrt.f32 %v1346_v58  ;;  %v1219_v10 = vmul.f32 0.0078125, %v1128_v61  ;;  %v1252_v33 = vmul.f32 %v9256_v60, %v9256_v60  ;;  %v1313_v58 = vsub.f32 %v8999_v51, %v9234_v1 }
 0x1ab   : > { %v1130_v38 = vpop.xlane.xlu1 %1129  ;;  %v1451_v31 = vmul.f32 %v9260_v7, %v1407_v2 }
 0x1ac   : > { %v7829_v18 = vpop.eup %7828  ;;  %v1283_v24 = vsub.f32 %v1219_v10, %v1251_v59  ;;  %v1220_v25 = vmul.f32 0.0078125, %v1130_v38  ;;  %v1314_v38 = vsub.f32 %v9003_v54, %v9241_v12 }
 0x1ad   : > { %v1036_v26 = vpop.xlane.xlu0 %1035  ;;  %v1408_v27 = vmul.f32 %v7829_v18, %v1312_v42  ;;  %v9279_v62 = vadd.f32 %v9267_v40, %v1451_v31 }
 0x1ae   : > { %v1347_v35 = vadd.f32 1e-05, %v1283_v24  ;;  %v1284_v41 = vsub.f32 %v1220_v25, %v1252_v33  ;;  %v9269_v47 = vmul.f32 0.0078125, %v1036_v26 }
 0x1af   : > { %v1038_v55 = vpop.xlane.xlu1 %1037  ;;  %v1452_v43 = vmul.f32 %v9260_v7, %v1408_v27  ;;  %12030 = vst [vmem:[#allocation42_spill] sm:$0xff] %v9279_v62 }
 0x1b0   : > { %7834 = vrsqrt.f32 %v1347_v35  ;;  %v1348_v56 = vadd.f32 1e-05, %v1284_v41  ;;  %v1253_v57 = vmul.f32 %v9269_v47, %v9269_v47  ;;  %v9276_v59 = vmul.f32 0.0078125, %v1038_v55 }
 0x1b1   : > { %v1132_v61 = vpop.xlane.xlu0 %1131  ;;  %v9282_v2 = vadd.f32 %v9267_v40, %v1452_v43 }
 0x1b2   : > { %v7831_v10 = vpop.eup %7830  ;;  %7836 = vrsqrt.f32 %v1348_v56  ;;  %v1221_v42 = vmul.f32 0.0078125, %v1132_v61  ;;  %v1254_v24 = vmul.f32 %v9276_v59, %v9276_v59 }
 0x1b3   : > { %12031 = vst [vmem:[#allocation43_spill] sm:$0xff] %v9282_v2  ;;  %v1134_v18 = vpop.xlane.xlu1 %1133  ;;  %v9288_v33 = vpack.c.bf16 %v9282_v2, %v9279_v62  ;;  %v1409_v51 = vmul.f32 %v7831_v10, %v1313_v58  ;;  %v1315_v58 = vsub.f32 %v9016_v0, %v9251_v45 }
 0x1b4   : > { %v7833_v1 = vpop.eup %7832  ;;  %v1285_v25 = vsub.f32 %v1221_v42, %v1253_v57  ;;  %v1222_v26 = vmul.f32 0.0078125, %v1134_v18 }
 0x1b5   : > { %v1040_v27 = vpop.xlane.xlu0 %1039  ;;  %1756 = vmatmul.mubr.bf16.vlgmr.msra.gmra.mrb[0].mxu0 %v9288_v33  ;;  %v1410_v31 = vmul.f32 %v7833_v1, %v1314_v38  ;;  %v1453_v35 = vmul.f32 %v9260_v7, %v1409_v51  ;;  %v1316_v1 = vsub.f32 %v9020_v4, %v9256_v60 }
 0x1b6   : > { %v1349_v41 = vadd.f32 1e-05, %v1285_v25  ;;  %v1286_v54 = vsub.f32 %v1222_v26, %v1254_v24  ;;  %v9294_v12 = vmul.f32 0.0078125, %v1040_v27  ;;  %1765 = vmatprep.mubr.bf16.mxu0 %v11902_v5 }
 0x1b7   : > { %v1042_v55 = vpop.xlane.xlu1 %1041  ;;  %v1454_v43 = vmul.f32 %v9260_v7, %v1410_v31  ;;  %v9305_v42 = vadd.f32 %v9267_v40, %v1453_v35 }
 0x1b8   : > { %7838 = vrsqrt.f32 %v1349_v41  ;;  %v1350_v56 = vadd.f32 1e-05, %v1286_v54  ;;  %v1255_v57 = vmul.f32 %v9294_v12, %v9294_v12  ;;  %v9302_v61 = vmul.f32 0.0078125, %v1042_v55 }
 0x1b9   : > { %v1136_v10 = vpop.xlane.xlu0 %1135  ;;  %12032 = vst [vmem:[#allocation44_spill] sm:$0xff] %v9305_v42  ;;  %v9308_v38 = vadd.f32 %v9267_v40, %v1454_v43 }
 0x1ba   : > { %v7835_v18 = vpop.eup %7834  ;;  %7840 = vrsqrt.f32 %v1350_v56  ;;  %v1223_v51 = vmul.f32 0.0078125, %v1136_v10  ;;  %v1256_v26 = vmul.f32 %v9302_v61, %v9302_v61  ;;  %v1317_v10 = vsub.f32 %v9034_v16, %v9269_v47 }
 0x1bb   : > { %12033 = vst [vmem:[#allocation45_spill] sm:$0xff] %v9308_v38  ;;  %v1138_v24 = vpop.xlane.xlu1 %1137  ;;  %v9314_v25 = vpack.c.bf16 %v9308_v38, %v9305_v42  ;;  %v1411_v0 = vmul.f32 %v7835_v18, %v1315_v58 }
 0x1bc   : > { %v7837_v45 = vpop.eup %7836  ;;  %v1287_v27 = vsub.f32 %v1223_v51, %v1255_v57  ;;  %v1224_v31 = vmul.f32 0.0078125, %v1138_v24 }
 0x1bd   : > { %v1044_v35 = vpop.xlane.xlu0 %1043  ;;  %1766 = vmatmul.mubr.bf16.gmra.mrb[4].mxu0 %v9314_v25  ;;  %v1412_v41 = vmul.f32 %v7837_v45, %v1316_v1  ;;  %v1455_v54 = vmul.f32 %v9260_v7, %v1411_v0 }
 0x1be   : > { %v1351_v55 = vadd.f32 1e-05, %v1287_v27  ;;  %v1288_v4 = vsub.f32 %v1224_v31, %v1256_v26  ;;  %v9320_v60 = vmul.f32 0.0078125, %v1044_v35  ;;  %1775 = vmatprep.mubr.bf16.mxu0 %v11902_v5  ;;  %v1318_v26 = vsub.f32 %v9037_v19, %v9276_v59 }
 0x1bf   : > { %v1046_v43 = vpop.xlane.xlu1 %1045  ;;  %v1456_v56 = vmul.f32 %v9260_v7, %v1412_v41  ;;  %v9331_v1 = vadd.f32 %v9267_v40, %v1455_v54 }
 0x1c0   : > { %7842 = vrsqrt.f32 %v1351_v55  ;;  %v1352_v58 = vadd.f32 1e-05, %v1288_v4  ;;  %v1257_v57 = vmul.f32 %v9320_v60, %v9320_v60  ;;  %v9328_v18 = vmul.f32 0.0078125, %v1046_v43 }
 0x1c1   : > { %v1140_v51 = vpop.xlane.xlu0 %1139  ;;  %12034 = vst [vmem:[#allocation46_spill] sm:$0xff] %v9331_v1  ;;  %v9334_v24 = vadd.f32 %v9267_v40, %v1456_v56 }
 0x1c2   : > { %v7839_v0 = vpop.eup %7838  ;;  %7844 = vrsqrt.f32 %v1352_v58  ;;  %v1225_v45 = vmul.f32 0.0078125, %v1140_v51  ;;  %v1258_v35 = vmul.f32 %v9328_v18, %v9328_v18 }
 0x1c3   : > { %12035 = vst [vmem:[#allocation47_spill] sm:$0xff] %v9334_v24  ;;  %v1142_v27 = vpop.xlane.xlu1 %1141  ;;  %v9340_v31 = vpack.c.bf16 %v9334_v24, %v9331_v1  ;;  %v1413_v16 = vmul.f32 %v7839_v0, %v1317_v10  ;;  %v1319_v0 = vsub.f32 %v9050_v29, %v9294_v12 }
 0x1c4   : > { %v7841_v47 = vpop.eup %7840  ;;  %v1289_v41 = vsub.f32 %v1225_v45, %v1257_v57  ;;  %v1226_v54 = vmul.f32 0.0078125, %v1142_v27 }
 0x1c5   : > { %v1048_v55 = vpop.xlane.xlu0 %1047  ;;  %1776 = vmatmul.mubr.bf16.gmra.mrb[8].mxu0 %v9340_v31  ;;  %v1414_v4 = vmul.f32 %v7841_v47, %v1318_v26  ;;  %v1457_v43 = vmul.f32 %v9260_v7, %v1413_v16 }
 0x1c6   : > { %v1353_v56 = vadd.f32 1e-05, %v1289_v41  ;;  %v1290_v19 = vsub.f32 %v1226_v54, %v1258_v35  ;;  %v9346_v59 = vmul.f32 0.0078125, %v1048_v55  ;;  %1785 = vmatprep.mubr.bf16.mxu0 %v11902_v5  ;;  %v1320_v41 = vsub.f32 %v9054_v34, %v9302_v61 }
 0x1c7   : > { %v1050_v58 = vpop.xlane.xlu1 %1049  ;;  %v1458_v10 = vmul.f32 %v9260_v7, %v1414_v4  ;;  %v9357_v27 = vadd.f32 %v9267_v40, %v1457_v43 }
 0x1c8   : > { %7846 = vrsqrt.f32 %v1353_v56  ;;  %v1354_v51 = vadd.f32 1e-05, %v1290_v19  ;;  %v1259_v57 = vmul.f32 %v9346_v59, %v9346_v59  ;;  %v9354_v45 = vmul.f32 0.0078125, %v1050_v58 }
 0x1c9   : > { %v1144_v26 = vpop.xlane.xlu0 %1143  ;;  %12036 = vst [vmem:[#allocation48_spill] sm:$0xff] %v9357_v27  ;;  %v9360_v16 = vadd.f32 %v9267_v40, %v1458_v10 }
 0x1ca   : > { %v7843_v47 = vpop.eup %7842  ;;  %7848 = vrsqrt.f32 %v1354_v51  ;;  %v1227_v35 = vmul.f32 0.0078125, %v1144_v26  ;;  %v1260_v4 = vmul.f32 %v9354_v45, %v9354_v45 }
 0x1cb   : > { %12037 = vst [vmem:[#allocation49_spill] sm:$0xff] %v9360_v16  ;;  %v1146_v54 = vpop.xlane.xlu1 %1145  ;;  %v9366_v55 = vpack.c.bf16 %v9360_v16, %v9357_v27  ;;  %v1415_v29 = vmul.f32 %v7843_v47, %v1319_v0 }
 0x1cc   : > { %v7845_v12 = vpop.eup %7844  ;;  %v1291_v43 = vsub.f32 %v1227_v35, %v1259_v57  ;;  %v1228_v56 = vmul.f32 0.0078125, %v1146_v54  ;;  %v1321_v35 = vsub.f32 %v9066_v46, %v9320_v60 }
 0x1cd   : > { %v1052_v19 = vpop.xlane.xlu0 %1051  ;;  %1786 = vmatmul.mubr.bf16.gmra.mrb[12].mxu0 %v9366_v55  ;;  %v1416_v58 = vmul.f32 %v7845_v12, %v1320_v41  ;;  %v1459_v10 = vmul.f32 %v9260_v7, %v1415_v29 }
 0x1ce   : > { %v1355_v51 = vadd.f32 1e-05, %v1291_v43  ;;  %v1292_v34 = vsub.f32 %v1228_v56, %v1260_v4  ;;  %v9372_v61 = vmul.f32 0.0078125, %v1052_v19  ;;  %1795 = vmatprep.mubr.bf16.mxu0 %v11902_v5  ;;  %v1322_v56 = vsub.f32 %v9071_v52, %v9328_v18 }
 0x1cf   : > { %v1054_v26 = vpop.xlane.xlu1 %1053  ;;  %v1460_v0 = vmul.f32 %v9260_v7, %v1416_v58  ;;  %v9383_v29 = vadd.f32 %v9267_v40, %v1459_v10 }
 0x1d0   : > { %7850 = vrsqrt.f32 %v1355_v51  ;;  %v1356_v47 = vadd.f32 1e-05, %v1292_v34  ;;  %v1261_v57 = vmul.f32 %v9372_v61, %v9372_v61  ;;  %v9380_v41 = vmul.f32 0.0078125, %v1054_v26 }
 0x1d1   : > { %v1148_v54 = vpop.xlane.xlu0 %1147  ;;  %12038 = vst [vmem:[#allocation50_spill] sm:$0xff] %v9383_v29  ;;  %v9386_v12 = vadd.f32 %v9267_v40, %v1460_v0 }
 0x1d2   : > { %v7847_v4 = vpop.eup %7846  ;;  %7852 = vrsqrt.f32 %v1356_v47  ;;  %v1229_v43 = vmul.f32 0.0078125, %v1148_v54  ;;  %v1262_v10 = vmul.f32 %v9380_v41, %v9380_v41 }
 0x1d3   : > { %12039 = vst [vmem:[#allocation51_spill] sm:$0xff] %v9386_v12  ;;  %v1150_v19 = vpop.xlane.xlu1 %1149  ;;  %v9392_v58 = vpack.c.bf16 %v9386_v12, %v9383_v29  ;;  %v1417_v46 = vmul.f32 %v7847_v4, %v1321_v35 }
 0x1d4   : > { %v7849_v60 = vpop.eup %7848  ;;  %v1293_v51 = vsub.f32 %v1229_v43, %v1261_v57  ;;  %v1230_v34 = vmul.f32 0.0078125, %v1150_v19  ;;  %v1323_v43 = vsub.f32 %v9083_v63, %v9346_v59 }
 0x1d5   : > { %v1056_v26 = vpop.xlane.xlu0 %1055  ;;  %1796 = vmatmul.mubr.bf16.gmra.mrb[16].mxu0 %v9392_v58  ;;  %v1418_v0 = vmul.f32 %v7849_v60, %v1322_v56  ;;  %v1461_v47 = vmul.f32 %v9260_v7, %v1417_v46 }
 0x1d6   : > { %v1357_v54 = vadd.f32 1e-05, %v1293_v51  ;;  %v1294_v52 = vsub.f32 %v1230_v34, %v1262_v10  ;;  %v9398_v18 = vmul.f32 0.0078125, %v1056_v26  ;;  %1805 = vmatprep.mubr.bf16.mxu0 %v11902_v5  ;;  %v1324_v34 = vsub.f32 %v9088_v6, %v9354_v45 }
 0x1d7   : > { %v1058_v12 = vpop.xlane.xlu1 %1057  ;;  %v1462_v35 = vmul.f32 %v9260_v7, %v1418_v0  ;;  %v9409_v46 = vadd.f32 %v9267_v40, %v1461_v47 }
 0x1d8   : > { %7854 = vrsqrt.f32 %v1357_v54  ;;  %v1358_v4 = vadd.f32 1e-05, %v1294_v52  ;;  %v1263_v57 = vmul.f32 %v9398_v18, %v9398_v18  ;;  %v9406_v56 = vmul.f32 0.0078125, %v1058_v12 }
 0x1d9   : > { %v1152_v19 = vpop.xlane.xlu0 %1151  ;;  %12040 = vst [vmem:[#allocation52_spill] sm:$0xff] %v9409_v46  ;;  %v9412_v60 = vadd.f32 %v9267_v40, %v1462_v35 }
 0x1da   : > { %v7851_v10 = vpop.eup %7850  ;;  %7856 = vrsqrt.f32 %v1358_v4  ;;  %v1231_v51 = vmul.f32 0.0078125, %v1152_v19  ;;  %v1264_v12 = vmul.f32 %v9406_v56, %v9406_v56 }
 0x1db   : > { %12041 = vst [vmem:[#allocation53_spill] sm:$0xff] %v9412_v60  ;;  %v1154_v26 = vpop.xlane.xlu1 %1153  ;;  %v9418_v0 = vpack.c.bf16 %v9412_v60, %v9409_v46  ;;  %v1419_v63 = vmul.f32 %v7851_v10, %v1323_v43 }
 0x1dc   : > { %v7853_v59 = vpop.eup %7852  ;;  %v1295_v47 = vsub.f32 %v1231_v51, %v1263_v57  ;;  %v1232_v54 = vmul.f32 0.0078125, %v1154_v26  ;;  %v1016_v51 = vcombine.high %v9243_v21, %v9243_v21 }
 0x1dd   : > { %v1060_v52 = vpop.xlane.xlu0 %1059  ;;  %1806 = vmatmul.mubr.bf16.gmra.mrb[20].mxu0 %v9418_v0  ;;  %v1420_v35 = vmul.f32 %v7853_v59, %v1324_v34  ;;  %v1463_v4 = vmul.f32 %v9260_v7, %v1419_v63  ;;  %v1325_v34 = vsub.f32 %v9102_v17, %v9372_v61 }
 0x1de   : > { %v1359_v19 = vadd.f32 1e-05, %v1295_v47  ;;  %v1296_v6 = vsub.f32 %v1232_v54, %v1264_v12  ;;  %v9424_v45 = vmul.f32 0.0078125, %v1060_v52  ;;  %1815 = vmatprep.mubr.bf16.mxu0 %v11902_v5  ;;  %v1326_v52 = vsub.f32 %v9116_v22, %v9380_v41 }
 0x1df   : > { %v1062_v60 = vpop.xlane.xlu1 %1061  ;;  %v1464_v43 = vmul.f32 %v9260_v7, %v1420_v35  ;;  %v9437_v59 = vadd.f32 %v9267_v40, %v1463_v4 }
 0x1e0   : > { %7858 = vrsqrt.f32 %v1359_v19  ;;  %v1360_v10 = vadd.f32 1e-05, %v1296_v6  ;;  %v1265_v57 = vmul.f32 %v9424_v45, %v9424_v45  ;;  %v9434_v26 = vmul.f32 0.0078125, %v1062_v60 }
 0x1e1   : > { %v1156_v63 = vpop.xlane.xlu0 %1155  ;;  %12042 = vst [vmem:[#allocation54_spill] sm:$0xff] %v9437_v59  ;;  %v9440_v12 = vadd.f32 %v9267_v40, %v1464_v43 }
 0x1e2   : > { %v7855_v47 = vpop.eup %7854  ;;  %7860 = vrsqrt.f32 %v1360_v10  ;;  %v1233_v54 = vmul.f32 0.0078125, %v1156_v63  ;;  %v1266_v60 = vmul.f32 %v9434_v26, %v9434_v26  ;;  %v1022_v63 = vadd.f32 1.0, %v1016_v51 }
 0x1e3   : > { %12043 = vst [vmem:[#allocation55_spill] sm:$0xff] %v9440_v12  ;;  %v1158_v35 = vpop.xlane.xlu1 %1157  ;;  %v9446_v21 = vpack.c.bf16 %v9440_v12, %v9437_v59  ;;  %v1421_v17 = vmul.f32 %v7855_v47, %v1325_v34  ;;  %v1020_v59 = vrot.slane %v1016_v51, 1 }
 0x1e4   : > { %v7857_v61 = vpop.eup %7856  ;;  %v1297_v4 = vsub.f32 %v1233_v54, %v1265_v57  ;;  %v1234_v19 = vmul.f32 0.0078125, %v1158_v35  ;;  %v1327_v57 = vsub.f32 %v9128_v32, %v9398_v18 }
 0x1e5   : > { %v1064_v6 = vpop.xlane.xlu0 %1063  ;;  %1816 = vmatmul.mubr.bf16.gmra.mrb[24].mxu0 %v9446_v21  ;;  %v1422_v43 = vmul.f32 %v7857_v61, %v1326_v52  ;;  %v1465_v10 = vmul.f32 %v9260_v7, %v1421_v17  ;;  %v9463_v17 = vrot.slane %v1022_v63, %v9249_v36 }
 0x1e6   : > { %v1361_v22 = vadd.f32 1e-05, %v1297_v4  ;;  %v1298_v41 = vsub.f32 %v1234_v19, %v1266_v60  ;;  %1825 = vmatprep.mubr.bf16.mxu0 %v11902_v5  ;;  %v9465_v60 = vmul.f32 0.0078125, %v1064_v6  ;;  %v9478_v6 = vrot.slane %v1020_v59, %v9249_v36 }
 0x1e7   : > { %v1066_v12 = vpop.xlane.xlu1 %1065  ;;  %v1466_v34 = vmul.f32 %v9260_v7, %v1422_v43  ;;  %v9457_v35 = vadd.f32 %v9267_v40, %v1465_v10  ;;  %v1328_v7 = vsub.f32 %v9131_v37, %v9406_v56  ;;  %v1329_v59 = vsub.f32 %v9141_v48, %v9424_v45 }
 0x1e8   : > { %7862 = vrsqrt.f32 %v1361_v22  ;;  %v1362_v47 = vadd.f32 1e-05, %v1298_v41  ;;  %v9473_v19 = vmul.f32 0.0078125, %v1066_v12  ;;  %v1267_v37 = vmul.f32 %v9465_v60, %v9465_v60 }
 0x1e9   : > { %v1072_v54 = vpop.xlane.xlu0 %1071  ;;  %12044 = vst [vmem:[#allocation56_spill] sm:$0xff] %v9457_v35  ;;  %v9460_v52 = vadd.f32 %v9267_v40, %v1466_v34 }
 0x1ea   : > { %v7859_v61 = vpop.eup %7858  ;;  %7864 = vrsqrt.f32 %v1362_v47  ;;  %v9482_v56 = vmul.f32 0.0078125, %v1072_v54  ;;  %v1268_v34 = vmul.f32 %v9473_v19, %v9473_v19 }
 0x1eb   : > { %12045 = vst [vmem:[#allocation57_spill] sm:$0xff] %v9460_v52  ;;  %v1074_v51 = vpop.xlane.xlu1 %1073  ;;  %v9471_v32 = vpack.c.bf16 %v9460_v52, %v9457_v35  ;;  %v1423_v18 = vmul.f32 %v7859_v61, %v1327_v57 }
 0x1ec   : > { %v7861_v4 = vpop.eup %7860  ;;  %v9485_v22 = vmul.f32 0.0078125, %v1074_v51 }
 0x1ed   : > { %v1160_v40 = vpop.xlane.xlu0 %1159  ;;  %1826 = vmatmul.mubr.bf16.gmra.mrb[28].mxu0 %v9471_v32  ;;  %v1424_v43 = vmul.f32 %v7861_v4, %v1328_v7  ;;  %v1467_v10 = vmul.f32 %v9463_v17, %v1423_v18  ;;  %v1271_v18 = vmul.f32 %v9482_v56, %v9482_v56 }
 0x1ee   : > { %v1235_v63 = vmul.f32 0.0078125, %v1160_v40  ;;  %1835 = vmatprep.mubr.bf16.mxu0 %v11902_v5  ;;  %v1272_v48 = vmul.f32 %v9485_v22, %v9485_v22 }
 0x1ef   : > { %v1162_v12 = vpop.xlane.xlu1 %1161  ;;  %v1468_v41 = vmul.f32 %v9463_v17, %v1424_v43  ;;  %v9493_v54 = vadd.f32 %v9478_v6, %v1467_v10 }
 0x1f0   : > { %v1299_v47 = vsub.f32 %v1235_v63, %v1267_v37  ;;  %v1236_v57 = vmul.f32 0.0078125, %v1162_v12  ;;  %v1330_v37 = vsub.f32 %v9144_v53, %v9434_v26 }
 0x1f1   : > { %v1168_v61 = vpop.xlane.xlu0 %1167  ;;  %12046 = vst [vmem:[#allocation58_spill] sm:$0xff] %v9493_v54  ;;  %v9496_v7 = vadd.f32 %v9478_v6, %v1468_v41 }
 0x1f2   : > { %v7863_v51 = vpop.eup %7862  ;;  %v1363_v4 = vadd.f32 1e-05, %v1299_v47  ;;  %v1300_v40 = vsub.f32 %v1236_v57, %v1268_v34  ;;  %v1239_v43 = vmul.f32 0.0078125, %v1168_v61  ;;  %v12048_v61 = vmov 0  }
 0x1f3   : > { %12047 = vst [vmem:[#allocation59_spill] sm:$0xff] %v9496_v7  ;;  %v1170_v45 = vpop.xlane.xlu1 %1169  ;;  %v9506_v10 = vpack.c.bf16 %v9496_v7, %v9493_v54  ;;  %v1425_v63 = vmul.f32 %v7863_v51, %v1329_v59 }
 0x1f4   : > { %v7865_v12 = vpop.eup %7864  ;;  %7866 = vrsqrt.f32 %v1363_v4  ;;  %v1364_v41 = vadd.f32 1e-05, %v1300_v40  ;;  %v1303_v5 = vsub.f32 %v1239_v43, %v1271_v18  ;;  %v1240_v52 = vmul.f32 0.0078125, %v1170_v45 }
 0x1f5   : > { %v1068_v47 = vpop.xlane.xlu0 %1067  ;;  %1836 = vmatmul.mubr.bf16.gmra.mrb[32].mxu0 %v9506_v10  ;;  %v1426_v34 = vmul.f32 %v7865_v12, %v1330_v37  ;;  %v1469_v53 = vmul.f32 %v9463_v17, %v1425_v63  ;;  %v1331_v37 = vsub.f32 %v9155_v3, %v9465_v60 }
 0x1f6   : > { %7868 = vrsqrt.f32 %v1364_v41  ;;  %v1367_v26 = vadd.f32 1e-05, %v1303_v5  ;;  %v1304_v57 = vsub.f32 %v1240_v52, %v1272_v48  ;;  %1845 = vmatprep.mubr.bf16.mxu0 %v12048_v61  ;;  %v9518_v40 = vmul.f32 0.0078125, %v1068_v47 }
 0x1f7   : > { %v1070_v35 = vpop.xlane.xlu1 %1069  ;;  %v1470_v7 = vmul.f32 %v9463_v17, %v1426_v34  ;;  %v9513_v18 = vadd.f32 %v9478_v6, %v1469_v53  ;;  %v1332_v41 = vsub.f32 %v9158_v9, %v9473_v19 }
 0x1f8   : > { %7870 = vrsqrt.f32 %v1367_v26  ;;  %v1368_v59 = vadd.f32 1e-05, %v1304_v57  ;;  %v9524_v52 = vmul.f32 0.0078125, %v1070_v35  ;;  %v1335_v57 = vsub.f32 %v9162_v13, %v9482_v56 }
 0x1f9   : > { %v1076_v51 = vpop.xlane.xlu0 %1075  ;;  %12049 = vst [vmem:[#allocation60_spill] sm:$0xff] %v9513_v18  ;;  %v9516_v4 = vadd.f32 %v9478_v6, %v1470_v7  ;;  %v1269_v7 = vmul.f32 %v9518_v40, %v9518_v40 }
 0x1fa   : > { %7872 = vrsqrt.f32 %v1368_v59  ;;  %v9531_v63 = vmul.f32 0.0078125, %v1076_v51  ;;  %v1270_v60 = vmul.f32 %v9524_v52, %v9524_v52 }
 0x1fb   : > { %12050 = vst [vmem:[#allocation61_spill] sm:$0xff] %v9516_v4  ;;  %v1078_v43 = vpop.xlane.xlu1 %1077  ;;  %v9522_v5 = vpack.c.bf16 %v9516_v4, %v9513_v18 }
 0x1fc   : > { %v9536_v35 = vmul.f32 0.0078125, %v1078_v43  ;;  %v1273_v9 = vmul.f32 %v9531_v63, %v9531_v63 }
 0x1fd   : > { %v1164_v48 = vpop.xlane.xlu0 %1163  ;;  %1846 = vmatmul.mubr.bf16.gmra.mrb[36].mxu0 %v9522_v5 }
 0x1fe   : > { %v7867_v45 = vpop.eup %7866  ;;  %v1237_v12 = vmul.f32 0.0078125, %v1164_v48  ;;  %1855 = vmatprep.mubr.bf16.mxu0 %v12048_v61 }
 0x1ff   : > { %v1166_v47 = vpop.xlane.xlu1 %1165  ;;  %v1427_v34 = vmul.f32 %v7867_v45, %v1331_v37  ;;  %v1336_v45 = vsub.f32 %v9165_v14, %v9485_v22 }
 0x200   : > { %v7869_v3 = vpop.eup %7868  ;;  %v1301_v53 = vsub.f32 %v1237_v12, %v1269_v7  ;;  %v1238_v26 = vmul.f32 0.0078125, %v1166_v47  ;;  %v1274_v7 = vmul.f32 %v9536_v35, %v9536_v35 }
 0x201   : > { %v1172_v59 = vpop.xlane.xlu0 %1171  ;;  %v1428_v51 = vmul.f32 %v7869_v3, %v1332_v41  ;;  %v1471_v48 = vmul.f32 %v9463_v17, %v1427_v34 }
 0x202   : > { %v7871_v4 = vpop.eup %7870  ;;  %v1365_v19 = vadd.f32 1e-05, %v1301_v53  ;;  %v1302_v43 = vsub.f32 %v1238_v26, %v1270_v60  ;;  %v1241_v37 = vmul.f32 0.0078125, %v1172_v59 }
 0x203   : > { %v1174_v12 = vpop.xlane.xlu1 %1173  ;;  %v1472_v13 = vmul.f32 %v9463_v17, %v1428_v51  ;;  %v1431_v56 = vmul.f32 %v7871_v4, %v1335_v57  ;;  %v9551_v53 = vadd.f32 %v9478_v6, %v1471_v48 }
 0x204   : > { %v7873_v41 = vpop.eup %7872  ;;  %7874 = vrsqrt.f32 %v1365_v19  ;;  %v1366_v47 = vadd.f32 1e-05, %v1302_v43  ;;  %v1305_v34 = vsub.f32 %v1241_v37, %v1273_v9  ;;  %v1242_v3 = vmul.f32 0.0078125, %v1174_v12 }
 0x205   : > { %v1080_v18 = vpop.xlane.xlu0 %1079  ;;  %12051 = vst [vmem:[#allocation62_spill] sm:$0xff] %v9551_v53  ;;  %v9554_v60 = vadd.f32 %v9478_v6, %v1472_v13  ;;  %v1432_v14 = vmul.f32 %v7873_v41, %v1336_v45  ;;  %v1475_v22 = vmul.f32 %v9463_v17, %v1431_v56  ;;  %v7771_v56 = vld [vmem:[%s9014_s4 + $0x20] ss:$12 sps:$4 sm:$0xff]  }
 0x206   : > { %7876 = vrsqrt.f32 %v1366_v47  ;;  %v1369_v26 = vadd.f32 1e-05, %v1305_v34  ;;  %v1306_v59 = vsub.f32 %v1242_v3, %v1274_v7  ;;  %v9557_v51 = vmul.f32 0.0078125, %v1080_v18 }
 0x207   : > { %12052 = vst [vmem:[#allocation63_spill] sm:$0xff] %v9554_v60  ;;  %v1082_v4 = vpop.xlane.xlu1 %1081  ;;  %v9561_v57 = vpack.c.bf16 %v9554_v60, %v9551_v53  ;;  %v1476_v48 = vmul.f32 %v9463_v17, %v1432_v14  ;;  %v9570_v18 = vadd.f32 %v9478_v6, %v1475_v22  ;;  %v1333_v3 = vsub.f32 %v9181_v39, %v9518_v40 }
 0x208   : > { %7878 = vrsqrt.f32 %v1369_v26  ;;  %v1370_v9 = vadd.f32 1e-05, %v1306_v59  ;;  %v1275_v19 = vmul.f32 %v9557_v51, %v9557_v51  ;;  %v9566_v43 = vmul.f32 0.0078125, %v1082_v4 }
 0x209   : > { %v1176_v37 = vpop.xlane.xlu0 %1175  ;;  %1856 = vmatmul.mubr.bf16.gmra.mrb[40].mxu0 %v9561_v57  ;;  %12053 = vst [vmem:[#allocation64_spill] sm:$0xff] %v9570_v18  ;;  %v9573_v45 = vadd.f32 %v9478_v6, %v1476_v48  ;;  %v1334_v48 = vsub.f32 %v9184_v44, %v9524_v52  ;;  %v1337_v44 = vsub.f32 %v9188_v49, %v9531_v63 }
 0x20a   : > { %7880 = vrsqrt.f32 %v1370_v9  ;;  %v1243_v7 = vmul.f32 0.0078125, %v1176_v37  ;;  %1865 = vmatprep.mubr.bf16.mxu0 %v12048_v61  ;;  %v1276_v41 = vmul.f32 %v9566_v43, %v9566_v43  ;;  %v7772_v37 = vld [vmem:[%s9014_s4 + $0x38] ss:$12 sps:$4 sm:$0xff]  }
 0x20b   : > { %12054 = vst [vmem:[#allocation65_spill] sm:$0xff] %v9573_v45  ;;  %v1178_v12 = vpop.xlane.xlu1 %1177  ;;  %v9578_v13 = vpack.c.bf16 %v9573_v45, %v9570_v18 }
 0x20c   : > { %v1307_v47 = vsub.f32 %v1243_v7, %v1275_v19  ;;  %v1244_v34 = vmul.f32 0.0078125, %v1178_v12 }
 0x20d   : > { %v1084_v14 = vpop.xlane.xlu0 %1083  ;;  %1876 = vmatmul.mubr.bf16.vlgmr.msra.gmra.mrb[0].mxu1 %v9578_v13 }
 0x20e   : > { %v7875_v22 = vpop.eup %7874  ;;  %v1371_v26 = vadd.f32 1e-05, %v1307_v47  ;;  %v1308_v59 = vsub.f32 %v1244_v34, %v1276_v41  ;;  %v9586_v4 = vmul.f32 0.0078125, %v1084_v14  ;;  %6929 = vmatpush3.bf16.msra.mxu1 %v9230_v20  ;;  %1885 = vmatprep.mubr.bf16.mxu1 %v12048_v61 }
 0x20f   : > { %v1086_v9 = vpop.xlane.xlu1 %1085  ;;  %v1429_v19 = vmul.f32 %v7875_v22, %v1333_v3  ;;  %6930 = vmatprep.subr.bf16.mxu1 %v7771_v56  ;;  %v1338_v3 = vsub.f32 %v9191_v50, %v9536_v35 }
 0x210   : > { %v7877_v39 = vpop.eup %7876  ;;  %7882 = vrsqrt.f32 %v1371_v26  ;;  %v1372_v40 = vadd.f32 1e-05, %v1308_v59  ;;  %v1277_v7 = vmul.f32 %v9586_v4, %v9586_v4  ;;  %v9595_v12 = vmul.f32 0.0078125, %v1086_v9  ;;  %v7773_v26 = vld [vmem:[%s9014_s4 + $0x50] ss:$12 sps:$4 sm:$0xff]  }
 0x211   : > { %v1180_v41 = vpop.xlane.xlu0 %1179  ;;  %v1430_v20 = vmul.f32 %v7877_v39, %v1334_v48  ;;  %v1473_v47 = vmul.f32 %v9463_v17, %v1429_v19 }
 0x212   : > { %v7879_v34 = vpop.eup %7878  ;;  %7884 = vrsqrt.f32 %v1372_v40  ;;  %v1245_v52 = vmul.f32 0.0078125, %v1180_v41  ;;  %6931 = vmatpush3.bf16.msra.mxu1 %v7771_v56  ;;  %v1278_v48 = vmul.f32 %v9595_v12, %v9595_v12 }
 0x213   : > { %v1182_v14 = vpop.xlane.xlu1 %1181  ;;  %v1474_v22 = vmul.f32 %v9463_v17, %v1430_v20  ;;  %6932 = vmatprep.subr.bf16.mxu1 %v7772_v37  ;;  %v1433_v39 = vmul.f32 %v7879_v34, %v1337_v44  ;;  %v9607_v49 = vadd.f32 %v9478_v6, %v1473_v47  ;;  %v7774_v20 = vld [vmem:[%s9014_s4 + $0x68] ss:$12 sps:$4 sm:$0xff]   ;;  %v1339_v34 = vsub.f32 %v9206_v8, %v9557_v51  ;;  %v7775_v51 = vld [vmem:[%s9014_s4 + $0x80] ss:$12 sps:$4 sm:$0xff]  }
 0x214   : > { %v7881_v59 = vpop.eup %7880  ;;  %v1309_v9 = vsub.f32 %v1245_v52, %v1277_v7  ;;  %v1246_v19 = vmul.f32 0.0078125, %v1182_v14 }
 0x215   : > { %12055 = vst [vmem:[#allocation66_spill] sm:$0xff] %v9607_v49  ;;  %v9610_v63 = vadd.f32 %v9478_v6, %v1474_v22  ;;  %v1434_v50 = vmul.f32 %v7881_v59, %v1338_v3  ;;  %v1477_v40 = vmul.f32 %v9463_v17, %v1433_v39  ;;  %v1340_v3 = vsub.f32 %v9209_v15, %v9566_v43  ;;  %v7776_v15 = vld [vmem:[%s9014_s4 + $0x98] ss:$12 sps:$4 sm:$0xff]  }
 0x216   : > { %v1373_v35 = vadd.f32 1e-05, %v1309_v9  ;;  %v1310_v56 = vsub.f32 %v1246_v19, %v1278_v48  ;;  %6933 = vmatpush3.bf16.msra.mxu1 %v7772_v37  ;;  %v1341_v43 = vsub.f32 %v9219_v28, %v9586_v4  ;;  %v2077_v28 = vld [vmem:[%s12061_s30] sm:$0xff]  ;;  %v2078_v4 = vld [vmem:[%s12062_s25 + $0x8] sm:$0xff]  ;;  %s10787_s30 = scalar_lea.vmem %s12216_s23, %s12025_s26 }
 0x217   : > { %12056 = vst [vmem:[#allocation67_spill] sm:$0xff] %v9610_v63  ;;  %v9615_v41 = vpack.c.bf16 %v9610_v63, %v9607_v49  ;;  %v1478_v7 = vmul.f32 %v9463_v17, %v1434_v50  ;;  %6934 = vmatprep.subr.bf16.mxu1 %v7773_v26  ;;  %v9623_v44 = vadd.f32 %v9478_v6, %v1477_v40  ;;  %v7777_v40 = vld [vmem:[%s9014_s4 + $0xb0] ss:$12 sps:$4 sm:$0xff]   ;;  %s6465_s4 = sshll.u32 %s12025_s26, 6 }
 0x218   : > { %7886 = vrsqrt.f32 %v1373_v35  ;;  %v1374_v47 = vadd.f32 1e-05, %v1310_v56  ;;  %v1342_v50 = vsub.f32 %v9221_v30, %v9595_v12  ;;  %s10341_s17 = scalar_lea.vmem [#allocation9], %s6465_s4 }
 0x219   : > { %1866 = vmatmul.mubr.bf16.gmra.mrb[44].mxu0 %v9615_v41  ;;  %12057 = vst [vmem:[#allocation68_spill] sm:$0xff] %v9623_v44  ;;  %v9626_v37 = vadd.f32 %v9478_v6, %v1478_v7 }
 0x21a   : > { %v7883_v52 = vpop.eup %7882  ;;  %7888 = vrsqrt.f32 %v1374_v47  ;;  %6935 = vmatpush3.bf16.msra.mxu1 %v7773_v26  ;;  %v9665_v47 = vpack.c.bf16 %v2078_v4, %v2077_v28 }
 0x21b   : > { %12058 = vst [vmem:[#allocation69_spill] sm:$0xff] %v9626_v37  ;;  %v9632_v14 = vpack.c.bf16 %v9626_v37, %v9623_v44  ;;  %v1435_v8 = vmul.f32 %v7883_v52, %v1339_v34  ;;  %6936 = vmatprep.subr.bf16.mxu1 %v7774_v20 }
 0x21c   : > { %v7885_v22 = vpop.eup %7884 }
 0x21d   : > { %1886 = vmatmul.mubr.bf16.gmra.mrb[4].mxu1 %v9632_v14  ;;  %v1436_v59 = vmul.f32 %v7885_v22, %v1340_v3  ;;  %v1479_v48 = vmul.f32 %v9463_v17, %v1435_v8  ;;  %v2080_v8 = vld [vmem:[%s12062_s25 + $0x18] sm:$0xff]  ;;  %v2082_v22 = vld [vmem:[%s12062_s25 + $0x28] sm:$0xff] }
 0x21e   : > { %1895 = vmatprep.mubr.bf16.mxu1 %v12048_v61  ;;  %6937 = vmatpush3.bf16.msra.mxu1 %v7774_v20 }
 0x21f   : > { %v1480_v26 = vmul.f32 %v9463_v17, %v1436_v59  ;;  %6938 = vmatprep.subr.bf16.mxu1 %v7775_v51  ;;  %v9643_v9 = vadd.f32 %v9478_v6, %v1479_v48  ;;  %v2083_v59 = vld [vmem:[%s12062_s25 + $0x30] sm:$0xff]  ;;  %v2084_v48 = vld [vmem:[%s12062_s25 + $0x38] sm:$0xff] }
 0x221   : > { %12059 = vst [vmem:[#allocation70_spill] sm:$0xff] %v9643_v9  ;;  %v9646_v19 = vadd.f32 %v9478_v6, %v1480_v26  ;;  %v2086_v26 = vld [vmem:[%s12062_s25 + $0x48] sm:$0xff] }
 0x222   : > { %v7887_v39 = vpop.eup %7886  ;;  %6939 = vmatpush3.bf16.msra.mxu1 %v7775_v51 }
 0x223   : > { %12060 = vst [vmem:[#allocation71_spill] sm:$0xff] %v9646_v19  ;;  %v9652_v35 = vpack.c.bf16 %v9646_v19, %v9643_v9  ;;  %v1437_v56 = vmul.f32 %v7887_v39, %v1341_v43  ;;  %6940 = vmatprep.subr.bf16.mxu1 %v7776_v15  ;;  %v2087_v43 = vld [vmem:[%s12062_s25 + $0x50] sm:$0xff]  ;;  %v2088_v39 = vld [vmem:[%s12062_s25 + $0x58] sm:$0xff] }
 0x224   : > { %v7889_v7 = vpop.eup %7888 }
 0x225   : > { %1896 = vmatmul.mubr.bf16.gmra.mrb[8].mxu1 %v9652_v35  ;;  %v1438_v20 = vmul.f32 %v7889_v7, %v1342_v50  ;;  %v1481_v30 = vmul.f32 %v9463_v17, %v1437_v56  ;;  %v2090_v50 = vld [vmem:[%s12062_s25 + $0x68] sm:$0xff]  ;;  %v2092_v7 = vld [vmem:[%s12062_s25 + $0x78] sm:$0xff] }
 0x226   : > { %1905 = vmatprep.mubr.bf16.mxu1 %v12048_v61  ;;  %6941 = vmatpush3.bf16.msra.mxu1 %v7776_v15 }
 0x227   : > { %v1482_v12 = vmul.f32 %v9463_v17, %v1438_v20  ;;  %6942 = vmatprep.subr.bf16.mxu1 %v7777_v40  ;;  %v9668_v34 = vadd.f32 %v9478_v6, %v1481_v30  ;;  %v2079_v17 = vld [vmem:[%s12062_s25 + $0x10] sm:$0xff] }
 0x228   : > { %v9683_v51 = vpack.c.bf16 %v2080_v8, %v2079_v17 }
 0x229   : > { %12063 = vst [vmem:[#allocation72_spill] sm:$0xff] %v9668_v34  ;;  %v9671_v52 = vadd.f32 %v9478_v6, %v1482_v12  ;;  %v2081_v6 = vld [vmem:[%s12062_s25 + $0x20] sm:$0xff] }
 0x22a   : > { %6943 = vmatpush3.bf16.msra.mxu1 %v7777_v40  ;;  %v2091_v40 = vld [vmem:[%s12062_s25 + $0x70] sm:$0xff] }
 0x22b   : > { %12064 = vst [vmem:[#allocation73_spill] sm:$0xff] %v9671_v52  ;;  %v1540_v3 = vpack.c.bf16 %v9671_v52, %v9668_v34  ;;  %7401 = vmatprep.subr.bf16.mxu1 %v9665_v47 }
 0x22d   : > { %1906 = vmatmul.mubr.bf16.gmra.mrb[12].mxu1 %v1540_v3 }
 0x22e   : > { %6944 = vmatprep.mubr.bf16.mxu1 %v9288_v33  ;;  %v9695_v33 = vpack.c.bf16 %v2082_v22, %v2081_v6 }
 0x235   : > { %6945 = vmatmul.mubr.bf16.vlgmr.msra.gmra.mrb[16].mxu1 %v9314_v25  ;;  %v9705_v25 = vpack.c.bf16 %v2084_v48, %v2083_v59 }
 0x236   : > { %6948 = vmatprep.mubr.bf16.mxu1 %v9340_v31  ;;  %7403 = vmatpush3.bf16.msra.mxu1 %v9665_v47  ;;  %v2085_v31 = vld [vmem:[%s12062_s25 + $0x40] sm:$0xff] }
 0x237   : > { %7405 = vmatprep.subr.bf16.mxu1 %v9683_v51  ;;  %v9717_v15 = vpack.c.bf16 %v2086_v26, %v2085_v31 }
 0x23a   : > { %7407 = vmatpush3.bf16.msra.mxu1 %v9683_v51 }
 0x23b   : > { %7409 = vmatprep.subr.bf16.mxu1 %v9695_v33 }
 0x23d   : > { %6949 = vmatmul.mubr.bf16.gmra.mrb[20].mxu1 %v9366_v55  ;;  %v9727_v55 = vpack.c.bf16 %v2088_v39, %v2087_v43 }
 0x23e   : > { %6952 = vmatprep.mubr.bf16.mxu1 %v9392_v58  ;;  %7411 = vmatpush3.bf16.msra.mxu1 %v9695_v33  ;;  %v2089_v58 = vld [vmem:[%s12062_s25 + $0x60] sm:$0xff] }
 0x23f   : > { %7413 = vmatprep.subr.bf16.mxu1 %v9705_v25  ;;  %v9739_v56 = vpack.c.bf16 %v2090_v50, %v2089_v58 }
 0x242   : > { %7415 = vmatpush3.bf16.msra.mxu1 %v9705_v25 }
 0x243   : > { %7417 = vmatprep.subr.bf16.mxu1 %v9717_v15 }
 0x245   : > { %6953 = vmatmul.mubr.bf16.gmra.mrb[24].mxu1 %v9418_v0  ;;  %v9749_v0 = vpack.c.bf16 %v2092_v7, %v2091_v40 }
 0x246   : > { %6956 = vmatprep.mubr.bf16.mxu1 %v9446_v21  ;;  %7419 = vmatpush3.bf16.msra.mxu1 %v9717_v15  ;;  %v11909_v21 = vsub.s32 1, %v9094_v11 }
 0x247   : > { %7421 = vmatprep.subr.bf16.mxu1 %v9727_v55 }
 0x24a   : > { %7423 = vmatpush3.bf16.msra.mxu1 %v9727_v55 }
 0x24b   : > { %7425 = vmatprep.subr.bf16.mxu1 %v9739_v56 }
 0x24d   : > { %6957 = vmatmul.mubr.bf16.gmra.mrb[28].mxu1 %v9471_v32  ;;  %v8274_v32 = vld [vmem:[%s9107_s24] sm:$0x7] }
 0x24e   : > { %6960 = vmatprep.mubr.bf16.mxu1 %v9506_v10  ;;  %7427 = vmatpush3.bf16.msra.mxu1 %v9739_v56  ;;  %v9766_v10 = vrot.slane %v8274_v32, %v9249_v36 }
 0x24f   : > { %7429 = vmatprep.subr.bf16.mxu1 %v9749_v0 }
 0x252   : > { %7431 = vmatpush3.bf16.msra.mxu1 %v9749_v0 }
 0x253   : > { %7433 = vmatprep.subr.bf16.mxu1 %v9665_v47 }
 0x255   : > { %6961 = vmatmul.mubr.bf16.gmra.mrb[32].mxu1 %v9522_v5  ;;  %v9770_v5 = vrot.slane %v8274_v32, %v11909_v21 }
 0x256   : > { %6964 = vmatprep.mubr.bf16.mxu1 %v9561_v57 }
 0x25d   : > { %6965 = vmatmul.mubr.bf16.gmra.mrb[36].mxu1 %v9615_v41 }
 0x25e   : > { %6968 = vmatprep.mubr.bf16.mxu1 %v9578_v13 }
 0x265   : > { %6969 = vmatmul.mubr.bf16.gmra.mrb[40].mxu1 %v9632_v14 }
 0x266   : > { %6972 = vmatprep.mubr.bf16.mxu1 %v9652_v35 }
 0x26d   : > { %6973 = vmatmul.mubr.bf16.gmra.mrb[44].mxu1 %v1540_v3 }
 0x288   : > { %v1757_v57 = vpop.f32.mrb[0].mxu0 }
 0x289   : > { %v9773_v41 = vadd.f32 %v1757_v57, %v9766_v10  ;;  %v1759_v13 = vpop.f32.mrb[1].mxu0 }
 0x28a   : > { %v9776_v14 = vadd.f32 %v1759_v13, %v9770_v5  ;;  %v1761_v35 = vpop.f32.mrb[2].mxu0 }
 0x28b   : > { %v9779_v28 = vadd.f32 %v1761_v35, %v9766_v10  ;;  %v1763_v4 = vpop.f32.mrb[3].mxu0 }
 0x28c   : > { %v2094_v20 = vmul.f32 %v9776_v14, %v9773_v41  ;;  %v9784_v30 = vadd.f32 %v1763_v4, %v9770_v5 }
 0x28e   : > { %v2095_v12 = vmul.f32 %v9784_v30, %v9779_v28  ;;  %7008 = vmatprep.mubr.f32.mxu1 %v2094_v20 }
 0x290   : > { %v1767_v3 = vpop.f32.mrb[4].mxu0  ;;  %7009 = vmatmul.mubr.f32.vlgmr.msra.gmra.mrb[48].mxu1 %v2095_v12 }
 0x291   : > { %v9789_v17 = vadd.f32 %v1767_v3, %v9766_v10  ;;  %v1769_v8 = vpop.f32.mrb[5].mxu0  ;;  %7435 = vmatpush3.bf16.msra.mxu1 %v9665_v47 }
 0x292   : > { %v9793_v6 = vadd.f32 %v1769_v8, %v9770_v5  ;;  %v1771_v22 = vpop.f32.mrb[6].mxu0  ;;  %7437 = vmatprep.subr.bf16.mxu1 %v9683_v51 }
 0x293   : > { %v9797_v59 = vadd.f32 %v1771_v22, %v9766_v10  ;;  %v1773_v48 = vpop.f32.mrb[7].mxu0 }
 0x294   : > { %v2096_v31 = vmul.f32 %v9793_v6, %v9789_v17  ;;  %v9802_v26 = vadd.f32 %v1773_v48, %v9770_v5 }
 0x295   : > { %7439 = vmatpush3.bf16.msra.mxu1 %v9683_v51 }
 0x296   : > { %v2097_v43 = vmul.f32 %v9802_v26, %v9797_v59  ;;  %7011 = vmatprep.mubr.f32.mxu1 %v2096_v31  ;;  %7441 = vmatprep.subr.bf16.mxu1 %v9695_v33 }
 0x298   : > { %v1777_v39 = vpop.f32.mrb[8].mxu0  ;;  %7012 = vmatmul.mubr.f32.gmra.mrb[50].mxu1 %v2097_v43 }
 0x299   : > { %v9809_v58 = vadd.f32 %v1777_v39, %v9766_v10  ;;  %v1779_v50 = vpop.f32.mrb[9].mxu0  ;;  %7443 = vmatpush3.bf16.msra.mxu1 %v9695_v33 }
 0x29a   : > { %v9813_v40 = vadd.f32 %v1779_v50, %v9770_v5  ;;  %v1781_v7 = vpop.f32.mrb[10].mxu0  ;;  %7445 = vmatprep.subr.bf16.mxu1 %v9705_v25 }
 0x29b   : > { %v9817_v32 = vadd.f32 %v1781_v7, %v9766_v10  ;;  %v1783_v57 = vpop.f32.mrb[11].mxu0 }
 0x29c   : > { %v2098_v13 = vmul.f32 %v9813_v40, %v9809_v58  ;;  %v9822_v35 = vadd.f32 %v1783_v57, %v9770_v5 }
 0x29d   : > { %7447 = vmatpush3.bf16.msra.mxu1 %v9705_v25 }
 0x29e   : > { %v2099_v4 = vmul.f32 %v9822_v35, %v9817_v32  ;;  %7014 = vmatprep.mubr.f32.mxu1 %v2098_v13  ;;  %7449 = vmatprep.subr.bf16.mxu1 %v9717_v15 }
 0x2a0   : > { %v1787_v20 = vpop.f32.mrb[12].mxu0  ;;  %7015 = vmatmul.mubr.f32.gmra.mrb[52].mxu1 %v2099_v4 }
 0x2a1   : > { %v9829_v12 = vadd.f32 %v1787_v20, %v9766_v10  ;;  %v1789_v3 = vpop.f32.mrb[13].mxu0  ;;  %7451 = vmatpush3.bf16.msra.mxu1 %v9717_v15 }
 0x2a2   : > { %v9833_v8 = vadd.f32 %v1789_v3, %v9770_v5  ;;  %v1791_v22 = vpop.f32.mrb[14].mxu0  ;;  %7453 = vmatprep.subr.bf16.mxu1 %v9727_v55 }
 0x2a3   : > { %v9837_v48 = vadd.f32 %v1791_v22, %v9766_v10  ;;  %v1793_v31 = vpop.f32.mrb[15].mxu0 }
 0x2a4   : > { %v2100_v43 = vmul.f32 %v9833_v8, %v9829_v12  ;;  %v9842_v39 = vadd.f32 %v1793_v31, %v9770_v5 }
 0x2a5   : > { %7455 = vmatpush3.bf16.msra.mxu1 %v9727_v55 }
 0x2a6   : > { %v2101_v50 = vmul.f32 %v9842_v39, %v9837_v48  ;;  %7017 = vmatprep.mubr.f32.mxu1 %v2100_v43  ;;  %7457 = vmatprep.subr.bf16.mxu1 %v9739_v56 }
 0x2a8   : > { %v1797_v7 = vpop.f32.mrb[16].mxu0  ;;  %7018 = vmatmul.mubr.f32.gmra.mrb[54].mxu1 %v2101_v50 }
 0x2a9   : > { %v9849_v57 = vadd.f32 %v1797_v7, %v9766_v10  ;;  %v1799_v13 = vpop.f32.mrb[17].mxu0  ;;  %7459 = vmatpush3.bf16.msra.mxu1 %v9739_v56 }
 0x2aa   : > { %v9853_v4 = vadd.f32 %v1799_v13, %v9770_v5  ;;  %v1801_v20 = vpop.f32.mrb[18].mxu0  ;;  %7461 = vmatprep.subr.bf16.mxu1 %v9749_v0 }
 0x2ab   : > { %v9857_v3 = vadd.f32 %v1801_v20, %v9766_v10  ;;  %v1803_v22 = vpop.f32.mrb[19].mxu0 }
 0x2ac   : > { %v2102_v31 = vmul.f32 %v9853_v4, %v9849_v57  ;;  %v9862_v43 = vadd.f32 %v1803_v22, %v9770_v5 }
 0x2ad   : > { %7463 = vmatpush3.bf16.msra.mxu1 %v9749_v0 }
 0x2ae   : > { %v2103_v50 = vmul.f32 %v9862_v43, %v9857_v3  ;;  %7020 = vmatprep.mubr.f32.mxu1 %v2102_v31 }
 0x2b0   : > { %v1807_v7 = vpop.f32.mrb[20].mxu0  ;;  %7021 = vmatmul.mubr.f32.gmra.mrb[56].mxu1 %v2103_v50 }
 0x2b1   : > { %v9868_v13 = vadd.f32 %v1807_v7, %v9766_v10  ;;  %v1809_v20 = vpop.f32.mrb[21].mxu0 }
 0x2b2   : > { %v9871_v21 = vadd.f32 %v1809_v20, %v9770_v5  ;;  %v1811_v11 = vpop.f32.mrb[22].mxu0 }
 0x2b3   : > { %v9874_v36 = vadd.f32 %v1811_v11, %v9766_v10  ;;  %v1813_v22 = vpop.f32.mrb[23].mxu0 }
 0x2b4   : > { %v2104_v52 = vmul.f32 %v9871_v21, %v9868_v13  ;;  %v9879_v34 = vadd.f32 %v1813_v22, %v9770_v5 }
 0x2b6   : > { %v2105_v31 = vmul.f32 %v9879_v34, %v9874_v36  ;;  %7023 = vmatprep.mubr.f32.mxu1 %v2104_v52 }
 0x2b8   : > { %v1817_v50 = vpop.f32.mrb[24].mxu0  ;;  %7024 = vmatmul.mubr.f32.gmra.mrb[58].mxu1 %v2105_v31 }
 0x2b9   : > { %v9884_v7 = vadd.f32 %v1817_v50, %v9766_v10  ;;  %v1819_v20 = vpop.f32.mrb[25].mxu0 }
 0x2ba   : > { %v9887_v11 = vadd.f32 %v1819_v20, %v9770_v5  ;;  %v1821_v19 = vpop.f32.mrb[26].mxu0 }
 0x2bb   : > { %v9890_v9 = vadd.f32 %v1821_v19, %v9766_v10  ;;  %v1823_v37 = vpop.f32.mrb[27].mxu0 }
 0x2bc   : > { %v2106_v22 = vmul.f32 %v9887_v11, %v9884_v7  ;;  %v9895_v44 = vadd.f32 %v1823_v37, %v9770_v5 }
 0x2be   : > { %v2107_v52 = vmul.f32 %v9895_v44, %v9890_v9  ;;  %7026 = vmatprep.mubr.f32.mxu1 %v2106_v22 }
 0x2c0   : > { %v1827_v31 = vpop.f32.mrb[28].mxu0  ;;  %7027 = vmatmul.mubr.f32.gmra.mrb[60].mxu1 %v2107_v52 }
 0x2c1   : > { %v9900_v50 = vadd.f32 %v1827_v31, %v9766_v10  ;;  %v1829_v20 = vpop.f32.mrb[29].mxu0 }
 0x2c2   : > { %v9903_v19 = vadd.f32 %v1829_v20, %v9770_v5  ;;  %v1831_v45 = vpop.f32.mrb[30].mxu0 }
 0x2c3   : > { %v9906_v18 = vadd.f32 %v1831_v45, %v9766_v10  ;;  %v1833_v63 = vpop.f32.mrb[31].mxu0 }
 0x2c4   : > { %v2108_v37 = vmul.f32 %v9903_v19, %v9900_v50  ;;  %v9911_v49 = vadd.f32 %v1833_v63, %v9770_v5 }
 0x2c6   : > { %v2109_v22 = vmul.f32 %v9911_v49, %v9906_v18  ;;  %7029 = vmatprep.mubr.f32.mxu1 %v2108_v37 }
 0x2c8   : > { %v1837_v52 = vpop.f32.mrb[32].mxu0  ;;  %7030 = vmatmul.mubr.f32.gmra.mrb[62].mxu1 %v2109_v22 }
 0x2c9   : > { %v1838_v31 = vadd.f32 %v1837_v52, %v9766_v10  ;;  %v1839_v20 = vpop.f32.mrb[33].mxu0 }
 0x2ca   : > { %v1840_v60 = vadd.f32 %v1839_v20, %v9770_v5  ;;  %v1841_v45 = vpop.f32.mrb[34].mxu0 }
 0x2cb   : > { %v9918_v53 = vmul.f32 %v1838_v31, %v9776_v14  ;;  %v1842_v54 = vadd.f32 %v1841_v45, %v9766_v10  ;;  %v1843_v46 = vpop.f32.mrb[35].mxu0 }
 0x2cc   : > { %v2255_v63 = vmul.f32 %v1840_v60, %v9773_v41  ;;  %v9922_v29 = vmul.f32 %v1840_v60, %v1838_v31  ;;  %v1844_v37 = vadd.f32 %v1843_v46, %v9770_v5 }
 0x2cd   : > { %v9926_v22 = vmul.f32 %v1842_v54, %v9784_v30 }
 0x2ce   : > { %v2256_v52 = vmul.f32 %v1844_v37, %v9779_v28  ;;  %v9929_v16 = vmul.f32 %v1844_v37, %v1842_v54  ;;  %7064 = vmatprep.mubr.f32.mxu1 %v2255_v63 }
 0x2d0   : > { %v1847_v20 = vpop.f32.mrb[36].mxu0  ;;  %7065 = vmatmul.mubr.f32.vlgmr.msra.gmra.mrb[64].mxu1 %v2256_v52 }
 0x2d1   : > { %v1848_v14 = vadd.f32 %v1847_v20, %v9766_v10  ;;  %v1849_v45 = vpop.f32.mrb[37].mxu0 }
 0x2d2   : > { %v1850_v27 = vadd.f32 %v1849_v45, %v9770_v5  ;;  %v1851_v41 = vpop.f32.mrb[38].mxu0 }
 0x2d3   : > { %v9934_v60 = vmul.f32 %v1848_v14, %v9793_v6  ;;  %v1852_v46 = vadd.f32 %v1851_v41, %v9766_v10  ;;  %v1853_v30 = vpop.f32.mrb[39].mxu0 }
 0x2d4   : > { %v2257_v31 = vmul.f32 %v1850_v27, %v9789_v17  ;;  %v9938_v28 = vmul.f32 %v1850_v27, %v1848_v14  ;;  %v1854_v54 = vadd.f32 %v1853_v30, %v9770_v5 }
 0x2d5   : > { %v9942_v63 = vmul.f32 %v1852_v46, %v9802_v26 }
 0x2d6   : > { %v2258_v37 = vmul.f32 %v1854_v54, %v9797_v59  ;;  %v9945_v52 = vmul.f32 %v1854_v54, %v1852_v46  ;;  %7067 = vmatprep.mubr.f32.mxu1 %v2257_v31 }
 0x2d8   : > { %7068 = vmatmul.mubr.f32.gmra.mrb[66].mxu1 %v2258_v37 }
 0x2dc   : > { %v1857_v6 = vpop.f32.mrb[40].mxu0 }
 0x2dd   : > { %v9948_v20 = vadd.f32 %v1857_v6, %v9766_v10  ;;  %v1859_v45 = vpop.f32.mrb[41].mxu0 }
 0x2de   : > { %v1860_v17 = vadd.f32 %v1859_v45, %v9770_v5  ;;  %v1861_v27 = vpop.f32.mrb[42].mxu0 }
 0x2df   : > { %v9952_v14 = vadd.f32 %v1861_v27, %v9766_v10  ;;  %v1863_v41 = vpop.f32.mrb[43].mxu0 }
 0x2e0   : > { %v2259_v26 = vmul.f32 %v1860_v17, %v9809_v58  ;;  %v9956_v59 = vmul.f32 %v1860_v17, %v9948_v20  ;;  %v1864_v46 = vadd.f32 %v1863_v41, %v9770_v5  ;;  %v1877_v30 = vpop.f32.mrb[0].mxu1 }
 0x2e1   : > { %v1878_v31 = vadd.f32 %v1877_v30, %v9766_v10  ;;  %v1879_v54 = vpop.f32.mrb[1].mxu1 }
 0x2e2   : > { %v2260_v37 = vmul.f32 %v1864_v46, %v9817_v32  ;;  %v9962_v6 = vmul.f32 %v1864_v46, %v9952_v14  ;;  %v1880_v45 = vadd.f32 %v1879_v54, %v9770_v5  ;;  %v1881_v27 = vpop.f32.mrb[2].mxu1  ;;  %7070 = vmatprep.mubr.f32.mxu1 %v2259_v26 }
 0x2e3   : > { %v9966_v58 = vmul.f32 %v1878_v31, %v9853_v4  ;;  %v1882_v17 = vadd.f32 %v1881_v27, %v9766_v10  ;;  %v1883_v24 = vpop.f32.mrb[3].mxu1 }
 0x2e4   : > { %v2263_v41 = vmul.f32 %v1880_v45, %v9849_v57  ;;  %v9970_v1 = vmul.f32 %v1880_v45, %v1878_v31  ;;  %v1884_v30 = vadd.f32 %v1883_v24, %v9770_v5  ;;  %7071 = vmatmul.mubr.f32.gmra.mrb[68].mxu1 %v2260_v37 }
 0x2e5   : > { %12065 = vst [vmem:[#allocation74_spill] sm:$0xff] %v9966_v58  ;;  %v9974_v32 = vmul.f32 %v1882_v17, %v9862_v43 }
 0x2e6   : > { %12066 = vst [vmem:[#allocation75_spill] sm:$0xff] %v9970_v1  ;;  %v2264_v46 = vmul.f32 %v1884_v30, %v9857_v3  ;;  %v9977_v54 = vmul.f32 %v1884_v30, %v1882_v17 }
 0x2e7   : > { %12067 = vst [vmem:[#allocation76_spill] sm:$0xff] %v9974_v32 }
 0x2e8   : > { %12068 = vst [vmem:[#allocation77_spill] sm:$0xff] %v9977_v54 }
 0x2ec   : > { %v1867_v26 = vpop.f32.mrb[44].mxu0 }
 0x2ed   : > { %v9980_v4 = vadd.f32 %v1867_v26, %v9766_v10  ;;  %v1869_v27 = vpop.f32.mrb[45].mxu0 }
 0x2ee   : > { %v1870_v38 = vadd.f32 %v1869_v27, %v9770_v5  ;;  %v1871_v57 = vpop.f32.mrb[46].mxu0 }
 0x2ef   : > { %v9984_v31 = vadd.f32 %v1871_v57, %v9766_v10  ;;  %v1873_v24 = vpop.f32.mrb[47].mxu0 }
 0x2f0   : > { %v2261_v37 = vmul.f32 %v1870_v38, %v9829_v12  ;;  %v9988_v43 = vmul.f32 %v1870_v38, %v9980_v4  ;;  %v1874_v3 = vadd.f32 %v1873_v24, %v9770_v5  ;;  %v1887_v45 = vpop.f32.mrb[4].mxu1 }
 0x2f1   : > { %v1888_v17 = vadd.f32 %v1887_v45, %v9766_v10  ;;  %v1889_v30 = vpop.f32.mrb[5].mxu1 }
 0x2f2   : > { %v2262_v26 = vmul.f32 %v1874_v3, %v9837_v48  ;;  %v9994_v27 = vmul.f32 %v1874_v3, %v9984_v31  ;;  %v1890_v57 = vadd.f32 %v1889_v30, %v9770_v5  ;;  %v1891_v42 = vpop.f32.mrb[6].mxu1  ;;  %7073 = vmatprep.mubr.f32.mxu1 %v2261_v37 }
 0x2f3   : > { %v9998_v12 = vmul.f32 %v1888_v17, %v9871_v21  ;;  %v1892_v38 = vadd.f32 %v1891_v42, %v9766_v10  ;;  %v1893_v2 = vpop.f32.mrb[7].mxu1 }
 0x2f4   : > { %12069 = vst [vmem:[#allocation78_spill] sm:$0xff] %v9994_v27  ;;  %v2265_v24 = vmul.f32 %v1890_v57, %v9868_v13  ;;  %v10002_v62 = vmul.f32 %v1890_v57, %v1888_v17  ;;  %v1894_v45 = vadd.f32 %v1893_v2, %v9770_v5  ;;  %7074 = vmatmul.mubr.f32.gmra.mrb[70].mxu1 %v2262_v26 }
 0x2f5   : > { %12070 = vst [vmem:[#allocation79_spill] sm:$0xff] %v9998_v12  ;;  %v10006_v48 = vmul.f32 %v1892_v38, %v9879_v34  ;;  %7076 = vmatprep.mubr.f32.mxu1 %v2263_v41 }
 0x2f6   : > { %12071 = vst [vmem:[#allocation80_spill] sm:$0xff] %v10002_v62  ;;  %v2266_v3 = vmul.f32 %v1894_v45, %v9874_v36  ;;  %v10009_v37 = vmul.f32 %v1894_v45, %v1892_v38 }
 0x2f7   : > { %12072 = vst [vmem:[#allocation81_spill] sm:$0xff] %v10006_v48 }
 0x2f8   : > { %12073 = vst [vmem:[#allocation82_spill] sm:$0xff] %v10009_v37  ;;  %v1897_v21 = vpop.f32.mrb[8].mxu1  ;;  %7077 = vmatmul.mubr.f32.gmra.mrb[72].mxu1 %v2264_v46  ;;  %v10024_v46 = vld [vmem:[%s12076_s27] sm:$0xf]  ;;  %s12217_s27 = sld [smem:[#allocation132_spill]] }
 0x2f9   : > { %v1898_v42 = vadd.f32 %v1897_v21, %v9766_v10  ;;  %v1899_v30 = vpop.f32.mrb[9].mxu1  ;;  %7079 = vmatprep.mubr.f32.mxu1 %v2265_v24  ;;  %7088 = vmatprep.subr.msk.mxu0 %vm2625_vm0, %v10024_v46 }
 0x2fa   : > { %v1900_v13 = vadd.f32 %v1899_v30, %v9770_v5  ;;  %v1901_v17 = vpop.f32.mrb[10].mxu1  ;;  %7114 = vmatprep.subr.msk.mxu1 %vm2625_vm0, %v10024_v46  ;;  %7089 = vmatpush3.msk.msra.mxu0 %vm2625_vm0, %v10024_v46 }
 0x2fb   : > { %v10014_v2 = vmul.f32 %v1898_v42, %v9887_v11  ;;  %v1902_v34 = vadd.f32 %v1901_v17, %v9766_v10  ;;  %v1903_v26 = vpop.f32.mrb[11].mxu1  ;;  %7115 = vmatpush3.msk.msra.mxu1 %vm2625_vm0, %v10024_v46  ;;  %7465 = vmatprep.subr.bf16.mxu0 %v9665_v47 }
 0x2fc   : > { %v2267_v41 = vmul.f32 %v1900_v13, %v9884_v7  ;;  %v10018_v36 = vmul.f32 %v1900_v13, %v1898_v42  ;;  %v1904_v57 = vadd.f32 %v1903_v26, %v9770_v5  ;;  %7080 = vmatmul.mubr.f32.gmra.mrb[74].mxu1 %v2266_v3  ;;  %7497 = vmatprep.subr.bf16.mxu1 %v9665_v47 }
 0x2fd   : > { %12074 = vst [vmem:[#allocation83_spill] sm:$0xff] %v10014_v2  ;;  %v10027_v38 = vmul.f32 %v1902_v34, %v9895_v44 }
 0x2fe   : > { %12075 = vst [vmem:[#allocation84_spill] sm:$0xff] %v10018_v36  ;;  %v2268_v7 = vmul.f32 %v1904_v57, %v9890_v9  ;;  %v10034_v11 = vmul.f32 %v1904_v57, %v1902_v34  ;;  %7082 = vmatprep.mubr.f32.mxu1 %v2267_v41  ;;  %s10802_s4 = scalar_lea.vmem %s12217_s27, %s12025_s26 }
 0x2ff   : > { %12077 = vst [vmem:[#allocation85_spill] sm:$0xff] %v10027_v38 }
 0x300   : > { %12078 = vst [vmem:[#allocation86_spill] sm:$0xff] %v10034_v11  ;;  %v1907_v44 = vpop.f32.mrb[12].mxu1  ;;  %7083 = vmatmul.mubr.f32.gmra.mrb[76].mxu1 %v2268_v7 }
 0x301   : > { %v1908_v24 = vadd.f32 %v1907_v44, %v9766_v10  ;;  %v1909_v45 = vpop.f32.mrb[13].mxu1 }
 0x302   : > { %v1910_v9 = vadd.f32 %v1909_v45, %v9770_v5  ;;  %v1911_v3 = vpop.f32.mrb[14].mxu1 }
 0x303   : > { %v10045_v21 = vmul.f32 %v1908_v24, %v9903_v19  ;;  %v1912_v42 = vadd.f32 %v1911_v3, %v9766_v10  ;;  %v1913_v30 = vpop.f32.mrb[15].mxu1 }
 0x304   : > { %v2269_v13 = vmul.f32 %v1910_v9, %v9900_v50  ;;  %v10049_v17 = vmul.f32 %v1910_v9, %v1908_v24  ;;  %v1914_v34 = vadd.f32 %v1913_v30, %v9770_v5 }
 0x305   : > { %12079 = vst [vmem:[#allocation87_spill] sm:$0xff] %v10045_v21  ;;  %v10053_v26 = vmul.f32 %v1912_v42, %v9911_v49 }
 0x306   : > { %12080 = vst [vmem:[#allocation88_spill] sm:$0xff] %v10049_v17  ;;  %v2270_v41 = vmul.f32 %v1914_v34, %v9906_v18  ;;  %v10056_v57 = vmul.f32 %v1914_v34, %v1912_v42  ;;  %7085 = vmatprep.mubr.f32.mxu1 %v2269_v13 }
 0x307   : > { %12081 = vst [vmem:[#allocation89_spill] sm:$0xff] %v10053_v26 }
 0x308   : > { %12082 = vst [vmem:[#allocation90_spill] sm:$0xff] %v10056_v57  ;;  %v6946_v7 = vpop.f32.mrb[16].mxu1  ;;  %7086 = vmatmul.mubr.f32.gmra.mrb[78].mxu1 %v2270_v41 }
 0x309   : > { %v10059_v19 = vadd.f32 %v6946_v7, %v9118_v23  ;;  %v1950_v10 = vpop.f32.mrb[17].mxu1 }
 0x30a   : > { %v10062_v50 = vadd.f32 %v1950_v10, %v9118_v23  ;;  %v6947_v44 = vpop.f32.mrb[18].mxu1 }
 0x30b   : > { %12083 = vst [vmem:[#allocation91_spill] sm:$0xff] %v10059_v19  ;;  %v10065_v5 = vadd.f32 %v6947_v44, %v9118_v23  ;;  %v1953_v49 = vpop.f32.mrb[19].mxu1 }
 0x30c   : > { %12084 = vst [vmem:[#allocation92_spill] sm:$0xff] %v10062_v50  ;;  %v10068_v24 = vadd.f32 %v1953_v49, %v9118_v23 }
 0x30d   : > { %12085 = vst [vmem:[#allocation93_spill] sm:$0xff] %v10065_v5 }
 0x30e   : > { %12086 = vst [vmem:[#allocation94_spill] sm:$0xff] %v10068_v24 }
 0x310   : > { %v6950_v18 = vpop.f32.mrb[20].mxu1 }
 0x311   : > { %v10071_v45 = vadd.f32 %v6950_v18, %v9118_v23  ;;  %v1966_v9 = vpop.f32.mrb[21].mxu1 }
 0x312   : > { %v10074_v3 = vadd.f32 %v1966_v9, %v9118_v23  ;;  %v6951_v42 = vpop.f32.mrb[22].mxu1 }
 0x313   : > { %12087 = vst [vmem:[#allocation95_spill] sm:$0xff] %v10071_v45  ;;  %v10077_v30 = vadd.f32 %v6951_v42, %v9118_v23  ;;  %v1969_v13 = vpop.f32.mrb[23].mxu1 }
 0x314   : > { %12088 = vst [vmem:[#allocation96_spill] sm:$0xff] %v10074_v3  ;;  %v10080_v34 = vadd.f32 %v1969_v13, %v9118_v23 }
 0x315   : > { %12089 = vst [vmem:[#allocation97_spill] sm:$0xff] %v10077_v30 }
 0x316   : > { %12090 = vst [vmem:[#allocation98_spill] sm:$0xff] %v10080_v34 }
 0x318   : > { %v6954_v41 = vpop.f32.mrb[24].mxu1 }
 0x319   : > { %v10083_v7 = vadd.f32 %v6954_v41, %v9118_v23  ;;  %v1982_v10 = vpop.f32.mrb[25].mxu1 }
 0x31a   : > { %v10086_v44 = vadd.f32 %v1982_v10, %v9118_v23  ;;  %v6955_v49 = vpop.f32.mrb[26].mxu1 }
 0x31b   : > { %12091 = vst [vmem:[#allocation99_spill] sm:$0xff] %v10083_v7  ;;  %v10089_v18 = vadd.f32 %v6955_v49, %v9118_v23  ;;  %v1985_v9 = vpop.f32.mrb[27].mxu1 }
 0x31c   : > { %12092 = vst [vmem:[#allocation100_spill] sm:$0xff] %v10086_v44  ;;  %v10092_v42 = vadd.f32 %v1985_v9, %v9118_v23 }
 0x31d   : > { %12093 = vst [vmem:[#allocation101_spill] sm:$0xff] %v10089_v18 }
 0x31e   : > { %12094 = vst [vmem:[#allocation102_spill] sm:$0xff] %v10092_v42 }
 0x320   : > { %v6958_v61 = vpop.f32.mrb[28].mxu1 }
 0x321   : > { %v10095_v13 = vadd.f32 %v6958_v61, %v9118_v23  ;;  %v1998_v45 = vpop.f32.mrb[29].mxu1 }
 0x322   : > { %v10098_v41 = vadd.f32 %v1998_v45, %v9118_v23  ;;  %v6959_v7 = vpop.f32.mrb[30].mxu1 }
 0x323   : > { %12095 = vst [vmem:[#allocation103_spill] sm:$0xff] %v10095_v13  ;;  %v10101_v10 = vadd.f32 %v6959_v7, %v9118_v23  ;;  %v2001_v44 = vpop.f32.mrb[31].mxu1 }
 0x324   : > { %12096 = vst [vmem:[#allocation104_spill] sm:$0xff] %v10098_v41  ;;  %v10104_v49 = vadd.f32 %v2001_v44, %v9118_v23 }
 0x325   : > { %12097 = vst [vmem:[#allocation105_spill] sm:$0xff] %v10101_v10 }
 0x326   : > { %12098 = vst [vmem:[#allocation106_spill] sm:$0xff] %v10104_v49 }
 0x328   : > { %v6962_v18 = vpop.f32.mrb[32].mxu1 }
 0x329   : > { %v10107_v9 = vadd.f32 %v6962_v18, %v9118_v23  ;;  %v2014_v42 = vpop.f32.mrb[33].mxu1 }
 0x32a   : > { %v10110_v61 = vadd.f32 %v2014_v42, %v9118_v23  ;;  %v6963_v13 = vpop.f32.mrb[34].mxu1 }
 0x32b   : > { %12099 = vst [vmem:[#allocation107_spill] sm:$0xff] %v10107_v9  ;;  %v10113_v45 = vadd.f32 %v6963_v13, %v9118_v23  ;;  %v2017_v41 = vpop.f32.mrb[35].mxu1 }
 0x32c   : > { %12100 = vst [vmem:[#allocation108_spill] sm:$0xff] %v10110_v61  ;;  %v10116_v7 = vadd.f32 %v2017_v41, %v9118_v23 }
 0x32d   : > { %12101 = vst [vmem:[#allocation109_spill] sm:$0xff] %v10113_v45 }
 0x32e   : > { %12102 = vst [vmem:[#allocation110_spill] sm:$0xff] %v10116_v7 }
 0x330   : > { %v6966_v10 = vpop.f32.mrb[36].mxu1 }
 0x331   : > { %v10119_v44 = vadd.f32 %v6966_v10, %v9118_v23  ;;  %v2030_v49 = vpop.f32.mrb[37].mxu1 }
 0x332   : > { %v10122_v18 = vadd.f32 %v2030_v49, %v9118_v23  ;;  %v6967_v30 = vpop.f32.mrb[38].mxu1 }
 0x333   : > { %12103 = vst [vmem:[#allocation111_spill] sm:$0xff] %v10119_v44  ;;  %v10125_v42 = vadd.f32 %v6967_v30, %v9118_v23  ;;  %v2033_v3 = vpop.f32.mrb[39].mxu1 }
 0x334   : > { %12104 = vst [vmem:[#allocation112_spill] sm:$0xff] %v10122_v18  ;;  %v10128_v13 = vadd.f32 %v2033_v3, %v9118_v23 }
 0x335   : > { %12105 = vst [vmem:[#allocation113_spill] sm:$0xff] %v10125_v42 }
 0x336   : > { %12106 = vst [vmem:[#allocation114_spill] sm:$0xff] %v10128_v13 }
 0x338   : > { %v6970_v34 = vpop.f32.mrb[40].mxu1 }
 0x339   : > { %v10131_v41 = vadd.f32 %v6970_v34, %v9118_v23  ;;  %v2046_v9 = vpop.f32.mrb[41].mxu1 }
 0x33a   : > { %v10134_v10 = vadd.f32 %v2046_v9, %v9118_v23  ;;  %v6971_v44 = vpop.f32.mrb[42].mxu1 }
 0x33b   : > { %12107 = vst [vmem:[#allocation115_spill] sm:$0xff] %v10131_v41  ;;  %v10137_v49 = vadd.f32 %v6971_v44, %v9118_v23  ;;  %v2049_v18 = vpop.f32.mrb[43].mxu1 }
 0x33c   : > { %12108 = vst [vmem:[#allocation116_spill] sm:$0xff] %v10134_v10  ;;  %v10140_v30 = vadd.f32 %v2049_v18, %v9118_v23 }
 0x33d   : > { %12109 = vst [vmem:[#allocation117_spill] sm:$0xff] %v10137_v49 }
 0x33e   : > { %12110 = vst [vmem:[#allocation118_spill] sm:$0xff] %v10140_v30 }
 0x340   : > { %v6974_v42 = vpop.f32.mrb[44].mxu1 }
 0x341   : > { %v10143_v3 = vadd.f32 %v6974_v42, %v9118_v23  ;;  %v2062_v13 = vpop.f32.mrb[45].mxu1 }
 0x342   : > { %v10146_v34 = vadd.f32 %v2062_v13, %v9118_v23  ;;  %v6975_v41 = vpop.f32.mrb[46].mxu1 }
 0x343   : > { %12111 = vst [vmem:[#allocation119_spill] sm:$0xff] %v10143_v3  ;;  %v10149_v9 = vadd.f32 %v6975_v41, %v9118_v23  ;;  %v2065_v10 = vpop.f32.mrb[47].mxu1 }
 0x344   : > { %12112 = vst [vmem:[#allocation120_spill] sm:$0xff] %v10146_v34  ;;  %v10152_v44 = vadd.f32 %v2065_v10, %v9118_v23 }
 0x345   : > { %12113 = vst [vmem:[#allocation121_spill] sm:$0xff] %v10149_v9 }
 0x346   : > { %12114 = vst [vmem:[#allocation122_spill] sm:$0xff] %v10152_v44 }
 0x363   : > { %v7010_v49 = vpop.f32.mrb[48].mxu1 }
 0x364   : > { %v2176_v45 = vpop.f32.mrb[49].mxu1 }
 0x36b   : > { %v7013_v18 = vpop.f32.mrb[50].mxu1 }
 0x36c   : > { %v2186_v30 = vpop.f32.mrb[51].mxu1 }
 0x373   : > { %v7016_v19 = vpop.f32.mrb[52].mxu1 }
 0x374   : > { %v10154_v5 = vpop.f32.mrb[53].mxu1 }
 0x37b   : > { %v10156_v42 = vpop.f32.mrb[54].mxu1 }
 0x37c   : > { %v10158_v3 = vpop.f32.mrb[55].mxu1 }
 0x383   : > { %v10160_v13 = vpop.f32.mrb[56].mxu1 }
 0x384   : > { %v10162_v34 = vpop.f32.mrb[57].mxu1 }
 0x38b   : > { %v10164_v41 = vpop.f32.mrb[58].mxu1 }
 0x38c   : > { %v10166_v9 = vpop.f32.mrb[59].mxu1 }
 0x393   : > { %v10168_v23 = vpop.f32.mrb[60].mxu1 }
 0x394   : > { %v10170_v10 = vpop.f32.mrb[61].mxu1 }
 0x39b   : > { %v10172_v44 = vpop.f32.mrb[62].mxu1 }
 0x39c   : > { %v10174_v61 = vpop.f32.mrb[63].mxu1 }
 0x3a3   : > { %v7066_v50 = vpop.f32.mrb[64].mxu1 }
 0x3a4   : > { %v2417_v7 = vmax.f32 %v7010_v49, %v7066_v50  ;;  %v2337_v24 = vpop.f32.mrb[65].mxu1 }
 0x3a5   : > { %v2416_v57 = vmax.f32 %v2176_v45, %v2337_v24 }
 0x3a6   : > { %v2433_v26 = vsub.f32 %v7010_v49, %v2417_v7  ;;  %v2481_v17 = vsub.f32 %v7066_v50, %v2417_v7 }
 0x3a7   : > { %v2432_v21 = vsub.f32 %v2176_v45, %v2416_v57  ;;  %v2480_v11 = vsub.f32 %v2337_v24, %v2416_v57 }
 0x3a8   : > { %v2450_v38 = vmul.f32 1.442695, %v2433_v26  ;;  %v2498_v36 = vmul.f32 1.442695, %v2481_v17 }
 0x3a9   : > { %v2448_v2 = vmul.f32 1.442695, %v2432_v21  ;;  %v2496_v37 = vmul.f32 1.442695, %v2480_v11 }
 0x3aa   : > { %7890 = vpow2.f32 %v2450_v38 }
 0x3ab   : > { %7892 = vpow2.f32 %v2498_v36  ;;  %v7069_v48 = vpop.f32.mrb[66].mxu1 }
 0x3ac   : > { %7894 = vpow2.f32 %v2448_v2  ;;  %v2419_v62 = vmax.f32 %v7013_v18, %v7069_v48  ;;  %v2347_v12 = vpop.f32.mrb[67].mxu1 }
 0x3ad   : > { %7896 = vpow2.f32 %v2496_v37  ;;  %v2418_v54 = vmax.f32 %v2186_v30, %v2347_v12 }
 0x3ae   : > { %v2435_v32 = vsub.f32 %v7013_v18, %v2419_v62  ;;  %v2483_v1 = vsub.f32 %v7069_v48, %v2419_v62 }
 0x3af   : > { %v2434_v58 = vsub.f32 %v2186_v30, %v2418_v54  ;;  %v2482_v27 = vsub.f32 %v2347_v12, %v2418_v54 }
 0x3b0   : > { %v2454_v49 = vmul.f32 1.442695, %v2435_v32  ;;  %v2502_v50 = vmul.f32 1.442695, %v2483_v1 }
 0x3b1   : > { %v2452_v45 = vmul.f32 1.442695, %v2434_v58  ;;  %v2500_v57 = vmul.f32 1.442695, %v2482_v27 }
 0x3b2   : > { %7898 = vpow2.f32 %v2454_v49 }
 0x3b3   : > { %7900 = vpow2.f32 %v2502_v50 }
 0x3b4   : > { %v7891_v21 = vpop.eup %7890  ;;  %7902 = vpow2.f32 %v2452_v45 }
 0x3b5   : > { %v7893_v38 = vpop.eup %7892  ;;  %7904 = vpow2.f32 %v2500_v57 }
 0x3b6   : > { %v7895_v36 = vpop.eup %7894  ;;  %v2529_v2 = vadd.f32 %v7893_v38, %v7891_v21 }
 0x3b7   : > { %v7897_v11 = vpop.eup %7896  ;;  %v7072_v17 = vpop.f32.mrb[68].mxu1 }
 0x3b8   : > { %7906 = vrcp.f32 %v2529_v2  ;;  %v2528_v37 = vadd.f32 %v7897_v11, %v7895_v36  ;;  %v2421_v26 = vmax.f32 %v7016_v19, %v7072_v17  ;;  %v2357_v62 = vpop.f32.mrb[69].mxu1 }
 0x3b9   : > { %v2420_v54 = vmax.f32 %v10154_v5, %v2357_v62 }
 0x3ba   : > { %7908 = vrcp.f32 %v2528_v37  ;;  %v2437_v1 = vsub.f32 %v7016_v19, %v2421_v26  ;;  %v2485_v58 = vsub.f32 %v7072_v17, %v2421_v26 }
 0x3bb   : > { %v2436_v32 = vsub.f32 %v10154_v5, %v2420_v54  ;;  %v2484_v27 = vsub.f32 %v2357_v62, %v2420_v54 }
 0x3bc   : > { %v7899_v12 = vpop.eup %7898  ;;  %v2458_v48 = vmul.f32 1.442695, %v2437_v1  ;;  %v2506_v24 = vmul.f32 1.442695, %v2485_v58 }
 0x3bd   : > { %v7901_v7 = vpop.eup %7900  ;;  %v2456_v30 = vmul.f32 1.442695, %v2436_v32  ;;  %v2504_v45 = vmul.f32 1.442695, %v2484_v27 }
 0x3be   : > { %v7903_v18 = vpop.eup %7902  ;;  %v2531_v49 = vadd.f32 %v7901_v7, %v7899_v12  ;;  %7910 = vpow2.f32 %v2458_v48 }
 0x3bf   : > { %v7905_v50 = vpop.eup %7904  ;;  %7912 = vpow2.f32 %v2506_v24 }
 0x3c0   : > { %7914 = vrcp.f32 %v2531_v49  ;;  %v2530_v57 = vadd.f32 %v7905_v50, %v7903_v18 }
 0x3c1   : > { %7916 = vpow2.f32 %v2456_v30 }
 0x3c2   : > { %v7907_v2 = vpop.eup %7906  ;;  %7918 = vrcp.f32 %v2530_v57 }
 0x3c3   : > { %v2561_v19 = vmul.f32 %v7907_v2, %v7891_v21  ;;  %v2791_v17 = vmul.f32 %v7907_v2, %v7893_v38  ;;  %7920 = vpow2.f32 %v2504_v45 }
 0x3c4   : > { %v7909_v5 = vpop.eup %7908 }
 0x3c5   : > { %v2560_v37 = vmul.f32 %v7909_v5, %v7895_v36  ;;  %v2790_v26 = vmul.f32 %v7909_v5, %v7897_v11 }
 0x3c7   : > { %7090 = vmatprep.mubr.msk.f32.mxu0 %vm2576_vm1, %v2560_v37  ;;  %7116 = vmatprep.mubr.msk.f32.mxu1 %vm2576_vm1, %v2790_v26  ;;  %v7075_v62 = vpop.f32.mrb[70].mxu1 }
 0x3c8   : > { %v10180_v54 = vpop.eup %7910  ;;  %7091 = vmatmul.mubr.msk.f32.vlgmr.msra.gmra.mrb[48].mxu0 %vm2576_vm1, %v2561_v19  ;;  %7117 = vmatmul.mubr.msk.f32.vlgmr.msra.gmra.mrb[80].mxu1 %vm2576_vm1, %v2791_v17  ;;  %v2423_v1 = vmax.f32 %v10156_v42, %v7075_v62  ;;  %v2367_v21 = vpop.f32.mrb[71].mxu1 }
 0x3c9   : > { %v10185_v38 = vpop.eup %7912  ;;  %v2422_v58 = vmax.f32 %v10158_v3, %v2367_v21  ;;  %7467 = vmatpush3.bf16.msra.mxu0 %v9665_v47  ;;  %7499 = vmatpush3.bf16.msra.mxu1 %v9665_v47 }
 0x3ca   : > { %v7915_v36 = vpop.eup %7914  ;;  %v2533_v11 = vadd.f32 %v10185_v38, %v10180_v54  ;;  %v2439_v32 = vsub.f32 %v10156_v42, %v2423_v1  ;;  %v2487_v27 = vsub.f32 %v7075_v62, %v2423_v1  ;;  %7469 = vmatprep.subr.bf16.mxu0 %v9683_v51  ;;  %7501 = vmatprep.subr.bf16.mxu1 %v9683_v51 }
 0x3cb   : > { %v10195_v48 = vpop.eup %7916  ;;  %v2438_v24 = vsub.f32 %v10158_v3, %v2422_v58  ;;  %v2486_v30 = vsub.f32 %v2367_v21, %v2422_v58  ;;  %v7078_v49 = vpop.f32.mrb[72].mxu1  ;;  %v2563_v45 = vmul.f32 %v7915_v36, %v7899_v12  ;;  %v2793_v57 = vmul.f32 %v7915_v36, %v7901_v7 }
 0x3cc   : > { %v7919_v47 = vpop.eup %7918  ;;  %7922 = vrcp.f32 %v2533_v11  ;;  %v2462_v2 = vmul.f32 1.442695, %v2439_v32  ;;  %v2510_v19 = vmul.f32 1.442695, %v2487_v27  ;;  %v2425_v17 = vmax.f32 %v10160_v13, %v7078_v49  ;;  %v2377_v42 = vpop.f32.mrb[73].mxu1 }
 0x3cd   : > { %v10199_v5 = vpop.eup %7920  ;;  %v2460_v37 = vmul.f32 1.442695, %v2438_v24  ;;  %v2508_v26 = vmul.f32 1.442695, %v2486_v30  ;;  %v2424_v62 = vmax.f32 %v10162_v34, %v2377_v42  ;;  %v2562_v1 = vmul.f32 %v7919_v47, %v7903_v18  ;;  %7471 = vmatpush3.bf16.msra.mxu0 %v9683_v51  ;;  %7503 = vmatpush3.bf16.msra.mxu1 %v9683_v51 }
 0x3ce   : > { %v2532_v3 = vadd.f32 %v10199_v5, %v10195_v48  ;;  %7924 = vpow2.f32 %v2462_v2  ;;  %v2441_v12 = vsub.f32 %v10160_v13, %v2425_v17  ;;  %v2489_v7 = vsub.f32 %v7078_v49, %v2425_v17  ;;  %7473 = vmatprep.subr.bf16.mxu0 %v9695_v33  ;;  %7505 = vmatprep.subr.bf16.mxu1 %v9695_v33 }
 0x3cf   : > { %7926 = vpow2.f32 %v2510_v19  ;;  %v2440_v21 = vsub.f32 %v10162_v34, %v2424_v62  ;;  %v2488_v58 = vsub.f32 %v2377_v42, %v2424_v62  ;;  %7093 = vmatprep.mubr.msk.f32.mxu0 %vm2576_vm1, %v2562_v1  ;;  %v2792_v18 = vmul.f32 %v7919_v47, %v7905_v50  ;;  %v7081_v36 = vpop.f32.mrb[74].mxu1 }
 0x3d0   : > { %7928 = vrcp.f32 %v2532_v3  ;;  %v2466_v51 = vmul.f32 1.442695, %v2441_v12  ;;  %v2514_v11 = vmul.f32 1.442695, %v2489_v7  ;;  %7094 = vmatmul.mubr.msk.f32.gmra.mrb[50].mxu0 %vm2576_vm1, %v2563_v45  ;;  %v2427_v13 = vmax.f32 %v10164_v41, %v7081_v36  ;;  %v2387_v32 = vpop.f32.mrb[75].mxu1 }
 0x3d1   : > { %7930 = vpow2.f32 %v2460_v37  ;;  %v2464_v27 = vmul.f32 1.442695, %v2440_v21  ;;  %7119 = vmatprep.mubr.msk.f32.mxu1 %vm2576_vm1, %v2792_v18  ;;  %v2426_v24 = vmax.f32 %v10166_v9, %v2387_v32  ;;  %7475 = vmatpush3.bf16.msra.mxu0 %v9695_v33  ;;  %v2512_v34 = vmul.f32 1.442695, %v2488_v58 }
 0x3d2   : > { %7932 = vpow2.f32 %v2508_v26  ;;  %7120 = vmatmul.mubr.msk.f32.gmra.mrb[82].mxu1 %vm2576_vm1, %v2793_v57  ;;  %v2443_v50 = vsub.f32 %v10164_v41, %v2427_v13  ;;  %v2491_v30 = vsub.f32 %v7081_v36, %v2427_v13  ;;  %7477 = vmatprep.subr.bf16.mxu0 %v9705_v25 }
 0x3d3   : > { %7934 = vpow2.f32 %v2466_v51  ;;  %v2442_v49 = vsub.f32 %v10166_v9, %v2426_v24  ;;  %v2490_v45 = vsub.f32 %v2387_v32, %v2426_v24  ;;  %v7084_v47 = vpop.f32.mrb[76].mxu1  ;;  %7507 = vmatpush3.bf16.msra.mxu1 %v9695_v33 }
 0x3d4   : > { %7936 = vpow2.f32 %v2514_v11  ;;  %v2470_v2 = vmul.f32 1.442695, %v2443_v50  ;;  %v2518_v19 = vmul.f32 1.442695, %v2491_v30  ;;  %v2429_v17 = vmax.f32 %v10168_v23, %v7084_v47  ;;  %v2397_v42 = vpop.f32.mrb[77].mxu1  ;;  %7509 = vmatprep.subr.bf16.mxu1 %v9705_v25 }
 0x3d5   : > { %7938 = vpow2.f32 %v2464_v27  ;;  %v2468_v41 = vmul.f32 1.442695, %v2442_v49  ;;  %v2428_v57 = vmax.f32 %v10170_v10, %v2397_v42  ;;  %7479 = vmatpush3.bf16.msra.mxu0 %v9705_v25  ;;  %v2516_v9 = vmul.f32 1.442695, %v2490_v45 }
 0x3d6   : > { %v7923_v37 = vpop.eup %7922  ;;  %7940 = vpow2.f32 %v2512_v34  ;;  %v2445_v26 = vsub.f32 %v10168_v23, %v2429_v17  ;;  %v2493_v33 = vsub.f32 %v7084_v47, %v2429_v17  ;;  %7481 = vmatprep.subr.bf16.mxu0 %v9717_v15 }
 0x3d7   : > { %7942 = vpow2.f32 %v2470_v2  ;;  %v2444_v62 = vsub.f32 %v10170_v10, %v2428_v57  ;;  %v2492_v1 = vsub.f32 %v2397_v42, %v2428_v57  ;;  %v2565_v3 = vmul.f32 %v7923_v37, %v10180_v54  ;;  %7511 = vmatpush3.bf16.msra.mxu1 %v9705_v25 }
 0x3d8   : > { %v10230_v12 = vpop.eup %7924  ;;  %7944 = vpow2.f32 %v2518_v19  ;;  %v2474_v7 = vmul.f32 1.442695, %v2445_v26  ;;  %v2795_v21 = vmul.f32 %v7923_v37, %v10185_v38  ;;  %7513 = vmatprep.subr.bf16.mxu1 %v9717_v15  ;;  %v2522_v58 = vmul.f32 1.442695, %v2493_v33 }
 0x3d9   : > { %v10234_v23 = vpop.eup %7926  ;;  %7946 = vpow2.f32 %v2468_v41  ;;  %7483 = vmatpush3.bf16.msra.mxu0 %v9717_v15  ;;  %v2472_v25 = vmul.f32 1.442695, %v2444_v62  ;;  %v2520_v13 = vmul.f32 1.442695, %v2492_v1 }
 0x3da   : > { %v7929_v10 = vpop.eup %7928  ;;  %v2535_v54 = vadd.f32 %v10234_v23, %v10230_v12  ;;  %7948 = vpow2.f32 %v2516_v9  ;;  %7485 = vmatprep.subr.bf16.mxu0 %v9727_v55 }
 0x3db   : > { %v10240_v18 = vpop.eup %7930  ;;  %7950 = vpow2.f32 %v2474_v7  ;;  %v2564_v38 = vmul.f32 %v7929_v10, %v10195_v48  ;;  %v2794_v36 = vmul.f32 %v7929_v10, %v10199_v5  ;;  %v7087_v51 = vpop.f32.mrb[78].mxu1  ;;  %7515 = vmatpush3.bf16.msra.mxu1 %v9717_v15 }
 0x3dc   : > { %v10245_v11 = vpop.eup %7932  ;;  %7952 = vrcp.f32 %v2535_v54  ;;  %v2431_v32 = vmax.f32 %v10172_v44, %v7087_v51  ;;  %v2407_v27 = vpop.f32.mrb[79].mxu1  ;;  %7517 = vmatprep.subr.bf16.mxu1 %v9727_v55 }
 0x3dd   : > { %v10249_v24 = vpop.eup %7934  ;;  %v2534_v34 = vadd.f32 %v10245_v11, %v10240_v18  ;;  %7954 = vpow2.f32 %v2522_v58  ;;  %7096 = vmatprep.mubr.msk.f32.mxu0 %vm2576_vm1, %v2564_v38  ;;  %7122 = vmatprep.mubr.msk.f32.mxu1 %vm2576_vm1, %v2794_v36  ;;  %v2430_v15 = vmax.f32 %v10174_v61, %v2407_v27 }
 0x3de   : > { %v7937_v48 = vpop.eup %7936  ;;  %7956 = vpow2.f32 %v2472_v25  ;;  %7097 = vmatmul.mubr.msk.f32.gmra.mrb[52].mxu0 %vm2576_vm1, %v2565_v3  ;;  %7123 = vmatmul.mubr.msk.f32.gmra.mrb[84].mxu1 %vm2576_vm1, %v2795_v21  ;;  %v2447_v5 = vsub.f32 %v10172_v44, %v2431_v32  ;;  %v2495_v50 = vsub.f32 %v7087_v51, %v2431_v32 }
 0x3df   : > { %v7939_v30 = vpop.eup %7938  ;;  %7958 = vrcp.f32 %v2534_v34  ;;  %v2537_v49 = vadd.f32 %v7937_v48, %v10249_v24  ;;  %v2446_v45 = vsub.f32 %v10174_v61, %v2430_v15  ;;  %v2494_v47 = vsub.f32 %v2407_v27, %v2430_v15  ;;  %7487 = vmatpush3.bf16.msra.mxu0 %v9727_v55  ;;  %7519 = vmatpush3.bf16.msra.mxu1 %v9727_v55 }
 0x3e0   : > { %v7941_v2 = vpop.eup %7940  ;;  %7960 = vpow2.f32 %v2520_v13  ;;  %v2478_v19 = vmul.f32 1.442695, %v2447_v5  ;;  %v2526_v17 = vmul.f32 1.442695, %v2495_v50  ;;  %7489 = vmatprep.subr.bf16.mxu0 %v9739_v56  ;;  %7521 = vmatprep.subr.bf16.mxu1 %v9739_v56 }
 0x3e1   : > { %v7943_v44 = vpop.eup %7942  ;;  %7962 = vrcp.f32 %v2537_v49  ;;  %v2536_v42 = vadd.f32 %v7941_v2, %v7939_v30  ;;  %v2476_v57 = vmul.f32 1.442695, %v2446_v45  ;;  %v2524_v9 = vmul.f32 1.442695, %v2494_v47 }
 0x3e2   : > { %v7945_v41 = vpop.eup %7944  ;;  %7964 = vpow2.f32 %v2478_v19 }
 0x3e3   : > { %v7947_v61 = vpop.eup %7946  ;;  %7966 = vrcp.f32 %v2536_v42  ;;  %v2539_v37 = vadd.f32 %v7945_v41, %v7943_v44  ;;  %7491 = vmatpush3.bf16.msra.mxu0 %v9739_v56  ;;  %7523 = vmatpush3.bf16.msra.mxu1 %v9739_v56 }
 0x3e4   : > { %v7949_v55 = vpop.eup %7948  ;;  %7968 = vpow2.f32 %v2526_v17  ;;  %7493 = vmatprep.subr.bf16.mxu0 %v9749_v0  ;;  %7525 = vmatprep.subr.bf16.mxu1 %v9749_v0 }
 0x3e5   : > { %v7951_v26 = vpop.eup %7950  ;;  %7970 = vrcp.f32 %v2539_v37  ;;  %v2538_v33 = vadd.f32 %v7949_v55, %v7947_v61 }
 0x3e6   : > { %v7953_v62 = vpop.eup %7952  ;;  %7972 = vpow2.f32 %v2476_v57 }
 0x3e7   : > { %v7955_v1 = vpop.eup %7954  ;;  %7974 = vrcp.f32 %v2538_v33  ;;  %v2567_v3 = vmul.f32 %v7953_v62, %v10230_v12  ;;  %v2797_v7 = vmul.f32 %v7953_v62, %v10234_v23  ;;  %7495 = vmatpush3.bf16.msra.mxu0 %v9749_v0  ;;  %7527 = vmatpush3.bf16.msra.mxu1 %v9749_v0 }
 0x3e8   : > { %v7957_v56 = vpop.eup %7956  ;;  %v2541_v21 = vadd.f32 %v7955_v1, %v7951_v26  ;;  %7976 = vpow2.f32 %v2524_v9  ;;  %7252 = vmatprep.subr.msk.mxu0 %vm2625_vm0, %v10024_v46  ;;  %7278 = vmatprep.subr.msk.mxu1 %vm2625_vm0, %v10024_v46  ;;  %v3035_v9 = vmul.f32 %v9948_v20, %v9813_v40  ;;  %v12115_v40 = vld [vmem:[#allocation78_spill] sm:$0xff] }
 0x3e9   : > { %v7959_v58 = vpop.eup %7958  ;;  %v12123_v20 = vld [vmem:[#allocation82_spill] sm:$0xff] }
 0x3ea   : > { %v7961_v10 = vpop.eup %7960  ;;  %7978 = vrcp.f32 %v2541_v21  ;;  %v2566_v12 = vmul.f32 %v7959_v58, %v10240_v18  ;;  %v2796_v23 = vmul.f32 %v7959_v58, %v10245_v11 }
 0x3eb   : > { %v7963_v54 = vpop.eup %7962  ;;  %v2540_v25 = vadd.f32 %v7961_v10, %v7957_v56 }
 0x3ec   : > { %v7965_v38 = vpop.eup %7964  ;;  %7099 = vmatprep.mubr.msk.f32.mxu0 %vm2576_vm1, %v2566_v12  ;;  %7125 = vmatprep.mubr.msk.f32.mxu1 %vm2576_vm1, %v2796_v23  ;;  %v2569_v0 = vmul.f32 %v7963_v54, %v10249_v24  ;;  %v2799_v36 = vmul.f32 %v7963_v54, %v7937_v48  ;;  %v12135_v23 = vld [vmem:[#allocation108_spill] sm:$0xff] }
 0x3ed   : > { %v7967_v51 = vpop.eup %7966  ;;  %7980 = vrcp.f32 %v2540_v25  ;;  %7100 = vmatmul.mubr.msk.f32.gmra.mrb[54].mxu0 %vm2576_vm1, %v2567_v3  ;;  %7126 = vmatmul.mubr.msk.f32.gmra.mrb[86].mxu1 %vm2576_vm1, %v2797_v7  ;;  %v12133_v7 = vld [vmem:[#allocation110_spill] sm:$0xff] }
 0x3ee   : > { %v7969_v13 = vpop.eup %7968  ;;  %v2568_v18 = vmul.f32 %v7967_v51, %v7939_v30  ;;  %v2798_v32 = vmul.f32 %v7967_v51, %v7941_v2  ;;  %v12136_v51 = vld [vmem:[#allocation93_spill] sm:$0xff] }
 0x3ef   : > { %v7971_v11 = vpop.eup %7970  ;;  %v2543_v27 = vadd.f32 %v7969_v13, %v7965_v38 }
 0x3f0   : > { %v7973_v34 = vpop.eup %7972  ;;  %7102 = vmatprep.mubr.msk.f32.mxu0 %vm2576_vm1, %v2568_v18  ;;  %7128 = vmatprep.mubr.msk.f32.mxu1 %vm2576_vm1, %v2798_v32  ;;  %v2571_v15 = vmul.f32 %v7971_v11, %v7943_v44  ;;  %v2801_v5 = vmul.f32 %v7971_v11, %v7945_v41  ;;  %v12137_v11 = vld [vmem:[#allocation91_spill] sm:$0xff] }
 0x3f1   : > { %v7975_v24 = vpop.eup %7974  ;;  %7982 = vrcp.f32 %v2543_v27  ;;  %7103 = vmatmul.mubr.msk.f32.gmra.mrb[56].mxu0 %vm2576_vm1, %v2569_v0  ;;  %7129 = vmatmul.mubr.msk.f32.gmra.mrb[88].mxu1 %vm2576_vm1, %v2799_v36 }
 0x3f2   : > { %v7977_v48 = vpop.eup %7976  ;;  %v2570_v50 = vmul.f32 %v7975_v24, %v7947_v61  ;;  %v2800_v49 = vmul.f32 %v7975_v24, %v7949_v55  ;;  %v12139_v24 = vld [vmem:[#allocation107_spill] sm:$0xff] }
 0x3f3   : > { %v2542_v30 = vadd.f32 %v7977_v48, %v7973_v34 }
 0x3f4   : > { %v7979_v45 = vpop.eup %7978  ;;  %7105 = vmatprep.mubr.msk.f32.mxu0 %vm2576_vm1, %v2570_v50  ;;  %7131 = vmatprep.mubr.msk.f32.mxu1 %vm2576_vm1, %v2800_v49 }
 0x3f5   : > { %7984 = vrcp.f32 %v2542_v30  ;;  %7106 = vmatmul.mubr.msk.f32.gmra.mrb[58].mxu0 %vm2576_vm1, %v2571_v15  ;;  %7132 = vmatmul.mubr.msk.f32.gmra.mrb[90].mxu1 %vm2576_vm1, %v2801_v5  ;;  %v2573_v47 = vmul.f32 %v7979_v45, %v7951_v26  ;;  %v2803_v2 = vmul.f32 %v7979_v45, %v7955_v1  ;;  %v10344_v26 = vld [vmem:[%s10341_s17] sm:$0xff]   ;;  %v12132_v1 = vld [vmem:[#allocation94_spill] sm:$0xff] }
 0x3f7   : > { %v7981_v19 = vpop.eup %7980 }
 0x3f8   : > { %v2572_v17 = vmul.f32 %v7981_v19, %v7957_v56  ;;  %v2802_v44 = vmul.f32 %v7981_v19, %v7961_v10  ;;  %v12134_v10 = vld [vmem:[#allocation92_spill] sm:$0xff] }
 0x3fa   : > { %7108 = vmatprep.mubr.msk.f32.mxu0 %vm2576_vm1, %v2572_v17  ;;  %7134 = vmatprep.mubr.msk.f32.mxu1 %vm2576_vm1, %v2802_v44  ;;  %v12141_v17 = vld [vmem:[#allocation114_spill] sm:$0xff] }
 0x3fb   : > { %v7983_v42 = vpop.eup %7982  ;;  %7109 = vmatmul.mubr.msk.f32.gmra.mrb[60].mxu0 %vm2576_vm1, %v2573_v47  ;;  %7135 = vmatmul.mubr.msk.f32.gmra.mrb[92].mxu1 %vm2576_vm1, %v2803_v2  ;;  %v12140_v2 = vld [vmem:[#allocation98_spill] sm:$0xff] }
 0x3fc   : > { %v2575_v41 = vmul.f32 %v7983_v42, %v7965_v38  ;;  %v2805_v57 = vmul.f32 %v7983_v42, %v7969_v13 }
 0x3ff   : > { %v7985_v61 = vpop.eup %7984 }
 0x400   : > { %v2574_v37 = vmul.f32 %v7985_v61, %v7973_v34  ;;  %v2804_v55 = vmul.f32 %v7985_v61, %v7977_v48  ;;  %v12138_v34 = vld [vmem:[#allocation109_spill] sm:$0xff] }
 0x402   : > { %7111 = vmatprep.mubr.msk.f32.mxu0 %vm2576_vm1, %v2574_v37  ;;  %7137 = vmatprep.mubr.msk.f32.mxu1 %vm2576_vm1, %v2804_v55  ;;  %v12143_v37 = vld [vmem:[#allocation112_spill] sm:$0xff] }
 0x403   : > { %7112 = vmatmul.mubr.msk.f32.gmra.mrb[62].mxu0 %vm2576_vm1, %v2575_v41  ;;  %7138 = vmatmul.mubr.msk.f32.gmra.mrb[94].mxu1 %vm2576_vm1, %v2805_v57  ;;  %v12142_v57 = vld [vmem:[#allocation96_spill] sm:$0xff] }
 0x404   : > { %7172 = vmatprep.mubr.f32.mxu0 %v9918_v53  ;;  %7228 = vmatprep.mubr.f32.mxu1 %v9922_v29  ;;  %v3037_v29 = vmul.f32 %v9980_v4, %v9833_v8  ;;  %v3038_v53 = vmul.f32 %v9984_v31, %v9842_v39  ;;  %v12119_v8 = vld [vmem:[#allocation77_spill] sm:$0xff]  ;;  %v12124_v39 = vld [vmem:[#allocation83_spill] sm:$0xff]  ;;  %v12129_v31 = vld [vmem:[#allocation88_spill] sm:$0xff] }
 0x405   : > { %v12128_v4 = vld [vmem:[#allocation87_spill] sm:$0xff] }
 0x407   : > { %7173 = vmatmul.mubr.f32.vlgmr.msra.gmra.mrb[64].mxu0 %v9926_v22  ;;  %7229 = vmatmul.mubr.f32.vlgmr.msra.gmra.mrb[96].mxu1 %v9929_v16  ;;  %v3036_v16 = vmul.f32 %v9952_v14, %v9822_v35  ;;  %v12116_v22 = vld [vmem:[#allocation74_spill] sm:$0xff]  ;;  %v12118_v35 = vld [vmem:[#allocation76_spill] sm:$0xff] }
 0x408   : > { %7175 = vmatprep.mubr.f32.mxu0 %v9934_v60  ;;  %7231 = vmatprep.mubr.f32.mxu1 %v9938_v28  ;;  %v12117_v60 = vld [vmem:[#allocation75_spill] sm:$0xff]  ;;  %v12125_v14 = vld [vmem:[#allocation84_spill] sm:$0xff] }
 0x409   : > { %7253 = vmatpush3.msk.msra.mxu0 %vm2625_vm0, %v10024_v46  ;;  %7279 = vmatpush3.msk.msra.mxu1 %vm2625_vm0, %v10024_v46  ;;  %v12120_v28 = vld [vmem:[#allocation79_spill] sm:$0xff]  ;;  %v12131_v46 = vld [vmem:[#allocation90_spill] sm:$0xff] }
 0x40a   : > { %7304 = vmatprep.subr.bf16.mxu0 %v10344_v26 }
 0x40b   : > { %7176 = vmatmul.mubr.f32.gmra.mrb[66].mxu0 %v9942_v63  ;;  %7232 = vmatmul.mubr.f32.gmra.mrb[98].mxu1 %v9945_v52  ;;  %v12121_v63 = vld [vmem:[#allocation80_spill] sm:$0xff]  ;;  %v12122_v52 = vld [vmem:[#allocation81_spill] sm:$0xff] }
 0x40c   : > { %7178 = vmatprep.mubr.f32.mxu0 %v3035_v9  ;;  %7234 = vmatprep.mubr.f32.mxu1 %v9956_v59  ;;  %v12126_v59 = vld [vmem:[#allocation85_spill] sm:$0xff] }
 0x40f   : > { %7179 = vmatmul.mubr.f32.gmra.mrb[68].mxu0 %v3036_v16  ;;  %7235 = vmatmul.mubr.f32.gmra.mrb[100].mxu1 %v9962_v6  ;;  %v12127_v6 = vld [vmem:[#allocation86_spill] sm:$0xff] }
 0x410   : > { %7181 = vmatprep.mubr.f32.mxu0 %v3037_v29  ;;  %7237 = vmatprep.mubr.f32.mxu1 %v9988_v43  ;;  %v12130_v43 = vld [vmem:[#allocation89_spill] sm:$0xff] }
 0x413   : > { %7182 = vmatmul.mubr.f32.gmra.mrb[70].mxu0 %v3038_v53  ;;  %7238 = vmatmul.mubr.f32.gmra.mrb[102].mxu1 %v12115_v40 }
 0x414   : > { %7184 = vmatprep.mubr.f32.mxu0 %v12116_v22  ;;  %7240 = vmatprep.mubr.f32.mxu1 %v12117_v60  ;;  %v12144_v22 = vld [vmem:[#allocation97_spill] sm:$0xff] }
 0x417   : > { %7185 = vmatmul.mubr.f32.gmra.mrb[72].mxu0 %v12118_v35  ;;  %7241 = vmatmul.mubr.f32.gmra.mrb[104].mxu1 %v12119_v8  ;;  %v12145_v35 = vld [vmem:[#allocation113_spill] sm:$0xff] }
 0x418   : > { %7187 = vmatprep.mubr.f32.mxu0 %v12120_v28  ;;  %7243 = vmatprep.mubr.f32.mxu1 %v12121_v63 }
 0x41b   : > { %7188 = vmatmul.mubr.f32.gmra.mrb[74].mxu0 %v12122_v52  ;;  %7244 = vmatmul.mubr.f32.gmra.mrb[106].mxu1 %v12123_v20  ;;  %v12146_v52 = vld [vmem:[#allocation95_spill] sm:$0xff] }
 0x41c   : > { %7190 = vmatprep.mubr.f32.mxu0 %v12124_v39  ;;  %7246 = vmatprep.mubr.f32.mxu1 %v12125_v14  ;;  %v12147_v39 = vld [vmem:[#allocation111_spill] sm:$0xff] }
 0x41f   : > { %7191 = vmatmul.mubr.f32.gmra.mrb[76].mxu0 %v12126_v59  ;;  %7247 = vmatmul.mubr.f32.gmra.mrb[108].mxu1 %v12127_v6 }
 0x420   : > { %7193 = vmatprep.mubr.f32.mxu0 %v12128_v4  ;;  %7249 = vmatprep.mubr.f32.mxu1 %v12129_v31 }
 0x423   : > { %7194 = vmatmul.mubr.f32.gmra.mrb[78].mxu0 %v12130_v43  ;;  %7250 = vmatmul.mubr.f32.gmra.mrb[110].mxu1 %v12131_v46  ;;  %v12148_v43 = vld [vmem:[#allocation102_spill] sm:$0xff] }
 0x49b   : > { %v7092_v33 = vpop.f32.mrb[48].mxu0  ;;  %v7118_v62 = vpop.f32.mrb[80].mxu1 }
 0x49c   : > { %v2775_v3 = vmul.f32 %v7092_v33, %v12132_v1  ;;  %v3000_v56 = vmul.f32 %v7118_v62, %v12133_v7  ;;  %v2695_v21 = vpop.f32.mrb[49].mxu0  ;;  %v2920_v58 = vpop.f32.mrb[81].mxu1  ;;  %v12149_v33 = vld [vmem:[#allocation118_spill] sm:$0xff] }
 0x49d   : > { %v2774_v12 = vmul.f32 %v2695_v21, %v12134_v10  ;;  %v2999_v54 = vmul.f32 %v2920_v58, %v12135_v23  ;;  %v12150_v21 = vld [vmem:[#allocation100_spill] sm:$0xff] }
 0x49e   : > { %v10351_v25 = vadd.f32 %v3000_v56, %v2775_v3 }
 0x49f   : > { %v10353_v38 = vadd.f32 %v2999_v54, %v2774_v12  ;;  %v12151_v12 = vld [vmem:[#allocation116_spill] sm:$0xff] }
 0x4a3   : > { %v7095_v36 = vpop.f32.mrb[50].mxu0 }
 0x4a4   : > { %v2777_v13 = vmul.f32 %v7095_v36, %v12136_v51  ;;  %v2705_v18 = vpop.f32.mrb[51].mxu0 }
 0x4a5   : > { %v7121_v32 = vpop.f32.mrb[82].mxu1  ;;  %v2776_v27 = vmul.f32 %v2705_v18, %v12137_v11 }
 0x4a6   : > { %v3002_v15 = vmul.f32 %v7121_v32, %v12138_v34  ;;  %v2930_v5 = vpop.f32.mrb[83].mxu1 }
 0x4a7   : > { %v3001_v48 = vmul.f32 %v2930_v5, %v12139_v24 }
 0x4a8   : > { %v10361_v50 = vadd.f32 %v3002_v15, %v2777_v13  ;;  %v12152_v15 = vld [vmem:[#allocation101_spill] sm:$0xff] }
 0x4a9   : > { %v10363_v49 = vadd.f32 %v3001_v48, %v2776_v27  ;;  %v12153_v48 = vld [vmem:[#allocation117_spill] sm:$0xff] }
 0x4b1   : > { %v7098_v45 = vpop.f32.mrb[52].mxu0  ;;  %v7124_v47 = vpop.f32.mrb[84].mxu1 }
 0x4b2   : > { %v2779_v19 = vmul.f32 %v7098_v45, %v12140_v2  ;;  %v3004_v44 = vmul.f32 %v7124_v47, %v12141_v17  ;;  %v2715_v42 = vpop.f32.mrb[53].mxu0  ;;  %v2940_v41 = vpop.f32.mrb[85].mxu1 }
 0x4b3   : > { %v2778_v61 = vmul.f32 %v2715_v42, %v12142_v57  ;;  %v3003_v55 = vmul.f32 %v2940_v41, %v12143_v37  ;;  %v12155_v41 = vld [vmem:[#allocation115_spill] sm:$0xff] }
 0x4b4   : > { %v10371_v9 = vadd.f32 %v3004_v44, %v2779_v19  ;;  %v12154_v44 = vld [vmem:[#allocation99_spill] sm:$0xff] }
 0x4b5   : > { %v10373_v16 = vadd.f32 %v3003_v55, %v2778_v61 }
 0x4c0   : > { %v7101_v53 = vpop.f32.mrb[54].mxu0  ;;  %v7127_v40 = vpop.f32.mrb[86].mxu1 }
 0x4c1   : > { %v2781_v60 = vmul.f32 %v7101_v53, %v12144_v22  ;;  %v3006_v8 = vmul.f32 %v7127_v40, %v12145_v35  ;;  %v2725_v28 = vpop.f32.mrb[55].mxu0  ;;  %v2950_v63 = vpop.f32.mrb[87].mxu1 }
 0x4c2   : > { %v2780_v20 = vmul.f32 %v2725_v28, %v12146_v52  ;;  %v3005_v14 = vmul.f32 %v2950_v63, %v12147_v39  ;;  %v12156_v63 = vld [vmem:[#allocation106_spill] sm:$0xff]  ;;  %v12162_v28 = vld [vmem:[#allocation103_spill] sm:$0xff] }
 0x4c3   : > { %v10381_v59 = vadd.f32 %v3006_v8, %v2781_v60 }
 0x4c4   : > { %v10383_v6 = vadd.f32 %v3005_v14, %v2780_v20  ;;  %v7104_v4 = vpop.f32.mrb[56].mxu0  ;;  %v7130_v31 = vpop.f32.mrb[88].mxu1  ;;  %v12157_v14 = vld [vmem:[#allocation122_spill] sm:$0xff] }
 0x4c5   : > { %v2783_v46 = vmul.f32 %v7104_v4, %v12148_v43  ;;  %v3008_v62 = vmul.f32 %v7130_v31, %v12149_v33  ;;  %v2735_v3 = vpop.f32.mrb[57].mxu0  ;;  %v2960_v56 = vpop.f32.mrb[89].mxu1 }
 0x4c6   : > { %v2782_v58 = vmul.f32 %v2735_v3, %v12150_v21  ;;  %v3007_v54 = vmul.f32 %v2960_v56, %v12151_v12  ;;  %v12159_v56 = vld [vmem:[#allocation120_spill] sm:$0xff] }
 0x4c7   : > { %v10391_v13 = vadd.f32 %v3008_v62, %v2783_v46  ;;  %v12158_v62 = vld [vmem:[#allocation104_spill] sm:$0xff] }
 0x4c8   : > { %v10393_v18 = vadd.f32 %v3007_v54, %v2782_v58  ;;  %v7107_v32 = vpop.f32.mrb[58].mxu0  ;;  %v7133_v27 = vpop.f32.mrb[90].mxu1 }
 0x4c9   : > { %v2785_v5 = vmul.f32 %v7107_v32, %v12152_v15  ;;  %v3010_v45 = vmul.f32 %v7133_v27, %v12153_v48  ;;  %v2745_v47 = vpop.f32.mrb[59].mxu0  ;;  %v2970_v19 = vpop.f32.mrb[91].mxu1 }
 0x4ca   : > { %v2784_v42 = vmul.f32 %v2745_v47, %v12154_v44  ;;  %v3009_v61 = vmul.f32 %v2970_v19, %v12155_v41  ;;  %v12160_v47 = vld [vmem:[#allocation105_spill] sm:$0xff] }
 0x4cb   : > { %v10401_v53 = vadd.f32 %v3010_v45, %v2785_v5 }
 0x4cc   : > { %v10403_v40 = vadd.f32 %v3009_v61, %v2784_v42  ;;  %v12161_v42 = vld [vmem:[#allocation121_spill] sm:$0xff] }
 0x4ce   : > { %v7110_v60 = vpop.f32.mrb[60].mxu0  ;;  %v7136_v8 = vpop.f32.mrb[92].mxu1 }
 0x4cf   : > { %v2787_v20 = vmul.f32 %v7110_v60, %v12156_v63  ;;  %v3012_v4 = vmul.f32 %v7136_v8, %v12157_v14  ;;  %v2755_v31 = vpop.f32.mrb[61].mxu0  ;;  %v2980_v46 = vpop.f32.mrb[93].mxu1 }
 0x4d0   : > { %v2786_v3 = vmul.f32 %v2755_v31, %v12158_v62  ;;  %v3011_v58 = vmul.f32 %v2980_v46, %v12159_v56  ;;  %v12163_v31 = vld [vmem:[#allocation119_spill] sm:$0xff] }
 0x4d1   : > { %v10411_v54 = vadd.f32 %v3012_v4, %v2787_v20 }
 0x4d2   : > { %v10413_v32 = vadd.f32 %v3011_v58, %v2786_v3 }
 0x4d6   : > { %v7113_v5 = vpop.f32.mrb[62].mxu0  ;;  %v7139_v45 = vpop.f32.mrb[94].mxu1 }
 0x4d7   : > { %v2789_v19 = vmul.f32 %v7113_v5, %v12160_v47  ;;  %v3014_v61 = vmul.f32 %v7139_v45, %v12161_v42  ;;  %v2765_v60 = vpop.f32.mrb[63].mxu0  ;;  %v2990_v8 = vpop.f32.mrb[95].mxu1 }
 0x4d8   : > { %v2788_v55 = vmul.f32 %v2765_v60, %v12162_v28  ;;  %v3013_v36 = vmul.f32 %v2990_v8, %v12163_v31 }
 0x4d9   : > { %v10421_v46 = vadd.f32 %v3014_v61, %v2789_v19 }
 0x4da   : > { %v10423_v20 = vadd.f32 %v3013_v36, %v2788_v55  ;;  %v7174_v4 = vpop.f32.mrb[64].mxu0  ;;  %v7230_v3 = vpop.f32.mrb[96].mxu1 }
 0x4db   : > { %v3354_v58 = vmax.f32 %v7174_v4, %v7230_v3  ;;  %v3113_v27 = vpop.f32.mrb[65].mxu0  ;;  %v3274_v29 = vpop.f32.mrb[97].mxu1 }
 0x4dc   : > { %v3353_v30 = vmax.f32 %v3113_v27, %v3274_v29 }
 0x4dd   : > { %v3370_v45 = vsub.f32 %v7174_v4, %v3354_v58  ;;  %v3418_v0 = vsub.f32 %v7230_v3, %v3354_v58 }
 0x4de   : > { %v3369_v42 = vsub.f32 %v3113_v27, %v3353_v30  ;;  %v3417_v47 = vsub.f32 %v3274_v29, %v3353_v30  ;;  %v7177_v60 = vpop.f32.mrb[66].mxu0  ;;  %v7233_v28 = vpop.f32.mrb[98].mxu1 }
 0x4df   : > { %v3387_v8 = vmul.f32 1.442695, %v3370_v45  ;;  %v3435_v19 = vmul.f32 1.442695, %v3418_v0  ;;  %v3356_v61 = vmax.f32 %v7177_v60, %v7233_v28  ;;  %v3123_v36 = vpop.f32.mrb[67].mxu0  ;;  %v3284_v55 = vpop.f32.mrb[99].mxu1 }
 0x4e0   : > { %v3385_v31 = vmul.f32 1.442695, %v3369_v42  ;;  %v3433_v56 = vmul.f32 1.442695, %v3417_v47  ;;  %v3355_v62 = vmax.f32 %v3123_v36, %v3284_v55 }
 0x4e1   : > { %7986 = vpow2.f32 %v3387_v8  ;;  %v3372_v14 = vsub.f32 %v7177_v60, %v3356_v61  ;;  %v3420_v63 = vsub.f32 %v7233_v28, %v3356_v61 }
 0x4e2   : > { %7988 = vpow2.f32 %v3435_v19  ;;  %v3371_v41 = vsub.f32 %v3123_v36, %v3355_v62  ;;  %v3419_v5 = vsub.f32 %v3284_v55, %v3355_v62  ;;  %v7180_v4 = vpop.f32.mrb[68].mxu0  ;;  %v7236_v3 = vpop.f32.mrb[100].mxu1 }
 0x4e3   : > { %7990 = vpow2.f32 %v3385_v31  ;;  %v3391_v30 = vmul.f32 1.442695, %v3372_v14  ;;  %v3439_v29 = vmul.f32 1.442695, %v3420_v63  ;;  %v3358_v27 = vmax.f32 %v7180_v4, %v7236_v3  ;;  %v3133_v58 = vpop.f32.mrb[69].mxu0  ;;  %v3294_v0 = vpop.f32.mrb[101].mxu1 }
 0x4e4   : > { %7992 = vpow2.f32 %v3433_v56  ;;  %v3389_v45 = vmul.f32 1.442695, %v3371_v41  ;;  %v3437_v44 = vmul.f32 1.442695, %v3419_v5  ;;  %v3357_v42 = vmax.f32 %v3133_v58, %v3294_v0 }
 0x4e5   : > { %7994 = vpow2.f32 %v3391_v30  ;;  %v3374_v47 = vsub.f32 %v7180_v4, %v3358_v27  ;;  %v3422_v8 = vsub.f32 %v7236_v3, %v3358_v27 }
 0x4e6   : > { %7996 = vpow2.f32 %v3439_v29  ;;  %v3373_v28 = vsub.f32 %v3133_v58, %v3357_v42  ;;  %v3421_v60 = vsub.f32 %v3294_v0, %v3357_v42  ;;  %v7183_v19 = vpop.f32.mrb[70].mxu0  ;;  %v7239_v62 = vpop.f32.mrb[102].mxu1 }
 0x4e7   : > { %7998 = vpow2.f32 %v3389_v45  ;;  %v3395_v61 = vmul.f32 1.442695, %v3374_v47  ;;  %v3443_v31 = vmul.f32 1.442695, %v3422_v8  ;;  %v3360_v14 = vmax.f32 %v7183_v19, %v7239_v62  ;;  %v3143_v63 = vpop.f32.mrb[71].mxu0  ;;  %v3304_v36 = vpop.f32.mrb[103].mxu1 }
 0x4e8   : > { %8000 = vpow2.f32 %v3437_v44  ;;  %v3393_v55 = vmul.f32 1.442695, %v3373_v28  ;;  %v3441_v56 = vmul.f32 1.442695, %v3421_v60  ;;  %v3359_v41 = vmax.f32 %v3143_v63, %v3304_v36 }
 0x4e9   : > { %8002 = vpow2.f32 %v3395_v61  ;;  %v3376_v5 = vsub.f32 %v7183_v19, %v3360_v14  ;;  %v3424_v30 = vsub.f32 %v7239_v62, %v3360_v14 }
 0x4ea   : > { %8004 = vpow2.f32 %v3443_v31  ;;  %v3375_v4 = vsub.f32 %v3143_v63, %v3359_v41  ;;  %v3423_v3 = vsub.f32 %v3304_v36, %v3359_v41  ;;  %v7186_v29 = vpop.f32.mrb[72].mxu0  ;;  %v7242_v27 = vpop.f32.mrb[104].mxu1 }
 0x4eb   : > { %v10427_v58 = vpop.eup %7986  ;;  %8006 = vpow2.f32 %v3393_v55  ;;  %v3399_v0 = vmul.f32 1.442695, %v3376_v5  ;;  %v3447_v45 = vmul.f32 1.442695, %v3424_v30  ;;  %v3362_v42 = vmax.f32 %v7186_v29, %v7242_v27  ;;  %v3153_v47 = vpop.f32.mrb[73].mxu0 }
 0x4ec   : > { %v3314_v8 = vpop.f32.mrb[105].mxu1  ;;  %v10429_v44 = vpop.eup %7988  ;;  %8008 = vpow2.f32 %v3441_v56  ;;  %v3397_v28 = vmul.f32 1.442695, %v3375_v4  ;;  %v3445_v63 = vmul.f32 1.442695, %v3423_v3 }
 0x4ed   : > { %v3361_v60 = vmax.f32 %v3153_v47, %v3314_v8  ;;  %v10431_v19 = vpop.eup %7990  ;;  %v3466_v62 = vadd.f32 %v10429_v44, %v10427_v58  ;;  %8010 = vpow2.f32 %v3399_v0  ;;  %v3378_v61 = vsub.f32 %v7186_v29, %v3362_v42 }
 0x4ee   : > { %v3426_v31 = vsub.f32 %v7242_v27, %v3362_v42  ;;  %v10435_v14 = vpop.eup %7992  ;;  %8012 = vpow2.f32 %v3447_v45  ;;  %v7189_v41 = vpop.f32.mrb[74].mxu0 }
 0x4ef   : > { %v3377_v36 = vsub.f32 %v3153_v47, %v3361_v60  ;;  %v3425_v55 = vsub.f32 %v3314_v8, %v3361_v60  ;;  %v7245_v5 = vpop.f32.mrb[106].mxu1  ;;  %v10437_v30 = vpop.eup %7994  ;;  %8014 = vrcp.f32 %v3466_v62  ;;  %v3465_v56 = vadd.f32 %v10435_v14, %v10431_v19 }
 0x4f0   : > { %v3163_v4 = vpop.f32.mrb[75].mxu0  ;;  %v3324_v48 = vpop.f32.mrb[107].mxu1  ;;  %8016 = vpow2.f32 %v3397_v28  ;;  %v3403_v29 = vmul.f32 1.442695, %v3378_v61  ;;  %v3364_v27 = vmax.f32 %v7189_v41, %v7245_v5  ;;  %v3451_v47 = vmul.f32 1.442695, %v3426_v31 }
 0x4f1   : > { %v10441_v15 = vpop.eup %7996  ;;  %8018 = vrcp.f32 %v3465_v56  ;;  %v3363_v45 = vmax.f32 %v3163_v4, %v3324_v48  ;;  %v3401_v31 = vmul.f32 1.442695, %v3377_v36 }
 0x4f2   : > { %v10443_v0 = vpop.eup %7998  ;;  %v3468_v3 = vadd.f32 %v10441_v15, %v10437_v30  ;;  %8020 = vpow2.f32 %v3445_v63  ;;  %v3380_v8 = vsub.f32 %v7189_v41, %v3364_v27  ;;  %v3428_v60 = vsub.f32 %v7245_v5, %v3364_v27  ;;  %v7192_v62 = vpop.f32.mrb[76].mxu0 }
 0x4f3   : > { %v10447_v42 = vpop.eup %8000  ;;  %v7248_v12 = vpop.f32.mrb[108].mxu1  ;;  %v3379_v61 = vsub.f32 %v3163_v4, %v3363_v45  ;;  %v3427_v56 = vsub.f32 %v3324_v48, %v3363_v45  ;;  %v3449_v27 = vmul.f32 1.442695, %v3425_v55 }
 0x4f4   : > { %v10449_v21 = vpop.eup %8002  ;;  %8022 = vrcp.f32 %v3468_v3  ;;  %v3467_v28 = vadd.f32 %v10447_v42, %v10443_v0  ;;  %v10453_v33 = vpop.f32.mrb[77].mxu0  ;;  %v3366_v63 = vmax.f32 %v7192_v62, %v7248_v12  ;;  %v3455_v35 = vmul.f32 1.442695, %v3428_v60 }
 0x4f5   : > { %v10455_v43 = vpop.f32.mrb[109].mxu1  ;;  %v10457_v39 = vpop.eup %8004  ;;  %8024 = vpow2.f32 %v3403_v29  ;;  %v3453_v60 = vmul.f32 1.442695, %v3427_v56 }
 0x4f6   : > { %v10459_v41 = vpop.eup %8006  ;;  %8026 = vrcp.f32 %v3467_v28  ;;  %v3470_v5 = vadd.f32 %v10457_v39, %v10449_v21  ;;  %v3382_v48 = vsub.f32 %v7192_v62, %v3366_v63  ;;  %v3430_v4 = vsub.f32 %v7248_v12, %v3366_v63  ;;  %v10467_v52 = vpop.f32.mrb[78].mxu0 }
 0x4f7   : > { %v10463_v3 = vpop.eup %8008  ;;  %8028 = vpow2.f32 %v3451_v47  ;;  %v3365_v45 = vmax.f32 %v10453_v33, %v10455_v43  ;;  %v10469_v29 = vpop.f32.mrb[110].mxu1  ;;  %v3407_v63 = vmul.f32 1.442695, %v3380_v8  ;;  %v3405_v8 = vmul.f32 1.442695, %v3379_v61 }
 0x4f8   : > { %v10471_v36 = vpop.eup %8010  ;;  %8030 = vrcp.f32 %v3470_v5  ;;  %v3469_v28 = vadd.f32 %v10463_v3, %v10459_v41  ;;  %v10477_v55 = vmax.f32 %v10467_v52, %v10469_v29  ;;  %v10479_v47 = vpop.f32.mrb[79].mxu0  ;;  %v3411_v61 = vmul.f32 1.442695, %v3382_v48 }
 0x4f9   : > { %v10481_v12 = vpop.f32.mrb[111].mxu1  ;;  %v10483_v62 = vpop.eup %8012  ;;  %8032 = vpow2.f32 %v3401_v31  ;;  %v3381_v22 = vsub.f32 %v10453_v33, %v3365_v45  ;;  %v3429_v57 = vsub.f32 %v10455_v43, %v3365_v45  ;;  %v3459_v56 = vmul.f32 1.442695, %v3430_v4 }
 0x4fa   : > { %v8015_v37 = vpop.eup %8014  ;;  %8034 = vrcp.f32 %v3469_v28  ;;  %v3472_v5 = vadd.f32 %v10483_v62, %v10471_v36  ;;  %v3384_v17 = vsub.f32 %v10467_v52, %v10477_v55  ;;  %v3432_v28 = vsub.f32 %v10469_v29, %v10477_v55 }
 0x4fb   : > { %v10491_v2 = vpop.eup %8016  ;;  %v3498_v24 = vmul.f32 %v8015_v37, %v10427_v58  ;;  %v3723_v31 = vmul.f32 %v8015_v37, %v10429_v44  ;;  %8036 = vpow2.f32 %v3449_v27  ;;  %v10501_v52 = vmax.f32 %v10479_v47, %v10481_v12  ;;  %v7779_v27 = vld [vmem:[%s10341_s17 + $0x8] sm:$0xff]  }
 0x4fc   : > { %v8019_v33 = vpop.eup %8018  ;;  %8038 = vrcp.f32 %v3472_v5  ;;  %v3409_v4 = vmul.f32 1.442695, %v3381_v22  ;;  %v7780_v5 = vld [vmem:[%s10341_s17 + $0x10] sm:$0xff]  }
 0x4fd   : > { %v10497_v11 = vpop.eup %8020  ;;  %8040 = vpow2.f32 %v3407_v63  ;;  %v3497_v43 = vmul.f32 %v8019_v33, %v10431_v19  ;;  %v3722_v37 = vmul.f32 %v8019_v33, %v10435_v14  ;;  %v3383_v29 = vsub.f32 %v10479_v47, %v10501_v52 }
 0x4fe   : > { %v8023_v58 = vpop.eup %8022  ;;  %v3471_v44 = vadd.f32 %v10497_v11, %v10491_v2  ;;  %8042 = vpow2.f32 %v3455_v35  ;;  %v3431_v55 = vsub.f32 %v10481_v12, %v10501_v52  ;;  %v3457_v63 = vmul.f32 1.442695, %v3429_v57 }
 0x4ff   : > { %v10508_v45 = vpop.eup %8024  ;;  %8044 = vpow2.f32 %v3405_v8  ;;  %7254 = vmatprep.mubr.msk.f32.mxu0 %vm2576_vm1, %v3497_v43  ;;  %7280 = vmatprep.mubr.msk.f32.mxu1 %vm2576_vm1, %v3722_v37  ;;  %v3500_v19 = vmul.f32 %v8023_v58, %v10437_v30  ;;  %v3725_v35 = vmul.f32 %v8023_v58, %v10441_v15  ;;  %v3415_v15 = vmul.f32 1.442695, %v3384_v17 }
 0x500   : > { %v8027_v14 = vpop.eup %8026  ;;  %8046 = vrcp.f32 %v3471_v44  ;;  %7255 = vmatmul.mubr.msk.f32.vlgmr.msra.gmra.mrb[80].mxu0 %vm2576_vm1, %v3498_v24  ;;  %7281 = vmatmul.mubr.msk.f32.vlgmr.msra.gmra.mrb[112].mxu1 %vm2576_vm1, %v3723_v31  ;;  %v3413_v33 = vmul.f32 1.442695, %v3383_v29  ;;  %v7782_v29 = vld [vmem:[%s10341_s17 + $0x20] sm:$0xff]  }
 0x501   : > { %v10520_v48 = vpop.eup %8028  ;;  %8048 = vpow2.f32 %v3453_v60  ;;  %7305 = vmatpush3.bf16.msra.mxu0 %v10344_v26  ;;  %v3499_v47 = vmul.f32 %v8027_v14, %v10443_v0  ;;  %v3724_v24 = vmul.f32 %v8027_v14, %v10447_v42  ;;  %v3463_v42 = vmul.f32 1.442695, %v3432_v28  ;;  %v7781_v60 = vld [vmem:[%s10341_s17 + $0x18] sm:$0xff]  }
 0x502   : > { %v8031_v12 = vpop.eup %8030  ;;  %v3474_v30 = vadd.f32 %v10520_v48, %v10508_v45  ;;  %8050 = vpow2.f32 %v3411_v61  ;;  %7306 = vmatprep.subr.bf16.mxu0 %v7779_v27 }
 0x503   : > { %v10528_v31 = vpop.eup %8032  ;;  %8052 = vpow2.f32 %v3459_v56  ;;  %7257 = vmatprep.mubr.msk.f32.mxu0 %vm2576_vm1, %v3499_v47  ;;  %v3502_v26 = vmul.f32 %v8031_v12, %v10449_v21  ;;  %v3727_v22 = vmul.f32 %v8031_v12, %v10457_v39  ;;  %7283 = vmatprep.mubr.msk.f32.mxu1 %vm2576_vm1, %v3724_v24  ;;  %v7783_v47 = vld [vmem:[%s10341_s17 + $0x28] sm:$0xff]  }
 0x504   : > { %v8035_v0 = vpop.eup %8034  ;;  %8054 = vrcp.f32 %v3474_v30  ;;  %7258 = vmatmul.mubr.msk.f32.gmra.mrb[82].mxu0 %vm2576_vm1, %v3500_v19  ;;  %7284 = vmatmul.mubr.msk.f32.gmra.mrb[114].mxu1 %vm2576_vm1, %v3725_v35 }
 0x505   : > { %v8037_v57 = vpop.eup %8036  ;;  %8056 = vpow2.f32 %v3409_v4  ;;  %7307 = vmatpush3.bf16.msra.mxu0 %v7779_v27  ;;  %v3501_v17 = vmul.f32 %v8035_v0, %v10459_v41  ;;  %v3726_v8 = vmul.f32 %v8035_v0, %v10463_v3  ;;  %v3461_v3 = vmul.f32 1.442695, %v3431_v55 }
 0x506   : > { %v8039_v21 = vpop.eup %8038  ;;  %v3473_v39 = vadd.f32 %v8037_v57, %v10528_v31  ;;  %8058 = vpow2.f32 %v3457_v63  ;;  %7308 = vmatprep.subr.bf16.mxu0 %v7780_v5 }
 0x507   : > { %v8041_v52 = vpop.eup %8040  ;;  %8060 = vpow2.f32 %v3415_v15  ;;  %7260 = vmatprep.mubr.msk.f32.mxu0 %vm2576_vm1, %v3501_v17  ;;  %7286 = vmatprep.mubr.msk.f32.mxu1 %vm2576_vm1, %v3726_v8  ;;  %v3504_v28 = vmul.f32 %v8039_v21, %v10471_v36  ;;  %v3729_v43 = vmul.f32 %v8039_v21, %v10483_v62 }
 0x508   : > { %v8043_v41 = vpop.eup %8042  ;;  %8062 = vrcp.f32 %v3473_v39  ;;  %7261 = vmatmul.mubr.msk.f32.gmra.mrb[84].mxu0 %vm2576_vm1, %v3502_v26  ;;  %7287 = vmatmul.mubr.msk.f32.gmra.mrb[116].mxu1 %vm2576_vm1, %v3727_v22 }
 0x509   : > { %v8045_v37 = vpop.eup %8044  ;;  %v3476_v58 = vadd.f32 %v8043_v41, %v8041_v52  ;;  %8064 = vpow2.f32 %v3463_v42  ;;  %7309 = vmatpush3.bf16.msra.mxu0 %v7780_v5 }
 0x50a   : > { %v8047_v44 = vpop.eup %8046  ;;  %8066 = vpow2.f32 %v3413_v33  ;;  %7310 = vmatprep.subr.bf16.mxu0 %v7781_v60  ;;  %v7785_v33 = vld [vmem:[%s10341_s17 + $0x38] sm:$0xff]  }
 0x50b   : > { %v8049_v61 = vpop.eup %8048  ;;  %8068 = vrcp.f32 %v3476_v58  ;;  %v3503_v36 = vmul.f32 %v8047_v44, %v10491_v2  ;;  %v3728_v62 = vmul.f32 %v8047_v44, %v10497_v11 }
 0x50c   : > { %v8051_v56 = vpop.eup %8050  ;;  %v3475_v27 = vadd.f32 %v8049_v61, %v8045_v37  ;;  %8070 = vpow2.f32 %v3461_v3 }
 0x50d   : > { %v8053_v55 = vpop.eup %8052  ;;  %7263 = vmatprep.mubr.msk.f32.mxu0 %vm2576_vm1, %v3503_v36  ;;  %7289 = vmatprep.mubr.msk.f32.mxu1 %vm2576_vm1, %v3728_v62  ;;  %v12164_v62 = vpack.c.bf16 %v10351_v25, %v10353_v38  ;;  %v12170_v25 = vpack.c.bf16 %v10401_v53, %v10403_v40  ;;  %v12171_v38 = vpack.c.bf16 %v10411_v54, %v10413_v32 }
 0x50e   : > { %v8055_v19 = vpop.eup %8054  ;;  %8072 = vrcp.f32 %v3475_v27  ;;  %v3478_v14 = vadd.f32 %v8053_v55, %v8051_v56  ;;  %7264 = vmatmul.mubr.msk.f32.gmra.mrb[86].mxu0 %vm2576_vm1, %v3504_v28  ;;  %7290 = vmatmul.mubr.msk.f32.gmra.mrb[118].mxu1 %vm2576_vm1, %v3729_v43  ;;  %v12166_v27 = vpack.c.bf16 %v10361_v50, %v10363_v49  ;;  %v12172_v50 = vpack.c.bf16 %v10421_v46, %v10423_v20  ;;  %v7786_v49 = vld [vmem:[%s10601_s11] ss:$8 sps:$4 sm:$0xff]  }
 0x50f   : > { %v8057_v2 = vpop.eup %8056  ;;  %7311 = vmatpush3.bf16.msra.mxu0 %v7781_v60  ;;  %v3506_v11 = vmul.f32 %v8055_v19, %v10508_v45  ;;  %v3731_v35 = vmul.f32 %v8055_v19, %v10520_v48  ;;  %v7784_v45 = vld [vmem:[%s10341_s17 + $0x30] sm:$0xff]   ;;  %v12169_v19 = vpack.c.bf16 %v10391_v13, %v10393_v18  ;;  %s6302_s17 = sshll.u32 %s12025_s26, 1 }
 0x510   : > { %v8059_v4 = vpop.eup %8058  ;;  %8074 = vrcp.f32 %v3478_v14  ;;  %7312 = vmatprep.subr.bf16.mxu0 %v7782_v29 }
 0x511   : > { %v8061_v12 = vpop.eup %8060  ;;  %v3477_v30 = vadd.f32 %v8059_v4, %v8057_v2 }
 0x512   : > { %v8063_v63 = vpop.eup %8062 }
 0x513   : > { %v8065_v24 = vpop.eup %8064  ;;  %8076 = vrcp.f32 %v3477_v30  ;;  %v3505_v5 = vmul.f32 %v8063_v63, %v10528_v31  ;;  %v3730_v15 = vmul.f32 %v8063_v63, %v8037_v57  ;;  %7313 = vmatpush3.bf16.msra.mxu0 %v7782_v29  ;;  %v12167_v29 = vpack.c.bf16 %v10371_v9, %v10373_v16  ;;  %v7788_v9 = vld [vmem:[%s10601_s11 + $0x4] ss:$8 sps:$4 sm:$0xff]  }
 0x514   : > { %v8067_v26 = vpop.eup %8066  ;;  %v3480_v22 = vadd.f32 %v8065_v24, %v8061_v12  ;;  %7314 = vmatprep.subr.bf16.mxu0 %v7783_v47  ;;  %4871 = vmatprep.subr.bf16.mxu1 %v7788_v9  ;;  %v12185_v9 = vld [vmem:[#allocation100_spill] sm:$0xff] }
 0x515   : > { %v8069_v0 = vpop.eup %8068  ;;  %7266 = vmatprep.mubr.msk.f32.mxu0 %vm2576_vm1, %v3505_v5  ;;  %7292 = vmatprep.mubr.msk.f32.mxu1 %vm2576_vm1, %v3730_v15 }
 0x516   : > { %v8071_v48 = vpop.eup %8070  ;;  %8078 = vrcp.f32 %v3480_v22  ;;  %7267 = vmatmul.mubr.msk.f32.gmra.mrb[88].mxu0 %vm2576_vm1, %v3506_v11  ;;  %7293 = vmatmul.mubr.msk.f32.gmra.mrb[120].mxu1 %vm2576_vm1, %v3731_v35  ;;  %v3508_v42 = vmul.f32 %v8069_v0, %v8041_v52  ;;  %v3733_v31 = vmul.f32 %v8069_v0, %v8043_v41  ;;  %v12176_v22 = vld [vmem:[#allocation114_spill] sm:$0xff] }
 0x517   : > { %v3479_v57 = vadd.f32 %v8071_v48, %v8067_v26  ;;  %7315 = vmatpush3.bf16.msra.mxu0 %v7783_v47  ;;  %4872 = vmatpush1.bf16.msra.mxu1 %v7786_v49 }
 0x518   : > { %v8073_v17 = vpop.eup %8072  ;;  %7316 = vmatprep.subr.bf16.mxu0 %v7784_v45 }
 0x519   : > { %8080 = vrcp.f32 %v3479_v57  ;;  %v3507_v8 = vmul.f32 %v8073_v17, %v8045_v37  ;;  %v3732_v21 = vmul.f32 %v8073_v17, %v8049_v61 }
 0x51a   : > { %v8075_v39 = vpop.eup %8074 }
 0x51b   : > { %7269 = vmatprep.mubr.msk.f32.mxu0 %vm2576_vm1, %v3507_v8  ;;  %7295 = vmatprep.mubr.msk.f32.mxu1 %vm2576_vm1, %v3732_v21  ;;  %v3510_v60 = vmul.f32 %v8075_v39, %v8051_v56  ;;  %v3735_v28 = vmul.f32 %v8075_v39, %v8053_v55  ;;  %v12165_v56 = vmov 0   ;;  %v12168_v55 = vpack.c.bf16 %v10381_v59, %v10383_v6  ;;  %v12179_v39 = vld [vmem:[#allocation97_spill] sm:$0xff] }
 0x51c   : > { %7270 = vmatmul.mubr.msk.f32.gmra.mrb[90].mxu0 %vm2576_vm1, %v3508_v42  ;;  %7296 = vmatmul.mubr.msk.f32.gmra.mrb[122].mxu1 %vm2576_vm1, %v3733_v31 }
 0x51d   : > { %v8077_v52 = vpop.eup %8076  ;;  %7317 = vmatpush3.bf16.msra.mxu0 %v7784_v45  ;;  %v12177_v45 = vld [vmem:[#allocation96_spill] sm:$0xff] }
 0x51e   : > { %v3509_v43 = vmul.f32 %v8077_v52, %v8057_v2  ;;  %v3734_v41 = vmul.f32 %v8077_v52, %v8059_v4  ;;  %7318 = vmatprep.subr.bf16.mxu0 %v7785_v33  ;;  %v12173_v4 = vld [vmem:[#allocation91_spill] sm:$0xff] }
 0x520   : > { %v8079_v3 = vpop.eup %8078  ;;  %7272 = vmatprep.mubr.msk.f32.mxu0 %vm2576_vm1, %v3509_v43  ;;  %7298 = vmatprep.mubr.msk.f32.mxu1 %vm2576_vm1, %v3734_v41 }
 0x521   : > { %7273 = vmatmul.mubr.msk.f32.gmra.mrb[92].mxu0 %vm2576_vm1, %v3510_v60  ;;  %7299 = vmatmul.mubr.msk.f32.gmra.mrb[124].mxu1 %vm2576_vm1, %v3735_v28  ;;  %v3512_v37 = vmul.f32 %v8079_v3, %v8061_v12  ;;  %v3737_v58 = vmul.f32 %v8079_v3, %v8065_v24  ;;  %v12180_v60 = vld [vmem:[#allocation113_spill] sm:$0xff]  ;;  %v12181_v3 = vld [vmem:[#allocation95_spill] sm:$0xff] }
 0x522   : > { %7319 = vmatpush3.bf16.msra.mxu0 %v7785_v33 }
 0x523   : > { %v8081_v44 = vpop.eup %8080 }
 0x524   : > { %v3511_v61 = vmul.f32 %v8081_v44, %v8067_v26  ;;  %v3736_v36 = vmul.f32 %v8081_v44, %v8071_v48 }
 0x526   : > { %7275 = vmatprep.mubr.msk.f32.mxu0 %vm2576_vm1, %v3511_v61  ;;  %7301 = vmatprep.mubr.msk.f32.mxu1 %vm2576_vm1, %v3736_v36 }
 0x527   : > { %7276 = vmatmul.mubr.msk.f32.gmra.mrb[94].mxu0 %vm2576_vm1, %v3512_v37  ;;  %7302 = vmatmul.mubr.msk.f32.gmra.mrb[126].mxu1 %vm2576_vm1, %v3737_v58  ;;  %v12182_v58 = vld [vmem:[#allocation111_spill] sm:$0xff] }
 0x528   : > { %7320 = vmatprep.mubr.bf16.mxu0 %v12164_v62  ;;  %4903 = vmatprep.mubr.bf16.mxu1 %v12165_v56 }
 0x52b   : > { %7321 = vmatmul.mubr.bf16.vlgmr.msra.gmra.mrb[96].mxu0 %v12166_v27 }
 0x52c   : > { %7324 = vmatprep.mubr.bf16.mxu0 %v12167_v29 }
 0x533   : > { %7325 = vmatmul.mubr.bf16.gmra.mrb[100].mxu0 %v12168_v55  ;;  %v12183_v55 = vld [vmem:[#allocation102_spill] sm:$0xff] }
 0x534   : > { %7328 = vmatprep.mubr.bf16.mxu0 %v12169_v19 }
 0x53b   : > { %7329 = vmatmul.mubr.bf16.gmra.mrb[104].mxu0 %v12170_v25  ;;  %v12184_v25 = vld [vmem:[#allocation118_spill] sm:$0xff] }
 0x53c   : > { %7332 = vmatprep.mubr.bf16.mxu0 %v12171_v38 }
 0x543   : > { %7333 = vmatmul.mubr.bf16.gmra.mrb[108].mxu0 %v12172_v50 }
 0x5d3   : > { %v7256_v16 = vpop.f32.mrb[80].mxu0  ;;  %v7282_v59 = vpop.f32.mrb[112].mxu1 }
 0x5d4   : > { %v3707_v6 = vmul.f32 %v7256_v16, %v12132_v1  ;;  %v3932_v13 = vmul.f32 %v7282_v59, %v12133_v7  ;;  %v3627_v18 = vpop.f32.mrb[81].mxu0  ;;  %v3852_v53 = vpop.f32.mrb[113].mxu1  ;;  %v12174_v7 = vld [vmem:[#allocation107_spill] sm:$0xff]  ;;  %v12186_v59 = vld [vmem:[#allocation116_spill] sm:$0xff] }
 0x5d5   : > { %v3706_v40 = vmul.f32 %v3627_v18, %v12134_v10  ;;  %v3931_v54 = vmul.f32 %v3852_v53, %v12135_v23  ;;  %v12175_v23 = vld [vmem:[#allocation98_spill] sm:$0xff] }
 0x5d6   : > { %v3948_v32 = vadd.f32 %v3932_v13, %v3707_v6 }
 0x5d7   : > { %v3947_v46 = vadd.f32 %v3931_v54, %v3706_v40  ;;  %v7259_v20 = vpop.f32.mrb[82].mxu0  ;;  %v7285_v2 = vpop.f32.mrb[114].mxu1 }
 0x5d8   : > { %v3709_v14 = vmul.f32 %v7259_v20, %v12136_v51  ;;  %v3637_v11 = vpop.f32.mrb[83].mxu0  ;;  %v3934_v35 = vmul.f32 %v7285_v2, %v12138_v34  ;;  %v3862_v1 = vpop.f32.mrb[115].mxu1  ;;  %v12178_v34 = vld [vmem:[#allocation112_spill] sm:$0xff]  ;;  %v12188_v20 = vld [vmem:[#allocation117_spill] sm:$0xff] }
 0x5d9   : > { %v3708_v47 = vmul.f32 %v3637_v11, %v12173_v4  ;;  %v3971_v12 = vpack.c.bf16 %v3948_v32, %v3947_v46  ;;  %v3933_v30 = vmul.f32 %v3862_v1, %v12174_v7  ;;  %v12187_v32 = vld [vmem:[#allocation101_spill] sm:$0xff] }
 0x5da   : > { %v3950_v63 = vadd.f32 %v3934_v35, %v3709_v14  ;;  %v12189_v35 = vld [vmem:[#allocation99_spill] sm:$0xff] }
 0x5db   : > { %v7262_v24 = vpop.f32.mrb[84].mxu0  ;;  %7336 = vmatprep.mubr.bf16.mxu0 %v3971_v12  ;;  %v3949_v10 = vadd.f32 %v3933_v30, %v3708_v47  ;;  %v7288_v15 = vpop.f32.mrb[116].mxu1  ;;  %v12190_v47 = vld [vmem:[#allocation115_spill] sm:$0xff] }
 0x5dc   : > { %v3711_v5 = vmul.f32 %v7262_v24, %v12175_v23  ;;  %v3647_v26 = vpop.f32.mrb[85].mxu0  ;;  %v3936_v51 = vmul.f32 %v7288_v15, %v12176_v22  ;;  %v3872_v48 = vpop.f32.mrb[117].mxu1  ;;  %v12191_v24 = vld [vmem:[#allocation106_spill] sm:$0xff] }
 0x5dd   : > { %v3710_v0 = vmul.f32 %v3647_v26, %v12177_v45  ;;  %v3935_v42 = vmul.f32 %v3872_v48, %v12178_v34  ;;  %v3972_v31 = vpack.c.bf16 %v3950_v63, %v3949_v10  ;;  %v12192_v23 = vld [vmem:[#allocation122_spill] sm:$0xff] }
 0x5de   : > { %v3952_v57 = vadd.f32 %v3936_v51, %v3711_v5  ;;  %v12193_v51 = vld [vmem:[#allocation104_spill] sm:$0xff] }
 0x5df   : > { %v3951_v17 = vadd.f32 %v3935_v42, %v3710_v0  ;;  %7337 = vmatmul.mubr.bf16.gmra.mrb[112].mxu0 %v3972_v31  ;;  %v12194_v0 = vld [vmem:[#allocation120_spill] sm:$0xff] }
 0x5e1   : > { %v7265_v8 = vpop.f32.mrb[86].mxu0  ;;  %v7291_v21 = vpop.f32.mrb[118].mxu1  ;;  %v3973_v41 = vpack.c.bf16 %v3952_v57, %v3951_v17 }
 0x5e2   : > { %v3713_v33 = vmul.f32 %v7265_v8, %v12179_v39  ;;  %v3938_v28 = vmul.f32 %v7291_v21, %v12180_v60  ;;  %v3657_v52 = vpop.f32.mrb[87].mxu0  ;;  %v3882_v43 = vpop.f32.mrb[119].mxu1  ;;  %v12196_v8 = vld [vmem:[#allocation105_spill] sm:$0xff] }
 0x5e3   : > { %v3712_v37 = vmul.f32 %v3657_v52, %v12181_v3  ;;  %v3937_v44 = vmul.f32 %v3882_v43, %v12182_v58  ;;  %7340 = vmatprep.mubr.bf16.mxu0 %v3973_v41  ;;  %v12197_v39 = vld [vmem:[#allocation121_spill] sm:$0xff]  ;;  %v12198_v52 = vld [vmem:[#allocation103_spill] sm:$0xff]  ;;  %v10643_v58 = vld [vmem:[%s3998_s9] ss:$0 sm:$0xff]  ;;  %s12240_s9 = sld [smem:[#allocation134_spill]] }
 0x5e4   : > { %v3954_v61 = vadd.f32 %v3938_v28, %v3713_v33  ;;  %v12199_v41 = vld [vmem:[#allocation119_spill] sm:$0xff] }
 0x5e5   : > { %v3953_v36 = vadd.f32 %v3937_v44, %v3712_v37 }
 0x5e7   : > { %v3974_v62 = vpack.c.bf16 %v3954_v61, %v3953_v36 }
 0x5e9   : > { %v7268_v27 = vpop.f32.mrb[88].mxu0  ;;  %v7294_v29 = vpop.f32.mrb[120].mxu1  ;;  %7341 = vmatmul.mubr.bf16.gmra.mrb[116].mxu0 %v3974_v62  ;;  %s5450_s28 = scalar_lea.vmem %s12240_s9, %s12025_s26 }
 0x5ea   : > { %v3715_v19 = vmul.f32 %v7268_v27, %v12183_v55  ;;  %v3940_v38 = vmul.f32 %v7294_v29, %v12184_v25  ;;  %v3667_v50 = vpop.f32.mrb[89].mxu0  ;;  %v3892_v49 = vpop.f32.mrb[121].mxu1 }
 0x5eb   : > { %v3714_v16 = vmul.f32 %v3667_v50, %v12185_v9  ;;  %v3939_v6 = vmul.f32 %v3892_v49, %v12186_v59  ;;  %v12201_v50 = vld [vmem:[#allocation43_spill] sm:$0xff] }
 0x5ec   : > { %v3956_v13 = vadd.f32 %v3940_v38, %v3715_v19  ;;  %v12200_v19 = vld [vmem:[#allocation42_spill] sm:$0xff] }
 0x5ed   : > { %v3955_v18 = vadd.f32 %v3939_v6, %v3714_v16 }
 0x5ef   : > { %v7271_v53 = vpop.f32.mrb[90].mxu0  ;;  %v7297_v40 = vpop.f32.mrb[122].mxu1  ;;  %v3975_v54 = vpack.c.bf16 %v3956_v13, %v3955_v18 }
 0x5f0   : > { %v3717_v46 = vmul.f32 %v7271_v53, %v12187_v32  ;;  %v3942_v14 = vmul.f32 %v7297_v40, %v12188_v20  ;;  %v3677_v2 = vpop.f32.mrb[91].mxu0  ;;  %v3902_v11 = vpop.f32.mrb[123].mxu1 }
 0x5f1   : > { %v3716_v4 = vmul.f32 %v3677_v2, %v12189_v35  ;;  %v3941_v1 = vmul.f32 %v3902_v11, %v12190_v47  ;;  %7344 = vmatprep.mubr.bf16.mxu0 %v3975_v54  ;;  %v12202_v54 = vld [vmem:[#allocation44_spill] sm:$0xff] }
 0x5f2   : > { %v3958_v12 = vadd.f32 %v3942_v14, %v3717_v46  ;;  %v12203_v46 = vld [vmem:[#allocation45_spill] sm:$0xff] }
 0x5f3   : > { %v3957_v7 = vadd.f32 %v3941_v1, %v3716_v4 }
 0x5f4   : > { %v7274_v30 = vpop.f32.mrb[92].mxu0  ;;  %v7300_v63 = vpop.f32.mrb[124].mxu1 }
 0x5f5   : > { %v3719_v10 = vmul.f32 %v7274_v30, %v12191_v24  ;;  %v3944_v5 = vmul.f32 %v7300_v63, %v12192_v23  ;;  %v3687_v15 = vpop.f32.mrb[93].mxu0  ;;  %v3912_v26 = vpop.f32.mrb[125].mxu1  ;;  %v3976_v22 = vpack.c.bf16 %v3958_v12, %v3957_v7  ;;  %v12204_v7 = vld [vmem:[#allocation46_spill] sm:$0xff]  ;;  %v12205_v24 = vld [vmem:[#allocation47_spill] sm:$0xff] }
 0x5f6   : > { %v3718_v45 = vmul.f32 %v3687_v15, %v12193_v51  ;;  %v3943_v48 = vmul.f32 %v3912_v26, %v12194_v0  ;;  %v7791_v63 = vld [vmem:[%s10601_s11 + $0x14] ss:$8 sps:$4 sm:$0xff]   ;;  %v7789_v23 = vld [vmem:[%s10601_s11 + $0x10] ss:$8 sps:$4 sm:$0xff]   ;;  %v7794_v51 = vld [vmem:[%s10601_s11 + $0x24] ss:$8 sps:$4 sm:$0xff]  }
 0x5f7   : > { %v3960_v34 = vadd.f32 %v3944_v5, %v3719_v10  ;;  %7345 = vmatmul.mubr.bf16.gmra.mrb[120].mxu0 %v3976_v22  ;;  %4873 = vmatprep.subr.bf16.mxu1 %v7791_v63 }
 0x5f8   : > { %v3959_v42 = vadd.f32 %v3943_v48, %v3718_v45  ;;  %4874 = vmatpush1.bf16.msra.mxu1 %v7789_v23 }
 0x5f9   : > { %4875 = vmatprep.subr.bf16.mxu1 %v7794_v51 }
 0x5fa   : > { %v7277_v31 = vpop.f32.mrb[94].mxu0  ;;  %v7303_v57 = vpop.f32.mrb[126].mxu1  ;;  %v3977_v17 = vpack.c.bf16 %v3960_v34, %v3959_v42  ;;  %v7792_v34 = vld [vmem:[%s10601_s11 + $0x20] ss:$8 sps:$4 sm:$0xff]  }
 0x5fb   : > { %v3721_v21 = vmul.f32 %v7277_v31, %v12196_v8  ;;  %v3946_v33 = vmul.f32 %v7303_v57, %v12197_v39  ;;  %v3697_v60 = vpop.f32.mrb[95].mxu0  ;;  %v3922_v28 = vpop.f32.mrb[127].mxu1  ;;  %v12206_v31 = vld [vmem:[#allocation48_spill] sm:$0xff]  ;;  %v7795_v39 = vld [vmem:[%s10601_s11 + $0x30] ss:$8 sps:$4 sm:$0xff]  }
 0x5fc   : > { %v3720_v43 = vmul.f32 %v3697_v60, %v12198_v52  ;;  %v3945_v3 = vmul.f32 %v3922_v28, %v12199_v41  ;;  %7348 = vmatprep.mubr.bf16.mxu0 %v3977_v17  ;;  %4876 = vmatpush1.bf16.msra.mxu1 %v7792_v34  ;;  %v12207_v17 = vld [vmem:[#allocation49_spill] sm:$0xff] }
 0x5fd   : > { %v3962_v37 = vadd.f32 %v3946_v33, %v3721_v21  ;;  %v7797_v21 = vld [vmem:[%s10601_s11 + $0x34] ss:$8 sps:$4 sm:$0xff]   ;;  %v7798_v41 = vld [vmem:[%s10601_s11 + $0x40] ss:$8 sps:$4 sm:$0xff]  }
 0x5fe   : > { %v3961_v44 = vadd.f32 %v3945_v3, %v3720_v43  ;;  %v7322_v61 = vpop.f32.mrb[96].mxu0  ;;  %4877 = vmatprep.subr.bf16.mxu1 %v7797_v21  ;;  %v7800_v43 = vld [vmem:[%s10601_s11 + $0x44] ss:$8 sps:$4 sm:$0xff]   ;;  %v12208_v3 = vld [vmem:[#allocation50_spill] sm:$0xff] }
 0x5ff   : > { %v4088_v36 = vpop.f32.mrb[97].mxu0  ;;  %v4097_v9 = vadd.f32 %v7322_v61, %v10643_v58 }
 0x600   : > { %v4089_v62 = vadd.f32 %v10643_v58, %v4088_v36  ;;  %v7323_v27 = vpop.f32.mrb[98].mxu0  ;;  %v3978_v29 = vpack.c.bf16 %v3962_v37, %v3961_v44  ;;  %4878 = vmatpush1.bf16.msra.mxu1 %v7795_v39  ;;  %v12209_v44 = vld [vmem:[#allocation51_spill] sm:$0xff] }
 0x601   : > { %v4091_v55 = vpop.f32.mrb[99].mxu0  ;;  %v4100_v13 = vadd.f32 %v7323_v27, %v10643_v58  ;;  %v10662_v32 = vadd.f32 %v4097_v9, %v12202_v54  ;;  %4879 = vmatprep.subr.bf16.mxu1 %v7800_v43  ;;  %v7803_v36 = vld [vmem:[%s10601_s11 + $0x54] ss:$8 sps:$4 sm:$0xff]   ;;  %v12210_v9 = vld [vmem:[#allocation52_spill] sm:$0xff] }
 0x602   : > { %v10647_v25 = vadd.f32 %v4089_v62, %v12200_v19  ;;  %v4092_v38 = vadd.f32 %v10643_v58, %v4091_v55  ;;  %7349 = vmatmul.mubr.bf16.gmra.mrb[124].mxu0 %v3978_v29  ;;  %v7801_v62 = vld [vmem:[%s10601_s11 + $0x50] ss:$8 sps:$4 sm:$0xff]  }
 0x603   : > { %v10665_v20 = vadd.f32 %v4100_v13, %v12203_v46  ;;  %v4313_v11 = vmul.f32 %v10662_v32, %v10662_v32  ;;  %v7809_v13 = vld [vmem:[%s10601_s11 + $0x74] ss:$8 sps:$4 sm:$0xff]  }
 0x604   : > { %v10651_v49 = vadd.f32 %v4092_v38, %v12201_v50  ;;  %4247 = vadd.xlane.f32.xlu0 %v10647_v25  ;;  %v4311_v59 = vmul.f32 %v10647_v25, %v10647_v25  ;;  %4880 = vmatpush1.bf16.msra.mxu1 %v7798_v41  ;;  %v7806_v38 = vld [vmem:[%s10601_s11 + $0x64] ss:$8 sps:$4 sm:$0xff]   ;;  %v7804_v50 = vld [vmem:[%s10601_s11 + $0x60] ss:$8 sps:$4 sm:$0xff]  }
 0x605   : > { %v4314_v1 = vmul.f32 %v10665_v20, %v10665_v20  ;;  %4881 = vmatprep.subr.bf16.mxu1 %v7803_v36 }
 0x606   : > { %v7326_v16 = vpop.f32.mrb[100].mxu0  ;;  %4249 = vadd.xlane.f32.xlu1 %v10651_v49  ;;  %v4312_v53 = vmul.f32 %v10651_v49, %v10651_v49 }
 0x607   : > { %v4104_v6 = vpop.f32.mrb[101].mxu0  ;;  %v4113_v5 = vadd.f32 %v7326_v16, %v10643_v58 }
 0x608   : > { %v7327_v18 = vpop.f32.mrb[102].mxu0  ;;  %4343 = vadd.xlane.f32.xlu0 %v4311_v59  ;;  %v4105_v14 = vadd.f32 %v10643_v58, %v4104_v6  ;;  %4882 = vmatpush1.bf16.msra.mxu1 %v7801_v62  ;;  %v12211_v59 = vld [vmem:[#allocation53_spill] sm:$0xff] }
 0x609   : > { %v4107_v40 = vpop.f32.mrb[103].mxu0  ;;  %v4116_v45 = vadd.f32 %v7327_v18, %v10643_v58  ;;  %v10698_v57 = vadd.f32 %v4113_v5, %v12206_v31  ;;  %4883 = vmatprep.subr.bf16.mxu1 %v7806_v38  ;;  %v7807_v18 = vld [vmem:[%s10601_s11 + $0x70] ss:$8 sps:$4 sm:$0xff]  }
 0x60a   : > { %4345 = vadd.xlane.f32.xlu1 %v4312_v53  ;;  %v4108_v4 = vadd.f32 %v10643_v58, %v4107_v40  ;;  %v10676_v30 = vadd.f32 %v4105_v14, %v12204_v7  ;;  %v12212_v14 = vld [vmem:[#allocation54_spill] sm:$0xff]  ;;  %v12214_v7 = vld [vmem:[#allocation56_spill] sm:$0xff] }
 0x60b   : > { %v10701_v8 = vadd.f32 %v4116_v45, %v12207_v17  ;;  %v4317_v60 = vmul.f32 %v10698_v57, %v10698_v57 }
 0x60c   : > { %4251 = vadd.xlane.f32.xlu0 %v10662_v32  ;;  %v10680_v10 = vadd.f32 %v4108_v4, %v12205_v24  ;;  %v4315_v26 = vmul.f32 %v10676_v30, %v10676_v30  ;;  %4884 = vmatpush1.bf16.msra.mxu1 %v7804_v50  ;;  %v12215_v24 = vld [vmem:[#allocation57_spill] sm:$0xff] }
 0x60d   : > { %v4318_v52 = vmul.f32 %v10701_v8, %v10701_v8  ;;  %4885 = vmatprep.subr.bf16.mxu1 %v7809_v13 }
 0x60e   : > { %v7330_v2 = vpop.f32.mrb[104].mxu0  ;;  %4253 = vadd.xlane.f32.xlu1 %v10665_v20  ;;  %v4316_v48 = vmul.f32 %v10680_v10, %v10680_v10 }
 0x60f   : > { %v4120_v35 = vpop.f32.mrb[105].mxu0  ;;  %v4129_v27 = vadd.f32 %v7330_v2, %v10643_v58 }
 0x610   : > { %v7331_v47 = vpop.f32.mrb[106].mxu0  ;;  %4347 = vadd.xlane.f32.xlu0 %v4313_v11  ;;  %v4121_v33 = vadd.f32 %v10643_v58, %v4120_v35  ;;  %4886 = vmatpush1.bf16.msra.mxu1 %v7807_v18  ;;  %v12213_v11 = vld [vmem:[#allocation55_spill] sm:$0xff] }
 0x611   : > { %v4123_v12 = vpop.f32.mrb[107].mxu0  ;;  %v4132_v55 = vadd.f32 %v7331_v47, %v10643_v58  ;;  %v10734_v16 = vadd.f32 %v4129_v27, %v12210_v9 }
 0x612   : > { %4349 = vadd.xlane.f32.xlu1 %v4314_v1  ;;  %v4124_v28 = vadd.f32 %v10643_v58, %v4123_v12  ;;  %v10716_v37 = vadd.f32 %v4121_v33, %v12208_v3 }
 0x613   : > { %v10737_v6 = vadd.f32 %v4132_v55, %v12211_v59  ;;  %v4321_v40 = vmul.f32 %v10734_v16, %v10734_v16 }
 0x614   : > { %4255 = vadd.xlane.f32.xlu0 %v10676_v30  ;;  %v10719_v61 = vadd.f32 %v4124_v28, %v12209_v44  ;;  %v4319_v29 = vmul.f32 %v10716_v37, %v10716_v37 }
 0x615   : > { %v4322_v46 = vmul.f32 %v10737_v6, %v10737_v6 }
 0x616   : > { %v10685_v15 = vpop.f32.mrb[108].mxu0  ;;  %4257 = vadd.xlane.f32.xlu1 %v10680_v10  ;;  %v4320_v19 = vmul.f32 %v10719_v61, %v10719_v61 }
 0x617   : > { %v4136_v22 = vpop.f32.mrb[109].mxu0  ;;  %v4145_v4 = vadd.f32 %v10685_v15, %v10643_v58 }
 0x618   : > { %v10692_v0 = vpop.f32.mrb[110].mxu0  ;;  %4351 = vadd.xlane.f32.xlu0 %v4315_v26  ;;  %v4137_v53 = vadd.f32 %v10643_v58, %v4136_v22 }
 0x619   : > { %v4139_v42 = vpop.f32.mrb[111].mxu0  ;;  %v4148_v1 = vadd.f32 %v10692_v0, %v10643_v58  ;;  %v10766_v63 = vadd.f32 %v4145_v4, %v12214_v7 }
 0x61a   : > { %4353 = vadd.xlane.f32.xlu1 %v4316_v48  ;;  %v4140_v54 = vadd.f32 %v10643_v58, %v4139_v42  ;;  %v10750_v2 = vadd.f32 %v4137_v53, %v12212_v14 }
 0x61b   : > { %v10769_v23 = vadd.f32 %v4148_v1, %v12215_v24  ;;  %v4325_v5 = vmul.f32 %v10766_v63, %v10766_v63 }
 0x61c   : > { %4259 = vadd.xlane.f32.xlu0 %v10698_v57  ;;  %v10753_v35 = vadd.f32 %v4140_v54, %v12213_v11  ;;  %v4323_v47 = vmul.f32 %v10750_v2, %v10750_v2  ;;  %v10795_v11 = vld [vmem:[%s10787_s30] ss:$0 sm:$0xff] }
 0x61d   : > { %v4326_v15 = vmul.f32 %v10769_v23, %v10769_v23 }
 0x61e   : > { %4261 = vadd.xlane.f32.xlu1 %v10701_v8  ;;  %v4324_v12 = vmul.f32 %v10753_v35, %v10753_v35 }
 0x620   : > { %4355 = vadd.xlane.f32.xlu0 %v4317_v60 }
 0x622   : > { %4357 = vadd.xlane.f32.xlu1 %v4318_v52 }
 0x624   : > { %4263 = vadd.xlane.f32.xlu0 %v10716_v37 }
 0x626   : > { %4265 = vadd.xlane.f32.xlu1 %v10719_v61 }
 0x628   : > { %4359 = vadd.xlane.f32.xlu0 %v4319_v29 }
 0x62a   : > { %4361 = vadd.xlane.f32.xlu1 %v4320_v19 }
 0x62c   : > { %4267 = vadd.xlane.f32.xlu0 %v10734_v16 }
 0x62e   : > { %4269 = vadd.xlane.f32.xlu1 %v10737_v6 }
 0x630   : > { %4363 = vadd.xlane.f32.xlu0 %v4321_v40 }
 0x632   : > { %4365 = vadd.xlane.f32.xlu1 %v4322_v46 }
 0x634   : > { %4271 = vadd.xlane.f32.xlu0 %v10750_v2 }
 0x636   : > { %4273 = vadd.xlane.f32.xlu1 %v10753_v35 }
 0x638   : > { %4367 = vadd.xlane.f32.xlu0 %v4323_v47 }
 0x63a   : > { %4369 = vadd.xlane.f32.xlu1 %v4324_v12 }
 0x63c   : > { %4275 = vadd.xlane.f32.xlu0 %v10766_v63 }
 0x63e   : > { %4277 = vadd.xlane.f32.xlu1 %v10769_v23 }
 0x640   : > { %4371 = vadd.xlane.f32.xlu0 %v4325_v5 }
 0x642   : > { %4373 = vadd.xlane.f32.xlu1 %v4326_v15 }
 0x691   : > { %v4248_v26 = vpop.xlane.xlu0 %4247 }
 0x692   : > { %v4407_v22 = vmul.f32 0.0078125, %v4248_v26 }
 0x693   : > { %v4250_v51 = vpop.xlane.xlu1 %4249 }
 0x694   : > { %v4408_v45 = vmul.f32 0.0078125, %v4250_v51  ;;  %v4471_v48 = vmul.f32 %v4407_v22, %v4407_v22  ;;  %v4535_v18 = vsub.f32 %v10647_v25, %v4407_v22 }
 0x695   : > { %v4344_v0 = vpop.xlane.xlu0 %4343 }
 0x696   : > { %v4439_v34 = vmul.f32 0.0078125, %v4344_v0  ;;  %v4472_v31 = vmul.f32 %v4408_v45, %v4408_v45  ;;  %v4536_v4 = vsub.f32 %v10651_v49, %v4408_v45  ;;  %v10810_v45 = vld [vmem:[%s10802_s4] ss:$0 sm:$0xff] }
 0x697   : > { %v4346_v42 = vpop.xlane.xlu1 %4345 }
 0x698   : > { %v4503_v17 = vsub.f32 %v4439_v34, %v4471_v48  ;;  %v4440_v21 = vmul.f32 0.0078125, %v4346_v42 }
 0x699   : > { %v4252_v39 = vpop.xlane.xlu0 %4251 }
 0x69a   : > { %v4567_v33 = vadd.f32 1e-05, %v4503_v17  ;;  %v4504_v60 = vsub.f32 %v4440_v21, %v4472_v31  ;;  %v4409_v28 = vmul.f32 0.0078125, %v4252_v39 }
 0x69b   : > { %v4254_v52 = vpop.xlane.xlu1 %4253 }
 0x69c   : > { %8082 = vrsqrt.f32 %v4567_v33  ;;  %v4568_v43 = vadd.f32 1e-05, %v4504_v60  ;;  %v10777_v41 = vmul.f32 0.0078125, %v4254_v52  ;;  %v4473_v44 = vmul.f32 %v4409_v28, %v4409_v28 }
 0x69d   : > { %v4348_v3 = vpop.xlane.xlu0 %4347  ;;  %v4537_v42 = vsub.f32 %v10662_v32, %v4409_v28 }
 0x69e   : > { %8084 = vrsqrt.f32 %v4568_v43  ;;  %v4441_v36 = vmul.f32 0.0078125, %v4348_v3  ;;  %v4474_v27 = vmul.f32 %v10777_v41, %v10777_v41  ;;  %v4538_v43 = vsub.f32 %v10665_v20, %v10777_v41 }
 0x69f   : > { %v4350_v62 = vpop.xlane.xlu1 %4349 }
 0x6a0   : > { %v4505_v29 = vsub.f32 %v4441_v36, %v4473_v44  ;;  %v4442_v55 = vmul.f32 0.0078125, %v4350_v62 }
 0x6a1   : > { %v4256_v19 = vpop.xlane.xlu0 %4255 }
 0x6a2   : > { %v4569_v38 = vadd.f32 1e-05, %v4505_v29  ;;  %v4506_v50 = vsub.f32 %v4442_v55, %v4474_v27  ;;  %v10781_v9 = vmul.f32 0.0078125, %v4256_v19 }
 0x6a3   : > { %v4258_v59 = vpop.xlane.xlu1 %4257 }
 0x6a4   : > { %8086 = vrsqrt.f32 %v4569_v38  ;;  %v4570_v13 = vadd.f32 1e-05, %v4506_v50  ;;  %v10790_v53 = vmul.f32 0.0078125, %v4258_v59  ;;  %v4475_v46 = vmul.f32 %v10781_v9, %v10781_v9 }
 0x6a5   : > { %v4352_v40 = vpop.xlane.xlu0 %4351 }
 0x6a6   : > { %v8083_v54 = vpop.eup %8082  ;;  %8088 = vrsqrt.f32 %v4570_v13  ;;  %v4443_v14 = vmul.f32 0.0078125, %v4352_v40  ;;  %v4476_v12 = vmul.f32 %v10790_v53, %v10790_v53 }
 0x6a7   : > { %v4631_v47 = vmul.f32 %v8083_v54, %v4535_v18  ;;  %v4354_v1 = vpop.xlane.xlu1 %4353 }
 0x6a8   : > { %v8085_v25 = vpop.eup %8084  ;;  %v4507_v7 = vsub.f32 %v4443_v14, %v4475_v46  ;;  %v4444_v24 = vmul.f32 0.0078125, %v4354_v1 }
 0x6a9   : > { %v4632_v5 = vmul.f32 %v8085_v25, %v4536_v4  ;;  %v4260_v15 = vpop.xlane.xlu0 %4259  ;;  %v4671_v26 = vmul.f32 %v10795_v11, %v4631_v47 }
 0x6aa   : > { %v4571_v22 = vadd.f32 1e-05, %v4507_v7  ;;  %v4508_v49 = vsub.f32 %v4444_v24, %v4476_v12  ;;  %v10807_v51 = vmul.f32 0.0078125, %v4260_v15  ;;  %v4540_v15 = vsub.f32 %v10680_v10, %v10790_v53 }
 0x6ab   : > { %v4262_v0 = vpop.xlane.xlu1 %4261  ;;  %v4672_v48 = vmul.f32 %v10795_v11, %v4632_v5  ;;  %v10817_v21 = vadd.f32 %v10810_v45, %v4671_v26  ;;  %v4539_v5 = vsub.f32 %v10676_v30, %v10781_v9 }
 0x6ac   : > { %8090 = vrsqrt.f32 %v4571_v22  ;;  %v4572_v34 = vadd.f32 1e-05, %v4508_v49  ;;  %v10814_v31 = vmul.f32 0.0078125, %v4262_v0  ;;  %v4477_v60 = vmul.f32 %v10807_v51, %v10807_v51 }
 0x6ad   : > { %v4356_v17 = vpop.xlane.xlu0 %4355  ;;  %v10820_v39 = vadd.f32 %v10810_v45, %v4672_v48 }
 0x6ae   : > { %v8087_v33 = vpop.eup %8086  ;;  %8092 = vrsqrt.f32 %v4572_v34  ;;  %v4445_v52 = vmul.f32 0.0078125, %v4356_v17  ;;  %v4478_v36 = vmul.f32 %v10814_v31, %v10814_v31 }
 0x6af   : > { %v4358_v3 = vpop.xlane.xlu1 %4357  ;;  %v4743_v32 = vpack.c.bf16 %v10820_v39, %v10817_v21  ;;  %v4633_v28 = vmul.f32 %v8087_v33, %v4537_v42  ;;  %v12218_v42 = vld [vmem:[#allocation58_spill] sm:$0xff] }
 0x6b0   : > { %v8089_v44 = vpop.eup %8088  ;;  %v4509_v62 = vsub.f32 %v4445_v52, %v4477_v60  ;;  %v4446_v27 = vmul.f32 0.0078125, %v4358_v3  ;;  %v12219_v3 = vld [vmem:[#allocation59_spill] sm:$0xff] }
 0x6b1   : > { %4904 = vmatmul.mubr.bf16.vlgmr.msra.gmra.mrb[128].mxu1 %v4743_v32  ;;  %v4264_v29 = vpop.xlane.xlu0 %4263  ;;  %v4634_v55 = vmul.f32 %v8089_v44, %v4538_v43  ;;  %v4673_v19 = vmul.f32 %v10795_v11, %v4633_v28 }
 0x6b2   : > { %v4573_v38 = vadd.f32 1e-05, %v4509_v62  ;;  %v4510_v50 = vsub.f32 %v4446_v27, %v4478_v36  ;;  %v10831_v59 = vmul.f32 0.0078125, %v4264_v29  ;;  %4913 = vmatprep.mubr.bf16.mxu1 %v12165_v56  ;;  %v7338_v13 = vpop.f32.mrb[112].mxu0 }
 0x6b3   : > { %v4266_v20 = vpop.xlane.xlu1 %4265  ;;  %v4674_v41 = vmul.f32 %v10795_v11, %v4634_v55  ;;  %v4152_v40 = vpop.f32.mrb[113].mxu0  ;;  %v10838_v14 = vadd.f32 %v10810_v45, %v4673_v19  ;;  %v4161_v62 = vadd.f32 %v7338_v13, %v10643_v58  ;;  %v4541_v13 = vsub.f32 %v10698_v57, %v10807_v51 }
 0x6b4   : > { %8094 = vrsqrt.f32 %v4573_v38  ;;  %v4574_v18 = vadd.f32 1e-05, %v4510_v50  ;;  %v10835_v54 = vmul.f32 0.0078125, %v4266_v20  ;;  %v4153_v47 = vadd.f32 %v10643_v58, %v4152_v40  ;;  %v7339_v1 = vpop.f32.mrb[114].mxu0 }
 0x6b5   : > { %v4360_v46 = vpop.xlane.xlu0 %4359  ;;  %v10841_v4 = vadd.f32 %v10810_v45, %v4674_v41  ;;  %v4479_v12 = vmul.f32 %v10831_v59, %v10831_v59  ;;  %v4155_v24 = vpop.f32.mrb[115].mxu0 }
 0x6b6   : > { %v8091_v25 = vpop.eup %8090  ;;  %8096 = vrsqrt.f32 %v4574_v18  ;;  %v4447_v7 = vmul.f32 0.0078125, %v4360_v46  ;;  %v4480_v0 = vmul.f32 %v10835_v54, %v10835_v54  ;;  %v10855_v17 = vadd.f32 %v4153_v47, %v12218_v42  ;;  %v12221_v42 = vld [vmem:[#allocation61_spill] sm:$0xff] }
 0x6b7   : > { %v4362_v26 = vpop.xlane.xlu1 %4361  ;;  %v4744_v22 = vpack.c.bf16 %v10841_v4, %v10838_v14  ;;  %v4156_v30 = vadd.f32 %v10643_v58, %v4155_v24  ;;  %v4635_v9 = vmul.f32 %v8091_v25, %v4539_v5  ;;  %v4542_v47 = vsub.f32 %v10701_v8, %v10814_v31 }
 0x6b8   : > { %v8093_v49 = vpop.eup %8092  ;;  %v4511_v48 = vsub.f32 %v4447_v7, %v4479_v12  ;;  %v4448_v34 = vmul.f32 0.0078125, %v4362_v26  ;;  %4279 = vadd.xlane.f32.xlu0 %v10855_v17  ;;  %v4327_v29 = vmul.f32 %v10855_v17, %v10855_v17  ;;  %v4164_v25 = vadd.f32 %v7339_v1, %v10643_v58 }
 0x6b9   : > { %4914 = vmatmul.mubr.bf16.gmra.mrb[132].mxu1 %v4744_v22  ;;  %v4268_v33 = vpop.xlane.xlu0 %4267  ;;  %v4636_v60 = vmul.f32 %v8093_v49, %v4540_v15  ;;  %v10863_v32 = vadd.f32 %v4156_v30, %v12219_v3  ;;  %v4675_v28 = vmul.f32 %v10795_v11, %v4635_v9  ;;  %v12220_v15 = vld [vmem:[#allocation60_spill] sm:$0xff]  ;;  %v4543_v3 = vsub.f32 %v10716_v37, %v10831_v59 }
 0x6ba   : > { %v4575_v10 = vadd.f32 1e-05, %v4511_v48  ;;  %v4512_v53 = vsub.f32 %v4448_v34, %v4480_v0  ;;  %v10858_v52 = vmul.f32 0.0078125, %v4268_v33  ;;  %4923 = vmatprep.mubr.bf16.mxu1 %v12165_v56  ;;  %v10897_v26 = vadd.f32 %v4161_v62, %v12220_v15 }
 0x6bb   : > { %v4270_v43 = vpop.xlane.xlu1 %4269  ;;  %v4676_v44 = vmul.f32 %v10795_v11, %v4636_v60  ;;  %v10875_v38 = vadd.f32 %v10810_v45, %v4675_v28  ;;  %4281 = vadd.xlane.f32.xlu1 %v10863_v32  ;;  %v4328_v57 = vmul.f32 %v10863_v32, %v10863_v32  ;;  %v10904_v33 = vadd.f32 %v4164_v25, %v12221_v42  ;;  %v12222_v25 = vld [vmem:[#allocation62_spill] sm:$0xff] }
 0x6bc   : > { %8098 = vrsqrt.f32 %v4575_v10  ;;  %v4576_v36 = vadd.f32 1e-05, %v4512_v53  ;;  %v10868_v27 = vpop.f32.mrb[116].mxu0  ;;  %v10872_v55 = vmul.f32 0.0078125, %v4270_v43  ;;  %v4481_v18 = vmul.f32 %v10858_v52, %v10858_v52  ;;  %4375 = vadd.xlane.f32.xlu0 %v4327_v29 }
 0x6bd   : > { %v4364_v19 = vpop.xlane.xlu0 %4363  ;;  %v10878_v50 = vadd.f32 %v10810_v45, %v4676_v44  ;;  %v4168_v20 = vpop.f32.mrb[117].mxu0  ;;  %v4329_v43 = vmul.f32 %v10897_v26, %v10897_v26 }
 0x6be   : > { %v8095_v41 = vpop.eup %8094  ;;  %8100 = vrsqrt.f32 %v4576_v36  ;;  %v4449_v40 = vmul.f32 0.0078125, %v4364_v19  ;;  %v10885_v46 = vpop.f32.mrb[118].mxu0  ;;  %v4482_v5 = vmul.f32 %v10872_v55, %v10872_v55  ;;  %v4169_v53 = vadd.f32 %v10643_v58, %v4168_v20 }
 0x6bf   : > { %v4366_v12 = vpop.xlane.xlu1 %4365  ;;  %v4745_v7 = vpack.c.bf16 %v10878_v50, %v10875_v38  ;;  %v4171_v24 = vpop.f32.mrb[119].mxu0  ;;  %4377 = vadd.xlane.f32.xlu1 %v4328_v57  ;;  %v4637_v31 = vmul.f32 %v8095_v41, %v4541_v13  ;;  %v4544_v19 = vsub.f32 %v10719_v61, %v10835_v54 }
 0x6c0   : > { %v8097_v51 = vpop.eup %8096  ;;  %v4513_v22 = vsub.f32 %v4449_v40, %v4481_v18  ;;  %v4450_v49 = vmul.f32 0.0078125, %v4366_v12  ;;  %4283 = vadd.xlane.f32.xlu0 %v10897_v26  ;;  %v4172_v41 = vadd.f32 %v10643_v58, %v4171_v24  ;;  %v4330_v18 = vmul.f32 %v10904_v33, %v10904_v33 }
 0x6c1   : > { %4924 = vmatmul.mubr.bf16.gmra.mrb[136].mxu1 %v4745_v7  ;;  %v4272_v8 = vpop.xlane.xlu0 %4271  ;;  %v4638_v1 = vmul.f32 %v8097_v51, %v4542_v47  ;;  %v4677_v9 = vmul.f32 %v10795_v11, %v4637_v31  ;;  %v10934_v12 = vadd.f32 %v4169_v53, %v12222_v25  ;;  %v12223_v31 = vld [vmem:[#allocation63_spill] sm:$0xff] }
 0x6c2   : > { %v4577_v0 = vadd.f32 1e-05, %v4513_v22  ;;  %v4514_v48 = vsub.f32 %v4450_v49, %v4482_v5  ;;  %v10899_v34 = vmul.f32 0.0078125, %v4272_v8  ;;  %4933 = vmatprep.mubr.bf16.mxu1 %v12165_v56  ;;  %v4177_v8 = vadd.f32 %v10868_v27, %v10643_v58 }
 0x6c3   : > { %v4274_v30 = vpop.xlane.xlu1 %4273  ;;  %v4678_v60 = vmul.f32 %v10795_v11, %v4638_v1  ;;  %v10916_v36 = vadd.f32 %v10810_v45, %v4677_v9  ;;  %4285 = vadd.xlane.f32.xlu1 %v10904_v33  ;;  %v10946_v1 = vadd.f32 %v4172_v41, %v12223_v31 }
 0x6c4   : > { %8102 = vrsqrt.f32 %v4577_v0  ;;  %v4578_v10 = vadd.f32 1e-05, %v4514_v48  ;;  %v10913_v28 = vmul.f32 0.0078125, %v4274_v30  ;;  %v4483_v20 = vmul.f32 %v10899_v34, %v10899_v34  ;;  %4379 = vadd.xlane.f32.xlu0 %v4329_v43 }
 0x6c5   : > { %v4368_v44 = vpop.xlane.xlu0 %4367  ;;  %v10919_v62 = vadd.f32 %v10810_v45, %v4678_v60  ;;  %v4331_v60 = vmul.f32 %v10934_v12, %v10934_v12  ;;  %v4547_v31 = vsub.f32 %v10750_v2, %v10899_v34 }
 0x6c6   : > { %v8099_v29 = vpop.eup %8098  ;;  %8104 = vrsqrt.f32 %v4578_v10  ;;  %v4451_v37 = vmul.f32 0.0078125, %v4368_v44  ;;  %v4484_v61 = vmul.f32 %v10913_v28, %v10913_v28  ;;  %v4180_v10 = vadd.f32 %v10885_v46, %v10643_v58 }
 0x6c7   : > { %v4370_v59 = vpop.xlane.xlu1 %4369  ;;  %v4746_v13 = vpack.c.bf16 %v10919_v62, %v10916_v36  ;;  %v4639_v40 = vmul.f32 %v8099_v29, %v4543_v3  ;;  %4381 = vadd.xlane.f32.xlu1 %v4330_v18  ;;  %v4545_v46 = vsub.f32 %v10734_v16, %v10858_v52  ;;  %v4332_v18 = vmul.f32 %v10946_v1, %v10946_v1 }
 0x6c8   : > { %v8101_v47 = vpop.eup %8100  ;;  %v4515_v54 = vsub.f32 %v4451_v37, %v4483_v20  ;;  %v4452_v7 = vmul.f32 0.0078125, %v4370_v59  ;;  %4287 = vadd.xlane.f32.xlu0 %v10934_v12  ;;  %v4546_v37 = vsub.f32 %v10737_v6, %v10872_v55  ;;  %v12224_v59 = vld [vmem:[#allocation66_spill] sm:$0xff]  ;;  %v12225_v6 = vld [vmem:[#allocation67_spill] sm:$0xff]  ;;  %v4548_v2 = vsub.f32 %v10753_v35, %v10913_v28  ;;  %v12227_v35 = vld [vmem:[#allocation65_spill] sm:$0xff] }
 0x6c9   : > { %4934 = vmatmul.mubr.bf16.gmra.mrb[140].mxu1 %v4746_v13  ;;  %v4276_v57 = vpop.xlane.xlu0 %4275  ;;  %v4640_v24 = vmul.f32 %v8101_v47, %v4544_v19  ;;  %v4679_v51 = vmul.f32 %v10795_v11, %v4639_v40  ;;  %v10971_v41 = vadd.f32 %v4177_v8, %v12224_v59  ;;  %v10980_v55 = vadd.f32 %v4180_v10, %v12225_v6 }
 0x6ca   : > { %v4579_v5 = vadd.f32 1e-05, %v4515_v54  ;;  %v4516_v15 = vsub.f32 %v4452_v7, %v4484_v61  ;;  %v10937_v22 = vmul.f32 0.0078125, %v4276_v57  ;;  %v10939_v49 = vpop.f32.mrb[120].mxu0  ;;  %4943 = vmatprep.mubr.bf16.mxu1 %v12165_v56 }
 0x6cb   : > { %v4278_v0 = vpop.xlane.xlu1 %4277  ;;  %v4184_v48 = vpop.f32.mrb[121].mxu0  ;;  %v4680_v42 = vmul.f32 %v10795_v11, %v4640_v24  ;;  %v10958_v3 = vadd.f32 %v10810_v45, %v4679_v51  ;;  %4289 = vadd.xlane.f32.xlu1 %v10946_v1  ;;  %v4333_v8 = vmul.f32 %v10971_v41, %v10971_v41  ;;  %v4334_v10 = vmul.f32 %v10980_v55, %v10980_v55 }
 0x6cc   : > { %8106 = vrsqrt.f32 %v4579_v5  ;;  %v4580_v30 = vadd.f32 1e-05, %v4516_v15  ;;  %v10949_v9 = vpop.f32.mrb[122].mxu0  ;;  %v10955_v53 = vmul.f32 0.0078125, %v4278_v0  ;;  %v4485_v29 = vmul.f32 %v10937_v22, %v10937_v22  ;;  %4383 = vadd.xlane.f32.xlu0 %v4331_v60 }
 0x6cd   : > { %v4372_v27 = vpop.xlane.xlu0 %4371  ;;  %v4187_v43 = vpop.f32.mrb[123].mxu0  ;;  %v10964_v20 = vadd.f32 %v10810_v45, %v4680_v42  ;;  %v4185_v5 = vadd.f32 %v10643_v58, %v4184_v48 }
 0x6ce   : > { %v8103_v44 = vpop.eup %8102  ;;  %8108 = vrsqrt.f32 %v4580_v30  ;;  %v4453_v19 = vmul.f32 0.0078125, %v4372_v27  ;;  %v4486_v47 = vmul.f32 %v10955_v53, %v10955_v53  ;;  %v4188_v34 = vadd.f32 %v10643_v58, %v4187_v43 }
 0x6cf   : > { %v4374_v13 = vpop.xlane.xlu1 %4373  ;;  %v4747_v25 = vpack.c.bf16 %v10964_v20, %v10958_v3  ;;  %4385 = vadd.xlane.f32.xlu1 %v4332_v18  ;;  %v4641_v16 = vmul.f32 %v8103_v44, %v4545_v46  ;;  %v12226_v46 = vld [vmem:[#allocation64_spill] sm:$0xff] }
 0x6d0   : > { %v8105_v40 = vpop.eup %8104  ;;  %v4517_v61 = vsub.f32 %v4453_v19, %v4485_v29  ;;  %v4454_v54 = vmul.f32 0.0078125, %v4374_v13  ;;  %4291 = vadd.xlane.f32.xlu0 %v10971_v41  ;;  %v11013_v28 = vadd.f32 %v4188_v34, %v12227_v35  ;;  %v12230_v34 = vld [vmem:[#allocation70_spill] sm:$0xff]  ;;  %v12232_v35 = vld [vmem:[#allocation72_spill] sm:$0xff] }
 0x6d1   : > { %v4642_v52 = vmul.f32 %v8105_v40, %v4546_v37  ;;  %4944 = vmatmul.mubr.bf16.gmra.mrb[144].mxu1 %v4747_v25  ;;  %v4681_v24 = vmul.f32 %v10795_v11, %v4641_v16  ;;  %v11008_v37 = vadd.f32 %v4185_v5, %v12226_v46  ;;  %v4193_v40 = vadd.f32 %v10939_v49, %v10643_v58 }
 0x6d2   : > { %v4581_v7 = vadd.f32 1e-05, %v4517_v61  ;;  %v4518_v57 = vsub.f32 %v4454_v54, %v4486_v47  ;;  %4953 = vmatprep.mubr.bf16.mxu1 %v12165_v56  ;;  %v4549_v61 = vsub.f32 %v10766_v63, %v10937_v22  ;;  %v4550_v49 = vsub.f32 %v10769_v23, %v10955_v53 }
 0x6d3   : > { %v4682_v51 = vmul.f32 %v10795_v11, %v4642_v52  ;;  %v10994_v42 = vadd.f32 %v10810_v45, %v4681_v24  ;;  %4293 = vadd.xlane.f32.xlu1 %v10980_v55  ;;  %v4335_v47 = vmul.f32 %v11008_v37, %v11008_v37  ;;  %v4196_v52 = vadd.f32 %v10949_v9, %v10643_v58  ;;  %v12229_v9 = vld [vmem:[#allocation69_spill] sm:$0xff] }
 0x6d4   : > { %8110 = vrsqrt.f32 %v4581_v7  ;;  %v4582_v15 = vadd.f32 1e-05, %v4518_v57  ;;  %4387 = vadd.xlane.f32.xlu0 %v4333_v8  ;;  %v4336_v63 = vmul.f32 %v11013_v28, %v11013_v28  ;;  %v12228_v57 = vld [vmem:[#allocation68_spill] sm:$0xff] }
 0x6d5   : > { %v10991_v0 = vpop.f32.mrb[124].mxu0  ;;  %v10997_v30 = vadd.f32 %v10810_v45, %v4682_v51  ;;  %v11039_v24 = vadd.f32 %v4193_v40, %v12228_v57  ;;  %v11044_v23 = vadd.f32 %v4196_v52, %v12229_v9  ;;  %v7813_v52 = vld [vmem:[%s10605_s1 + $0x8] sm:$0xff]   ;;  %v7819_v57 = vld [vmem:[%s10605_s1 + $0x20] sm:$0xff]   ;;  %v7822_v9 = vld [vmem:[%s10605_s1 + $0x70] sm:$0xff]  }
 0x6d6   : > { %v8107_v60 = vpop.eup %8106  ;;  %8112 = vrsqrt.f32 %v4582_v15  ;;  %v4200_v48 = vpop.f32.mrb[125].mxu0  ;;  %v4209_v46 = vadd.f32 %v10991_v0, %v10643_v58  ;;  %v12233_v0 = vld [vmem:[#allocation73_spill] sm:$0xff] }
 0x6d7   : > { %v7351_v27 = vpop.f32.mrb[126].mxu0  ;;  %v4748_v44 = vpack.c.bf16 %v10997_v30, %v10994_v42  ;;  %v4643_v29 = vmul.f32 %v8107_v60, %v4547_v31  ;;  %4389 = vadd.xlane.f32.xlu1 %v4334_v10  ;;  %v4201_v15 = vadd.f32 %v10643_v58, %v4200_v48  ;;  %v4337_v8 = vmul.f32 %v11039_v24, %v11039_v24 }
 0x6d8   : > { %v8109_v19 = vpop.eup %8108  ;;  %v4203_v59 = vpop.f32.mrb[127].mxu0  ;;  %4295 = vadd.xlane.f32.xlu0 %v11008_v37  ;;  %v4338_v48 = vmul.f32 %v11044_v23, %v11044_v23 }
 0x6d9   : > { %v4644_v13 = vmul.f32 %v8109_v19, %v4548_v2  ;;  %v4683_v18 = vmul.f32 %v10795_v11, %v4643_v29  ;;  %4954 = vmatmul.mubr.bf16.gmra.mrb[148].mxu1 %v4748_v44  ;;  %v4204_v10 = vadd.f32 %v10643_v58, %v4203_v59  ;;  %v11064_v44 = vadd.f32 %v4201_v15, %v12230_v34  ;;  %v12231_v29 = vld [vmem:[#allocation71_spill] sm:$0xff] }
 0x6da   : > { %4963 = vmatprep.mubr.bf16.mxu1 %v12165_v56  ;;  %v7824_v15 = vld [vmem:[%s10605_s1 + $0x78] sm:$0xff]  }
 0x6db   : > { %v4684_v43 = vmul.f32 %v10795_v11, %v4644_v13  ;;  %v11024_v54 = vadd.f32 %v10810_v45, %v4683_v18  ;;  %4297 = vadd.xlane.f32.xlu1 %v11013_v28  ;;  %v11068_v19 = vadd.f32 %v4204_v10, %v12231_v29  ;;  %v4339_v59 = vmul.f32 %v11064_v44, %v11064_v44 }
 0x6dc   : > { %4391 = vadd.xlane.f32.xlu0 %v4335_v47  ;;  %v4212_v13 = vadd.f32 %v7351_v27, %v10643_v58  ;;  %v7810_v27 = vld [vmem:[%s10605_s1 + $0x40] sm:$0xff]  }
 0x6dd   : > { %v11027_v25 = vadd.f32 %v10810_v45, %v4684_v43  ;;  %v4340_v18 = vmul.f32 %v11068_v19, %v11068_v19  ;;  %v11080_v43 = vadd.f32 %v4209_v46, %v12232_v35  ;;  %6792 = vmatprep.subr.bf16.mxu0 %v7810_v27 }
 0x6de   : > { %v8111_v16 = vpop.eup %8110  ;;  %v11084_v40 = vadd.f32 %v4212_v13, %v12233_v0 }
 0x6df   : > { %v4749_v6 = vpack.c.bf16 %v11027_v25, %v11024_v54  ;;  %v4645_v22 = vmul.f32 %v8111_v16, %v4549_v61  ;;  %4393 = vadd.xlane.f32.xlu1 %v4336_v63  ;;  %v4341_v47 = vmul.f32 %v11080_v43, %v11080_v43  ;;  %v7811_v61 = vld [vmem:[%s10605_s1] sm:$0xff]   ;;  %v7812_v16 = vld [vmem:[%s10605_s1 + $0x48] sm:$0xff]   ;;  %v7816_v63 = vld [vmem:[%s10605_s1 + $0x58] sm:$0xff]  }
 0x6e0   : > { %v8113_v7 = vpop.eup %8112  ;;  %4299 = vadd.xlane.f32.xlu0 %v11039_v24  ;;  %v4342_v58 = vmul.f32 %v11084_v40, %v11084_v40  ;;  %6793 = vmatpush3.bf16.msra.mxu0 %v7811_v61 }
 0x6e1   : > { %v4646_v51 = vmul.f32 %v8113_v7, %v4550_v49  ;;  %v4685_v5 = vmul.f32 %v10795_v11, %v4645_v22  ;;  %4964 = vmatmul.mubr.bf16.gmra.mrb[152].mxu1 %v4749_v6  ;;  %6794 = vmatprep.subr.bf16.mxu0 %v7812_v16  ;;  %v7814_v49 = vld [vmem:[%s10605_s1 + $0x50] sm:$0xff]   ;;  %v7817_v22 = vld [vmem:[%s10605_s1 + $0x18] sm:$0xff]   ;;  %v7818_v7 = vld [vmem:[%s10605_s1 + $0x60] sm:$0xff]  }
 0x6e2   : > { %4973 = vmatprep.mubr.bf16.mxu1 %v12165_v56  ;;  %v7815_v6 = vld [vmem:[%s10605_s1 + $0x10] sm:$0xff]  }
 0x6e3   : > { %v4686_v53 = vmul.f32 %v10795_v11, %v4646_v51  ;;  %v11052_v31 = vadd.f32 %v10810_v45, %v4685_v5  ;;  %4301 = vadd.xlane.f32.xlu1 %v11044_v23  ;;  %v7820_v51 = vld [vmem:[%s10605_s1 + $0x68] sm:$0xff]  }
 0x6e4   : > { %4395 = vadd.xlane.f32.xlu0 %v4337_v8  ;;  %6795 = vmatpush3.bf16.msra.mxu0 %v7813_v52  ;;  %v7821_v5 = vld [vmem:[%s10605_s1 + $0x28] sm:$0xff]   ;;  %v7825_v8 = vld [vmem:[%s10605_s1 + $0x38] sm:$0xff]  }
 0x6e5   : > { %v11055_v60 = vadd.f32 %v10810_v45, %v4686_v53  ;;  %6796 = vmatprep.subr.bf16.mxu0 %v7814_v49  ;;  %v7823_v53 = vld [vmem:[%s10605_s1 + $0x30] sm:$0xff]   ;;  %s12234_s1 = sld [smem:[#allocation133_spill]] }
 0x6e7   : > { %v4750_v2 = vpack.c.bf16 %v11055_v60, %v11052_v31  ;;  %4397 = vadd.xlane.f32.xlu1 %v4338_v48 }
 0x6e8   : > { %4303 = vadd.xlane.f32.xlu0 %v11064_v44  ;;  %6797 = vmatpush3.bf16.msra.mxu0 %v7815_v6 }
 0x6e9   : > { %4974 = vmatmul.mubr.bf16.gmra.mrb[156].mxu1 %v4750_v2  ;;  %6798 = vmatprep.subr.bf16.mxu0 %v7816_v63 }
 0x6ea   : > { %4983 = vmatprep.mubr.bf16.mxu1 %v12165_v56 }
 0x6eb   : > { %4305 = vadd.xlane.f32.xlu1 %v11068_v19  ;;  %s4778_s16 = scalar_lea.vmem %s12234_s1, %s6302_s17 }
 0x6ec   : > { %4399 = vadd.xlane.f32.xlu0 %v4339_v59  ;;  %6799 = vmatpush3.bf16.msra.mxu0 %v7817_v22 }
 0x6ed   : > { %6800 = vmatprep.subr.bf16.mxu0 %v7818_v7 }
 0x6ef   : > { %4401 = vadd.xlane.f32.xlu1 %v4340_v18 }
 0x6f0   : > { %4307 = vadd.xlane.f32.xlu0 %v11080_v43  ;;  %6801 = vmatpush3.bf16.msra.mxu0 %v7819_v57 }
 0x6f1   : > { %6802 = vmatprep.subr.bf16.mxu0 %v7820_v51 }
 0x6f3   : > { %4309 = vadd.xlane.f32.xlu1 %v11084_v40 }
 0x6f4   : > { %4403 = vadd.xlane.f32.xlu0 %v4341_v47  ;;  %6803 = vmatpush3.bf16.msra.mxu0 %v7821_v5 }
 0x6f5   : > { %6804 = vmatprep.subr.bf16.mxu0 %v7822_v9 }
 0x6f7   : > { %4405 = vadd.xlane.f32.xlu1 %v4342_v58 }
 0x6f8   : > { %6805 = vmatpush3.bf16.msra.mxu0 %v7823_v53 }
 0x6f9   : > { %6806 = vmatprep.subr.bf16.mxu0 %v7824_v15 }
 0x6fc   : > { %6807 = vmatpush3.bf16.msra.mxu0 %v7825_v8 }
 0x745   : > { %v4280_v10 = vpop.xlane.xlu0 %4279 }
 0x746   : > { %v4423_v2 = vmul.f32 0.0078125, %v4280_v10 }
 0x748   : > { %v4282_v48 = vpop.xlane.xlu1 %4281  ;;  %v4487_v46 = vmul.f32 %v4423_v2, %v4423_v2 }
 0x749   : > { %v4424_v34 = vmul.f32 0.0078125, %v4282_v48  ;;  %v4376_v29 = vpop.xlane.xlu0 %4375  ;;  %v4551_v48 = vsub.f32 %v10855_v17, %v4423_v2 }
 0x74a   : > { %v4455_v59 = vmul.f32 0.0078125, %v4376_v29 }
 0x74b   : > { %v4488_v35 = vmul.f32 %v4424_v34, %v4424_v34 }
 0x74c   : > { %v4519_v13 = vsub.f32 %v4455_v59, %v4487_v46  ;;  %v4378_v18 = vpop.xlane.xlu1 %4377 }
 0x74d   : > { %v4456_v0 = vmul.f32 0.0078125, %v4378_v18  ;;  %v4284_v47 = vpop.xlane.xlu0 %4283 }
 0x74e   : > { %v4583_v58 = vadd.f32 1e-05, %v4519_v13  ;;  %v4425_v27 = vmul.f32 0.0078125, %v4284_v47  ;;  %v4552_v47 = vsub.f32 %v10863_v32, %v4424_v34 }
 0x74f   : > { %v4520_v61 = vsub.f32 %v4456_v0, %v4488_v35 }
 0x750   : > { %8114 = vrsqrt.f32 %v4583_v58  ;;  %v4286_v16 = vpop.xlane.xlu1 %4285  ;;  %v4489_v63 = vmul.f32 %v4425_v27, %v4425_v27  ;;  %v4553_v32 = vsub.f32 %v10897_v26, %v4425_v27 }
 0x751   : > { %v4584_v52 = vadd.f32 1e-05, %v4520_v61  ;;  %v4426_v49 = vmul.f32 0.0078125, %v4286_v16  ;;  %v4380_v6 = vpop.xlane.xlu0 %4379 }
 0x752   : > { %v4457_v22 = vmul.f32 0.0078125, %v4380_v6 }
 0x753   : > { %8116 = vrsqrt.f32 %v4584_v52  ;;  %v4490_v51 = vmul.f32 %v4426_v49, %v4426_v49 }
 0x754   : > { %v4521_v7 = vsub.f32 %v4457_v22, %v4489_v63  ;;  %v4382_v57 = vpop.xlane.xlu1 %4381 }
 0x755   : > { %v4458_v5 = vmul.f32 0.0078125, %v4382_v57  ;;  %v4288_v9 = vpop.xlane.xlu0 %4287 }
 0x756   : > { %v4585_v53 = vadd.f32 1e-05, %v4521_v7  ;;  %v11107_v15 = vmul.f32 0.0078125, %v4288_v9 }
 0x757   : > { %v4522_v8 = vsub.f32 %v4458_v5, %v4490_v51 }
 0x758   : > { %8118 = vrsqrt.f32 %v4585_v53  ;;  %v4290_v10 = vpop.xlane.xlu1 %4289  ;;  %v4491_v18 = vmul.f32 %v11107_v15, %v11107_v15 }
 0x759   : > { %v4586_v29 = vadd.f32 1e-05, %v4522_v8  ;;  %v11110_v46 = vmul.f32 0.0078125, %v4290_v10  ;;  %v4384_v59 = vpop.xlane.xlu0 %4383 }
 0x75a   : > { %v8115_v13 = vpop.eup %8114  ;;  %v4459_v35 = vmul.f32 0.0078125, %v4384_v59 }
 0x75b   : > { %8120 = vrsqrt.f32 %v4586_v29  ;;  %v4647_v0 = vmul.f32 %v8115_v13, %v4551_v48  ;;  %v4492_v52 = vmul.f32 %v11110_v46, %v11110_v46 }
 0x75c   : > { %v4523_v58 = vsub.f32 %v4459_v35, %v4491_v18  ;;  %v4386_v61 = vpop.xlane.xlu1 %4385  ;;  %v4554_v18 = vsub.f32 %v10904_v33, %v4426_v49 }
 0x75d   : > { %v8117_v16 = vpop.eup %8116  ;;  %v4460_v17 = vmul.f32 0.0078125, %v4386_v61  ;;  %v4292_v2 = vpop.xlane.xlu0 %4291  ;;  %v4687_v7 = vmul.f32 %v10795_v11, %v4647_v0 }
 0x75e   : > { %v4587_v6 = vadd.f32 1e-05, %v4523_v58  ;;  %v11117_v63 = vmul.f32 0.0078125, %v4292_v2  ;;  %v4648_v22 = vmul.f32 %v8117_v16, %v4552_v47 }
 0x75f   : > { %v4524_v57 = vsub.f32 %v4460_v17, %v4492_v52  ;;  %v11127_v29 = vadd.f32 %v10810_v45, %v4687_v7 }
 0x760   : > { %8122 = vrsqrt.f32 %v4587_v6  ;;  %v4294_v51 = vpop.xlane.xlu1 %4293  ;;  %v4688_v5 = vmul.f32 %v10795_v11, %v4648_v22  ;;  %v4493_v10 = vmul.f32 %v11117_v63, %v11117_v63  ;;  %v4555_v22 = vsub.f32 %v10934_v12, %v11107_v15 }
 0x761   : > { %v4588_v34 = vadd.f32 1e-05, %v4524_v57  ;;  %v11122_v9 = vmul.f32 0.0078125, %v4294_v51  ;;  %v4388_v53 = vpop.xlane.xlu0 %4387  ;;  %v4556_v12 = vsub.f32 %v10946_v1, %v11110_v46 }
 0x762   : > { %v8119_v8 = vpop.eup %8118  ;;  %v4461_v48 = vmul.f32 0.0078125, %v4388_v53  ;;  %v11130_v59 = vadd.f32 %v10810_v45, %v4688_v5 }
 0x763   : > { %8124 = vrsqrt.f32 %v4588_v34  ;;  %v4649_v13 = vmul.f32 %v8119_v8, %v4553_v32  ;;  %v4494_v47 = vmul.f32 %v11122_v9, %v11122_v9 }
 0x764   : > { %v4525_v26 = vsub.f32 %v4461_v48, %v4493_v10  ;;  %v4390_v27 = vpop.xlane.xlu1 %4389  ;;  %v4751_v35 = vpack.c.bf16 %v11130_v59, %v11127_v29 }
 0x765   : > { %v8121_v0 = vpop.eup %8120  ;;  %v4462_v58 = vmul.f32 0.0078125, %v4390_v27  ;;  %v4296_v61 = vpop.xlane.xlu0 %4295  ;;  %v4689_v2 = vmul.f32 %v10795_v11, %v4649_v13 }
 0x766   : > { %v4589_v16 = vadd.f32 1e-05, %v4525_v26  ;;  %4984 = vmatmul.mubr.bf16.gmra.mrb[160].mxu1 %v4751_v35  ;;  %v11137_v52 = vmul.f32 0.0078125, %v4296_v61  ;;  %v4650_v17 = vmul.f32 %v8121_v0, %v4554_v18 }
 0x767   : > { %v4526_v6 = vsub.f32 %v4462_v58, %v4494_v47  ;;  %4993 = vmatprep.mubr.bf16.mxu1 %v12165_v56  ;;  %v11149_v53 = vadd.f32 %v10810_v45, %v4689_v2 }
 0x768   : > { %8126 = vrsqrt.f32 %v4589_v16  ;;  %v4298_v33 = vpop.xlane.xlu1 %4297  ;;  %v4690_v49 = vmul.f32 %v10795_v11, %v4650_v17  ;;  %v4495_v32 = vmul.f32 %v11137_v52, %v11137_v52  ;;  %v4557_v17 = vsub.f32 %v10971_v41, %v11117_v63 }
 0x769   : > { %v4590_v7 = vadd.f32 1e-05, %v4526_v6  ;;  %v11144_v57 = vmul.f32 0.0078125, %v4298_v33  ;;  %v4392_v51 = vpop.xlane.xlu0 %4391  ;;  %v4558_v41 = vsub.f32 %v10980_v55, %v11122_v9 }
 0x76a   : > { %v8123_v5 = vpop.eup %8122  ;;  %v4463_v34 = vmul.f32 0.0078125, %v4392_v51  ;;  %v11152_v8 = vadd.f32 %v10810_v45, %v4690_v49 }
 0x76b   : > { %8128 = vrsqrt.f32 %v4590_v7  ;;  %v4651_v10 = vmul.f32 %v8123_v5, %v4555_v22  ;;  %v4496_v26 = vmul.f32 %v11144_v57, %v11144_v57 }
 0x76c   : > { %v4527_v15 = vsub.f32 %v4463_v34, %v4495_v32  ;;  %v4394_v48 = vpop.xlane.xlu1 %4393  ;;  %v4752_v13 = vpack.c.bf16 %v11152_v8, %v11149_v53 }
 0x76d   : > { %v8125_v18 = vpop.eup %8124  ;;  %v4464_v27 = vmul.f32 0.0078125, %v4394_v48  ;;  %v4300_v35 = vpop.xlane.xlu0 %4299  ;;  %v4691_v61 = vmul.f32 %v10795_v11, %v4651_v10 }
 0x76e   : > { %v4591_v0 = vadd.f32 1e-05, %v4527_v15  ;;  %4994 = vmatmul.mubr.bf16.gmra.mrb[164].mxu1 %v4752_v13  ;;  %v11160_v47 = vmul.f32 0.0078125, %v4300_v35  ;;  %v4652_v58 = vmul.f32 %v8125_v18, %v4556_v12 }
 0x76f   : > { %v4528_v16 = vsub.f32 %v4464_v27, %v4496_v26  ;;  %5003 = vmatprep.mubr.bf16.mxu1 %v12165_v56  ;;  %v11172_v51 = vadd.f32 %v10810_v45, %v4691_v61 }
 0x770   : > { %8130 = vrsqrt.f32 %v4591_v0  ;;  %v4302_v1 = vpop.xlane.xlu1 %4301  ;;  %v4692_v46 = vmul.f32 %v10795_v11, %v4652_v58  ;;  %v4497_v22 = vmul.f32 %v11160_v47, %v11160_v47  ;;  %v4559_v58 = vsub.f32 %v11008_v37, %v11137_v52 }
 0x771   : > { %v4592_v2 = vadd.f32 1e-05, %v4528_v16  ;;  %v11167_v6 = vmul.f32 0.0078125, %v4302_v1  ;;  %v4396_v33 = vpop.xlane.xlu0 %4395  ;;  %v4560_v37 = vsub.f32 %v11013_v28, %v11144_v57 }
 0x772   : > { %v8127_v49 = vpop.eup %8126  ;;  %v4465_v7 = vmul.f32 0.0078125, %v4396_v33  ;;  %v11175_v5 = vadd.f32 %v10810_v45, %v4692_v46 }
 0x773   : > { %8132 = vrsqrt.f32 %v4592_v2  ;;  %v4653_v32 = vmul.f32 %v8127_v49, %v4557_v17  ;;  %v4498_v15 = vmul.f32 %v11167_v6, %v11167_v6 }
 0x774   : > { %v4529_v63 = vsub.f32 %v4465_v7, %v4497_v22  ;;  %v4398_v34 = vpop.xlane.xlu1 %4397  ;;  %v4753_v10 = vpack.c.bf16 %v11175_v5, %v11172_v51  ;;  %v4779_v7 = vld [vmem:[%s4778_s16] sm:$0x3] }
 0x775   : > { %v8129_v12 = vpop.eup %8128  ;;  %v4466_v48 = vmul.f32 0.0078125, %v4398_v34  ;;  %v4304_v13 = vpop.xlane.xlu0 %4303  ;;  %v4693_v35 = vmul.f32 %v10795_v11, %v4653_v32 }
 0x776   : > { %v4593_v18 = vadd.f32 1e-05, %v4529_v63  ;;  %5004 = vmatmul.mubr.bf16.gmra.mrb[168].mxu1 %v4753_v10  ;;  %v11184_v26 = vmul.f32 0.0078125, %v4304_v13  ;;  %v4654_v27 = vmul.f32 %v8129_v12, %v4558_v41 }
 0x777   : > { %v4530_v55 = vsub.f32 %v4466_v48, %v4498_v15  ;;  %5013 = vmatprep.mubr.bf16.mxu1 %v12165_v56  ;;  %v11199_v33 = vadd.f32 %v10810_v45, %v4693_v35  ;;  %v12236_v35 = vld [vmem:[#allocation40_spill] sm:$0xff] }
 0x778   : > { %8134 = vrsqrt.f32 %v4593_v18  ;;  %v4306_v9 = vpop.xlane.xlu1 %4305  ;;  %v4694_v0 = vmul.f32 %v10795_v11, %v4654_v27  ;;  %v4499_v17 = vmul.f32 %v11184_v26, %v11184_v26  ;;  %v12235_v27 = vld [vmem:[#allocation41_spill] sm:$0xff] }
 0x779   : > { %v4594_v61 = vadd.f32 1e-05, %v4530_v55  ;;  %v11194_v16 = vmul.f32 0.0078125, %v4306_v9  ;;  %v4400_v1 = vpop.xlane.xlu0 %4399  ;;  %v11214_v28 = vrot.slane %v4779_v7, %v12235_v27  ;;  %v12237_v55 = vsub.s32 1, %v12236_v35 }
 0x77a   : > { %v8131_v46 = vpop.eup %8130  ;;  %v4467_v2 = vmul.f32 0.0078125, %v4400_v1  ;;  %v11202_v49 = vadd.f32 %v10810_v45, %v4694_v0  ;;  %v4562_v35 = vsub.f32 %v11044_v23, %v11167_v6 }
 0x77b   : > { %8136 = vrsqrt.f32 %v4594_v61  ;;  %v4655_v22 = vmul.f32 %v8131_v46, %v4559_v58  ;;  %v4500_v34 = vmul.f32 %v11194_v16, %v11194_v16  ;;  %v11219_v9 = vrot.slane %v4779_v7, %v12237_v55 }
 0x77c   : > { %v4531_v52 = vsub.f32 %v4467_v2, %v4499_v17  ;;  %v4402_v32 = vpop.xlane.xlu1 %4401  ;;  %v4754_v41 = vpack.c.bf16 %v11202_v49, %v11199_v33 }
 0x77d   : > { %v8133_v63 = vpop.eup %8132  ;;  %v4468_v10 = vmul.f32 0.0078125, %v4402_v32  ;;  %v4308_v12 = vpop.xlane.xlu0 %4307  ;;  %v4695_v18 = vmul.f32 %v10795_v11, %v4655_v22  ;;  %v4561_v32 = vsub.f32 %v11039_v24, %v11160_v47 }
 0x77e   : > { %v4595_v15 = vadd.f32 1e-05, %v4531_v52  ;;  %5014 = vmatmul.mubr.bf16.gmra.mrb[172].mxu1 %v4754_v41  ;;  %v11210_v48 = vmul.f32 0.0078125, %v4308_v12  ;;  %v4656_v13 = vmul.f32 %v8133_v63, %v4560_v37 }
 0x77f   : > { %v4532_v57 = vsub.f32 %v4468_v10, %v4500_v34  ;;  %5023 = vmatprep.mubr.bf16.mxu1 %v12165_v56  ;;  %v11227_v52 = vadd.f32 %v10810_v45, %v4695_v18 }
 0x780   : > { %8138 = vrsqrt.f32 %v4595_v15  ;;  %v4310_v0 = vpop.xlane.xlu1 %4309  ;;  %v4696_v58 = vmul.f32 %v10795_v11, %v4656_v13  ;;  %v4501_v22 = vmul.f32 %v11210_v48, %v11210_v48 }
 0x781   : > { %v4596_v61 = vadd.f32 1e-05, %v4532_v57  ;;  %v11222_v1 = vmul.f32 0.0078125, %v4310_v0  ;;  %v4404_v46 = vpop.xlane.xlu0 %4403 }
 0x782   : > { %v8135_v17 = vpop.eup %8134  ;;  %v4469_v37 = vmul.f32 0.0078125, %v4404_v46  ;;  %v11230_v7 = vadd.f32 %v10810_v45, %v4696_v58 }
 0x783   : > { %8140 = vrsqrt.f32 %v4596_v61  ;;  %v4502_v10 = vmul.f32 %v11222_v1, %v11222_v1  ;;  %v4657_v57 = vmul.f32 %v8135_v17, %v4561_v32 }
 0x784   : > { %v4905_v2 = vpop.f32.mrb[128].mxu1  ;;  %v4533_v12 = vsub.f32 %v4469_v37, %v4501_v22  ;;  %v4406_v15 = vpop.xlane.xlu1 %4405  ;;  %v4755_v45 = vpack.c.bf16 %v11230_v7, %v11227_v52  ;;  %v11255_v37 = vld [vmem:[%s10787_s30] ss:$0 sm:$0xff]  ;;  %s12243_s30 = sld [smem:[#allocation135_spill]] (!%p6447_p9) }
 0x785   : > { %v11235_v11 = vadd.f32 %v4905_v2, %v11214_v28  ;;  %v4907_v41 = vpop.f32.mrb[129].mxu1  ;;  %v8137_v13 = vpop.eup %8136  ;;  %v4470_v27 = vmul.f32 0.0078125, %v4406_v15  ;;  %v4697_v23 = vmul.f32 %v11255_v37, %v4657_v57 }
 0x786   : > { %v11238_v63 = vadd.f32 %v4907_v41, %v11219_v9  ;;  %v4909_v34 = vpop.f32.mrb[130].mxu1  ;;  %5024 = vmatmul.mubr.bf16.gmra.mrb[176].mxu1 %v4755_v45  ;;  %v4597_v2 = vadd.f32 1e-05, %v4533_v12  ;;  %v4658_v22 = vmul.f32 %v8137_v13, %v4562_v35 }
 0x787   : > { %v5128_v24 = vmul.f32 0.70710677, %v11235_v11  ;;  %v11246_v47 = vadd.f32 %v4909_v34, %v11214_v28  ;;  %v4911_v18 = vpop.f32.mrb[131].mxu1  ;;  %v4534_v61 = vsub.f32 %v4470_v27, %v4502_v10  ;;  %5033 = vmatprep.mubr.bf16.mxu1 %v12165_v56  ;;  %v4563_v34 = vsub.f32 %v11064_v44, %v11184_v26 }
 0x788   : > { %v5129_v55 = vmul.f32 0.70710677, %v11238_v63  ;;  %v4912_v0 = vadd.f32 %v4911_v18, %v11219_v9  ;;  %v4698_v41 = vmul.f32 %v11255_v37, %v4658_v22  ;;  %v4564_v10 = vsub.f32 %v11068_v19, %v11194_v16 }
 0x789   : > { %8142 = verf.f32 %v5128_v24  ;;  %v5130_v58 = vmul.f32 0.70710677, %v11246_v47  ;;  %v4598_v17 = vadd.f32 1e-05, %v4534_v61  ;;  %v11270_v24 = vld [vmem:[%s10802_s4] ss:$0 sm:$0xff] }
 0x78a   : > { %8144 = verf.f32 %v5129_v55  ;;  %v5131_v46 = vmul.f32 0.70710677, %v4912_v0  ;;  %v8139_v6 = vpop.eup %8138  ;;  %v11273_v18 = vadd.f32 %v11270_v24, %v4697_v23  ;;  %v11276_v27 = vadd.f32 %v11270_v24, %v4698_v41  ;;  %s12244_s24 = smov (!%p6447_p9), %s12243_s30 }
 0x78b   : > { %8146 = verf.f32 %v5130_v58  ;;  %v4659_v57 = vmul.f32 %v8139_v6, %v4563_v34  ;;  %v4565_v34 = vsub.f32 %v11080_v43, %v11210_v48 }
 0x78c   : > { %8148 = verf.f32 %v5131_v46  ;;  %v4915_v32 = vpop.f32.mrb[132].mxu1  ;;  %12238 = vst [vmem:[#allocation78_spill] sm:$0xff] %v11273_v18  ;;  %12239 = vst [vmem:[#allocation74_spill] sm:$0xff] %v11276_v27  ;;  %v4756_v58 = vpack.c.bf16 %v11276_v27, %v11273_v18 }
 0x78d   : > { %v11264_v12 = vadd.f32 %v4915_v32, %v11214_v28  ;;  %v4917_v15 = vpop.f32.mrb[133].mxu1  ;;  %8150 = vrsqrt.f32 %v4597_v2  ;;  %v8141_v44 = vpop.eup %8140  ;;  %v5064_v32 = vmul.f32 0.5, %v11235_v11  ;;  %v5066_v11 = vmul.f32 0.5, %v11246_v47 }
 0x78e   : > { %v11267_v45 = vadd.f32 %v4917_v15, %v11219_v9  ;;  %v4919_v13 = vpop.f32.mrb[134].mxu1  ;;  %8152 = vrsqrt.f32 %v4598_v17  ;;  %v4660_v46 = vmul.f32 %v8141_v44, %v4564_v10  ;;  %5034 = vmatmul.mubr.bf16.gmra.mrb[180].mxu1 %v4756_v58  ;;  %v4699_v17 = vmul.f32 %v11255_v37, %v4659_v57 }
 0x78f   : > { %v5132_v19 = vmul.f32 0.70710677, %v11264_v12  ;;  %v11280_v26 = vadd.f32 %v4919_v13, %v11214_v28  ;;  %v4921_v16 = vpop.f32.mrb[135].mxu1  ;;  %5043 = vmatprep.mubr.bf16.mxu1 %v12165_v56  ;;  %v5065_v13 = vmul.f32 0.5, %v11238_v63 }
 0x790   : > { %v5133_v35 = vmul.f32 0.70710677, %v11267_v45  ;;  %v11284_v55 = vadd.f32 %v4921_v16, %v11219_v9  ;;  %v4700_v23 = vmul.f32 %v11255_v37, %v4660_v46 }
 0x791   : > { %8154 = verf.f32 %v5132_v19  ;;  %v5134_v61 = vmul.f32 0.70710677, %v11280_v26 }
 0x792   : > { %8156 = verf.f32 %v5133_v35  ;;  %v5135_v2 = vmul.f32 0.70710677, %v11284_v55  ;;  %v11301_v57 = vadd.f32 %v11270_v24, %v4700_v23 }
 0x793   : > { %v8143_v22 = vpop.eup %8142  ;;  %8158 = verf.f32 %v5134_v61  ;;  %v5067_v61 = vmul.f32 0.5, %v4912_v0 }
 0x794   : > { %v8145_v6 = vpop.eup %8144  ;;  %v5256_v41 = vadd.f32 1.0, %v8143_v22  ;;  %8160 = verf.f32 %v5135_v2  ;;  %v4925_v10 = vpop.f32.mrb[136].mxu1 }
 0x795   : > { %v8147_v15 = vpop.eup %8146  ;;  %v5257_v44 = vadd.f32 1.0, %v8145_v6  ;;  %v11298_v19 = vadd.f32 %v4925_v10, %v11214_v28  ;;  %v4927_v16 = vpop.f32.mrb[137].mxu1  ;;  %v11309_v6 = vadd.f32 %v11270_v24, %v4699_v17  ;;  %v4566_v17 = vsub.f32 %v11084_v40, %v11222_v1 }
 0x796   : > { %v8149_v35 = vpop.eup %8148  ;;  %v5258_v58 = vadd.f32 1.0, %v8147_v15  ;;  %v11305_v43 = vadd.f32 %v4927_v16, %v11219_v9  ;;  %v4929_v48 = vpop.f32.mrb[138].mxu1  ;;  %v5320_v46 = vmul.f32 %v5256_v41, %v5064_v32  ;;  %v5069_v40 = vmul.f32 0.5, %v11267_v45 }
 0x797   : > { %v5259_v2 = vadd.f32 1.0, %v8149_v35  ;;  %v5136_v63 = vmul.f32 0.70710677, %v11298_v19  ;;  %v4931_v22 = vpop.f32.mrb[139].mxu1  ;;  %v8151_v10 = vpop.eup %8150  ;;  %v5321_v23 = vmul.f32 %v5257_v44, %v5065_v13  ;;  %v11313_v47 = vadd.f32 %v4929_v48, %v11214_v28 }
 0x798   : > { %v5322_v27 = vmul.f32 %v5258_v58, %v5066_v11  ;;  %v5137_v18 = vmul.f32 0.70710677, %v11305_v43  ;;  %v8153_v0 = vpop.eup %8152  ;;  %v11316_v32 = vadd.f32 %v4931_v22, %v11219_v9  ;;  %v4757_v41 = vpack.c.bf16 %v11301_v57, %v11309_v6 }
 0x799   : > { %v5323_v15 = vmul.f32 %v5259_v2, %v5067_v61  ;;  %8162 = verf.f32 %v5136_v63  ;;  %v5138_v13 = vmul.f32 0.70710677, %v11313_v47  ;;  %v4661_v58 = vmul.f32 %v8151_v10, %v4565_v34 }
 0x79a   : > { %v5384_v16 = vpack.c.bf16 %v5322_v27, %v5320_v46  ;;  %8164 = verf.f32 %v5137_v18  ;;  %v5139_v35 = vmul.f32 0.70710677, %v11316_v32  ;;  %5044 = vmatmul.mubr.bf16.gmra.mrb[184].mxu1 %v4757_v41  ;;  %v5068_v48 = vmul.f32 0.5, %v11264_v12 }
 0x79b   : > { %v8155_v44 = vpop.eup %8154  ;;  %v5385_v11 = vpack.c.bf16 %v5323_v15, %v5321_v23  ;;  %8166 = verf.f32 %v5138_v13  ;;  %5053 = vmatprep.mubr.bf16.mxu1 %v12165_v56  ;;  %v4662_v27 = vmul.f32 %v8153_v0, %v4566_v17  ;;  %v5070_v10 = vmul.f32 0.5, %v11280_v26 }
 0x79c   : > { %v8157_v61 = vpop.eup %8156  ;;  %v5260_v2 = vadd.f32 1.0, %v8155_v44  ;;  %v4935_v63 = vpop.f32.mrb[140].mxu1  ;;  %8168 = verf.f32 %v5139_v35  ;;  %v5071_v23 = vmul.f32 0.5, %v11284_v55  ;;  %v4701_v17 = vmul.f32 %v11255_v37, %v4661_v58 }
 0x79d   : > { %v8159_v46 = vpop.eup %8158  ;;  %v5261_v1 = vadd.f32 1.0, %v8157_v61  ;;  %v11328_v18 = vadd.f32 %v4935_v63, %v11214_v28  ;;  %v4937_v22 = vpop.f32.mrb[141].mxu1  ;;  %5586 = vmatprep.mubr.bf16.mxu0 %v5385_v11  ;;  %v4702_v13 = vmul.f32 %v11255_v37, %v4662_v27 }
 0x79e   : > { %v8161_v34 = vpop.eup %8160  ;;  %v5262_v12 = vadd.f32 1.0, %v8159_v46  ;;  %v11333_v15 = vadd.f32 %v4937_v22, %v11219_v9  ;;  %v4939_v56 = vpop.f32.mrb[142].mxu1  ;;  %5587 = vmatmul.mubr.bf16.vlgmr.msra.gmra.mrb[128].mxu0 %v5384_v16  ;;  %v5324_v44 = vmul.f32 %v5260_v2, %v5068_v48  ;;  %v11348_v2 = vadd.f32 %v11270_v24, %v4701_v17 }
 0x79f   : > { %v5263_v0 = vadd.f32 1.0, %v8161_v34  ;;  %v5140_v45 = vmul.f32 0.70710677, %v11328_v18  ;;  %v4941_v41 = vpop.f32.mrb[143].mxu1  ;;  %v11340_v11 = vadd.f32 %v4939_v56, %v11214_v28  ;;  %v5325_v55 = vmul.f32 %v5261_v1, %v5069_v40 }
 0x7a0   : > { %v5326_v35 = vmul.f32 %v5262_v12, %v5070_v10  ;;  %v5141_v26 = vmul.f32 0.70710677, %v11333_v15  ;;  %v11343_v16 = vadd.f32 %v4941_v41, %v11219_v9  ;;  %v11351_v27 = vadd.f32 %v11270_v24, %v4702_v13 }
 0x7a1   : > { %v5327_v61 = vmul.f32 %v5263_v0, %v5071_v23  ;;  %8170 = verf.f32 %v5140_v45  ;;  %v5142_v63 = vmul.f32 0.70710677, %v11340_v11  ;;  %v5072_v12 = vmul.f32 0.5, %v11298_v19 }
 0x7a2   : > { %8172 = verf.f32 %v5141_v26  ;;  %v5386_v46 = vpack.c.bf16 %v5326_v35, %v5324_v44  ;;  %v5143_v37 = vmul.f32 0.70710677, %v11343_v16  ;;  %v4758_v34 = vpack.c.bf16 %v11351_v27, %v11348_v2 }
 0x7a3   : > { %v8163_v58 = vpop.eup %8162  ;;  %v5387_v48 = vpack.c.bf16 %v5327_v61, %v5325_v55  ;;  %8174 = verf.f32 %v5142_v63  ;;  %v5073_v45 = vmul.f32 0.5, %v11305_v43  ;;  %v5074_v41 = vmul.f32 0.5, %v11313_v47 }
 0x7a4   : > { %v8165_v40 = vpop.eup %8164  ;;  %v5264_v1 = vadd.f32 1.0, %v8163_v58  ;;  %8176 = verf.f32 %v5143_v37  ;;  %v4945_v22 = vpop.f32.mrb[144].mxu1  ;;  %5054 = vmatmul.mubr.bf16.gmra.mrb[188].mxu1 %v4758_v34  ;;  %v5075_v35 = vmul.f32 0.5, %v11316_v32 }
 0x7a5   : > { %5594 = vmatprep.mubr.bf16.mxu0 %v5387_v48  ;;  %v8167_v10 = vpop.eup %8166  ;;  %v5265_v23 = vadd.f32 1.0, %v8165_v40  ;;  %v11357_v56 = vadd.f32 %v4945_v22, %v11214_v28  ;;  %v4947_v0 = vpop.f32.mrb[145].mxu1 }
 0x7a6   : > { %5595 = vmatmul.mubr.bf16.gmra.mrb[132].mxu0 %v5386_v46  ;;  %v8169_v24 = vpop.eup %8168  ;;  %v5266_v17 = vadd.f32 1.0, %v8167_v10  ;;  %v11362_v13 = vadd.f32 %v4947_v0, %v11219_v9  ;;  %v4949_v44 = vpop.f32.mrb[146].mxu1  ;;  %v5328_v63 = vmul.f32 %v5264_v1, %v5072_v12 }
 0x7a7   : > { %v5267_v19 = vadd.f32 1.0, %v8169_v24  ;;  %v5144_v26 = vmul.f32 0.70710677, %v11357_v56  ;;  %v4950_v55 = vadd.f32 %v4949_v44, %v11214_v28  ;;  %v4951_v61 = vpop.f32.mrb[147].mxu1  ;;  %v5329_v58 = vmul.f32 %v5265_v23, %v5073_v45 }
 0x7a8   : > { %v5330_v46 = vmul.f32 %v5266_v17, %v5074_v41  ;;  %v5145_v43 = vmul.f32 0.70710677, %v11362_v13  ;;  %v11369_v47 = vadd.f32 %v4951_v61, %v11219_v9  ;;  %v5076_v24 = vmul.f32 0.5, %v11328_v18 }
 0x7a9   : > { %v5331_v37 = vmul.f32 %v5267_v19, %v5075_v35  ;;  %8178 = verf.f32 %v5144_v26  ;;  %v5146_v48 = vmul.f32 0.70710677, %v4950_v55  ;;  %v5077_v44 = vmul.f32 0.5, %v11333_v15 }
 0x7aa   : > { %8180 = verf.f32 %v5145_v43  ;;  %v5147_v32 = vmul.f32 0.70710677, %v11369_v47  ;;  %v5388_v22 = vpack.c.bf16 %v5330_v46, %v5328_v63  ;;  %v5078_v35 = vmul.f32 0.5, %v11340_v11 }
 0x7ab   : > { %v8171_v40 = vpop.eup %8170  ;;  %8182 = verf.f32 %v5146_v48  ;;  %v5389_v10 = vpack.c.bf16 %v5331_v37, %v5329_v58  ;;  %v5079_v63 = vmul.f32 0.5, %v11343_v16 }
 0x7ac   : > { %v8173_v34 = vpop.eup %8172  ;;  %v5268_v0 = vadd.f32 1.0, %v8171_v40  ;;  %8184 = verf.f32 %v5147_v32  ;;  %v4955_v1 = vpop.f32.mrb[148].mxu1 }
 0x7ad   : > { %v8175_v12 = vpop.eup %8174  ;;  %v5269_v41 = vadd.f32 1.0, %v8173_v34  ;;  %v11374_v23 = vadd.f32 %v4955_v1, %v11214_v28  ;;  %v4957_v45 = vpop.f32.mrb[149].mxu1  ;;  %5602 = vmatprep.mubr.bf16.mxu0 %v5389_v10 }
 0x7ae   : > { %v8177_v17 = vpop.eup %8176  ;;  %v5270_v19 = vadd.f32 1.0, %v8175_v12  ;;  %v11379_v26 = vadd.f32 %v4957_v45, %v11219_v9  ;;  %v4959_v61 = vpop.f32.mrb[150].mxu1  ;;  %5603 = vmatmul.mubr.bf16.gmra.mrb[136].mxu0 %v5388_v22  ;;  %v5332_v37 = vmul.f32 %v5268_v0, %v5076_v24 }
 0x7af   : > { %v5271_v18 = vadd.f32 1.0, %v8177_v17  ;;  %v5148_v46 = vmul.f32 0.70710677, %v11374_v23  ;;  %v4960_v43 = vadd.f32 %v4959_v61, %v11214_v28  ;;  %v4961_v58 = vpop.f32.mrb[151].mxu1  ;;  %v5333_v40 = vmul.f32 %v5269_v41, %v5077_v44 }
 0x7b0   : > { %v5334_v48 = vmul.f32 %v5270_v19, %v5078_v35  ;;  %v5149_v15 = vmul.f32 0.70710677, %v11379_v26  ;;  %v11386_v11 = vadd.f32 %v4961_v58, %v11219_v9  ;;  %v5080_v19 = vmul.f32 0.5, %v11357_v56 }
 0x7b1   : > { %v5335_v32 = vmul.f32 %v5271_v18, %v5079_v63  ;;  %8186 = verf.f32 %v5148_v46  ;;  %v5150_v34 = vmul.f32 0.70710677, %v4960_v43  ;;  %v5082_v61 = vmul.f32 0.5, %v4950_v55 }
 0x7b2   : > { %8188 = verf.f32 %v5149_v15  ;;  %v5151_v16 = vmul.f32 0.70710677, %v11386_v11  ;;  %v5390_v22 = vpack.c.bf16 %v5334_v48, %v5332_v37  ;;  %v5081_v58 = vmul.f32 0.5, %v11362_v13 }
 0x7b3   : > { %v8179_v10 = vpop.eup %8178  ;;  %8190 = verf.f32 %v5150_v34  ;;  %v5391_v1 = vpack.c.bf16 %v5335_v32, %v5333_v40  ;;  %v5083_v37 = vmul.f32 0.5, %v11369_v47 }
 0x7b4   : > { %v8181_v12 = vpop.eup %8180  ;;  %v5272_v45 = vadd.f32 1.0, %v8179_v10  ;;  %8192 = verf.f32 %v5151_v16  ;;  %v4965_v0 = vpop.f32.mrb[152].mxu1 }
 0x7b5   : > { %v8183_v24 = vpop.eup %8182  ;;  %v5273_v17 = vadd.f32 1.0, %v8181_v12  ;;  %v11390_v35 = vadd.f32 %v4965_v0, %v11214_v28  ;;  %v4967_v41 = vpop.f32.mrb[153].mxu1  ;;  %5610 = vmatprep.mubr.bf16.mxu0 %v5391_v1 }
 0x7b6   : > { %v8185_v44 = vpop.eup %8184  ;;  %v5274_v63 = vadd.f32 1.0, %v8183_v24  ;;  %v11394_v18 = vadd.f32 %v4967_v41, %v11219_v9  ;;  %v4969_v46 = vpop.f32.mrb[154].mxu1  ;;  %5611 = vmatmul.mubr.bf16.gmra.mrb[140].mxu0 %v5390_v22  ;;  %v5336_v32 = vmul.f32 %v5272_v45, %v5080_v19 }
 0x7b7   : > { %v5275_v48 = vadd.f32 1.0, %v8185_v44  ;;  %v5152_v15 = vmul.f32 0.70710677, %v11390_v35  ;;  %v4971_v40 = vpop.f32.mrb[155].mxu1  ;;  %v4970_v56 = vadd.f32 %v4969_v46, %v11214_v28  ;;  %v5337_v55 = vmul.f32 %v5273_v17, %v5081_v58 }
 0x7b8   : > { %v5338_v34 = vmul.f32 %v5274_v63, %v5082_v61  ;;  %v5153_v16 = vmul.f32 0.70710677, %v11394_v18  ;;  %v4972_v1 = vadd.f32 %v4971_v40, %v11219_v9  ;;  %v5084_v46 = vmul.f32 0.5, %v11374_v23 }
 0x7b9   : > { %v5339_v10 = vmul.f32 %v5275_v48, %v5083_v37  ;;  %8194 = verf.f32 %v5152_v15  ;;  %v5154_v22 = vmul.f32 0.70710677, %v4970_v56  ;;  %v5086_v58 = vmul.f32 0.5, %v4960_v43 }
 0x7ba   : > { %8196 = verf.f32 %v5153_v16  ;;  %v5392_v13 = vpack.c.bf16 %v5338_v34, %v5336_v32  ;;  %v5155_v47 = vmul.f32 0.70710677, %v4972_v1  ;;  %v5085_v40 = vmul.f32 0.5, %v11379_v26 }
 0x7bb   : > { %v8187_v12 = vpop.eup %8186  ;;  %v5393_v0 = vpack.c.bf16 %v5339_v10, %v5337_v55  ;;  %8198 = verf.f32 %v5154_v22  ;;  %v5087_v32 = vmul.f32 0.5, %v11386_v11 }
 0x7bc   : > { %v8189_v24 = vpop.eup %8188  ;;  %v5276_v41 = vadd.f32 1.0, %v8187_v12  ;;  %v4975_v45 = vpop.f32.mrb[156].mxu1  ;;  %8200 = verf.f32 %v5155_v47 }
 0x7bd   : > { %v8191_v44 = vpop.eup %8190  ;;  %v5277_v19 = vadd.f32 1.0, %v8189_v24  ;;  %v4976_v61 = vadd.f32 %v4975_v45, %v11214_v28  ;;  %v4977_v17 = vpop.f32.mrb[157].mxu1  ;;  %5618 = vmatprep.mubr.bf16.mxu0 %v5393_v0 }
 0x7be   : > { %v8193_v63 = vpop.eup %8192  ;;  %v5278_v37 = vadd.f32 1.0, %v8191_v44  ;;  %v4978_v48 = vadd.f32 %v4977_v17, %v11219_v9  ;;  %v4979_v15 = vpop.f32.mrb[158].mxu1  ;;  %5619 = vmatmul.mubr.bf16.gmra.mrb[144].mxu0 %v5392_v13  ;;  %v5340_v10 = vmul.f32 %v5276_v41, %v5084_v46 }
 0x7bf   : > { %v5279_v34 = vadd.f32 1.0, %v8193_v63  ;;  %v5156_v16 = vmul.f32 0.70710677, %v4976_v61  ;;  %v4981_v55 = vpop.f32.mrb[159].mxu1  ;;  %v4980_v47 = vadd.f32 %v4979_v15, %v11214_v28  ;;  %v5341_v0 = vmul.f32 %v5277_v19, %v5085_v40 }
 0x7c0   : > { %v5342_v22 = vmul.f32 %v5278_v37, %v5086_v58  ;;  %v5157_v12 = vmul.f32 0.70710677, %v4978_v48  ;;  %v4982_v43 = vadd.f32 %v4981_v55, %v11219_v9  ;;  %v5088_v19 = vmul.f32 0.5, %v11390_v35 }
 0x7c1   : > { %v5343_v23 = vmul.f32 %v5279_v34, %v5087_v32  ;;  %8202 = verf.f32 %v5156_v16  ;;  %v5158_v24 = vmul.f32 0.70710677, %v4980_v47  ;;  %v5090_v58 = vmul.f32 0.5, %v4970_v56 }
 0x7c2   : > { %8204 = verf.f32 %v5157_v12  ;;  %v5394_v13 = vpack.c.bf16 %v5342_v22, %v5340_v10  ;;  %v5159_v26 = vmul.f32 0.70710677, %v4982_v43  ;;  %v5089_v15 = vmul.f32 0.5, %v11394_v18 }
 0x7c3   : > { %v8195_v45 = vpop.eup %8194  ;;  %v5395_v44 = vpack.c.bf16 %v5343_v23, %v5341_v0  ;;  %8206 = verf.f32 %v5158_v24  ;;  %v5091_v40 = vmul.f32 0.5, %v4972_v1  ;;  %v5092_v35 = vmul.f32 0.5, %v4976_v61 }
 0x7c4   : > { %v8197_v11 = vpop.eup %8196  ;;  %v5280_v17 = vadd.f32 1.0, %v8195_v45  ;;  %8208 = verf.f32 %v5159_v26  ;;  %v5094_v56 = vmul.f32 0.5, %v4980_v47  ;;  %v5093_v18 = vmul.f32 0.5, %v4978_v48 }
 0x7c5   : > { %5626 = vmatprep.mubr.bf16.mxu0 %v5395_v44  ;;  %v8199_v41 = vpop.eup %8198  ;;  %v5281_v63 = vadd.f32 1.0, %v8197_v11  ;;  %v5095_v1 = vmul.f32 0.5, %v4982_v43 }
 0x7c6   : > { %5627 = vmatmul.mubr.bf16.gmra.mrb[148].mxu0 %v5394_v13  ;;  %v8201_v46 = vpop.eup %8200  ;;  %v5282_v37 = vadd.f32 1.0, %v8199_v41  ;;  %v5344_v34 = vmul.f32 %v5280_v17, %v5088_v19 }
 0x7c7   : > { %v5283_v32 = vadd.f32 1.0, %v8201_v46  ;;  %v5345_v55 = vmul.f32 %v5281_v63, %v5089_v15 }
 0x7c8   : > { %v5346_v16 = vmul.f32 %v5282_v37, %v5090_v58 }
 0x7c9   : > { %v5347_v10 = vmul.f32 %v5283_v32, %v5091_v40 }
 0x7ca   : > { %v5396_v12 = vpack.c.bf16 %v5346_v16, %v5344_v34 }
 0x7cb   : > { %v8203_v22 = vpop.eup %8202  ;;  %v5397_v23 = vpack.c.bf16 %v5347_v10, %v5345_v55 }
 0x7cc   : > { %v8205_v0 = vpop.eup %8204  ;;  %v5284_v24 = vadd.f32 1.0, %v8203_v22 }
 0x7cd   : > { %v8207_v45 = vpop.eup %8206  ;;  %v5285_v13 = vadd.f32 1.0, %v8205_v0  ;;  %5634 = vmatprep.mubr.bf16.mxu0 %v5397_v23 }
 0x7ce   : > { %v8209_v26 = vpop.eup %8208  ;;  %v5286_v44 = vadd.f32 1.0, %v8207_v45  ;;  %5635 = vmatmul.mubr.bf16.gmra.mrb[152].mxu0 %v5396_v12  ;;  %v5348_v17 = vmul.f32 %v5284_v24, %v5092_v35 }
 0x7cf   : > { %v5287_v11 = vadd.f32 1.0, %v8209_v26  ;;  %v5349_v63 = vmul.f32 %v5285_v13, %v5093_v18 }
 0x7d0   : > { %v5350_v41 = vmul.f32 %v5286_v44, %v5094_v56 }
 0x7d1   : > { %v5351_v46 = vmul.f32 %v5287_v11, %v5095_v1 }
 0x7d2   : > { %v5398_v19 = vpack.c.bf16 %v5350_v41, %v5348_v17 }
 0x7d3   : > { %v5399_v58 = vpack.c.bf16 %v5351_v46, %v5349_v63 }
 0x7d5   : > { %5642 = vmatprep.mubr.bf16.mxu0 %v5399_v58 }
 0x7d6   : > { %5643 = vmatmul.mubr.bf16.gmra.mrb[156].mxu0 %v5398_v19 }
 0x839   : > { %v4985_v37 = vpop.f32.mrb[160].mxu1 }
 0x83a   : > { %v4986_v15 = vadd.f32 %v4985_v37, %v11214_v28  ;;  %v4987_v40 = vpop.f32.mrb[161].mxu1 }
 0x83b   : > { %v4988_v61 = vadd.f32 %v4987_v40, %v11219_v9  ;;  %v4989_v47 = vpop.f32.mrb[162].mxu1 }
 0x83c   : > { %v5160_v32 = vmul.f32 0.70710677, %v4986_v15  ;;  %v4990_v48 = vadd.f32 %v4989_v47, %v11214_v28  ;;  %v4991_v43 = vpop.f32.mrb[163].mxu1  ;;  %v5096_v40 = vmul.f32 0.5, %v4986_v15 }
 0x83d   : > { %v5161_v34 = vmul.f32 0.70710677, %v4988_v61  ;;  %v4992_v16 = vadd.f32 %v4991_v43, %v11219_v9 }
 0x83e   : > { %8210 = verf.f32 %v5160_v32  ;;  %v5162_v55 = vmul.f32 0.70710677, %v4990_v48  ;;  %v5098_v47 = vmul.f32 0.5, %v4990_v48 }
 0x83f   : > { %8212 = verf.f32 %v5161_v34  ;;  %v5163_v10 = vmul.f32 0.70710677, %v4992_v16 }
 0x840   : > { %8214 = verf.f32 %v5162_v55  ;;  %v5097_v55 = vmul.f32 0.5, %v4988_v61 }
 0x841   : > { %8216 = verf.f32 %v5163_v10  ;;  %v4995_v22 = vpop.f32.mrb[164].mxu1  ;;  %v5099_v10 = vmul.f32 0.5, %v4992_v16 }
 0x842   : > { %v4996_v12 = vadd.f32 %v4995_v22, %v11214_v28  ;;  %v4997_v0 = vpop.f32.mrb[165].mxu1 }
 0x843   : > { %v4998_v23 = vadd.f32 %v4997_v0, %v11219_v9  ;;  %v4999_v24 = vpop.f32.mrb[166].mxu1 }
 0x844   : > { %v5164_v45 = vmul.f32 0.70710677, %v4996_v12  ;;  %v5000_v13 = vadd.f32 %v4999_v24, %v11214_v28  ;;  %v5001_v26 = vpop.f32.mrb[167].mxu1 }
 0x845   : > { %v5165_v35 = vmul.f32 0.70710677, %v4998_v23  ;;  %v5002_v56 = vadd.f32 %v5001_v26, %v11219_v9 }
 0x846   : > { %8218 = verf.f32 %v5164_v45  ;;  %v5166_v44 = vmul.f32 0.70710677, %v5000_v13 }
 0x847   : > { %8220 = verf.f32 %v5165_v35  ;;  %v5167_v18 = vmul.f32 0.70710677, %v5002_v56 }
 0x848   : > { %v8211_v1 = vpop.eup %8210  ;;  %8222 = verf.f32 %v5166_v44 }
 0x849   : > { %v8213_v11 = vpop.eup %8212  ;;  %v5288_v17 = vadd.f32 1.0, %v8211_v1  ;;  %8224 = verf.f32 %v5167_v18  ;;  %v5005_v41 = vpop.f32.mrb[168].mxu1 }
 0x84a   : > { %v8215_v63 = vpop.eup %8214  ;;  %v5289_v46 = vadd.f32 1.0, %v8213_v11  ;;  %v11420_v19 = vadd.f32 %v5005_v41, %v11214_v28  ;;  %v5007_v58 = vpop.f32.mrb[169].mxu1 }
 0x84b   : > { %v8217_v37 = vpop.eup %8216  ;;  %v5290_v32 = vadd.f32 1.0, %v8215_v63  ;;  %v11423_v43 = vadd.f32 %v5007_v58, %v11219_v9  ;;  %v5009_v34 = vpop.f32.mrb[170].mxu1  ;;  %v5352_v45 = vmul.f32 %v5288_v17, %v5096_v40 }
 0x84c   : > { %v5291_v22 = vadd.f32 1.0, %v8217_v37  ;;  %v5168_v0 = vmul.f32 0.70710677, %v11420_v19  ;;  %v5011_v24 = vpop.f32.mrb[171].mxu1  ;;  %v5010_v44 = vadd.f32 %v5009_v34, %v11214_v28  ;;  %v5353_v18 = vmul.f32 %v5289_v46, %v5097_v55 }
 0x84d   : > { %v5354_v26 = vmul.f32 %v5290_v32, %v5098_v47  ;;  %v5169_v35 = vmul.f32 0.70710677, %v11423_v43  ;;  %v5012_v48 = vadd.f32 %v5011_v24, %v11219_v9  ;;  %v5100_v34 = vmul.f32 0.5, %v4996_v12 }
 0x84e   : > { %v5355_v15 = vmul.f32 %v5291_v22, %v5099_v10  ;;  %8226 = verf.f32 %v5168_v0  ;;  %v5170_v1 = vmul.f32 0.70710677, %v5010_v44  ;;  %v5102_v55 = vmul.f32 0.5, %v5000_v13 }
 0x84f   : > { %8228 = verf.f32 %v5169_v35  ;;  %v5400_v11 = vpack.c.bf16 %v5354_v26, %v5352_v45  ;;  %v5171_v16 = vmul.f32 0.70710677, %v5012_v48  ;;  %v5101_v24 = vmul.f32 0.5, %v4998_v23 }
 0x850   : > { %v8219_v61 = vpop.eup %8218  ;;  %v5401_v41 = vpack.c.bf16 %v5355_v15, %v5353_v18  ;;  %8230 = verf.f32 %v5170_v1  ;;  %v5103_v45 = vmul.f32 0.5, %v5002_v56 }
 0x851   : > { %v8221_v63 = vpop.eup %8220  ;;  %v5292_v58 = vadd.f32 1.0, %v8219_v61  ;;  %v5015_v17 = vpop.f32.mrb[172].mxu1  ;;  %8232 = verf.f32 %v5171_v16 }
 0x852   : > { %v8223_v37 = vpop.eup %8222  ;;  %v5293_v40 = vadd.f32 1.0, %v8221_v63  ;;  %v11430_v47 = vadd.f32 %v5015_v17, %v11214_v28  ;;  %v5017_v46 = vpop.f32.mrb[173].mxu1  ;;  %5650 = vmatprep.mubr.bf16.mxu0 %v5401_v41 }
 0x853   : > { %v8225_v32 = vpop.eup %8224  ;;  %v5294_v10 = vadd.f32 1.0, %v8223_v37  ;;  %v11433_v22 = vadd.f32 %v5017_v46, %v11219_v9  ;;  %v5019_v0 = vpop.f32.mrb[174].mxu1  ;;  %5651 = vmatmul.mubr.bf16.gmra.mrb[160].mxu0 %v5400_v11  ;;  %v5356_v15 = vmul.f32 %v5292_v58, %v5100_v34 }
 0x854   : > { %v5295_v26 = vadd.f32 1.0, %v8225_v32  ;;  %v5172_v35 = vmul.f32 0.70710677, %v11430_v47  ;;  %v5021_v18 = vpop.f32.mrb[175].mxu1  ;;  %v5020_v16 = vadd.f32 %v5019_v0, %v11214_v28  ;;  %v5357_v12 = vmul.f32 %v5293_v40, %v5101_v24 }
 0x855   : > { %v5358_v1 = vmul.f32 %v5294_v10, %v5102_v55  ;;  %v5173_v61 = vmul.f32 0.70710677, %v11433_v22  ;;  %v5022_v41 = vadd.f32 %v5021_v18, %v11219_v9  ;;  %v5104_v55 = vmul.f32 0.5, %v11420_v19 }
 0x856   : > { %v5359_v13 = vmul.f32 %v5295_v26, %v5103_v45  ;;  %8234 = verf.f32 %v5172_v35  ;;  %v5174_v63 = vmul.f32 0.70710677, %v5020_v16  ;;  %v5105_v26 = vmul.f32 0.5, %v11423_v43 }
 0x857   : > { %8236 = verf.f32 %v5173_v61  ;;  %v5402_v11 = vpack.c.bf16 %v5358_v1, %v5356_v15  ;;  %v5175_v56 = vmul.f32 0.70710677, %v5022_v41  ;;  %v5106_v35 = vmul.f32 0.5, %v5010_v44 }
 0x858   : > { %v8227_v23 = vpop.eup %8226  ;;  %v5403_v17 = vpack.c.bf16 %v5359_v13, %v5357_v12  ;;  %8238 = verf.f32 %v5174_v63  ;;  %v5107_v61 = vmul.f32 0.5, %v5012_v48 }
 0x859   : > { %v8229_v37 = vpop.eup %8228  ;;  %v5025_v46 = vpop.f32.mrb[176].mxu1  ;;  %v5296_v58 = vadd.f32 1.0, %v8227_v23  ;;  %8240 = verf.f32 %v5175_v56 }
 0x85a   : > { %v11440_v32 = vadd.f32 %v5025_v46, %v11214_v28  ;;  %v5027_v34 = vpop.f32.mrb[177].mxu1  ;;  %5658 = vmatprep.mubr.bf16.mxu0 %v5403_v17  ;;  %v8231_v40 = vpop.eup %8230  ;;  %v5297_v10 = vadd.f32 1.0, %v8229_v37 }
 0x85b   : > { %v11444_v0 = vadd.f32 %v5027_v34, %v11219_v9  ;;  %v5029_v24 = vpop.f32.mrb[178].mxu1  ;;  %5659 = vmatmul.mubr.bf16.gmra.mrb[164].mxu0 %v5402_v11  ;;  %v8233_v45 = vpop.eup %8232  ;;  %v5298_v18 = vadd.f32 1.0, %v8231_v40  ;;  %v5360_v63 = vmul.f32 %v5296_v58, %v5104_v55 }
 0x85c   : > { %v5176_v15 = vmul.f32 0.70710677, %v11440_v32  ;;  %v5031_v1 = vpop.f32.mrb[179].mxu1  ;;  %v5299_v12 = vadd.f32 1.0, %v8233_v45  ;;  %v5030_v19 = vadd.f32 %v5029_v24, %v11214_v28  ;;  %v5361_v11 = vmul.f32 %v5297_v10, %v5105_v26 }
 0x85d   : > { %v5177_v13 = vmul.f32 0.70710677, %v11444_v0  ;;  %v5362_v23 = vmul.f32 %v5298_v18, %v5106_v35  ;;  %v5032_v56 = vadd.f32 %v5031_v1, %v11219_v9  ;;  %v5108_v24 = vmul.f32 0.5, %v11430_v47 }
 0x85e   : > { %8242 = verf.f32 %v5176_v15  ;;  %v5363_v17 = vmul.f32 %v5299_v12, %v5107_v61  ;;  %v5178_v43 = vmul.f32 0.70710677, %v5030_v19  ;;  %v5110_v18 = vmul.f32 0.5, %v5020_v16 }
 0x85f   : > { %8244 = verf.f32 %v5177_v13  ;;  %v5179_v37 = vmul.f32 0.70710677, %v5032_v56  ;;  %v5404_v46 = vpack.c.bf16 %v5362_v23, %v5360_v63  ;;  %v5109_v1 = vmul.f32 0.5, %v11433_v22 }
 0x860   : > { %v8235_v44 = vpop.eup %8234  ;;  %8246 = verf.f32 %v5178_v43  ;;  %v5405_v48 = vpack.c.bf16 %v5363_v17, %v5361_v11  ;;  %v5111_v61 = vmul.f32 0.5, %v5022_v41 }
 0x861   : > { %v8237_v34 = vpop.eup %8236  ;;  %v5300_v40 = vadd.f32 1.0, %v8235_v44  ;;  %8248 = verf.f32 %v5179_v37  ;;  %v5035_v58 = vpop.f32.mrb[180].mxu1 }
 0x862   : > { %v8239_v45 = vpop.eup %8238  ;;  %5666 = vmatprep.mubr.bf16.mxu0 %v5405_v48  ;;  %v5301_v35 = vadd.f32 1.0, %v8237_v34  ;;  %v11453_v26 = vadd.f32 %v5035_v58, %v11214_v28  ;;  %v5037_v15 = vpop.f32.mrb[181].mxu1 }
 0x863   : > { %v8241_v55 = vpop.eup %8240  ;;  %v5302_v10 = vadd.f32 1.0, %v8239_v45  ;;  %5667 = vmatmul.mubr.bf16.gmra.mrb[168].mxu0 %v5404_v46  ;;  %v11457_v13 = vadd.f32 %v5037_v15, %v11219_v9  ;;  %v5039_v63 = vpop.f32.mrb[182].mxu1  ;;  %v5364_v47 = vmul.f32 %v5300_v40, %v5108_v24  ;;  %v5114_v15 = vmul.f32 0.5, %v5030_v19 }
 0x864   : > { %v5303_v12 = vadd.f32 1.0, %v8241_v55  ;;  %v5180_v11 = vmul.f32 0.70710677, %v11453_v26  ;;  %v11461_v16 = vadd.f32 %v5039_v63, %v11214_v28  ;;  %v5041_v17 = vpop.f32.mrb[183].mxu1  ;;  %v5365_v41 = vmul.f32 %v5301_v35, %v5109_v1 }
 0x865   : > { %v5366_v23 = vmul.f32 %v5302_v10, %v5110_v18  ;;  %v5181_v44 = vmul.f32 0.70710677, %v11457_v13  ;;  %v11465_v37 = vadd.f32 %v5041_v17, %v11219_v9  ;;  %v5112_v18 = vmul.f32 0.5, %v11440_v32 }
 0x866   : > { %v5367_v43 = vmul.f32 %v5303_v12, %v5111_v61  ;;  %8250 = verf.f32 %v5180_v11  ;;  %v5182_v46 = vmul.f32 0.70710677, %v11461_v16  ;;  %v5115_v61 = vmul.f32 0.5, %v5032_v56 }
 0x867   : > { %v5406_v34 = vpack.c.bf16 %v5366_v23, %v5364_v47  ;;  %8252 = verf.f32 %v5181_v44  ;;  %v5183_v40 = vmul.f32 0.70710677, %v11465_v37  ;;  %v5113_v11 = vmul.f32 0.5, %v11444_v0 }
 0x868   : > { %v8243_v22 = vpop.eup %8242  ;;  %8254 = verf.f32 %v5182_v46  ;;  %v5407_v24 = vpack.c.bf16 %v5367_v43, %v5365_v41 }
 0x869   : > { %v8245_v48 = vpop.eup %8244  ;;  %v5304_v45 = vadd.f32 1.0, %v8243_v22  ;;  %8256 = verf.f32 %v5183_v40 }
 0x86a   : > { %v8247_v58 = vpop.eup %8246  ;;  %v5305_v10 = vadd.f32 1.0, %v8245_v48  ;;  %5674 = vmatprep.mubr.bf16.mxu0 %v5407_v24  ;;  %v11485_v48 = vld [vmem:[%s5450_s28] ss:$0 sm:$0xff] }
 0x86b   : > { %v8249_v55 = vpop.eup %8248  ;;  %v5306_v35 = vadd.f32 1.0, %v8247_v58  ;;  %5675 = vmatmul.mubr.bf16.gmra.mrb[172].mxu0 %v5406_v34  ;;  %v5368_v23 = vmul.f32 %v5304_v45, %v5112_v18 }
 0x86c   : > { %v5307_v12 = vadd.f32 1.0, %v8249_v55  ;;  %v5369_v46 = vmul.f32 %v5305_v10, %v5113_v11 }
 0x86d   : > { %v5045_v1 = vpop.f32.mrb[184].mxu1  ;;  %v5370_v32 = vmul.f32 %v5306_v35, %v5114_v15 }
 0x86e   : > { %v11475_v63 = vadd.f32 %v5045_v1, %v11214_v28  ;;  %v5047_v47 = vpop.f32.mrb[185].mxu1  ;;  %v5371_v43 = vmul.f32 %v5307_v12, %v5115_v61 }
 0x86f   : > { %v11479_v19 = vadd.f32 %v5047_v47, %v11219_v9  ;;  %v5049_v17 = vpop.f32.mrb[186].mxu1  ;;  %v5408_v45 = vpack.c.bf16 %v5370_v32, %v5368_v23  ;;  %v5116_v23 = vmul.f32 0.5, %v11453_v26 }
 0x870   : > { %v5184_v44 = vmul.f32 0.70710677, %v11475_v63  ;;  %v11483_v22 = vadd.f32 %v5049_v17, %v11214_v28  ;;  %v5051_v41 = vpop.f32.mrb[187].mxu1  ;;  %v8251_v18 = vpop.eup %8250  ;;  %v5409_v10 = vpack.c.bf16 %v5371_v43, %v5369_v46  ;;  %v5117_v46 = vmul.f32 0.5, %v11457_v13 }
 0x871   : > { %v6808_v56 = vpop.f32.mrb[128].mxu0  ;;  %v5185_v40 = vmul.f32 0.70710677, %v11479_v19  ;;  %v11489_v0 = vadd.f32 %v5051_v41, %v11219_v9  ;;  %v8253_v1 = vpop.eup %8252  ;;  %v5308_v61 = vadd.f32 1.0, %v8251_v18 }
 0x872   : > { %v6809_v34 = vpop.f32.mrb[129].mxu0  ;;  %8258 = verf.f32 %v5184_v44  ;;  %v5186_v55 = vmul.f32 0.70710677, %v11483_v22  ;;  %v8255_v11 = vpop.eup %8254  ;;  %v5309_v32 = vadd.f32 1.0, %v8253_v1  ;;  %5682 = vmatprep.mubr.bf16.mxu0 %v5409_v10 }
 0x873   : > { %v6810_v24 = vadd.f32 %v6809_v34, %v6808_v56  ;;  %v6811_v58 = vpop.f32.mrb[130].mxu0  ;;  %8260 = verf.f32 %v5185_v40  ;;  %v5187_v35 = vmul.f32 0.70710677, %v11489_v0  ;;  %v8257_v17 = vpop.eup %8256  ;;  %v5118_v56 = vmul.f32 0.5, %v11461_v16  ;;  %5683 = vmatmul.mubr.bf16.gmra.mrb[176].mxu0 %v5408_v45 }
 0x874   : > { %v6812_v15 = vpop.f32.mrb[131].mxu0  ;;  %8262 = verf.f32 %v5186_v55  ;;  %v5310_v44 = vadd.f32 1.0, %v8255_v11  ;;  %v5119_v34 = vmul.f32 0.5, %v11465_v37  ;;  %v5311_v40 = vadd.f32 1.0, %v8257_v17 }
 0x875   : > { %v5589_v12 = vadd.f32 %v6810_v24, %v11485_v48  ;;  %v6813_v47 = vadd.f32 %v6812_v15, %v6811_v58  ;;  %8264 = verf.f32 %v5187_v35  ;;  %v5372_v24 = vmul.f32 %v5308_v61, %v5116_v23 }
 0x876   : > { %v5374_v26 = vmul.f32 %v5310_v44, %v5118_v56  ;;  %v5373_v55 = vmul.f32 %v5309_v32, %v5117_v46  ;;  %v5375_v18 = vmul.f32 %v5311_v40, %v5119_v34 }
 0x877   : > { %v11497_v41 = vadd.f32 %v5589_v12, %v10817_v21  ;;  %v5592_v43 = vadd.f32 %v6813_v47, %v11485_v48  ;;  %v5055_v15 = vpop.f32.mrb[188].mxu1 }
 0x878   : > { %v11508_v13 = vadd.f32 %v5055_v15, %v11214_v28  ;;  %v5057_v35 = vpop.f32.mrb[189].mxu1  ;;  %v5410_v10 = vpack.c.bf16 %v5374_v26, %v5372_v24  ;;  %v5411_v12 = vpack.c.bf16 %v5375_v18, %v5373_v55  ;;  %v5120_v55 = vmul.f32 0.5, %v11475_v63 }
 0x879   : > { %5747 = vst [vmem:[#allocation2] sm:$0xff] %v11497_v41  ;;  %v11504_v58 = vadd.f32 %v5592_v43, %v10820_v39  ;;  %v6814_v16 = vpop.f32.mrb[132].mxu0  ;;  %v11511_v1 = vadd.f32 %v5057_v35, %v11219_v9  ;;  %v5059_v39 = vpop.f32.mrb[190].mxu1  ;;  %v5121_v18 = vmul.f32 0.5, %v11479_v19 }
 0x87a   : > { %v6815_v21 = vpop.f32.mrb[133].mxu0  ;;  %v5188_v23 = vmul.f32 0.70710677, %v11508_v13  ;;  %v5061_v17 = vpop.f32.mrb[191].mxu1  ;;  %v5060_v46 = vadd.f32 %v5059_v39, %v11214_v28  ;;  %5690 = vmatprep.mubr.bf16.mxu0 %v5411_v12  ;;  %v5123_v28 = vmul.f32 0.5, %v11489_v0 }
 0x87b   : > { %5748 = vst [vmem:[#allocation2 + $0x8] sm:$0xff] %v11504_v58  ;;  %v6816_v45 = vadd.f32 %v6815_v21, %v6814_v16  ;;  %v6817_v37 = vpop.f32.mrb[134].mxu0  ;;  %v5189_v43 = vmul.f32 0.70710677, %v11511_v1  ;;  %5691 = vmatmul.mubr.bf16.gmra.mrb[180].mxu0 %v5410_v10  ;;  %v5122_v21 = vmul.f32 0.5, %v11483_v22  ;;  %v5062_v10 = vadd.f32 %v5061_v17, %v11219_v9 }
 0x87c   : > { %v6818_v61 = vpop.f32.mrb[135].mxu0  ;;  %v8259_v47 = vpop.eup %8258  ;;  %8266 = verf.f32 %v5188_v23 }
 0x87d   : > { %v5597_v11 = vadd.f32 %v6816_v45, %v11485_v48  ;;  %v6819_v32 = vadd.f32 %v6818_v61, %v6817_v37  ;;  %v8261_v56 = vpop.eup %8260  ;;  %v5312_v44 = vadd.f32 1.0, %v8259_v47  ;;  %v5190_v37 = vmul.f32 0.70710677, %v5060_v46 }
 0x87e   : > { %v8263_v34 = vpop.eup %8262  ;;  %v5313_v40 = vadd.f32 1.0, %v8261_v56  ;;  %8268 = verf.f32 %v5189_v43  ;;  %v5191_v0 = vmul.f32 0.70710677, %v5062_v10 }
 0x87f   : > { %v11518_v24 = vadd.f32 %v5597_v11, %v10838_v14  ;;  %v5600_v26 = vadd.f32 %v6819_v32, %v11485_v48  ;;  %v8265_v16 = vpop.eup %8264  ;;  %v5314_v15 = vadd.f32 1.0, %v8263_v34  ;;  %v5376_v35 = vmul.f32 %v5312_v44, %v5120_v55 }
 0x880   : > { %v5315_v45 = vadd.f32 1.0, %v8265_v16  ;;  %v5377_v39 = vmul.f32 %v5313_v40, %v5121_v18  ;;  %8270 = verf.f32 %v5190_v37 }
 0x881   : > { %5749 = vst [vmem:[#allocation2 + $0x10] sm:$0xff] %v11518_v24  ;;  %v11527_v14 = vadd.f32 %v5600_v26, %v10841_v4  ;;  %v5378_v61 = vmul.f32 %v5314_v15, %v5122_v21  ;;  %v6820_v63 = vpop.f32.mrb[136].mxu0  ;;  %8272 = verf.f32 %v5191_v0  ;;  %v5125_v0 = vmul.f32 0.5, %v11511_v1 }
 0x882   : > { %v5379_v19 = vmul.f32 %v5315_v45, %v5123_v28  ;;  %v6821_v22 = vpop.f32.mrb[137].mxu0  ;;  %v5126_v28 = vmul.f32 0.5, %v5060_v46 }
 0x883   : > { %5750 = vst [vmem:[#allocation2 + $0x18] sm:$0xff] %v11527_v14  ;;  %v6822_v12 = vadd.f32 %v6821_v22, %v6820_v63  ;;  %v6823_v47 = vpop.f32.mrb[138].mxu0  ;;  %v5412_v11 = vpack.c.bf16 %v5378_v61, %v5376_v35 }
 0x884   : > { %v6824_v23 = vpop.f32.mrb[139].mxu0  ;;  %v5413_v4 = vpack.c.bf16 %v5379_v19, %v5377_v39 }
 0x885   : > { %v5605_v32 = vadd.f32 %v6822_v12, %v11485_v48  ;;  %v6825_v56 = vadd.f32 %v6824_v23, %v6823_v47  ;;  %v5127_v12 = vmul.f32 0.5, %v5062_v10 }
 0x886   : > { %5698 = vmatprep.mubr.bf16.mxu0 %v5413_v4  ;;  %v8267_v44 = vpop.eup %8266 }
 0x887   : > { %v11533_v9 = vadd.f32 %v5605_v32, %v10875_v38  ;;  %v5608_v17 = vadd.f32 %v6825_v56, %v11485_v48  ;;  %5699 = vmatmul.mubr.bf16.gmra.mrb[184].mxu0 %v5412_v11  ;;  %v5316_v16 = vadd.f32 1.0, %v8267_v44  ;;  %v5124_v38 = vmul.f32 0.5, %v11508_v13 }
 0x888   : > { %v8269_v26 = vpop.eup %8268 }
 0x889   : > { %5751 = vst [vmem:[#allocation2 + $0x20] sm:$0xff] %v11533_v9  ;;  %v11538_v43 = vadd.f32 %v5608_v17, %v10878_v50  ;;  %v6826_v34 = vpop.f32.mrb[140].mxu0  ;;  %v5317_v61 = vadd.f32 1.0, %v8269_v26  ;;  %v5380_v63 = vmul.f32 %v5316_v16, %v5124_v38 }
 0x88a   : > { %v6827_v40 = vpop.f32.mrb[141].mxu0  ;;  %v8271_v21 = vpop.eup %8270 }
 0x88b   : > { %5752 = vst [vmem:[#allocation2 + $0x28] sm:$0xff] %v11538_v43  ;;  %v6828_v55 = vadd.f32 %v6827_v40, %v6826_v34  ;;  %v6829_v18 = vpop.f32.mrb[142].mxu0  ;;  %v5318_v45 = vadd.f32 1.0, %v8271_v21  ;;  %v8273_v50 = vpop.eup %8272  ;;  %v5381_v23 = vmul.f32 %v5317_v61, %v5125_v0 }
 0x88c   : > { %v6830_v15 = vpop.f32.mrb[143].mxu0  ;;  %v5319_v47 = vadd.f32 1.0, %v8273_v50 }
 0x88d   : > { %v5613_v37 = vadd.f32 %v6828_v55, %v11485_v48  ;;  %v6831_v35 = vadd.f32 %v6830_v15, %v6829_v18  ;;  %v5382_v39 = vmul.f32 %v5318_v45, %v5126_v28 }
 0x88e   : > { %v5383_v4 = vmul.f32 %v5319_v47, %v5127_v12 }
 0x88f   : > { %v11544_v19 = vadd.f32 %v5613_v37, %v10916_v36  ;;  %v5616_v22 = vadd.f32 %v6831_v35, %v11485_v48  ;;  %v5414_v11 = vpack.c.bf16 %v5382_v39, %v5380_v63 }
 0x890   : > { %v5415_v44 = vpack.c.bf16 %v5383_v4, %v5381_v23 }
 0x891   : > { %5753 = vst [vmem:[#allocation2 + $0x30] sm:$0xff] %v11544_v19  ;;  %v11550_v13 = vadd.f32 %v5616_v22, %v10919_v62  ;;  %v6832_v46 = vpop.f32.mrb[144].mxu0 }
 0x892   : > { %v6833_v32 = vpop.f32.mrb[145].mxu0  ;;  %5706 = vmatprep.mubr.bf16.mxu0 %v5415_v44 }
 0x893   : > { %5754 = vst [vmem:[#allocation2 + $0x38] sm:$0xff] %v11550_v13  ;;  %v6834_v36 = vadd.f32 %v6833_v32, %v6832_v46  ;;  %v6835_v56 = vpop.f32.mrb[146].mxu0  ;;  %5707 = vmatmul.mubr.bf16.gmra.mrb[188].mxu0 %v5414_v11 }
 0x894   : > { %v6836_v17 = vpop.f32.mrb[147].mxu0 }
 0x895   : > { %v5621_v1 = vadd.f32 %v6834_v36, %v11485_v48  ;;  %v6837_v10 = vadd.f32 %v6836_v17, %v6835_v56 }
 0x897   : > { %v11555_v34 = vadd.f32 %v5621_v1, %v10958_v3  ;;  %v5624_v62 = vadd.f32 %v6837_v10, %v11485_v48 }
 0x899   : > { %5755 = vst [vmem:[#allocation2 + $0x40] sm:$0xff] %v11555_v34  ;;  %v11560_v40 = vadd.f32 %v5624_v62, %v10964_v20  ;;  %v6838_v26 = vpop.f32.mrb[148].mxu0 }
 0x89a   : > { %v6839_v16 = vpop.f32.mrb[149].mxu0 }
 0x89b   : > { %5756 = vst [vmem:[#allocation2 + $0x48] sm:$0xff] %v11560_v40  ;;  %v6840_v55 = vadd.f32 %v6839_v16, %v6838_v26  ;;  %v6841_v18 = vpop.f32.mrb[150].mxu0 }
 0x89c   : > { %v6842_v21 = vpop.f32.mrb[151].mxu0 }
 0x89d   : > { %v5629_v38 = vadd.f32 %v6840_v55, %v11485_v48  ;;  %v6843_v15 = vadd.f32 %v6842_v21, %v6841_v18 }
 0x89f   : > { %v11565_v3 = vadd.f32 %v5629_v38, %v10994_v42  ;;  %v5632_v28 = vadd.f32 %v6843_v15, %v11485_v48 }
 0x8a1   : > { %5757 = vst [vmem:[#allocation2 + $0x50] sm:$0xff] %v11565_v3  ;;  %v11570_v20 = vadd.f32 %v5632_v28, %v10997_v30  ;;  %v6844_v45 = vpop.f32.mrb[152].mxu0 }
 0x8a2   : > { %v6845_v37 = vpop.f32.mrb[153].mxu0 }
 0x8a3   : > { %5758 = vst [vmem:[#allocation2 + $0x58] sm:$0xff] %v11570_v20  ;;  %v6846_v35 = vadd.f32 %v6845_v37, %v6844_v45  ;;  %v6847_v61 = vpop.f32.mrb[154].mxu0 }
 0x8a4   : > { %v6848_v50 = vpop.f32.mrb[155].mxu0 }
 0x8a5   : > { %v5637_v63 = vadd.f32 %v6846_v35, %v11485_v48  ;;  %v6849_v39 = vadd.f32 %v6848_v50, %v6847_v61 }
 0x8a7   : > { %v11575_v42 = vadd.f32 %v5637_v63, %v11024_v54  ;;  %v5640_v22 = vadd.f32 %v6849_v39, %v11485_v48 }
 0x8a9   : > { %5759 = vst [vmem:[#allocation2 + $0x60] sm:$0xff] %v11575_v42  ;;  %v11580_v30 = vadd.f32 %v5640_v22, %v11027_v25  ;;  %v6850_v0 = vpop.f32.mrb[156].mxu0 }
 0x8aa   : > { %v6851_v12 = vpop.f32.mrb[157].mxu0 }
 0x8ab   : > { %5760 = vst [vmem:[#allocation2 + $0x68] sm:$0xff] %v11580_v30  ;;  %v6852_v47 = vadd.f32 %v6851_v12, %v6850_v0  ;;  %v6853_v46 = vpop.f32.mrb[158].mxu0 }
 0x8ac   : > { %v6854_v11 = vpop.f32.mrb[159].mxu0 }
 0x8ad   : > { %v5645_v23 = vadd.f32 %v6852_v47, %v11485_v48  ;;  %v6855_v4 = vadd.f32 %v6854_v11, %v6853_v46 }
 0x8af   : > { %v11585_v54 = vadd.f32 %v5645_v23, %v11052_v31  ;;  %v5648_v32 = vadd.f32 %v6855_v4, %v11485_v48 }
 0x8b1   : > { %5761 = vst [vmem:[#allocation2 + $0x70] sm:$0xff] %v11585_v54  ;;  %v11590_v25 = vadd.f32 %v5648_v32, %v11055_v60 }
 0x8b3   : > { %5762 = vst [vmem:[#allocation2 + $0x78] sm:$0xff] %v11590_v25 }
 0x926   : > { %v6856_v36 = vpop.f32.mrb[160].mxu0 }
 0x927   : > { %v6857_v56 = vpop.f32.mrb[161].mxu0 }
 0x928   : > { %v6858_v17 = vadd.f32 %v6857_v56, %v6856_v36  ;;  %v6859_v44 = vpop.f32.mrb[162].mxu0 }
 0x929   : > { %v6860_v1 = vpop.f32.mrb[163].mxu0 }
 0x92a   : > { %v5653_v10 = vadd.f32 %v6858_v17, %v11485_v48  ;;  %v6861_v62 = vadd.f32 %v6860_v1, %v6859_v44 }
 0x92c   : > { %v11595_v31 = vadd.f32 %v5653_v10, %v11127_v29  ;;  %v5656_v26 = vadd.f32 %v6861_v62, %v11485_v48 }
 0x92e   : > { %5763 = vst [vmem:[#allocation2 + $0x80] sm:$0xff] %v11595_v31  ;;  %v11600_v60 = vadd.f32 %v5656_v26, %v11130_v59  ;;  %v6862_v16 = vpop.f32.mrb[164].mxu0 }
 0x92f   : > { %v6863_v55 = vpop.f32.mrb[165].mxu0 }
 0x930   : > { %5764 = vst [vmem:[#allocation2 + $0x88] sm:$0xff] %v11600_v60  ;;  %v6864_v18 = vadd.f32 %v6863_v55, %v6862_v16  ;;  %v6865_v21 = vpop.f32.mrb[166].mxu0 }
 0x931   : > { %v6866_v38 = vpop.f32.mrb[167].mxu0 }
 0x932   : > { %v5661_v15 = vadd.f32 %v6864_v18, %v11485_v48  ;;  %v6867_v28 = vadd.f32 %v6866_v38, %v6865_v21 }
 0x934   : > { %v11605_v29 = vadd.f32 %v5661_v15, %v11149_v53  ;;  %v5664_v45 = vadd.f32 %v6867_v28, %v11485_v48 }
 0x936   : > { %5765 = vst [vmem:[#allocation2 + $0x90] sm:$0xff] %v11605_v29  ;;  %v11610_v59 = vadd.f32 %v5664_v45, %v11152_v8  ;;  %v6868_v37 = vpop.f32.mrb[168].mxu0 }
 0x937   : > { %v6869_v35 = vpop.f32.mrb[169].mxu0 }
 0x938   : > { %5766 = vst [vmem:[#allocation2 + $0x98] sm:$0xff] %v11610_v59  ;;  %v6870_v61 = vadd.f32 %v6869_v35, %v6868_v37  ;;  %v6871_v50 = vpop.f32.mrb[170].mxu0  ;;  %v12241_v37 = vld [vmem:[#allocation78_spill] sm:$0xff] }
 0x939   : > { %v6872_v63 = vpop.f32.mrb[171].mxu0 }
 0x93a   : > { %v5669_v39 = vadd.f32 %v6870_v61, %v11485_v48  ;;  %v6873_v22 = vadd.f32 %v6872_v63, %v6871_v50  ;;  %v12242_v61 = vld [vmem:[#allocation74_spill] sm:$0xff] }
 0x93c   : > { %v11615_v53 = vadd.f32 %v5669_v39, %v11172_v51  ;;  %v5672_v0 = vadd.f32 %v6873_v22, %v11485_v48 }
 0x93e   : > { %5767 = vst [vmem:[#allocation2 + $0xa0] sm:$0xff] %v11615_v53  ;;  %v11620_v8 = vadd.f32 %v5672_v0, %v11175_v5  ;;  %v6874_v12 = vpop.f32.mrb[172].mxu0 }
 0x93f   : > { %v6875_v47 = vpop.f32.mrb[173].mxu0 }
 0x940   : > { %5768 = vst [vmem:[#allocation2 + $0xa8] sm:$0xff] %v11620_v8  ;;  %v6876_v46 = vadd.f32 %v6875_v47, %v6874_v12  ;;  %v6877_v11 = vpop.f32.mrb[174].mxu0 }
 0x941   : > { %v6878_v23 = vpop.f32.mrb[175].mxu0 }
 0x942   : > { %v5677_v4 = vadd.f32 %v6876_v46, %v11485_v48  ;;  %v6879_v32 = vadd.f32 %v6878_v23, %v6877_v11 }
 0x944   : > { %v11625_v51 = vadd.f32 %v5677_v4, %v11199_v33  ;;  %v5680_v36 = vadd.f32 %v6879_v32, %v11485_v48 }
 0x946   : > { %5769 = vst [vmem:[#allocation2 + $0xb0] sm:$0xff] %v11625_v51  ;;  %v11630_v5 = vadd.f32 %v5680_v36, %v11202_v49  ;;  %v6880_v56 = vpop.f32.mrb[176].mxu0 }
 0x947   : > { %v6881_v17 = vpop.f32.mrb[177].mxu0 }
 0x948   : > { %5770 = vst [vmem:[#allocation2 + $0xb8] sm:$0xff] %v11630_v5  ;;  %v6882_v44 = vadd.f32 %v6881_v17, %v6880_v56  ;;  %v6883_v1 = vpop.f32.mrb[178].mxu0 }
 0x949   : > { %v6884_v10 = vpop.f32.mrb[179].mxu0 }
 0x94a   : > { %v5685_v62 = vadd.f32 %v6882_v44, %v11485_v48  ;;  %v6885_v26 = vadd.f32 %v6884_v10, %v6883_v1 }
 0x94c   : > { %v11635_v33 = vadd.f32 %v5685_v62, %v11227_v52  ;;  %v5688_v16 = vadd.f32 %v6885_v26, %v11485_v48  ;;  %v8277_v62 = vld [vmem:[%s12243_s30] sm:$0xff] (!%p6447_p9)   ;;  %v8279_v26 = vld [vmem:[%s12244_s24 + $0x10] sm:$0xff] (!%p6447_p9)  }
 0x94d   : > { %7352 = vmatprep.subr.bf16.mxu0 (!%p6447_p9), %v8277_v62  ;;  %7544 = vmatprep.subr.bf16.mxu1 (!%p6447_p9), %v8277_v62 }
 0x94e   : > { %5771 = vst [vmem:[#allocation2 + $0xc0] sm:$0xff] %v11635_v33  ;;  %v11640_v49 = vadd.f32 %v5688_v16, %v11230_v7  ;;  %v6886_v55 = vpop.f32.mrb[180].mxu0  ;;  %7353 = vmatpush3.bf16.msra.mxu0 (!%p6447_p9), %v8277_v62  ;;  %7552 = vmatpush3.bf16.msra.mxu1 (!%p6447_p9), %v8277_v62  ;;  %v8284_v16 = vld [vmem:[%s12244_s24 + $0x38] sm:$0xff] (!%p6447_p9)  }
 0x94f   : > { %v6887_v18 = vpop.f32.mrb[181].mxu0 }
 0x950   : > { %5772 = vst [vmem:[#allocation2 + $0xc8] sm:$0xff] %v11640_v49  ;;  %v6888_v21 = vadd.f32 %v6887_v18, %v6886_v55  ;;  %v6889_v38 = vpop.f32.mrb[182].mxu0  ;;  %v5784_v55 = vpack.c.bf16 (!%p6447_p9), %v11527_v14, %v11518_v24  ;;  %v5792_v18 = vpack.c.bf16 (!%p6447_p9), %v11610_v59, %v11605_v29  ;;  %v5794_v24 = vpack.c.bf16 (!%p6447_p9), %v11630_v5, %v11625_v51 }
 0x951   : > { %v6890_v15 = vpop.f32.mrb[183].mxu0  ;;  %v5787_v14 = vpack.c.bf16 (!%p6447_p9), %v11560_v40, %v11555_v34  ;;  %v5795_v29 = vpack.c.bf16 (!%p6447_p9), %v11640_v49, %v11635_v33  ;;  %v5790_v34 = vpack.c.bf16 (!%p6447_p9), %v11590_v25, %v11585_v54 }
 0x952   : > { %v5693_v28 = vadd.f32 %v6888_v21, %v11485_v48  ;;  %v6891_v45 = vadd.f32 %v6890_v15, %v6889_v38  ;;  %v5785_v21 = vpack.c.bf16 (!%p6447_p9), %v11538_v43, %v11533_v9  ;;  %v5793_v38 = vpack.c.bf16 (!%p6447_p9), %v11620_v8, %v11615_v53 }
 0x953   : > { %v5786_v15 = vpack.c.bf16 (!%p6447_p9), %v11550_v13, %v11544_v19  ;;  %v5788_v9 = vpack.c.bf16 (!%p6447_p9), %v11570_v20, %v11565_v3  ;;  %v5789_v19 = vpack.c.bf16 (!%p6447_p9), %v11580_v30, %v11575_v42  ;;  %v11733_v3 = vld [vmem:[%s12245_s18] ss:$0 sm:$0xff] (!%p6447_p9) }
 0x954   : > { %v11645_v52 = vadd.f32 %v5693_v28, %v12241_v37  ;;  %v5696_v35 = vadd.f32 %v6891_v45, %v11485_v48 }
 0x956   : > { %5773 = vst [vmem:[#allocation2 + $0xd0] sm:$0xff] %v11645_v52  ;;  %v11650_v7 = vadd.f32 %v5696_v35, %v12242_v61 }
 0x958   : > { %5774 = vst [vmem:[#allocation2 + $0xd8] sm:$0xff] %v11650_v7  ;;  %v5796_v43 = vpack.c.bf16 (!%p6447_p9), %v11650_v7, %v11645_v52 }
 0x95a   : > { %v6892_v50 = vpop.f32.mrb[184].mxu0 }
 0x95b   : > { %v6893_v63 = vpop.f32.mrb[185].mxu0 }
 0x95c   : > { %v6894_v39 = vadd.f32 %v6893_v63, %v6892_v50  ;;  %v6895_v22 = vpop.f32.mrb[186].mxu0 }
 0x95d   : > { %v6896_v0 = vpop.f32.mrb[187].mxu0 }
 0x95e   : > { %v5701_v12 = vadd.f32 %v6894_v39, %v11485_v48  ;;  %v6897_v47 = vadd.f32 %v6896_v0, %v6895_v22 }
 0x960   : > { %v11655_v46 = vadd.f32 %v5701_v12, %v11309_v6  ;;  %v5704_v11 = vadd.f32 %v6897_v47, %v11485_v48 }
 0x962   : > { %5775 = vst [vmem:[#allocation2 + $0xe0] sm:$0xff] %v11655_v46  ;;  %v11660_v23 = vadd.f32 %v5704_v11, %v11301_v57 }
 0x964   : > { %5776 = vst [vmem:[#allocation2 + $0xe8] sm:$0xff] %v11660_v23  ;;  %v5797_v13 = vpack.c.bf16 (!%p6447_p9), %v11660_v23, %v11655_v46 }
 0x966   : > { %v6898_v4 = vpop.f32.mrb[188].mxu0 }
 0x967   : > { %v6899_v32 = vpop.f32.mrb[189].mxu0 }
 0x968   : > { %v6900_v36 = vadd.f32 %v6899_v32, %v6898_v4  ;;  %v6901_v56 = vpop.f32.mrb[190].mxu0 }
 0x969   : > { %v6902_v17 = vpop.f32.mrb[191].mxu0 }
 0x96a   : > { %v5709_v44 = vadd.f32 %v6900_v36, %v11485_v48  ;;  %v6903_v1 = vadd.f32 %v6902_v17, %v6901_v56  ;;  %5782 = sbr.rel (%p6447_p9) target bundleno = 2684 (0xa7c), region = 124 }
 0x96c   : > { %v11665_v6 = vadd.f32 %v5709_v44, %v11348_v2  ;;  %v5712_v10 = vadd.f32 %v6903_v1, %v11485_v48  ;;  %v8278_v2 = vld [vmem:[%s12244_s24 + $0x8] sm:$0xff] (!%p6447_p9)   ;;  %v5783_v48 = vpack.c.bf16 (!%p6447_p9), %v11504_v58, %v11497_v41  ;;  %v8280_v41 = vld [vmem:[%s12244_s24 + $0x18] sm:$0xff] (!%p6447_p9)   ;;  %v8281_v58 = vld [vmem:[%s12244_s24 + $0x20] sm:$0xff] (!%p6447_p9)  }
 0x96d   : > { %7354 = vmatprep.subr.bf16.mxu0 (!%p6447_p9), %v8278_v2  ;;  %7545 = vmatprep.subr.bf16.mxu1 (!%p6447_p9), %v8278_v2 }
 0x96e   : > { %5777 = vst [vmem:[#allocation2 + $0xf0] sm:$0xff] %v11665_v6  ;;  %v11670_v57 = vadd.f32 %v5712_v10, %v11351_v27  ;;  %v5791_v27 = vpack.c.bf16 (!%p6447_p9), %v11600_v60, %v11595_v31  ;;  %7368 = vmatprep.mubr.bf16.mxu0 (!%p6447_p9), %v5783_v48  ;;  %7355 = vmatpush3.bf16.msra.mxu0 (!%p6447_p9), %v8278_v2  ;;  %v8282_v31 = vld [vmem:[%s12244_s24 + $0x28] sm:$0xff] (!%p6447_p9)   ;;  %v8283_v60 = vld [vmem:[%s12244_s24 + $0x30] sm:$0xff] (!%p6447_p9)  }
 0x96f   : > { %7553 = vmatpush3.bf16.msra.mxu1 (!%p6447_p9), %v8278_v2  ;;  %7356 = vmatprep.subr.bf16.mxu0 (!%p6447_p9), %v8279_v26 }
 0x970   : > { %5778 = vst [vmem:[#allocation2 + $0xf8] sm:$0xff] %v11670_v57  ;;  %7384 = vmatprep.mubr.bf16.mxu1 (!%p6447_p9), %v5791_v27  ;;  %7546 = vmatprep.subr.bf16.mxu1 (!%p6447_p9), %v8279_v26  ;;  %v5798_v40 = vpack.c.bf16 (!%p6447_p9), %v11670_v57, %v11665_v6 }
 0x972   : > { %7357 = vmatpush3.bf16.msra.mxu0 %v8279_v26 }
 0x973   : > { %7554 = vmatpush3.bf16.msra.mxu1 %v8279_v26  ;;  %7358 = vmatprep.subr.bf16.mxu0 %v8280_v41 }
 0x974   : > { %7547 = vmatprep.subr.bf16.mxu1 %v8280_v41 }
 0x976   : > { %7359 = vmatpush3.bf16.msra.mxu0 %v8280_v41 }
 0x977   : > { %7555 = vmatpush3.bf16.msra.mxu1 %v8280_v41  ;;  %7360 = vmatprep.subr.bf16.mxu0 %v8281_v58 }
 0x978   : > { %7548 = vmatprep.subr.bf16.mxu1 %v8281_v58 }
 0x97a   : > { %7361 = vmatpush3.bf16.msra.mxu0 %v8281_v58 }
 0x97b   : > { %7556 = vmatpush3.bf16.msra.mxu1 %v8281_v58  ;;  %7362 = vmatprep.subr.bf16.mxu0 %v8282_v31 }
 0x97c   : > { %7549 = vmatprep.subr.bf16.mxu1 %v8282_v31 }
 0x97e   : > { %7363 = vmatpush3.bf16.msra.mxu0 %v8282_v31 }
 0x97f   : > { %7557 = vmatpush3.bf16.msra.mxu1 %v8282_v31  ;;  %7364 = vmatprep.subr.bf16.mxu0 %v8283_v60 }
 0x980   : > { %7550 = vmatprep.subr.bf16.mxu1 %v8283_v60 }
 0x982   : > { %7365 = vmatpush3.bf16.msra.mxu0 %v8283_v60 }
 0x983   : > { %7558 = vmatpush3.bf16.msra.mxu1 %v8283_v60  ;;  %7366 = vmatprep.subr.bf16.mxu0 %v8284_v16 }
 0x984   : > { %7551 = vmatprep.subr.bf16.mxu1 %v8284_v16 }
 0x986   : > { %7367 = vmatpush3.bf16.msra.mxu0 %v8284_v16 }
 0x987   : > { %7559 = vmatpush3.bf16.msra.mxu1 %v8284_v16 }
 0x989   : > { %7369 = vmatmul.mubr.bf16.vlgmr.msra.gmra.mrb[0].mxu0 %v5784_v55 }
 0x98a   : > { %7385 = vmatmul.mubr.bf16.vlgmr.msra.gmra.mrb[0].mxu1 %v5792_v18  ;;  %7372 = vmatprep.mubr.bf16.mxu0 %v5785_v21 }
 0x98b   : > { %7388 = vmatprep.mubr.bf16.mxu1 %v5793_v38 }
 0x991   : > { %7373 = vmatmul.mubr.bf16.gmra.mrb[4].mxu0 %v5786_v15 }
 0x992   : > { %7389 = vmatmul.mubr.bf16.gmra.mrb[4].mxu1 %v5794_v24  ;;  %7376 = vmatprep.mubr.bf16.mxu0 %v5787_v14 }
 0x993   : > { %7392 = vmatprep.mubr.bf16.mxu1 %v5795_v29 }
 0x999   : > { %7377 = vmatmul.mubr.bf16.gmra.mrb[8].mxu0 %v5788_v9 }
 0x99a   : > { %7393 = vmatmul.mubr.bf16.gmra.mrb[8].mxu1 %v5796_v43  ;;  %7380 = vmatprep.mubr.bf16.mxu0 %v5789_v19 }
 0x99b   : > { %7396 = vmatprep.mubr.bf16.mxu1 %v5797_v13 }
 0x9a1   : > { %7381 = vmatmul.mubr.bf16.gmra.mrb[12].mxu0 %v5790_v34 }
 0x9a2   : > { %7397 = vmatmul.mubr.bf16.gmra.mrb[12].mxu1 %v5798_v40 }
 0xa5c   : > { %v7370_v20 = vpop.f32.mrb[0].mxu0 }
 0xa5d   : > { %v7386_v42 = vpop.f32.mrb[0].mxu1  ;;  %v5913_v30 = vadd.f32 %v7370_v20, %v11733_v3  ;;  %v5904_v54 = vpop.f32.mrb[1].mxu0 }
 0xa5e   : > { %v5977_v59 = vadd.f32 %v7386_v42, %v11733_v3  ;;  %v5968_v25 = vpop.f32.mrb[1].mxu1  ;;  %v5905_v53 = vadd.f32 %v11733_v3, %v5904_v54  ;;  %v7371_v51 = vpop.f32.mrb[2].mxu0 }
 0xa5f   : > { %v5969_v8 = vadd.f32 %v11733_v3, %v5968_v25  ;;  %v7387_v5 = vpop.f32.mrb[2].mxu1  ;;  %6033 = vst [vmem:[%s8943_s15 + $0x10] sm:$0xff] %v5913_v30  ;;  %v5916_v33 = vadd.f32 %v7371_v51, %v11733_v3  ;;  %v5907_v28 = vpop.f32.mrb[3].mxu0 }
 0xa60   : > { %6049 = vst [vmem:[%s8943_s15 + $0x90] sm:$0xff] %v5977_v59  ;;  %v5980_v49 = vadd.f32 %v7387_v5, %v11733_v3  ;;  %v5971_v45 = vpop.f32.mrb[3].mxu1  ;;  %6031 = vst [vmem:[%s8943_s15] sm:$0xff] %v5905_v53  ;;  %v5908_v37 = vadd.f32 %v11733_v3, %v5907_v28 }
 0xa61   : > { %6047 = vst [vmem:[%s8943_s15 + $0x80] sm:$0xff] %v5969_v8  ;;  %v5972_v52 = vadd.f32 %v11733_v3, %v5971_v45  ;;  %6034 = vst [vmem:[%s8943_s15 + $0x18] sm:$0xff] %v5916_v33 }
 0xa62   : > { %6050 = vst [vmem:[%s8943_s15 + $0x98] sm:$0xff] %v5980_v49  ;;  %6032 = vst [vmem:[%s8943_s15 + $0x8] sm:$0xff] %v5908_v37 }
 0xa63   : > { %6048 = vst [vmem:[%s8943_s15 + $0x88] sm:$0xff] %v5972_v52 }
 0xa64   : > { %v7374_v35 = vpop.f32.mrb[4].mxu0 }
 0xa65   : > { %v7390_v61 = vpop.f32.mrb[4].mxu1  ;;  %v5929_v7 = vadd.f32 %v7374_v35, %v11733_v3  ;;  %v5920_v63 = vpop.f32.mrb[5].mxu0 }
 0xa66   : > { %v5993_v50 = vadd.f32 %v7390_v61, %v11733_v3  ;;  %v5984_v39 = vpop.f32.mrb[5].mxu1  ;;  %v5921_v22 = vadd.f32 %v11733_v3, %v5920_v63  ;;  %v7375_v12 = vpop.f32.mrb[6].mxu0 }
 0xa67   : > { %v5985_v0 = vadd.f32 %v11733_v3, %v5984_v39  ;;  %v7391_v47 = vpop.f32.mrb[6].mxu1  ;;  %6037 = vst [vmem:[%s8943_s15 + $0x30] sm:$0xff] %v5929_v7  ;;  %v5932_v46 = vadd.f32 %v7375_v12, %v11733_v3  ;;  %v5923_v23 = vpop.f32.mrb[7].mxu0 }
 0xa68   : > { %6053 = vst [vmem:[%s8943_s15 + $0xb0] sm:$0xff] %v5993_v50  ;;  %v5996_v11 = vadd.f32 %v7391_v47, %v11733_v3  ;;  %v5987_v4 = vpop.f32.mrb[7].mxu1  ;;  %6035 = vst [vmem:[%s8943_s15 + $0x20] sm:$0xff] %v5921_v22  ;;  %v5924_v32 = vadd.f32 %v11733_v3, %v5923_v23 }
 0xa69   : > { %6051 = vst [vmem:[%s8943_s15 + $0xa0] sm:$0xff] %v5985_v0  ;;  %v5988_v36 = vadd.f32 %v11733_v3, %v5987_v4  ;;  %6038 = vst [vmem:[%s8943_s15 + $0x38] sm:$0xff] %v5932_v46 }
 0xa6a   : > { %6054 = vst [vmem:[%s8943_s15 + $0xb8] sm:$0xff] %v5996_v11  ;;  %6036 = vst [vmem:[%s8943_s15 + $0x28] sm:$0xff] %v5924_v32 }
 0xa6b   : > { %6052 = vst [vmem:[%s8943_s15 + $0xa8] sm:$0xff] %v5988_v36 }
 0xa6c   : > { %v7378_v56 = vpop.f32.mrb[8].mxu0 }
 0xa6d   : > { %v7394_v17 = vpop.f32.mrb[8].mxu1  ;;  %v5945_v44 = vadd.f32 %v7378_v56, %v11733_v3  ;;  %v5936_v6 = vpop.f32.mrb[9].mxu0 }
 0xa6e   : > { %v6009_v1 = vadd.f32 %v7394_v17, %v11733_v3  ;;  %v6000_v10 = vpop.f32.mrb[9].mxu1  ;;  %v5937_v57 = vadd.f32 %v11733_v3, %v5936_v6  ;;  %v7379_v2 = vpop.f32.mrb[10].mxu0 }
 0xa6f   : > { %v6001_v62 = vadd.f32 %v11733_v3, %v6000_v10  ;;  %v7395_v48 = vpop.f32.mrb[10].mxu1  ;;  %6041 = vst [vmem:[%s8943_s15 + $0x50] sm:$0xff] %v5945_v44  ;;  %v5948_v27 = vadd.f32 %v7379_v2, %v11733_v3  ;;  %v5939_v41 = vpop.f32.mrb[11].mxu0 }
 0xa70   : > { %6057 = vst [vmem:[%s8943_s15 + $0xd0] sm:$0xff] %v6009_v1  ;;  %v6012_v26 = vadd.f32 %v7395_v48, %v11733_v3  ;;  %v6003_v58 = vpop.f32.mrb[11].mxu1  ;;  %6039 = vst [vmem:[%s8943_s15 + $0x40] sm:$0xff] %v5937_v57  ;;  %v5940_v31 = vadd.f32 %v11733_v3, %v5939_v41 }
 0xa71   : > { %6055 = vst [vmem:[%s8943_s15 + $0xc0] sm:$0xff] %v6001_v62  ;;  %v6004_v60 = vadd.f32 %v11733_v3, %v6003_v58  ;;  %6042 = vst [vmem:[%s8943_s15 + $0x58] sm:$0xff] %v5948_v27 }
 0xa72   : > { %6058 = vst [vmem:[%s8943_s15 + $0xd8] sm:$0xff] %v6012_v26  ;;  %6040 = vst [vmem:[%s8943_s15 + $0x48] sm:$0xff] %v5940_v31 }
 0xa73   : > { %6056 = vst [vmem:[%s8943_s15 + $0xc8] sm:$0xff] %v6004_v60 }
 0xa74   : > { %v7382_v16 = vpop.f32.mrb[12].mxu0 }
 0xa75   : > { %v7398_v55 = vpop.f32.mrb[12].mxu1  ;;  %v5961_v18 = vadd.f32 %v7382_v16, %v11733_v3  ;;  %v5952_v38 = vpop.f32.mrb[13].mxu0 }
 0xa76   : > { %v6025_v21 = vadd.f32 %v7398_v55, %v11733_v3  ;;  %v6016_v15 = vpop.f32.mrb[13].mxu1  ;;  %v5953_v24 = vadd.f32 %v11733_v3, %v5952_v38  ;;  %v7383_v29 = vpop.f32.mrb[14].mxu0 }
 0xa77   : > { %v6017_v14 = vadd.f32 %v11733_v3, %v6016_v15  ;;  %v7399_v9 = vpop.f32.mrb[14].mxu1  ;;  %6045 = vst [vmem:[%s8943_s15 + $0x70] sm:$0xff] %v5961_v18  ;;  %v5964_v43 = vadd.f32 %v7383_v29, %v11733_v3  ;;  %v5955_v13 = vpop.f32.mrb[15].mxu0 }
 0xa78   : > { %6061 = vst [vmem:[%s8943_s15 + $0xf0] sm:$0xff] %v6025_v21  ;;  %v6028_v19 = vadd.f32 %v7399_v9, %v11733_v3  ;;  %v6019_v34 = vpop.f32.mrb[15].mxu1  ;;  %6043 = vst [vmem:[%s8943_s15 + $0x60] sm:$0xff] %v5953_v24  ;;  %v5956_v40 = vadd.f32 %v11733_v3, %v5955_v13 }
 0xa79   : > { %6059 = vst [vmem:[%s8943_s15 + $0xe0] sm:$0xff] %v6017_v14  ;;  %v6020_v20 = vadd.f32 %v11733_v3, %v6019_v34  ;;  %6046 = vst [vmem:[%s8943_s15 + $0x78] sm:$0xff] %v5964_v43 }
 0xa7a   : > { %6062 = vst [vmem:[%s8943_s15 + $0xf8] sm:$0xff] %v6028_v19  ;;  %6044 = vst [vmem:[%s8943_s15 + $0x68] sm:$0xff] %v5956_v40 }
 0xa7b   : > { %6060 = vst [vmem:[%s8943_s15 + $0xe8] sm:$0xff] %v6020_v20 }
 0xa7c PF: > { %s6064_s27 = scalar_lea.sflag [#allocation5], %s8913_s7 }
 0xa7d   : > { %s12246_s26 = sld [smem:[#allocation32_spill]]  ;;  %s12247_s4 = sld [smem:[#allocation38_spill]] }
 0xa7e   : > { %s6093_s5 = sshll.u32 %s8943_s15, 4  ;;  %s12248_s16 = sld [smem:[#allocation137_spill]]  ;;  %s6094_s5 = int_to_ptr.vmem [resolvable:$true] %s6093_s5 }
 0xa7f   : > { %s8532_s13 = smov 2048   ;;  %s8533_s7 = smov 4096  }
 0xa80   : > { %s8534_s9 = smov 16   ;;  %s8535_s28 = smov 128  }
 0xa81   : > { %s8536_s15 = smov 8   ;;  %s8537_s10 = smov [#allocation19]  }
 0xa82   : > { %s8538_s23 = smov 0  }
 0xa83   : > { %s6468_s17 = sshll.u32 %s12246_s26, 11  ;;  %p12249_p3 = scmp.ne.s32.totalorder %s12247_s4, 0 }
 0xa84   : > { %s6076_s20 = scalar_lea.hbm %s12248_s16, %s6468_s17 }
 0xa85   : > { %7594 = sst [smem:[#allocation20]] (%p12249_p3), %s8532_s13 }
 0xa86   : > { %7595 = sst [smem:[#allocation20 + $0x1]] (%p12249_p3), %s8533_s7 }
 0xa87   : > { %7596 = sst [smem:[#allocation20 + $0x2]] (%p12249_p3), %s8534_s9 }
 0xa88   : > { %7597 = sst [smem:[#allocation20 + $0x3]] (%p12249_p3), %s8535_s28 }
 0xa89   : > { %7598 = sst [smem:[#allocation20 + $0x4]] (%p12249_p3), %s8535_s28 }
 0xa8a   : > { %7599 = sst [smem:[#allocation20 + $0x5]] (%p12249_p3), %s8536_s15 }
 0xa8b   : > { %7600 = dma.general (%p12249_p3), %s6094_s5, 4096, %s6076_s20, %s6064_s27, %s8537_s10, [#allocation20], %s8538_s23, 0  }
 0xa8c PF: > { %s12250_s30 = sld [smem:[#allocation30_spill]]  ;;  %s12251_s18 = sld [smem:[#allocation39_spill]] }
 0xa8d   : > { %p7627_p11 = scmp.ge.s32.totalorder %s8507_s2, 2 }
 0xa92   : > { %s6121_s26 = sand.u32 1, %s12250_s30   ;;  %p12252_p1 = scmp.ne.s32.totalorder %s12251_s18, 0 }
 0xa93   : > { %s6122_s17 = scalar_lea.sflag [#allocation5], %s6121_s26 }
 0xa94   : > { %p7616_p6 = pnand %p7627_p11, %p12252_p1 }
 0xa96   : > { %8462 = dma.done.wait (!%p7616_p6), %s6122_s17, 4096  }
 0xa97   : > { %8464 = vsyncadd (!%p7616_p6), %s6122_s17, 4294963200  ;;  %s39_s2 = sadd.s32 1, %s8507_s2   ;;  %s12253_s27 = sld [smem:[#allocation29_spill]] }
 0xa98   : > { %p36_p7 = scmp.ge.s32.totalorder %s39_s2, 8   ;;  %s12254_s11 = sld [smem:[#allocation36_spill]] }
 0xa99   : > { %s12255_s4 = sld [smem:[#allocation35_spill]]  ;;  %s12256_s5 = sld [smem:[#allocation33_spill]] }
 0xa9a   : > { %s12257_s16 = sld [smem:[#allocation34_spill]]  ;;  %s12258_s28 = smov %s8475_s29 }
 0xa9b   : > { %s12260_s30 = smov %s8483_s0  ;;  %s12261_s0 = smov %s8487_s19 }
 0xa9c   : > { %s12263_s1 = smov %s8499_s21  ;;  %s12264_s20 = smov %s8503_s22 }
 0xa9d   :  { %38 = sbr.rel (!%p36_p7) target bundleno = 29 (0x1d), region = 200 }
 0xa9e   : > { %s12259_s29 = smov %s12254_s11 }
 0xa9f   : > { %s12262_s19 = smov %s12255_s4  ;;  %s12265_s21 = smov %s12256_s5 }
 0xaa0   : > { %s12266_s22 = smov %s12257_s16 }
 0xaa4   :  { %6127 = vsyncpa [#allocation4], 1 }
 0xaa5   :  { %6129 = vsyncpa [#allocation4 + $0x1], 1 }
 0xaa6   :  { %6130 = vsyncpa [#allocation7], 1 }
 0xaa7   :  { %6132 = vsyncpa [#allocation7 + $0x1], 1 }
 0xaa8   :  { %6133 = vsyncpa [#allocation10], 1 }
 0xaa9   :  { %6134 = vsyncpa [#allocation13], 1 }
 0xaaa   :  { %6135 = vsyncpa [#allocation5], 1 }
 0xaab   :  { %6137 = vsyncpa [#allocation5 + $0x1], 1 }

</bundles_post_ra>
